<compile_context>
chip_gen: v5e
topology: v5e:2x2
jax: 0.10.0
libtpu: 0.0.40
codegen_flags: <defaults>
</compile_context>

<pallas_src>
import functools
import numpy as np
import jax
import jax.numpy as jnp
from jax import lax
from jax.experimental import pallas as pl
from jax.experimental.pallas import tpu as pltpu

EPS = 1e-5


# --------------------------- in-kernel conv core ---------------------------- #

def _conv3x3_im2col(a, w_flat):
    """3x3 'same' conv of a single image, fully in VMEM/registers.

    a:      (H, W, Cin) float32 activation (already BN/ReLU'd if applicable)
    w_flat: (9*Cin, Cout) float32 weights, rows ordered (ky, kx, cin)
    returns (H, W, Cout) float32

    Zero padding is built in-register with two concatenates (no padded copy of
    the activation ever round-trips HBM).  The nine taps are gathered into a
    single (H*W, 9*Cin) im2col matrix so the MXU sees ONE matmul with
    contraction depth 9*Cin instead of nine matmuls of depth Cin.
    """
    H, W, Cin = a.shape
    zrow = jnp.zeros((1, W, Cin), jnp.float32)
    zcol = jnp.zeros((H + 2, 1, Cin), jnp.float32)
    xp = jnp.concatenate([zrow, a, zrow], axis=0)            # (H+2, W,   Cin)
    xp = jnp.concatenate([zcol, xp, zcol], axis=1)           # (H+2, W+2, Cin)

    cols = []
    for ky in range(3):
        for kx in range(3):
            cols.append(xp[ky:ky + H, kx:kx + W, :].reshape(H * W, Cin))
    patches = jnp.concatenate(cols, axis=1)                  # (H*W, 9*Cin)

    y = lax.dot_general(patches, w_flat,
                        dimension_numbers=(((1,), (0,)), ((), ())),
                        preferred_element_type=jnp.float32)  # (H*W, Cout)
    return y.reshape(H, W, w_flat.shape[-1])


def _accumulate_stats(y, n, sum_scr, sq_scr, mean_ref, var_ref, hw):
    """Fused per-channel batch-statistics accumulation across the batch grid."""
    @pl.when(n == 0)
    def _():
        sum_scr[...] = jnp.zeros_like(sum_scr)
        sq_scr[...] = jnp.zeros_like(sq_scr)

    sum_scr[...] += jnp.sum(y, axis=(0, 1))[None, :]
    sq_scr[...] += jnp.sum(y * y, axis=(0, 1))[None, :]

    @pl.when(n == pl.num_programs(0) - 1)
    def _():
        count = pl.num_programs(0) * hw
        mean = sum_scr[...] / count
        mean_ref[...] = mean
        # Biased variance via E[x^2] - E[x]^2; fine in f32 at these magnitudes.
        var_ref[...] = sq_scr[...] / count - mean * mean


# ------------------------------ Pallas kernels ------------------------------ #

def conv_stats_kernel(x_ref, w_ref, o_ref, mean_ref, var_ref, sum_scr, sq_scr):
    # conv1 (bias dropped: it is cancelled by training-mode BN) + fused stats.
    n = pl.program_id(0)
    x = x_ref[0].astype(jnp.float32)                         # (H, W, Cin)
    y = _conv3x3_im2col(x, w_ref[...])                       # (H, W, Cout)
    o_ref[...] = y[None].astype(o_ref.dtype)
    _accumulate_stats(y, n, sum_scr, sq_scr, mean_ref, var_ref,
                      o_ref.shape[1] * o_ref.shape[2])


def bn_relu_conv_stats_kernel(x_ref, m1_ref, v1_ref, g1_ref, b1_ref, w_ref,
                              o_ref, mean_ref, var_ref, sum_scr, sq_scr):
    # BN1-apply + ReLU fused onto the loaded tile, then conv2 + fused stats:
    # the layer-1 activation makes exactly one HBM round trip.
    n = pl.program_id(0)
    x = x_ref[0].astype(jnp.float32)                         # (H, W, C)
    inv = lax.rsqrt(v1_ref[...] + EPS)                       # (1, C)
    a = (x - m1_ref[...]) * (inv * g1_ref[...]) + b1_ref[...]
    a = jnp.maximum(a, 0.0)
    y = _conv3x3_im2col(a, w_ref[...])                       # (H, W, Cout)
    o_ref[...] = y[None].astype(o_ref.dtype)
    _accumulate_stats(y, n, sum_scr, sq_scr, mean_ref, var_ref,
                      o_ref.shape[1] * o_ref.shape[2])


def bn_relu_kernel(x_ref, mean_ref, var_ref, gamma_ref, beta_ref, o_ref):
    # Final BN2-apply + ReLU (nothing left to fuse it into).
    x = x_ref[...].astype(jnp.float32)                       # (1, H, W, C)
    inv = lax.rsqrt(var_ref[...] + EPS)
    y = (x - mean_ref[...]) * (inv * gamma_ref[...]) + beta_ref[...]
    o_ref[...] = jnp.maximum(y, 0.0).astype(o_ref.dtype)


def conv_bias_relu_kernel(x_ref, w_ref, b_ref, o_ref):
    # batch_normalization=False path: conv + bias + ReLU in one kernel.
    x = x_ref[0].astype(jnp.float32)
    y = _conv3x3_im2col(x, w_ref[...]) + b_ref[...]
    o_ref[...] = jnp.maximum(y, 0.0)[None].astype(o_ref.dtype)


# ----------------------------- Pallas wrappers ------------------------------ #

def conv1_stats(x_nhwc, w_flat):
    """conv1 + BN batch statistics. Returns (y_raw, mean, var)."""
    N, H, W, Cin = x_nhwc.shape
    Cout = w_flat.shape[-1]
    cspec = pl.BlockSpec((1, Cout), lambda n: (0, 0))
    return pl.pallas_call(
        conv_stats_kernel,
        out_shape=(jax.ShapeDtypeStruct((N, H, W, Cout), jnp.float32),
                   jax.ShapeDtypeStruct((1, Cout), jnp.float32),
                   jax.ShapeDtypeStruct((1, Cout), jnp.float32)),
        grid_spec=pltpu.PrefetchScalarGridSpec(
            num_scalar_prefetch=0,
            grid=(N,),
            in_specs=[
                pl.BlockSpec((1, H, W, Cin), lambda n: (n, 0, 0, 0)),
                pl.BlockSpec((9 * Cin, Cout), lambda n: (0, 0)),
            ],
            out_specs=(pl.BlockSpec((1, H, W, Cout), lambda n: (n, 0, 0, 0)),
                       cspec, cspec),
            scratch_shapes=[pltpu.VMEM((1, Cout), jnp.float32),
                            pltpu.VMEM((1, Cout), jnp.float32)],
        ),
        # "arbitrary": stats accumulate sequentially in VMEM scratch.
        compiler_params=pltpu.CompilerParams(
            dimension_semantics=("arbitrary",)),
    )(x_nhwc, w_flat)


def bn_relu_conv2_stats(y1, m1, v1, gamma1, beta1, w_flat):
    """BN1+ReLU (fused into the load) + conv2 + BN2 batch statistics."""
    N, H, W, C = y1.shape
    Cout = w_flat.shape[-1]
    cspec_in = pl.BlockSpec((1, C), lambda n: (0, 0))
    cspec_out = pl.BlockSpec((1, Cout), lambda n: (0, 0))
    return pl.pallas_call(
        bn_relu_conv_stats_kernel,
        out_shape=(jax.ShapeDtypeStruct((N, H, W, Cout), jnp.float32),
                   jax.ShapeDtypeStruct((1, Cout), jnp.float32),
                   jax.ShapeDtypeStruct((1, Cout), jnp.float32)),
        grid_spec=pltpu.PrefetchScalarGridSpec(
            num_scalar_prefetch=0,
            grid=(N,),
            in_specs=[
                pl.BlockSpec((1, H, W, C), lambda n: (n, 0, 0, 0)),
                cspec_in, cspec_in, cspec_in, cspec_in,
                pl.BlockSpec((9 * C, Cout), lambda n: (0, 0)),
            ],
            out_specs=(pl.BlockSpec((1, H, W, Cout), lambda n: (n, 0, 0, 0)),
                       cspec_out, cspec_out),
            scratch_shapes=[pltpu.VMEM((1, Cout), jnp.float32),
                            pltpu.VMEM((1, Cout), jnp.float32)],
        ),
        compiler_params=pltpu.CompilerParams(
            dimension_semantics=("arbitrary",)),
    )(y1, m1, v1, gamma1.reshape(1, C), beta1.reshape(1, C), w_flat)


def bn_relu(x_nhwc, mean, var, gamma, beta):
    N, H, W, C = x_nhwc.shape
    cspec = pl.BlockSpec((1, C), lambda n: (0, 0))
    return pl.pallas_call(
        bn_relu_kernel,
        out_shape=jax.ShapeDtypeStruct((N, H, W, C), jnp.float32),
        grid_spec=pltpu.PrefetchScalarGridSpec(
            num_scalar_prefetch=0,
            grid=(N,),
            in_specs=[
                pl.BlockSpec((1, H, W, C), lambda n: (n, 0, 0, 0)),
                cspec, cspec, cspec, cspec,
            ],
            out_specs=pl.BlockSpec((1, H, W, C), lambda n: (n, 0, 0, 0)),
        ),
        compiler_params=pltpu.CompilerParams(
            dimension_semantics=("parallel",)),
    )(x_nhwc, mean, var, gamma.reshape(1, C), beta.reshape(1, C))


def conv_bias_relu(x_nhwc, w_flat, b):
    N, H, W, Cin = x_nhwc.shape
    Cout = w_flat.shape[-1]
    return pl.pallas_call(
        conv_bias_relu_kernel,
        out_shape=jax.ShapeDtypeStruct((N, H, W, Cout), jnp.float32),
        grid_spec=pltpu.PrefetchScalarGridSpec(
            num_scalar_prefetch=0,
            grid=(N,),
            in_specs=[
                pl.BlockSpec((1, H, W, Cin), lambda n: (n, 0, 0, 0)),
                pl.BlockSpec((9 * Cin, Cout), lambda n: (0, 0)),
                pl.BlockSpec((1, Cout), lambda n: (0, 0)),
            ],
            out_specs=pl.BlockSpec((1, H, W, Cout), lambda n: (n, 0, 0, 0)),
        ),
        compiler_params=pltpu.CompilerParams(
            dimension_semantics=("parallel",)),
    )(x_nhwc, w_flat, b.reshape(1, Cout))


# ------------------------------ ConvBlock ----------------------------------- #

def init_conv_block_params(key, input_channel, output_channel):
    """Deterministic init matching PyTorch Conv2d/BatchNorm2d parameter shapes."""
    ks = jax.random.split(key, 4)
    bound1 = 1.0 / np.sqrt(input_channel * 9)
    bound2 = 1.0 / np.sqrt(output_channel * 9)
    return {
        # stored as (3, 3, Cin, Cout) for the NHWC kernels
        "w1": jax.random.uniform(ks[0], (3, 3, input_channel, output_channel),
                                 jnp.float32, -bound1, bound1),
        "b1": jax.random.uniform(ks[1], (output_channel,), jnp.float32,
                                 -bound1, bound1),
        "w2": jax.random.uniform(ks[2], (3, 3, output_channel, output_channel),
                                 jnp.float32, -bound2, bound2),
        "b2": jax.random.uniform(ks[3], (output_channel,), jnp.float32,
                                 -bound2, bound2),
        "gamma1": jnp.ones((output_channel,), jnp.float32),
        "beta1": jnp.zeros((output_channel,), jnp.float32),
        "gamma2": jnp.ones((output_channel,), jnp.float32),
        "beta2": jnp.zeros((output_channel,), jnp.float32),
    }


@functools.partial(jax.jit, static_argnames=("batch_normalization",))
def conv_block_forward(x_nchw, params, batch_normalization=True):
    # Accepts NCHW (PyTorch convention), computes in NHWC (C on the lane dim),
    # returns NCHW.  The two boundary transposes are kept only for interface
    # fidelity; NHWC callers should skip them.
    x = jnp.transpose(x_nchw, (0, 2, 3, 1)).astype(jnp.float32)

    w1 = params["w1"]
    w2 = params["w2"]
    w1_flat = w1.reshape(9 * w1.shape[2], w1.shape[3])       # (9*Cin, Cout)
    w2_flat = w2.reshape(9 * w2.shape[2], w2.shape[3])

    if batch_normalization:
        # Conv bias is mathematically cancelled by training-mode BN mean
        # subtraction, so it is dropped (saves the add and the bias DMA).
        y1, m1, v1 = conv1_stats(x, w1_flat)
        y2, m2, v2 = bn_relu_conv2_stats(y1, m1, v1,
                                         params["gamma1"], params["beta1"],
                                         w2_flat)
        out = bn_relu(y2, m2, v2, params["gamma2"], params["beta2"])
    else:
        h = conv_bias_relu(x, w1_flat, params["b1"])
        out = conv_bias_relu(h, w2_flat, params["b2"])

    return jnp.transpose(out, (0, 3, 1, 2))                  # back to NCHW


# ------------------------------ Reference ----------------------------------- #

def conv_block_ref(x_nchw, params, batch_normalization=True):
    """Pure-JAX (XLA) reference mirroring PyTorch training-mode forward."""
    def conv(x, w, b):
        w_oihw = jnp.transpose(w, (3, 2, 0, 1))
        y = lax.conv_general_dilated(
            x, w_oihw, window_strides=(1, 1), padding=((1, 1), (1, 1)),
            dimension_numbers=("NCHW", "OIHW", "NCHW"))
        return y + b[None, :, None, None]

    def bn(x, gamma, beta):
        m = jnp.mean(x, axis=(0, 2, 3), keepdims=True)
        v = jnp.var(x, axis=(0, 2, 3), keepdims=True)
        return (x - m) * lax.rsqrt(v + EPS) * gamma[None, :, None, None] \
            + beta[None, :, None, None]

    x = conv(x_nchw, params["w1"], params["b1"])
    if batch_normalization:
        x = bn(x, params["gamma1"], params["beta1"])
    x = jnp.maximum(x, 0.0)
    x = conv(x, params["w2"], params["b2"])
    if batch_normalization:
        x = bn(x, params["gamma2"], params["beta2"])
    x = jnp.maximum(x, 0.0)
    return x


# -------------------------------- Main --------------------------------------- #

if __name__ == "__main__":
    key = jax.random.PRNGKey(0)
    k_x, k_p = jax.random.split(key)

    N, C_IN, C_OUT, H, W = 2, 4, 8, 16, 16
    x = jax.random.normal(k_x, (N, C_IN, H, W), jnp.float32)
    params = init_conv_block_params(k_p, C_IN, C_OUT)

    for use_bn in (True, False):
        out = jax.block_until_ready(
            conv_block_forward(x, params, batch_normalization=use_bn))
        ref = jax.block_until_ready(conv_block_ref(x, params, use_bn))
        assert out.shape == (N, C_OUT, H, W), out.shape
        np.testing.assert_allclose(np.asarray(out), np.asarray(ref),
                                   rtol=1e-4, atol=1e-4)

    print("KERNEL_OK")
</pallas_src>

<mosaic_0001>
module attributes {stable_mosaic.version = 11 : i64} {
  func.func @conv_stats_kernel(%arg0: i32, %arg1: memref<1x16x16x4xf32, #tpu.memory_space<vmem>>, %arg2: memref<36x8xf32, #tpu.memory_space<vmem>>, %arg3: memref<1x16x16x8xf32, #tpu.memory_space<vmem>>, %arg4: memref<1x8xf32, #tpu.memory_space<vmem>>, %arg5: memref<1x8xf32, #tpu.memory_space<vmem>>, %arg6: memref<1x8xf32, #tpu.memory_space<vmem>>, %arg7: memref<1x8xf32, #tpu.memory_space<vmem>>) attributes {dimension_semantics = [#tpu.dimension_semantics<arbitrary>], iteration_bounds = array<i64: 2>, scalar_prefetch = 0 : i64, scratch_operands = 2 : i64, tpu.core_type = #tpu.core_type<tc>, window_params = [{transform_indices = @transform_0, window_bounds = array<i64: 1, 16, 16, 4>}, {pipeline_mode = #tpu.pipeline_mode<synchronous>, transform_indices = @transform_1, window_bounds = array<i64: 36, 8>}, {transform_indices = @transform_2, window_bounds = array<i64: 1, 16, 16, 8>}, {pipeline_mode = #tpu.pipeline_mode<synchronous>, transform_indices = @transform_3, window_bounds = array<i64: 1, 8>}, {pipeline_mode = #tpu.pipeline_mode<synchronous>, transform_indices = @transform_4, window_bounds = array<i64: 1, 8>}]} {
    %c0 = arith.constant 0 : index
    %c0_0 = arith.constant 0 : index
    %c0_1 = arith.constant 0 : index
    %c0_2 = arith.constant 0 : index
    %0 = vector.load %arg1[%c0, %c0_0, %c0_1, %c0_2] : memref<1x16x16x4xf32, #tpu.memory_space<vmem>>, vector<1x16x16x4xf32>
    %1 = vector.shape_cast %0 : vector<1x16x16x4xf32> to vector<16x16x4xf32>
    %c0_3 = arith.constant 0 : index
    %c0_4 = arith.constant 0 : index
    %2 = vector.load %arg2[%c0_3, %c0_4] : memref<36x8xf32, #tpu.memory_space<vmem>>, vector<36x8xf32>
    %cst = arith.constant 0.000000e+00 : f32
    %3 = vector.broadcast %cst : f32 to vector<1x16x4xf32>
    %cst_5 = arith.constant 0.000000e+00 : f32
    %4 = vector.broadcast %cst_5 : f32 to vector<18x1x4xf32>
    %5 = tpu.concatenate %3, %1, %3 in 0 : vector<1x16x4xf32>, vector<16x16x4xf32>, vector<1x16x4xf32> -> vector<18x16x4xf32>
    %6 = tpu.concatenate %4, %5, %4 in 1 : vector<18x1x4xf32>, vector<18x16x4xf32>, vector<18x1x4xf32> -> vector<18x18x4xf32>
    %7 = vector.extract_strided_slice %6 {offsets = [0, 0, 0], sizes = [16, 16, 4], strides = [1, 1, 1]} : vector<18x18x4xf32> to vector<16x16x4xf32>
    %8 = vector.shape_cast %7 : vector<16x16x4xf32> to vector<256x4xf32>
    %9 = vector.extract_strided_slice %6 {offsets = [0, 1, 0], sizes = [16, 16, 4], strides = [1, 1, 1]} : vector<18x18x4xf32> to vector<16x16x4xf32>
    %10 = vector.shape_cast %9 : vector<16x16x4xf32> to vector<256x4xf32>
    %11 = vector.extract_strided_slice %6 {offsets = [0, 2, 0], sizes = [16, 16, 4], strides = [1, 1, 1]} : vector<18x18x4xf32> to vector<16x16x4xf32>
    %12 = vector.shape_cast %11 : vector<16x16x4xf32> to vector<256x4xf32>
    %13 = vector.extract_strided_slice %6 {offsets = [1, 0, 0], sizes = [16, 16, 4], strides = [1, 1, 1]} : vector<18x18x4xf32> to vector<16x16x4xf32>
    %14 = vector.shape_cast %13 : vector<16x16x4xf32> to vector<256x4xf32>
    %15 = vector.extract_strided_slice %6 {offsets = [1, 1, 0], sizes = [16, 16, 4], strides = [1, 1, 1]} : vector<18x18x4xf32> to vector<16x16x4xf32>
    %16 = vector.shape_cast %15 : vector<16x16x4xf32> to vector<256x4xf32>
    %17 = vector.extract_strided_slice %6 {offsets = [1, 2, 0], sizes = [16, 16, 4], strides = [1, 1, 1]} : vector<18x18x4xf32> to vector<16x16x4xf32>
    %18 = vector.shape_cast %17 : vector<16x16x4xf32> to vector<256x4xf32>
    %19 = vector.extract_strided_slice %6 {offsets = [2, 0, 0], sizes = [16, 16, 4], strides = [1, 1, 1]} : vector<18x18x4xf32> to vector<16x16x4xf32>
    %20 = vector.shape_cast %19 : vector<16x16x4xf32> to vector<256x4xf32>
    %21 = vector.extract_strided_slice %6 {offsets = [2, 1, 0], sizes = [16, 16, 4], strides = [1, 1, 1]} : vector<18x18x4xf32> to vector<16x16x4xf32>
    %22 = vector.shape_cast %21 : vector<16x16x4xf32> to vector<256x4xf32>
    %23 = vector.extract_strided_slice %6 {offsets = [2, 2, 0], sizes = [16, 16, 4], strides = [1, 1, 1]} : vector<18x18x4xf32> to vector<16x16x4xf32>
    %24 = vector.shape_cast %23 : vector<16x16x4xf32> to vector<256x4xf32>
    %25 = tpu.concatenate %8, %10, %12, %14, %16, %18, %20, %22, %24 in 1 : vector<256x4xf32>, vector<256x4xf32>, vector<256x4xf32>, vector<256x4xf32>, vector<256x4xf32>, vector<256x4xf32>, vector<256x4xf32>, vector<256x4xf32>, vector<256x4xf32> -> vector<256x36xf32>
    %cst_6 = arith.constant dense<0.000000e+00> : vector<256x8xf32>
    %26 = tpu.matmul %25, %2, %cst_6 {dimension_numbers = #tpu.dot_dimension_numbers<[1], [0], [0], [1], [0, 0, 1, 1], [], []>} : vector<256x36xf32>, vector<36x8xf32>, vector<256x8xf32> -> vector<256x8xf32>
    %27 = vector.shape_cast %26 : vector<256x8xf32> to vector<16x16x8xf32>
    %28 = vector.shape_cast %27 : vector<16x16x8xf32> to vector<1x16x16x8xf32>
    %c0_7 = arith.constant 0 : index
    %c0_8 = arith.constant 0 : index
    %c0_9 = arith.constant 0 : index
    %c0_10 = arith.constant 0 : index
    %29 = vector.load %arg3[%c0_7, %c0_8, %c0_9, %c0_10] : memref<1x16x16x8xf32, #tpu.memory_space<vmem>>, vector<1x16x16x8xf32>
    tpu.vector_store %arg3[%c0_7, %c0_8, %c0_9, %c0_10], %28 {strides = array<i32>} : memref<1x16x16x8xf32, #tpu.memory_space<vmem>>, vector<1x16x16x8xf32>,
    %c0_i32 = arith.constant 0 : i32
    %30 = arith.cmpi eq, %arg0, %c0_i32 : i32
    %31 = arith.extui %30 : i1 to i32
    %c0_i32_11 = arith.constant 0 : i32
    %32 = arith.cmpi ne, %31, %c0_i32_11 : i32
    scf.if %32 {
      %cst_23 = arith.constant 0.000000e+00 : f32
      %47 = vector.broadcast %cst_23 : f32 to vector<1x8xf32>
      %c0_24 = arith.constant 0 : index
      %c0_25 = arith.constant 0 : index
      %48 = vector.load %arg6[%c0_24, %c0_25] : memref<1x8xf32, #tpu.memory_space<vmem>>, vector<1x8xf32>
      tpu.vector_store %arg6[%c0_24, %c0_25], %47 {strides = array<i32>} : memref<1x8xf32, #tpu.memory_space<vmem>>, vector<1x8xf32>,
      %cst_26 = arith.constant 0.000000e+00 : f32
      %49 = vector.broadcast %cst_26 : f32 to vector<1x8xf32>
      %c0_27 = arith.constant 0 : index
      %c0_28 = arith.constant 0 : index
      %50 = vector.load %arg7[%c0_27, %c0_28] : memref<1x8xf32, #tpu.memory_space<vmem>>, vector<1x8xf32>
      tpu.vector_store %arg7[%c0_27, %c0_28], %49 {strides = array<i32>} : memref<1x8xf32, #tpu.memory_space<vmem>>, vector<1x8xf32>,
    } else {
    }
    %c0_12 = arith.constant 0 : index
    %c0_13 = arith.constant 0 : index
    %33 = vector.load %arg6[%c0_12, %c0_13] : memref<1x8xf32, #tpu.memory_space<vmem>>, vector<1x8xf32>
    %cst_14 = arith.constant dense<0.000000e+00> : vector<8xf32>
    %34 = vector.multi_reduction <add>, %27, %cst_14 [0, 1] : vector<16x16x8xf32> to vector<8xf32>
    %35 = vector.shape_cast %34 : vector<8xf32> to vector<1x8xf32>
    %36 = arith.addf %33, %35 : vector<1x8xf32>
    %c0_15 = arith.constant 0 : index
    %c0_16 = arith.constant 0 : index
    %37 = vector.load %arg6[%c0_15, %c0_16] : memref<1x8xf32, #tpu.memory_space<vmem>>, vector<1x8xf32>
    tpu.vector_store %arg6[%c0_15, %c0_16], %36 {strides = array<i32>} : memref<1x8xf32, #tpu.memory_space<vmem>>, vector<1x8xf32>,
    %c0_17 = arith.constant 0 : index
    %c0_18 = arith.constant 0 : index
    %38 = vector.load %arg7[%c0_17, %c0_18] : memref<1x8xf32, #tpu.memory_space<vmem>>, vector<1x8xf32>
    %39 = arith.mulf %27, %27 : vector<16x16x8xf32>
    %cst_19 = arith.constant dense<0.000000e+00> : vector<8xf32>
    %40 = vector.multi_reduction <add>, %39, %cst_19 [0, 1] : vector<16x16x8xf32> to vector<8xf32>
    %41 = vector.shape_cast %40 : vector<8xf32> to vector<1x8xf32>
    %42 = arith.addf %38, %41 : vector<1x8xf32>
    %c0_20 = arith.constant 0 : index
    %c0_21 = arith.constant 0 : index
    %43 = vector.load %arg7[%c0_20, %c0_21] : memref<1x8xf32, #tpu.memory_space<vmem>>, vector<1x8xf32>
    tpu.vector_store %arg7[%c0_20, %c0_21], %42 {strides = array<i32>} : memref<1x8xf32, #tpu.memory_space<vmem>>, vector<1x8xf32>,
    %c1_i32 = arith.constant 1 : i32
    %44 = arith.cmpi eq, %arg0, %c1_i32 : i32
    %45 = arith.extui %44 : i1 to i32
    %c0_i32_22 = arith.constant 0 : i32
    %46 = arith.cmpi ne, %45, %c0_i32_22 : i32
    scf.if %46 {
      %c0_23 = arith.constant 0 : index
      %c0_24 = arith.constant 0 : index
      %47 = vector.load %arg6[%c0_23, %c0_24] : memref<1x8xf32, #tpu.memory_space<vmem>>, vector<1x8xf32>
      %cst_25 = arith.constant 5.120000e+02 : f32
      %48 = vector.broadcast %cst_25 : f32 to vector<1x8xf32>
      %49 = arith.divf %47, %48 : vector<1x8xf32>
      %c0_26 = arith.constant 0 : index
      %c0_27 = arith.constant 0 : index
      %50 = vector.load %arg4[%c0_26, %c0_27] : memref<1x8xf32, #tpu.memory_space<vmem>>, vector<1x8xf32>
      tpu.vector_store %arg4[%c0_26, %c0_27], %49 {strides = array<i32>} : memref<1x8xf32, #tpu.memory_space<vmem>>, vector<1x8xf32>,
      %c0_28 = arith.constant 0 : index
      %c0_29 = arith.constant 0 : index
      %51 = vector.load %arg7[%c0_28, %c0_29] : memref<1x8xf32, #tpu.memory_space<vmem>>, vector<1x8xf32>
      %cst_30 = arith.constant 5.120000e+02 : f32
      %52 = vector.broadcast %cst_30 : f32 to vector<1x8xf32>
      %53 = arith.divf %51, %52 : vector<1x8xf32>
      %54 = arith.mulf %49, %49 : vector<1x8xf32>
      %55 = arith.subf %53, %54 : vector<1x8xf32>
      %c0_31 = arith.constant 0 : index
      %c0_32 = arith.constant 0 : index
      %56 = vector.load %arg5[%c0_31, %c0_32] : memref<1x8xf32, #tpu.memory_space<vmem>>, vector<1x8xf32>
      tpu.vector_store %arg5[%c0_31, %c0_32], %55 {strides = array<i32>} : memref<1x8xf32, #tpu.memory_space<vmem>>, vector<1x8xf32>,
    } else {
    }
    return
  }
  func.func @transform_0(%arg0: i32) -> (i32, i32, i32, i32) {
    %c0_i32 = arith.constant 0 : i32
    %c0_i32_0 = arith.constant 0 : i32
    %c0_i32_1 = arith.constant 0 : i32
    %c0_i32_2 = arith.constant 0 : i32
    return %arg0, %c0_i32, %c0_i32_0, %c0_i32_1 : i32, i32, i32, i32
  }
  func.func @transform_1(%arg0: i32) -> (i32, i32) {
    %c0_i32 = arith.constant 0 : i32
    %c0_i32_0 = arith.constant 0 : i32
    %c0_i32_1 = arith.constant 0 : i32
    return %c0_i32, %c0_i32_0 : i32, i32
  }
  func.func @transform_2(%arg0: i32) -> (i32, i32, i32, i32) {
    %c0_i32 = arith.constant 0 : i32
    %c0_i32_0 = arith.constant 0 : i32
    %c0_i32_1 = arith.constant 0 : i32
    %c0_i32_2 = arith.constant 0 : i32
    return %arg0, %c0_i32, %c0_i32_0, %c0_i32_1 : i32, i32, i32, i32
  }
  func.func @transform_3(%arg0: i32) -> (i32, i32) {
    %c0_i32 = arith.constant 0 : i32
    %c0_i32_0 = arith.constant 0 : i32
    %c0_i32_1 = arith.constant 0 : i32
    return %c0_i32, %c0_i32_0 : i32, i32
  }
  func.func @transform_4(%arg0: i32) -> (i32, i32) {
    %c0_i32 = arith.constant 0 : i32
    %c0_i32_0 = arith.constant 0 : i32
    %c0_i32_1 = arith.constant 0 : i32
    return %c0_i32, %c0_i32_0 : i32, i32
  }
}

module attributes {stable_mosaic.version = 11 : i64} {
  func.func @bn_relu_conv_stats_kernel(%arg0: i32, %arg1: memref<1x16x16x8xf32, #tpu.memory_space<vmem>>, %arg2: memref<1x8xf32, #tpu.memory_space<vmem>>, %arg3: memref<1x8xf32, #tpu.memory_space<vmem>>, %arg4: memref<1x8xf32, #tpu.memory_space<vmem>>, %arg5: memref<1x8xf32, #tpu.memory_space<vmem>>, %arg6: memref<72x8xf32, #tpu.memory_space<vmem>>, %arg7: memref<1x16x16x8xf32, #tpu.memory_space<vmem>>, %arg8: memref<1x8xf32, #tpu.memory_space<vmem>>, %arg9: memref<1x8xf32, #tpu.memory_space<vmem>>, %arg10: memref<1x8xf32, #tpu.memory_space<vmem>>, %arg11: memref<1x8xf32, #tpu.memory_space<vmem>>) attributes {dimension_semantics = [#tpu.dimension_semantics<arbitrary>], iteration_bounds = array<i64: 2>, scalar_prefetch = 0 : i64, scratch_operands = 2 : i64, tpu.core_type = #tpu.core_type<tc>, window_params = [{transform_indices = @transform_0, window_bounds = array<i64: 1, 16, 16, 8>}, {pipeline_mode = #tpu.pipeline_mode<synchronous>, transform_indices = @transform_1, window_bounds = array<i64: 1, 8>}, {pipeline_mode = #tpu.pipeline_mode<synchronous>, transform_indices = @transform_2, window_bounds = array<i64: 1, 8>}, {pipeline_mode = #tpu.pipeline_mode<synchronous>, transform_indices = @transform_3, window_bounds = array<i64: 1, 8>}, {pipeline_mode = #tpu.pipeline_mode<synchronous>, transform_indices = @transform_4, window_bounds = array<i64: 1, 8>}, {pipeline_mode = #tpu.pipeline_mode<synchronous>, transform_indices = @transform_5, window_bounds = array<i64: 72, 8>}, {transform_indices = @transform_6, window_bounds = array<i64: 1, 16, 16, 8>}, {pipeline_mode = #tpu.pipeline_mode<synchronous>, transform_indices = @transform_7, window_bounds = array<i64: 1, 8>}, {pipeline_mode = #tpu.pipeline_mode<synchronous>, transform_indices = @transform_8, window_bounds = array<i64: 1, 8>}]} {
    %c0 = arith.constant 0 : index
    %c0_0 = arith.constant 0 : index
    %c0_1 = arith.constant 0 : index
    %c0_2 = arith.constant 0 : index
    %0 = vector.load %arg1[%c0, %c0_0, %c0_1, %c0_2] : memref<1x16x16x8xf32, #tpu.memory_space<vmem>>, vector<1x16x16x8xf32>
    %1 = vector.shape_cast %0 : vector<1x16x16x8xf32> to vector<16x16x8xf32>
    %c0_3 = arith.constant 0 : index
    %c0_4 = arith.constant 0 : index
    %2 = vector.load %arg3[%c0_3, %c0_4] : memref<1x8xf32, #tpu.memory_space<vmem>>, vector<1x8xf32>
    %cst = arith.constant 9.99999974E-6 : f32
    %3 = vector.broadcast %cst : f32 to vector<1x8xf32>
    %4 = arith.addf %2, %3 : vector<1x8xf32>
    %5 = math.rsqrt %4 : vector<1x8xf32>
    %c0_5 = arith.constant 0 : index
    %c0_6 = arith.constant 0 : index
    %6 = vector.load %arg2[%c0_5, %c0_6] : memref<1x8xf32, #tpu.memory_space<vmem>>, vector<1x8xf32>
    %7 = vector.shape_cast %6 : vector<1x8xf32> to vector<1x1x8xf32>
    %8 = vector.broadcast %7 : vector<1x1x8xf32> to vector<16x16x8xf32>
    %9 = arith.subf %1, %8 : vector<16x16x8xf32>
    %c0_7 = arith.constant 0 : index
    %c0_8 = arith.constant 0 : index
    %10 = vector.load %arg4[%c0_7, %c0_8] : memref<1x8xf32, #tpu.memory_space<vmem>>, vector<1x8xf32>
    %11 = arith.mulf %5, %10 : vector<1x8xf32>
    %12 = vector.shape_cast %11 : vector<1x8xf32> to vector<1x1x8xf32>
    %13 = vector.broadcast %12 : vector<1x1x8xf32> to vector<16x16x8xf32>
    %14 = arith.mulf %9, %13 : vector<16x16x8xf32>
    %c0_9 = arith.constant 0 : index
    %c0_10 = arith.constant 0 : index
    %15 = vector.load %arg5[%c0_9, %c0_10] : memref<1x8xf32, #tpu.memory_space<vmem>>, vector<1x8xf32>
    %16 = vector.shape_cast %15 : vector<1x8xf32> to vector<1x1x8xf32>
    %17 = vector.broadcast %16 : vector<1x1x8xf32> to vector<16x16x8xf32>
    %18 = arith.addf %14, %17 : vector<16x16x8xf32>
    %cst_11 = arith.constant 0.000000e+00 : f32
    %19 = vector.broadcast %cst_11 : f32 to vector<16x16x8xf32>
    %20 = arith.maximumf %18, %19 : vector<16x16x8xf32>
    %c0_12 = arith.constant 0 : index
    %c0_13 = arith.constant 0 : index
    %21 = vector.load %arg6[%c0_12, %c0_13] : memref<72x8xf32, #tpu.memory_space<vmem>>, vector<72x8xf32>
    %cst_14 = arith.constant 0.000000e+00 : f32
    %22 = vector.broadcast %cst_14 : f32 to vector<1x16x8xf32>
    %cst_15 = arith.constant 0.000000e+00 : f32
    %23 = vector.broadcast %cst_15 : f32 to vector<18x1x8xf32>
    %24 = tpu.concatenate %22, %20, %22 in 0 : vector<1x16x8xf32>, vector<16x16x8xf32>, vector<1x16x8xf32> -> vector<18x16x8xf32>
    %25 = tpu.concatenate %23, %24, %23 in 1 : vector<18x1x8xf32>, vector<18x16x8xf32>, vector<18x1x8xf32> -> vector<18x18x8xf32>
    %26 = vector.extract_strided_slice %25 {offsets = [0, 0, 0], sizes = [16, 16, 8], strides = [1, 1, 1]} : vector<18x18x8xf32> to vector<16x16x8xf32>
    %27 = vector.shape_cast %26 : vector<16x16x8xf32> to vector<256x8xf32>
    %28 = vector.extract_strided_slice %25 {offsets = [0, 1, 0], sizes = [16, 16, 8], strides = [1, 1, 1]} : vector<18x18x8xf32> to vector<16x16x8xf32>
    %29 = vector.shape_cast %28 : vector<16x16x8xf32> to vector<256x8xf32>
    %30 = vector.extract_strided_slice %25 {offsets = [0, 2, 0], sizes = [16, 16, 8], strides = [1, 1, 1]} : vector<18x18x8xf32> to vector<16x16x8xf32>
    %31 = vector.shape_cast %30 : vector<16x16x8xf32> to vector<256x8xf32>
    %32 = vector.extract_strided_slice %25 {offsets = [1, 0, 0], sizes = [16, 16, 8], strides = [1, 1, 1]} : vector<18x18x8xf32> to vector<16x16x8xf32>
    %33 = vector.shape_cast %32 : vector<16x16x8xf32> to vector<256x8xf32>
    %34 = vector.extract_strided_slice %25 {offsets = [1, 1, 0], sizes = [16, 16, 8], strides = [1, 1, 1]} : vector<18x18x8xf32> to vector<16x16x8xf32>
    %35 = vector.shape_cast %34 : vector<16x16x8xf32> to vector<256x8xf32>
    %36 = vector.extract_strided_slice %25 {offsets = [1, 2, 0], sizes = [16, 16, 8], strides = [1, 1, 1]} : vector<18x18x8xf32> to vector<16x16x8xf32>
    %37 = vector.shape_cast %36 : vector<16x16x8xf32> to vector<256x8xf32>
    %38 = vector.extract_strided_slice %25 {offsets = [2, 0, 0], sizes = [16, 16, 8], strides = [1, 1, 1]} : vector<18x18x8xf32> to vector<16x16x8xf32>
    %39 = vector.shape_cast %38 : vector<16x16x8xf32> to vector<256x8xf32>
    %40 = vector.extract_strided_slice %25 {offsets = [2, 1, 0], sizes = [16, 16, 8], strides = [1, 1, 1]} : vector<18x18x8xf32> to vector<16x16x8xf32>
    %41 = vector.shape_cast %40 : vector<16x16x8xf32> to vector<256x8xf32>
    %42 = vector.extract_strided_slice %25 {offsets = [2, 2, 0], sizes = [16, 16, 8], strides = [1, 1, 1]} : vector<18x18x8xf32> to vector<16x16x8xf32>
    %43 = vector.shape_cast %42 : vector<16x16x8xf32> to vector<256x8xf32>
    %44 = tpu.concatenate %27, %29, %31, %33, %35, %37, %39, %41, %43 in 1 : vector<256x8xf32>, vector<256x8xf32>, vector<256x8xf32>, vector<256x8xf32>, vector<256x8xf32>, vector<256x8xf32>, vector<256x8xf32>, vector<256x8xf32>, vector<256x8xf32> -> vector<256x72xf32>
    %cst_16 = arith.constant dense<0.000000e+00> : vector<256x8xf32>
    %45 = tpu.matmul %44, %21, %cst_16 {dimension_numbers = #tpu.dot_dimension_numbers<[1], [0], [0], [1], [0, 0, 1, 1], [], []>} : vector<256x72xf32>, vector<72x8xf32>, vector<256x8xf32> -> vector<256x8xf32>
    %46 = vector.shape_cast %45 : vector<256x8xf32> to vector<16x16x8xf32>
    %47 = vector.shape_cast %46 : vector<16x16x8xf32> to vector<1x16x16x8xf32>
    %c0_17 = arith.constant 0 : index
    %c0_18 = arith.constant 0 : index
    %c0_19 = arith.constant 0 : index
    %c0_20 = arith.constant 0 : index
    %48 = vector.load %arg7[%c0_17, %c0_18, %c0_19, %c0_20] : memref<1x16x16x8xf32, #tpu.memory_space<vmem>>, vector<1x16x16x8xf32>
    tpu.vector_store %arg7[%c0_17, %c0_18, %c0_19, %c0_20], %47 {strides = array<i32>} : memref<1x16x16x8xf32, #tpu.memory_space<vmem>>, vector<1x16x16x8xf32>,
    %c0_i32 = arith.constant 0 : i32
    %49 = arith.cmpi eq, %arg0, %c0_i32 : i32
    %50 = arith.extui %49 : i1 to i32
    %c0_i32_21 = arith.constant 0 : i32
    %51 = arith.cmpi ne, %50, %c0_i32_21 : i32
    scf.if %51 {
      %cst_33 = arith.constant 0.000000e+00 : f32
      %66 = vector.broadcast %cst_33 : f32 to vector<1x8xf32>
      %c0_34 = arith.constant 0 : index
      %c0_35 = arith.constant 0 : index
      %67 = vector.load %arg10[%c0_34, %c0_35] : memref<1x8xf32, #tpu.memory_space<vmem>>, vector<1x8xf32>
      tpu.vector_store %arg10[%c0_34, %c0_35], %66 {strides = array<i32>} : memref<1x8xf32, #tpu.memory_space<vmem>>, vector<1x8xf32>,
      %cst_36 = arith.constant 0.000000e+00 : f32
      %68 = vector.broadcast %cst_36 : f32 to vector<1x8xf32>
      %c0_37 = arith.constant 0 : index
      %c0_38 = arith.constant 0 : index
      %69 = vector.load %arg11[%c0_37, %c0_38] : memref<1x8xf32, #tpu.memory_space<vmem>>, vector<1x8xf32>
      tpu.vector_store %arg11[%c0_37, %c0_38], %68 {strides = array<i32>} : memref<1x8xf32, #tpu.memory_space<vmem>>, vector<1x8xf32>,
    } else {
    }
    %c0_22 = arith.constant 0 : index
    %c0_23 = arith.constant 0 : index
    %52 = vector.load %arg10[%c0_22, %c0_23] : memref<1x8xf32, #tpu.memory_space<vmem>>, vector<1x8xf32>
    %cst_24 = arith.constant dense<0.000000e+00> : vector<8xf32>
    %53 = vector.multi_reduction <add>, %46, %cst_24 [0, 1] : vector<16x16x8xf32> to vector<8xf32>
    %54 = vector.shape_cast %53 : vector<8xf32> to vector<1x8xf32>
    %55 = arith.addf %52, %54 : vector<1x8xf32>
    %c0_25 = arith.constant 0 : index
    %c0_26 = arith.constant 0 : index
    %56 = vector.load %arg10[%c0_25, %c0_26] : memref<1x8xf32, #tpu.memory_space<vmem>>, vector<1x8xf32>
    tpu.vector_store %arg10[%c0_25, %c0_26], %55 {strides = array<i32>} : memref<1x8xf32, #tpu.memory_space<vmem>>, vector<1x8xf32>,
    %c0_27 = arith.constant 0 : index
    %c0_28 = arith.constant 0 : index
    %57 = vector.load %arg11[%c0_27, %c0_28] : memref<1x8xf32, #tpu.memory_space<vmem>>, vector<1x8xf32>
    %58 = arith.mulf %46, %46 : vector<16x16x8xf32>
    %cst_29 = arith.constant dense<0.000000e+00> : vector<8xf32>
    %59 = vector.multi_reduction <add>, %58, %cst_29 [0, 1] : vector<16x16x8xf32> to vector<8xf32>
    %60 = vector.shape_cast %59 : vector<8xf32> to vector<1x8xf32>
    %61 = arith.addf %57, %60 : vector<1x8xf32>
    %c0_30 = arith.constant 0 : index
    %c0_31 = arith.constant 0 : index
    %62 = vector.load %arg11[%c0_30, %c0_31] : memref<1x8xf32, #tpu.memory_space<vmem>>, vector<1x8xf32>
    tpu.vector_store %arg11[%c0_30, %c0_31], %61 {strides = array<i32>} : memref<1x8xf32, #tpu.memory_space<vmem>>, vector<1x8xf32>,
    %c1_i32 = arith.constant 1 : i32
    %63 = arith.cmpi eq, %arg0, %c1_i32 : i32
    %64 = arith.extui %63 : i1 to i32
    %c0_i32_32 = arith.constant 0 : i32
    %65 = arith.cmpi ne, %64, %c0_i32_32 : i32
    scf.if %65 {
      %c0_33 = arith.constant 0 : index
      %c0_34 = arith.constant 0 : index
      %66 = vector.load %arg10[%c0_33, %c0_34] : memref<1x8xf32, #tpu.memory_space<vmem>>, vector<1x8xf32>
      %cst_35 = arith.constant 5.120000e+02 : f32
      %67 = vector.broadcast %cst_35 : f32 to vector<1x8xf32>
      %68 = arith.divf %66, %67 : vector<1x8xf32>
      %c0_36 = arith.constant 0 : index
      %c0_37 = arith.constant 0 : index
      %69 = vector.load %arg8[%c0_36, %c0_37] : memref<1x8xf32, #tpu.memory_space<vmem>>, vector<1x8xf32>
      tpu.vector_store %arg8[%c0_36, %c0_37], %68 {strides = array<i32>} : memref<1x8xf32, #tpu.memory_space<vmem>>, vector<1x8xf32>,
      %c0_38 = arith.constant 0 : index
      %c0_39 = arith.constant 0 : index
      %70 = vector.load %arg11[%c0_38, %c0_39] : memref<1x8xf32, #tpu.memory_space<vmem>>, vector<1x8xf32>
      %cst_40 = arith.constant 5.120000e+02 : f32
      %71 = vector.broadcast %cst_40 : f32 to vector<1x8xf32>
      %72 = arith.divf %70, %71 : vector<1x8xf32>
      %73 = arith.mulf %68, %68 : vector<1x8xf32>
      %74 = arith.subf %72, %73 : vector<1x8xf32>
      %c0_41 = arith.constant 0 : index
      %c0_42 = arith.constant 0 : index
      %75 = vector.load %arg9[%c0_41, %c0_42] : memref<1x8xf32, #tpu.memory_space<vmem>>, vector<1x8xf32>
      tpu.vector_store %arg9[%c0_41, %c0_42], %74 {strides = array<i32>} : memref<1x8xf32, #tpu.memory_space<vmem>>, vector<1x8xf32>,
    } else {
    }
    return
  }
  func.func @transform_0(%arg0: i32) -> (i32, i32, i32, i32) {
    %c0_i32 = arith.constant 0 : i32
    %c0_i32_0 = arith.constant 0 : i32
    %c0_i32_1 = arith.constant 0 : i32
    %c0_i32_2 = arith.constant 0 : i32
    return %arg0, %c0_i32, %c0_i32_0, %c0_i32_1 : i32, i32, i32, i32
  }
  func.func @transform_1(%arg0: i32) -> (i32, i32) {
    %c0_i32 = arith.constant 0 : i32
    %c0_i32_0 = arith.constant 0 : i32
    %c0_i32_1 = arith.constant 0 : i32
    return %c0_i32, %c0_i32_0 : i32, i32
  }
  func.func @transform_2(%arg0: i32) -> (i32, i32) {
    %c0_i32 = arith.constant 0 : i32
    %c0_i32_0 = arith.constant 0 : i32
    %c0_i32_1 = arith.constant 0 : i32
    return %c0_i32, %c0_i32_0 : i32, i32
  }
  func.func @transform_3(%arg0: i32) -> (i32, i32) {
    %c0_i32 = arith.constant 0 : i32
    %c0_i32_0 = arith.constant 0 : i32
    %c0_i32_1 = arith.constant 0 : i32
    return %c0_i32, %c0_i32_0 : i32, i32
  }
  func.func @transform_4(%arg0: i32) -> (i32, i32) {
    %c0_i32 = arith.constant 0 : i32
    %c0_i32_0 = arith.constant 0 : i32
    %c0_i32_1 = arith.constant 0 : i32
    return %c0_i32, %c0_i32_0 : i32, i32
  }
  func.func @transform_5(%arg0: i32) -> (i32, i32) {
    %c0_i32 = arith.constant 0 : i32
    %c0_i32_0 = arith.constant 0 : i32
    %c0_i32_1 = arith.constant 0 : i32
    return %c0_i32, %c0_i32_0 : i32, i32
  }
  func.func @transform_6(%arg0: i32) -> (i32, i32, i32, i32) {
    %c0_i32 = arith.constant 0 : i32
    %c0_i32_0 = arith.constant 0 : i32
    %c0_i32_1 = arith.constant 0 : i32
    %c0_i32_2 = arith.constant 0 : i32
    return %arg0, %c0_i32, %c0_i32_0, %c0_i32_1 : i32, i32, i32, i32
  }
  func.func @transform_7(%arg0: i32) -> (i32, i32) {
    %c0_i32 = arith.constant 0 : i32
    %c0_i32_0 = arith.constant 0 : i32
    %c0_i32_1 = arith.constant 0 : i32
    return %c0_i32, %c0_i32_0 : i32, i32
  }
  func.func @transform_8(%arg0: i32) -> (i32, i32) {
    %c0_i32 = arith.constant 0 : i32
    %c0_i32_0 = arith.constant 0 : i32
    %c0_i32_1 = arith.constant 0 : i32
    return %c0_i32, %c0_i32_0 : i32, i32
  }
}

module attributes {stable_mosaic.version = 11 : i64} {
  func.func @bn_relu_kernel(%arg0: i32, %arg1: memref<1x16x16x8xf32, #tpu.memory_space<vmem>>, %arg2: memref<1x8xf32, #tpu.memory_space<vmem>>, %arg3: memref<1x8xf32, #tpu.memory_space<vmem>>, %arg4: memref<1x8xf32, #tpu.memory_space<vmem>>, %arg5: memref<1x8xf32, #tpu.memory_space<vmem>>, %arg6: memref<1x16x16x8xf32, #tpu.memory_space<vmem>>) attributes {dimension_semantics = [#tpu.dimension_semantics<parallel>], iteration_bounds = array<i64: 2>, scalar_prefetch = 0 : i64, scratch_operands = 0 : i64, tpu.core_type = #tpu.core_type<tc>, window_params = [{transform_indices = @transform_0, window_bounds = array<i64: 1, 16, 16, 8>}, {pipeline_mode = #tpu.pipeline_mode<synchronous>, transform_indices = @transform_1, window_bounds = array<i64: 1, 8>}, {pipeline_mode = #tpu.pipeline_mode<synchronous>, transform_indices = @transform_2, window_bounds = array<i64: 1, 8>}, {pipeline_mode = #tpu.pipeline_mode<synchronous>, transform_indices = @transform_3, window_bounds = array<i64: 1, 8>}, {pipeline_mode = #tpu.pipeline_mode<synchronous>, transform_indices = @transform_4, window_bounds = array<i64: 1, 8>}, {transform_indices = @transform_5, window_bounds = array<i64: 1, 16, 16, 8>}]} {
    %c0 = arith.constant 0 : index
    %c0_0 = arith.constant 0 : index
    %c0_1 = arith.constant 0 : index
    %c0_2 = arith.constant 0 : index
    %0 = vector.load %arg1[%c0, %c0_0, %c0_1, %c0_2] : memref<1x16x16x8xf32, #tpu.memory_space<vmem>>, vector<1x16x16x8xf32>
    %c0_3 = arith.constant 0 : index
    %c0_4 = arith.constant 0 : index
    %1 = vector.load %arg3[%c0_3, %c0_4] : memref<1x8xf32, #tpu.memory_space<vmem>>, vector<1x8xf32>
    %cst = arith.constant 9.99999974E-6 : f32
    %2 = vector.broadcast %cst : f32 to vector<1x8xf32>
    %3 = arith.addf %1, %2 : vector<1x8xf32>
    %4 = math.rsqrt %3 : vector<1x8xf32>
    %c0_5 = arith.constant 0 : index
    %c0_6 = arith.constant 0 : index
    %5 = vector.load %arg2[%c0_5, %c0_6] : memref<1x8xf32, #tpu.memory_space<vmem>>, vector<1x8xf32>
    %6 = vector.shape_cast %5 : vector<1x8xf32> to vector<1x1x1x8xf32>
    %7 = vector.broadcast %6 : vector<1x1x1x8xf32> to vector<1x16x16x8xf32>
    %8 = arith.subf %0, %7 : vector<1x16x16x8xf32>
    %c0_7 = arith.constant 0 : index
    %c0_8 = arith.constant 0 : index
    %9 = vector.load %arg4[%c0_7, %c0_8] : memref<1x8xf32, #tpu.memory_space<vmem>>, vector<1x8xf32>
    %10 = arith.mulf %4, %9 : vector<1x8xf32>
    %11 = vector.shape_cast %10 : vector<1x8xf32> to vector<1x1x1x8xf32>
    %12 = vector.broadcast %11 : vector<1x1x1x8xf32> to vector<1x16x16x8xf32>
    %13 = arith.mulf %8, %12 : vector<1x16x16x8xf32>
    %c0_9 = arith.constant 0 : index
    %c0_10 = arith.constant 0 : index
    %14 = vector.load %arg5[%c0_9, %c0_10] : memref<1x8xf32, #tpu.memory_space<vmem>>, vector<1x8xf32>
    %15 = vector.shape_cast %14 : vector<1x8xf32> to vector<1x1x1x8xf32>
    %16 = vector.broadcast %15 : vector<1x1x1x8xf32> to vector<1x16x16x8xf32>
    %17 = arith.addf %13, %16 : vector<1x16x16x8xf32>
    %cst_11 = arith.constant 0.000000e+00 : f32
    %18 = vector.broadcast %cst_11 : f32 to vector<1x16x16x8xf32>
    %19 = arith.maximumf %17, %18 : vector<1x16x16x8xf32>
    %c0_12 = arith.constant 0 : index
    %c0_13 = arith.constant 0 : index
    %c0_14 = arith.constant 0 : index
    %c0_15 = arith.constant 0 : index
    %20 = vector.load %arg6[%c0_12, %c0_13, %c0_14, %c0_15] : memref<1x16x16x8xf32, #tpu.memory_space<vmem>>, vector<1x16x16x8xf32>
    tpu.vector_store %arg6[%c0_12, %c0_13, %c0_14, %c0_15], %19 {strides = array<i32>} : memref<1x16x16x8xf32, #tpu.memory_space<vmem>>, vector<1x16x16x8xf32>,
    return
  }
  func.func @transform_0(%arg0: i32) -> (i32, i32, i32, i32) {
    %c0_i32 = arith.constant 0 : i32
    %c0_i32_0 = arith.constant 0 : i32
    %c0_i32_1 = arith.constant 0 : i32
    %c0_i32_2 = arith.constant 0 : i32
    return %arg0, %c0_i32, %c0_i32_0, %c0_i32_1 : i32, i32, i32, i32
  }
  func.func @transform_1(%arg0: i32) -> (i32, i32) {
    %c0_i32 = arith.constant 0 : i32
    %c0_i32_0 = arith.constant 0 : i32
    %c0_i32_1 = arith.constant 0 : i32
    return %c0_i32, %c0_i32_0 : i32, i32
  }
  func.func @transform_2(%arg0: i32) -> (i32, i32) {
    %c0_i32 = arith.constant 0 : i32
    %c0_i32_0 = arith.constant 0 : i32
    %c0_i32_1 = arith.constant 0 : i32
    return %c0_i32, %c0_i32_0 : i32, i32
  }
  func.func @transform_3(%arg0: i32) -> (i32, i32) {
    %c0_i32 = arith.constant 0 : i32
    %c0_i32_0 = arith.constant 0 : i32
    %c0_i32_1 = arith.constant 0 : i32
    return %c0_i32, %c0_i32_0 : i32, i32
  }
  func.func @transform_4(%arg0: i32) -> (i32, i32) {
    %c0_i32 = arith.constant 0 : i32
    %c0_i32_0 = arith.constant 0 : i32
    %c0_i32_1 = arith.constant 0 : i32
    return %c0_i32, %c0_i32_0 : i32, i32
  }
  func.func @transform_5(%arg0: i32) -> (i32, i32, i32, i32) {
    %c0_i32 = arith.constant 0 : i32
    %c0_i32_0 = arith.constant 0 : i32
    %c0_i32_1 = arith.constant 0 : i32
    %c0_i32_2 = arith.constant 0 : i32
    return %arg0, %c0_i32, %c0_i32_0, %c0_i32_1 : i32, i32, i32, i32
  }
}

</mosaic_0001>

<bundles_post_ra>
// kernel: conv_block_forward.5
= control target key start
LH: loop header
LB: loop body
LE: loop exit
PB: predicated region body
PF: predicated region fallthrough
CT: control target
= control target key end

     0   :  { %s561_s18 = smov 0   ;;  %s814_s0 = inlined_call_operand.vmem [shape: f32[2,16,16,8], index: 0, kind: input, shape index: {}]   ;;  %s815_s1 = inlined_call_operand.vmem [shape: f32[1,8], index: 1, kind: input, shape index: {}]   ;;  %s816_s2 = inlined_call_operand.vmem [shape: f32[1,8], index: 2, kind: input, shape index: {}]   ;;  %s817_s3 = inlined_call_operand.vmem [shape: f32[1,8], index: 3, kind: input, shape index: {}]   ;;  %s818_s4 = inlined_call_operand.vmem [shape: f32[1,8], index: 4, kind: input, shape index: {}]   ;;  %s819_s5 = inlined_call_operand.vmem [shape: f32[2,16,16,8], index: 5, kind: output, shape index: {}]  }
   0x1 LB: > { %s498_s19 = sadd.s32 4294967295, %s529_s18   ;;  %p502_p0 = scmp.ge.s32.totalorder %s529_s18, 1  ;;  %s529_s18 = sphi %s561_s18, %s15_s18  }
   0x2   : > { %p187_p1 = scmp.lt.s32.totalorder %s529_s18, 3 }
   0x4   : > { %p188_p2 = pnand %p502_p0, %p187_p1 }
   0x5   : > { %p215_p3 = scmp.lt.s32.totalorder (!%p188_p2), %s498_s19, 1 }
   0x6   : > { %191 = sbr.rel (%p188_p2) target bundleno = 74 (0x4a), region = 40 }
   0xb   : > { %v257_v0 = vld [vmem:[%s816_s2] sm:$0x1]  ;;  %s823_s19 = smov (!%p215_p3, %s498_s19), 1  ;;  %vm410_vm3 = vcmask 64512  }
   0xc   : > { %v258_v1 = vadd.f32 1e-05, %v257_v0  ;;  %s509_s22 = sshll.u32 %s823_s19, 8  ;;  %v585_v6 = vld [vmem:[%s815_s1] ss:$0 sm:$0xff] }
   0xd   : > { %s580_s25 = scalar_lea.vmem %s814_s0, %s509_s22  ;;  %v305_v9 = vld [vmem:[%s817_s3] sm:$0x1]  ;;  %s662_s9 = scalar_lea.vmem %s819_s5, %s509_s22 }
   0xe   : > { %521 = vrsqrt.f32 %v258_v1  ;;  %vm265_vm0 = vweird.f32 %v258_v1  ;;  %v225_v7 = vld [vmem:[%s580_s25] sm:$0xff]  ;;  %v226_v10 = vld [vmem:[%s580_s25 + $0x8] sm:$0xff]  ;;  %v227_v12 = vld [vmem:[%s580_s25 + $0x10] sm:$0xff] }
   0xf   : > { %v228_v13 = vld [vmem:[%s580_s25 + $0x18] sm:$0xff]  ;;  %v229_v15 = vld [vmem:[%s580_s25 + $0x20] sm:$0xff]  ;;  %v230_v16 = vld [vmem:[%s580_s25 + $0x28] sm:$0xff]  ;;  %v273_v22 = vsub.f32 %v225_v7, %v585_v6  ;;  %v274_v23 = vsub.f32 %v226_v10, %v585_v6  ;;  %v275_v28 = vsub.f32 %v227_v12, %v585_v6 }
  0x10   : > { %v231_v17 = vld [vmem:[%s580_s25 + $0x30] sm:$0xff]  ;;  %v232_v18 = vld [vmem:[%s580_s25 + $0x38] sm:$0xff]  ;;  %v233_v19 = vld [vmem:[%s580_s25 + $0x40] sm:$0xff]  ;;  %v276_v29 = vsub.f32 %v228_v13, %v585_v6  ;;  %v277_v30 = vsub.f32 %v229_v15, %v585_v6  ;;  %v278_v34 = vsub.f32 %v230_v16, %v585_v6 }
  0x11   : > { %v234_v20 = vld [vmem:[%s580_s25 + $0x48] sm:$0xff]  ;;  %v235_v24 = vld [vmem:[%s580_s25 + $0x50] sm:$0xff]  ;;  %v236_v25 = vld [vmem:[%s580_s25 + $0x58] sm:$0xff]  ;;  %v279_v35 = vsub.f32 %v231_v17, %v585_v6  ;;  %v280_v36 = vsub.f32 %v232_v18, %v585_v6  ;;  %v281_v37 = vsub.f32 %v233_v19, %v585_v6 }
  0x12   : > { %v237_v26 = vld [vmem:[%s580_s25 + $0x60] sm:$0xff]  ;;  %v238_v31 = vld [vmem:[%s580_s25 + $0x68] sm:$0xff]  ;;  %v239_v32 = vld [vmem:[%s580_s25 + $0x70] sm:$0xff]  ;;  %v282_v40 = vsub.f32 %v234_v20, %v585_v6  ;;  %v283_v41 = vsub.f32 %v235_v24, %v585_v6  ;;  %v284_v42 = vsub.f32 %v236_v25, %v585_v6 }
  0x13   : > { %v617_v33 = vld [vmem:[%s580_s25 + $0x78] sm:$0xff]  ;;  %v628_v39 = vld [vmem:[%s818_s4] ss:$0 sm:$0xff]  ;;  %v285_v43 = vsub.f32 %v237_v26, %v585_v6  ;;  %v286_v44 = vsub.f32 %v238_v31, %v585_v6  ;;  %v287_v45 = vsub.f32 %v239_v32, %v585_v6  ;;  %v646_v52 = vld [vmem:[%s580_s25 + $0x88] sm:$0xff] }
  0x14   : > { %v522_v2 = vpop.eup %521  ;;  %v288_v46 = vsub.f32 %v617_v33, %v585_v6  ;;  %v643_v51 = vld [vmem:[%s580_s25 + $0x80] sm:$0xff]  ;;  %v243_v61 = vld [vmem:[%s580_s25 + $0x90] sm:$0xff]  ;;  %v244_v15 = vld [vmem:[%s580_s25 + $0x98] sm:$0xff] }
  0x15   : > { %v260_v3 = vmul.f32 %v522_v2, %v258_v1  ;;  %vm266_vm1 = vweird.f32 %v522_v2  ;;  %v289_v0 = vsub.f32 %v643_v51, %v585_v6  ;;  %v290_v1 = vsub.f32 %v646_v52, %v585_v6  ;;  %v245_v20 = vld [vmem:[%s580_s25 + $0xa0] sm:$0xff]  ;;  %v247_v26 = vld [vmem:[%s580_s25 + $0xb0] sm:$0xff] }
  0x16   : > { %vm592_vm2 = vmor %vm265_vm0, %vm266_vm1  ;;  %v291_v10 = vsub.f32 %v243_v61, %v585_v6  ;;  %v293_v33 = vsub.f32 %v245_v20, %v585_v6  ;;  %v251_v52 = vld [vmem:[%s580_s25 + $0xd0] sm:$0xff] }
  0x17   : > { %v261_v4 = vmul.f32 %v522_v2, %v260_v3 }
  0x19   : > { %v262_v5 = vmul.f32 0.5, %v261_v4 }
  0x1b   : > { %v263_v8 = vsub.f32 1.5, %v262_v5 }
  0x1d   : > { %v264_v14 = vmul.f32 %v522_v2, %v263_v8 }
  0x1f   : > { %v268_v21 = vsel %vm592_vm2, %v522_v2, %v264_v14 }
  0x20   : > { %v306_v27 = vmul.f32 %v305_v9, %v268_v21  ;;  %v246_v21 = vld [vmem:[%s580_s25 + $0xa8] sm:$0xff] }
  0x22   : > { %v623_v38 = vperm.slane %v306_v27, 0 }
  0x24   : > { %v310_v47 = vmul.f32 %v623_v38, %v273_v22  ;;  %v311_v48 = vmul.f32 %v623_v38, %v274_v23  ;;  %v312_v49 = vmul.f32 %v623_v38, %v275_v28  ;;  %v313_v50 = vmul.f32 %v623_v38, %v276_v29 }
  0x25   : > { %v314_v53 = vmul.f32 %v623_v38, %v277_v30  ;;  %v315_v54 = vmul.f32 %v623_v38, %v278_v34  ;;  %v316_v55 = vmul.f32 %v623_v38, %v279_v35  ;;  %v317_v56 = vmul.f32 %v623_v38, %v280_v36  ;;  %v248_v35 = vld [vmem:[%s580_s25 + $0xb8] sm:$0xff] }
  0x26   : > { %v346_v57 = vadd.f32 %v628_v39, %v310_v47  ;;  %v347_v58 = vadd.f32 %v628_v39, %v311_v48  ;;  %v348_v59 = vadd.f32 %v628_v39, %v312_v49  ;;  %v349_v60 = vadd.f32 %v628_v39, %v313_v50  ;;  %v250_v47 = vld [vmem:[%s580_s25 + $0xc8] sm:$0xff] }
  0x27   : > { %v350_v62 = vadd.f32 %v628_v39, %v314_v53  ;;  %v351_v63 = vadd.f32 %v628_v39, %v315_v54  ;;  %v352_v5 = vadd.f32 %v628_v39, %v316_v55  ;;  %v353_v9 = vadd.f32 %v628_v39, %v317_v56 }
  0x28   : > { %v378_v2 = vmax.f32 %v346_v57, 0.0  ;;  %v379_v3 = vmax.f32 %v347_v58, 0.0  ;;  %v380_v4 = vmax.f32 %v348_v59, 0.0  ;;  %v381_v7 = vmax.f32 %v349_v60, 0.0  ;;  %v252_v57 = vld [vmem:[%s580_s25 + $0xd8] sm:$0xff] }
  0x29   : > { %v382_v8 = vmax.f32 %v350_v62, 0.0  ;;  %v318_v11 = vmul.f32 %v623_v38, %v281_v37  ;;  %v319_v12 = vmul.f32 %v623_v38, %v282_v40  ;;  %v320_v13 = vmul.f32 %v623_v38, %v283_v41  ;;  %v253_v62 = vld [vmem:[%s580_s25 + $0xe0] sm:$0xff] }
  0x2a   : > { %411 = vst.msk [vmem:[%s662_s9] sm:$0xff] %vm410_vm3, %v378_v2  ;;  %v321_v14 = vmul.f32 %v623_v38, %v284_v42  ;;  %v383_v16 = vmax.f32 %v351_v63, 0.0  ;;  %v322_v17 = vmul.f32 %v623_v38, %v285_v43  ;;  %v323_v18 = vmul.f32 %v623_v38, %v286_v44  ;;  %v249_v42 = vld [vmem:[%s580_s25 + $0xc0] sm:$0xff] }
  0x2b   : > { %412 = vst.msk [vmem:[%s662_s9 + $0x8] sm:$0xff] %vm410_vm3, %v379_v3  ;;  %v324_v19 = vmul.f32 %v623_v38, %v287_v45  ;;  %v384_v22 = vmax.f32 %v352_v5, 0.0  ;;  %v354_v23 = vadd.f32 %v628_v39, %v318_v11  ;;  %v355_v24 = vadd.f32 %v628_v39, %v319_v12  ;;  %v254_v3 = vld [vmem:[%s580_s25 + $0xe8] sm:$0xff] }
  0x2c   : > { %413 = vst.msk [vmem:[%s662_s9 + $0x10] sm:$0xff] %vm410_vm3, %v380_v4  ;;  %v356_v25 = vadd.f32 %v628_v39, %v320_v13  ;;  %v385_v27 = vmax.f32 %v353_v9, 0.0  ;;  %v357_v28 = vadd.f32 %v628_v39, %v321_v14  ;;  %v325_v29 = vmul.f32 %v623_v38, %v288_v46  ;;  %v255_v9 = vld [vmem:[%s580_s25 + $0xf0] sm:$0xff]  ;;  %v256_v14 = vld [vmem:[%s580_s25 + $0xf8] sm:$0xff] }
  0x2d   : > { %414 = vst.msk [vmem:[%s662_s9 + $0x18] sm:$0xff] %vm410_vm3, %v381_v7  ;;  %v292_v30 = vsub.f32 %v244_v15, %v585_v6  ;;  %v386_v31 = vmax.f32 %v354_v23, 0.0  ;;  %v358_v32 = vadd.f32 %v628_v39, %v322_v17  ;;  %v294_v34 = vsub.f32 %v246_v21, %v585_v6 }
  0x2e   : > { %415 = vst.msk [vmem:[%s662_s9 + $0x20] sm:$0xff] %vm410_vm3, %v382_v8  ;;  %v387_v36 = vmax.f32 %v355_v24, 0.0  ;;  %v359_v37 = vadd.f32 %v628_v39, %v323_v18  ;;  %v360_v40 = vadd.f32 %v628_v39, %v324_v19  ;;  %v295_v41 = vsub.f32 %v247_v26, %v585_v6 }
  0x2f   : > { %416 = vst.msk [vmem:[%s662_s9 + $0x28] sm:$0xff] %vm410_vm3, %v383_v16  ;;  %v388_v43 = vmax.f32 %v356_v25, 0.0  ;;  %v326_v44 = vmul.f32 %v623_v38, %v289_v0  ;;  %v327_v45 = vmul.f32 %v623_v38, %v290_v1  ;;  %v328_v46 = vmul.f32 %v623_v38, %v291_v10 }
  0x30   : > { %417 = vst.msk [vmem:[%s662_s9 + $0x30] sm:$0xff] %vm410_vm3, %v384_v22  ;;  %v389_v48 = vmax.f32 %v357_v28, 0.0  ;;  %v361_v49 = vadd.f32 %v628_v39, %v325_v29  ;;  %v329_v50 = vmul.f32 %v623_v38, %v292_v30  ;;  %v296_v51 = vsub.f32 %v248_v35, %v585_v6 }
  0x31   : > { %418 = vst.msk [vmem:[%s662_s9 + $0x38] sm:$0xff] %vm410_vm3, %v385_v27  ;;  %v390_v53 = vmax.f32 %v358_v32, 0.0  ;;  %v362_v54 = vadd.f32 %v628_v39, %v326_v44  ;;  %v330_v55 = vmul.f32 %v623_v38, %v293_v33  ;;  %v297_v56 = vsub.f32 %v249_v42, %v585_v6 }
  0x32   : > { %419 = vst.msk [vmem:[%s662_s9 + $0x40] sm:$0xff] %vm410_vm3, %v386_v31  ;;  %v391_v58 = vmax.f32 %v359_v37, 0.0  ;;  %v363_v59 = vadd.f32 %v628_v39, %v327_v45  ;;  %v331_v60 = vmul.f32 %v623_v38, %v294_v34  ;;  %v298_v61 = vsub.f32 %v250_v47, %v585_v6 }
  0x33   : > { %420 = vst.msk [vmem:[%s662_s9 + $0x48] sm:$0xff] %vm410_vm3, %v387_v36  ;;  %v392_v63 = vmax.f32 %v360_v40, 0.0  ;;  %v364_v0 = vadd.f32 %v628_v39, %v328_v46  ;;  %v332_v1 = vmul.f32 %v623_v38, %v295_v41  ;;  %v299_v2 = vsub.f32 %v251_v52, %v585_v6 }
  0x34   : > { %421 = vst.msk [vmem:[%s662_s9 + $0x50] sm:$0xff] %vm410_vm3, %v388_v43  ;;  %v393_v4 = vmax.f32 %v361_v49, 0.0  ;;  %v365_v5 = vadd.f32 %v628_v39, %v329_v50  ;;  %v333_v7 = vmul.f32 %v623_v38, %v296_v51  ;;  %v300_v8 = vsub.f32 %v252_v57, %v585_v6 }
  0x35   : > { %422 = vst.msk [vmem:[%s662_s9 + $0x58] sm:$0xff] %vm410_vm3, %v389_v48  ;;  %v394_v10 = vmax.f32 %v362_v54, 0.0  ;;  %v366_v11 = vadd.f32 %v628_v39, %v330_v55  ;;  %v334_v12 = vmul.f32 %v623_v38, %v297_v56  ;;  %v301_v13 = vsub.f32 %v253_v62, %v585_v6 }
  0x36   : > { %423 = vst.msk [vmem:[%s662_s9 + $0x60] sm:$0xff] %vm410_vm3, %v390_v53  ;;  %v395_v15 = vmax.f32 %v363_v59, 0.0  ;;  %v367_v16 = vadd.f32 %v628_v39, %v331_v60  ;;  %v335_v17 = vmul.f32 %v623_v38, %v298_v61  ;;  %v302_v18 = vsub.f32 %v254_v3, %v585_v6 }
  0x37   : > { %424 = vst.msk [vmem:[%s662_s9 + $0x68] sm:$0xff] %vm410_vm3, %v391_v58  ;;  %v396_v19 = vmax.f32 %v364_v0, 0.0  ;;  %v368_v20 = vadd.f32 %v628_v39, %v332_v1  ;;  %v336_v21 = vmul.f32 %v623_v38, %v299_v2  ;;  %v303_v22 = vsub.f32 %v255_v9, %v585_v6 }
  0x38   : > { %425 = vst.msk [vmem:[%s662_s9 + $0x70] sm:$0xff] %vm410_vm3, %v392_v63  ;;  %v397_v23 = vmax.f32 %v365_v5, 0.0  ;;  %v369_v24 = vadd.f32 %v628_v39, %v333_v7  ;;  %v337_v25 = vmul.f32 %v623_v38, %v300_v8  ;;  %v304_v26 = vsub.f32 %v256_v14, %v585_v6 }
  0x39   : > { %426 = vst.msk [vmem:[%s662_s9 + $0x78] sm:$0xff] %vm410_vm3, %v393_v4  ;;  %v398_v27 = vmax.f32 %v366_v11, 0.0  ;;  %v370_v28 = vadd.f32 %v628_v39, %v334_v12  ;;  %v338_v29 = vmul.f32 %v623_v38, %v301_v13  ;;  %v399_v30 = vmax.f32 %v367_v16, 0.0 }
  0x3a   : > { %427 = vst.msk [vmem:[%s662_s9 + $0x80] sm:$0xff] %vm410_vm3, %v394_v10  ;;  %v371_v31 = vadd.f32 %v628_v39, %v335_v17  ;;  %v339_v32 = vmul.f32 %v623_v38, %v302_v18  ;;  %v400_v6 = vmax.f32 %v368_v20, 0.0  ;;  %v372_v33 = vadd.f32 %v628_v39, %v336_v21 }
  0x3b   : > { %428 = vst.msk [vmem:[%s662_s9 + $0x88] sm:$0xff] %vm410_vm3, %v395_v15  ;;  %v340_v34 = vmul.f32 %v623_v38, %v303_v22  ;;  %v401_v35 = vmax.f32 %v369_v24, 0.0  ;;  %v373_v36 = vadd.f32 %v628_v39, %v337_v25  ;;  %v341_v37 = vmul.f32 %v623_v38, %v304_v26 }
  0x3c   : > { %429 = vst.msk [vmem:[%s662_s9 + $0x90] sm:$0xff] %vm410_vm3, %v396_v19  ;;  %v402_v40 = vmax.f32 %v370_v28, 0.0  ;;  %v374_v41 = vadd.f32 %v628_v39, %v338_v29  ;;  %v403_v42 = vmax.f32 %v371_v31, 0.0  ;;  %v375_v43 = vadd.f32 %v628_v39, %v339_v32 }
  0x3d   : > { %430 = vst.msk [vmem:[%s662_s9 + $0x98] sm:$0xff] %vm410_vm3, %v397_v23  ;;  %v404_v44 = vmax.f32 %v372_v33, 0.0  ;;  %v376_v38 = vadd.f32 %v628_v39, %v340_v34  ;;  %v405_v45 = vmax.f32 %v373_v36, 0.0  ;;  %v377_v46 = vadd.f32 %v628_v39, %v341_v37 }
  0x3e   : > { %431 = vst.msk [vmem:[%s662_s9 + $0xa0] sm:$0xff] %vm410_vm3, %v398_v27  ;;  %v406_v47 = vmax.f32 %v374_v41, 0.0  ;;  %v407_v48 = vmax.f32 %v375_v43, 0.0 }
  0x3f   : > { %432 = vst.msk [vmem:[%s662_s9 + $0xa8] sm:$0xff] %vm410_vm3, %v399_v30  ;;  %v408_v49 = vmax.f32 %v376_v38, 0.0  ;;  %v409_v50 = vmax.f32 %v377_v46, 0.0 }
  0x40   : > { %433 = vst.msk [vmem:[%s662_s9 + $0xb0] sm:$0xff] %vm410_vm3, %v400_v6 }
  0x41   : > { %434 = vst.msk [vmem:[%s662_s9 + $0xb8] sm:$0xff] %vm410_vm3, %v401_v35 }
  0x42   : > { %435 = vst.msk [vmem:[%s662_s9 + $0xc0] sm:$0xff] %vm410_vm3, %v402_v40 }
  0x43   : > { %436 = vst.msk [vmem:[%s662_s9 + $0xc8] sm:$0xff] %vm410_vm3, %v403_v42 }
  0x44   : > { %437 = vst.msk [vmem:[%s662_s9 + $0xd0] sm:$0xff] %vm410_vm3, %v404_v44 }
  0x45   : > { %438 = vst.msk [vmem:[%s662_s9 + $0xd8] sm:$0xff] %vm410_vm3, %v405_v45 }
  0x46   : > { %439 = vst.msk [vmem:[%s662_s9 + $0xe0] sm:$0xff] %vm410_vm3, %v406_v47 }
  0x47   : > { %440 = vst.msk [vmem:[%s662_s9 + $0xe8] sm:$0xff] %vm410_vm3, %v407_v48 }
  0x48   : > { %441 = vst.msk [vmem:[%s662_s9 + $0xf0] sm:$0xff] %vm410_vm3, %v408_v49 }
  0x49   : > { %442 = vst.msk [vmem:[%s662_s9 + $0xf8] sm:$0xff] %vm410_vm3, %v409_v50 }
  0x4a PF: > { %s15_s18 = sadd.s32 1, %s529_s18  }
  0x4b   : > { %p12_p4 = scmp.ge.s32.totalorder %s15_s18, 4  }
  0x4d   :  { %14 = sbr.rel (!%p12_p4) target bundleno = 1 (0x1), region = 70 }

// kernel: conv_block_forward.3
= control target key start
LH: loop header
LB: loop body
LE: loop exit
PB: predicated region body
PF: predicated region fallthrough
CT: control target
= control target key end

     0   :  { %s2304_s15 = smov 0   ;;  %s4498_s0 = inlined_call_operand.vmem [shape: f32[2,16,16,4], index: 0, kind: input, shape index: {}]   ;;  %s4499_s1 = inlined_call_operand.vmem [shape: f32[36,8], index: 1, kind: input, shape index: {}]   ;;  %s4500_s2 = inlined_call_operand.vmem [shape: f32[2,16,16,8], index: 2, kind: output, shape index: {0}]   ;;  %s4501_s3 = inlined_call_operand.vmem [shape: f32[1,8], index: 3, kind: output, shape index: {1}]   ;;  %s4502_s4 = inlined_call_operand.vmem [shape: f32[1,8], index: 4, kind: output, shape index: {2}]  }
   0x1 LB: > { %s2310_s16 = sadd.s32 4294967295, %s2266_s15   ;;  %p2155_p0 = scmp.ge.s32.totalorder %s2266_s15, 1  ;;  %s2266_s15 = sphi %s2304_s15, %s15_s15  }
   0x2   : > { %p157_p1 = scmp.lt.s32.totalorder %s2266_s15, 3 }
   0x4   : > { %p158_p2 = pnand %p2155_p0, %p157_p1 }
   0x6   : > { %161 = sbr.rel (%p158_p2) target bundleno = 1041 (0x411), region = 28 }
   0xb   : > { %vm263_vm0 = vcmask 1040384   ;;  %p183_p3 = scmp.lt.s32.totalorder %s2310_s16, 1  ;;  %v2268_v0 = vmov 0.0   ;;  %vm429_vm1 = vcmask 1046528   ;;  %s2269_s22 = smov 4   ;;  %vm510_vm2 = vcmask 1045504  }
   0xc   : > { %v2315_v1 = vrot.slane %v2268_v0, 7  ;;  %s2270_s23 = smov 8   ;;  %s2271_s24 = smov 12   ;;  %vm1371_vm3 = vcmask 31744   ;;  %vm1404_vm4 = vcmask 64512   ;;  %vm1437_vm5 = vcmask 97280  }
   0xd   : > { %s2318_s17 = scalar_select %p183_p3, %s2310_s16, 1  ;;  %vm1470_vm6 = vcmask 130048   ;;  %vm1503_vm7 = vcmask 162816   ;;  %vm1536_vm8 = vcmask 195584   ;;  %vm1732_vm9 = vcmask 1043456  }
   0xe   : > { %4625 = vst [vmem:[#allocation4_spill] sm:$0xff] %v2315_v1  ;;  %v2322_v2 = vsel %vm263_vm0, 0.0, %v2315_v1  ;;  %v2326_v3 = vsel %vm263_vm0, %v2315_v1, 0.0  ;;  %v431_v4 = vrot.slane %v2315_v1, 1  ;;  %s2272_s25 = smov 16   ;;  %s2273_s26 = smov 20  }
   0xf   : > { %4626 = vst [vmem:[#allocation5_spill] sm:$0xff] %v2322_v2  ;;  %v430_v5 = vrot.slane %v2322_v2, 1  ;;  %v433_v6 = vrot.slane %v2326_v3, 1  ;;  %s2197_s18 = sshll.u32 %s2318_s17, 8  ;;  %s2274_s27 = smov 24   ;;  %vm1602_vm10 = vcmask 261120  }
  0x10   : > { %s2337_s21 = scalar_lea.vmem %s4498_s0, %s2197_s18  ;;  %s2275_s28 = smov 28   ;;  %vm1569_vm11 = vcmask 228352   ;;  %vm1635_vm12 = vcmask 293888  }
  0x11   : > { %v432_v7 = vsel %vm429_vm1, %v430_v5, %v431_v4  ;;  %v434_v8 = vsel %vm429_vm1, %v431_v4, %v433_v6  ;;  %v195_v9 = vld [vmem:[%s2337_s21 + $0x10] sm:$0xff]  ;;  %v196_v10 = vld [vmem:[%s2337_s21 + $0x18] sm:$0xff]  ;;  %v193_v11 = vld [vmem:[%s2337_s21] sm:$0xff]  ;;  %s2276_s29 = smov 32   ;;  %s4144_s20 = scalar_lea.vmem %s4500_s2, %s2197_s18 }
  0x12   : > { %v2344_v12 = vpack.i.bf16 %v434_v8, %v432_v7  ;;  %v269_v13 = vrot.slane %v195_v9, 7  ;;  %v270_v14 = vrot.slane %v196_v10, 7  ;;  %v194_v15 = vld [vmem:[%s2337_s21 + $0x8] sm:$0xff]  ;;  %v197_v16 = vld [vmem:[%s2337_s21 + $0x20] sm:$0xff]  ;;  %v266_v18 = vrot.slane %v193_v11, 7  ;;  %v199_v29 = vld [vmem:[%s2337_s21 + $0x30] sm:$0xff] }
  0x13   : > { %v198_v17 = vld [vmem:[%s2337_s21 + $0x28] sm:$0xff]  ;;  %v267_v19 = vrot.slane %v194_v15, 7  ;;  %v272_v20 = vrot.slane %v197_v16, 7  ;;  %v200_v37 = vld [vmem:[%s2337_s21 + $0x38] sm:$0xff]  ;;  %v275_v39 = vrot.slane %v199_v29, 7  ;;  %v201_v46 = vld [vmem:[%s2337_s21 + $0x40] sm:$0xff] }
  0x14   : > { %4627 = vst [vmem:[#allocation6_spill] sm:$0xff] %v2344_v12  ;;  %v273_v21 = vrot.slane %v198_v17, 7  ;;  %2234 = vrot.lane.b32.xlu0 %v2344_v12, %s2269_s22  ;;  %v2352_v22 = vsel %vm263_vm0, %v269_v13, %v270_v14  ;;  %v2355_v23 = vsel %vm263_vm0, %v270_v14, 0.0  ;;  %v2358_v24 = vsel %vm263_vm0, 0.0, %v269_v13  ;;  %v202_v47 = vld [vmem:[%s2337_s21 + $0x48] sm:$0xff]  ;;  %v203_v56 = vld [vmem:[%s2337_s21 + $0x50] sm:$0xff] }
  0x15   : > { %4628 = vst [vmem:[#allocation7_spill] sm:$0xff] %v2352_v22  ;;  %v441_v25 = vrot.slane %v2352_v22, 1  ;;  %v443_v26 = vrot.slane %v2355_v23, 1  ;;  %v2363_v27 = vsel %vm263_vm0, %v266_v18, %v267_v19  ;;  %v2366_v28 = vsel %vm263_vm0, %v267_v19, 0.0  ;;  %v204_v57 = vld [vmem:[%s2337_s21 + $0x58] sm:$0xff]  ;;  %v205_v13 = vld [vmem:[%s2337_s21 + $0x60] sm:$0xff] }
  0x16   : > { %4629 = vst [vmem:[#allocation8_spill] sm:$0xff] %v2358_v24  ;;  %v436_v30 = vrot.slane %v2363_v27, 1  ;;  %v438_v31 = vrot.slane %v2366_v28, 1  ;;  %v2372_v32 = vsel %vm263_vm0, 0.0, %v266_v18  ;;  %v2375_v33 = vsel %vm263_vm0, %v272_v20, %v273_v21  ;;  %v206_v14 = vld [vmem:[%s2337_s21 + $0x68] sm:$0xff]  ;;  %p2193_p4 = scmp.ne.s32.totalorder %s2310_s16, 0 }
  0x17   : > { %4630 = vst [vmem:[#allocation9_spill] sm:$0xff] %v2363_v27  ;;  %v2378_v34 = vsel %vm429_vm1, %v441_v25, %v443_v26  ;;  %v435_v35 = vrot.slane %v2372_v32, 1  ;;  %v2382_v36 = vsel %vm263_vm0, 0.0, %v272_v20  ;;  %v446_v42 = vrot.slane %v2375_v33, 1  ;;  %v208_v26 = vld [vmem:[%s2337_s21 + $0x78] sm:$0xff] }
  0x18   : > { %4631 = vst [vmem:[#allocation10_spill] sm:$0xff] %v2372_v32  ;;  %613 = vrot.lane.b32.xlu2 %v2378_v34, %s2269_s22  ;;  %v2388_v38 = vsel %vm429_vm1, %v436_v30, %v438_v31  ;;  %v445_v41 = vrot.slane %v2382_v36, 1  ;;  %v440_v43 = vrot.slane %v2358_v24, 1  ;;  %v2399_v44 = vsel %vm263_vm0, %v273_v21, 0.0 }
  0x19   : > { %4632 = vst [vmem:[#allocation11_spill] sm:$0xff] %v2375_v33  ;;  %609 = vrot.lane.b32.xlu1 %v2388_v38, %s2269_s22  ;;  %v2393_v40 = vsel %vm429_vm1, %v435_v35, %v436_v30  ;;  %v276_v45 = vrot.slane %v200_v37, 7  ;;  %v448_v50 = vrot.slane %v2399_v44, 1  ;;  %v2413_v51 = vsel %vm263_vm0, 0.0, %v275_v39 }
  0x1a   : > { %4633 = vst [vmem:[#allocation12_spill] sm:$0xff] %v2378_v34  ;;  %v2406_v48 = vsel %vm429_vm1, %v445_v41, %v446_v42  ;;  %v2409_v49 = vsel %vm429_vm1, %v440_v43, %v441_v25  ;;  %v278_v54 = vrot.slane %v201_v46, 7  ;;  %v279_v55 = vrot.slane %v202_v47, 7  ;;  %v207_v25 = vld [vmem:[%s2337_s21 + $0x70] sm:$0xff] }
  0x1b   : > { %4634 = vst [vmem:[#allocation13_spill] sm:$0xff] %v2406_v48  ;;  %v2416_v52 = vsel %vm263_vm0, %v275_v39, %v276_v45  ;;  %v2419_v53 = vsel %vm263_vm0, %v276_v45, 0.0  ;;  %v2428_v58 = vsel %vm429_vm1, %v446_v42, %v448_v50  ;;  %v450_v61 = vrot.slane %v2413_v51, 1  ;;  %v209_v42 = vld [vmem:[%s2337_s21 + $0x80] sm:$0xff]  ;;  %v210_v45 = vld [vmem:[%s2337_s21 + $0x88] sm:$0xff] }
  0x1c   : > { %607 = vrot.lane.b32.xlu0 %v2393_v40, %s2269_s22  ;;  %4635 = vst [vmem:[#allocation14_spill] sm:$0xff] %v2413_v51  ;;  %v451_v59 = vrot.slane %v2416_v52, 1  ;;  %v453_v60 = vrot.slane %v2419_v53, 1  ;;  %v2434_v62 = vsel %vm263_vm0, %v278_v54, %v279_v55  ;;  %v2437_v63 = vsel %vm263_vm0, 0.0, %v278_v54 }
  0x1d   : > { %4636 = vst [vmem:[#allocation15_spill] sm:$0xff] %v2416_v52  ;;  %v281_v0 = vrot.slane %v203_v56, 7  ;;  %v282_v4 = vrot.slane %v204_v57, 7  ;;  %v455_v6 = vrot.slane %v2437_v63, 1  ;;  %v456_v7 = vrot.slane %v2434_v62, 1 }
  0x1e   : > { %4637 = vst [vmem:[#allocation16_spill] sm:$0xff] %v2428_v58  ;;  %v2442_v5 = vsel %vm429_vm1, %v451_v59, %v453_v60  ;;  %v2447_v8 = vsel %vm429_vm1, %v450_v61, %v451_v59  ;;  %v2456_v11 = vsel %vm263_vm0, %v279_v55, 0.0  ;;  %v284_v20 = vrot.slane %v205_v13, 7 }
  0x1f   : > { %4638 = vst [vmem:[#allocation17_spill] sm:$0xff] %v2442_v5  ;;  %v2450_v9 = vsel %vm263_vm0, %v281_v0, %v282_v4  ;;  %v2453_v10 = vsel %vm263_vm0, 0.0, %v281_v0  ;;  %v2465_v15 = vsel %vm429_vm1, %v455_v6, %v456_v7  ;;  %v458_v18 = vrot.slane %v2456_v11, 1 }
  0x20   : > { %615 = vrot.lane.b32.xlu2 %v2406_v48, %s2269_s22  ;;  %4639 = vst [vmem:[#allocation18_spill] sm:$0xff] %v2447_v8  ;;  %v460_v16 = vrot.slane %v2453_v10, 1  ;;  %v461_v17 = vrot.slane %v2450_v9, 1  ;;  %v2471_v19 = vsel %vm263_vm0, %v282_v4, 0.0  ;;  %v285_v21 = vrot.slane %v206_v14, 7  ;;  %v211_v14 = vld [vmem:[%s2337_s21 + $0x90] sm:$0xff] }
  0x21   : > { %611 = vrot.lane.b32.xlu1 %v2409_v49, %s2269_s22  ;;  %4640 = vst [vmem:[#allocation19_spill] sm:$0xff] %v2465_v15  ;;  %v2481_v30 = vsel %vm429_vm1, %v456_v7, %v458_v18  ;;  %v463_v31 = vrot.slane %v2471_v19, 1  ;;  %v287_v39 = vrot.slane %v207_v25, 7  ;;  %v288_v41 = vrot.slane %v208_v26, 7 }
  0x22   : > { %v2478_v29 = vsel %vm429_vm1, %v460_v16, %v461_v17  ;;  %4642 = vst [vmem:[#allocation21_spill] sm:$0xff] %v2481_v30  ;;  %v2485_v35 = vsel %vm263_vm0, %v284_v20, %v285_v21  ;;  %v2488_v37 = vsel %vm263_vm0, %v285_v21, 0.0  ;;  %v2492_v43 = vsel %vm263_vm0, 0.0, %v284_v20  ;;  %v212_v16 = vld [vmem:[%s2337_s21 + $0x98] sm:$0xff] }
  0x23   : > { %4641 = vst [vmem:[#allocation20_spill] sm:$0xff] %v2478_v29  ;;  %v2500_v46 = vsel %vm429_vm1, %v461_v17, %v463_v31  ;;  %v466_v47 = vrot.slane %v2485_v35, 1  ;;  %v468_v50 = vrot.slane %v2488_v37, 1  ;;  %v290_v54 = vrot.slane %v209_v42, 7 }
  0x24   : > { %617 = vrot.lane.b32.xlu0 %v2428_v58, %s2269_s22  ;;  %4643 = vst [vmem:[#allocation22_spill] sm:$0xff] %v2500_v46  ;;  %v465_v55 = vrot.slane %v2492_v43, 1  ;;  %v2506_v56 = vsel %vm263_vm0, %v287_v39, %v288_v41  ;;  %v2509_v57 = vsel %vm263_vm0, 0.0, %v287_v39  ;;  %v291_v59 = vrot.slane %v210_v45, 7  ;;  %v213_v39 = vld [vmem:[%s2337_s21 + $0xa0] sm:$0xff] }
  0x25   : > { %v2514_v60 = vsel %vm429_vm1, %v466_v47, %v468_v50  ;;  %v470_v61 = vrot.slane %v2509_v57, 1  ;;  %v471_v0 = vrot.slane %v2506_v56, 1  ;;  %v2525_v7 = vsel %vm263_vm0, 0.0, %v290_v54 }
  0x26   : > { %4644 = vst [vmem:[#allocation23_spill] sm:$0xff] %v2514_v60  ;;  %v2519_v4 = vsel %vm429_vm1, %v465_v55, %v466_v47  ;;  %v2522_v6 = vsel %vm263_vm0, %v290_v54, %v291_v59  ;;  %v2528_v13 = vsel %vm263_vm0, %v288_v41, 0.0  ;;  %v475_v18 = vrot.slane %v2525_v7, 1  ;;  %v214_v41 = vld [vmem:[%s2337_s21 + $0xa8] sm:$0xff] }
  0x27   : > { %4645 = vst [vmem:[#allocation24_spill] sm:$0xff] %v2519_v4  ;;  %v2537_v17 = vsel %vm429_vm1, %v470_v61, %v471_v0  ;;  %v476_v20 = vrot.slane %v2522_v6, 1  ;;  %v2542_v21 = vsel %vm263_vm0, %v291_v59, 0.0  ;;  %v473_v25 = vrot.slane %v2528_v13, 1 }
  0x28   : > { %621 = vrot.lane.b32.xlu2 %v2442_v5, %s2269_s22  ;;  %4646 = vst [vmem:[#allocation25_spill] sm:$0xff] %v2537_v17  ;;  %v293_v26 = vrot.slane %v211_v14, 7  ;;  %v294_v31 = vrot.slane %v212_v16, 7  ;;  %v478_v42 = vrot.slane %v2542_v21, 1  ;;  %v296_v47 = vrot.slane %v213_v39, 7  ;;  %v215_v14 = vld [vmem:[%s2337_s21 + $0xb0] sm:$0xff] }
  0x29   : > { %619 = vrot.lane.b32.xlu1 %v2447_v8, %s2269_s22  ;;  %v2551_v45 = vsel %vm429_vm1, %v475_v18, %v476_v20  ;;  %v297_v50 = vrot.slane %v214_v41, 7  ;;  %v2554_v54 = vsel %vm429_vm1, %v471_v0, %v473_v25  ;;  %v216_v16 = vld [vmem:[%s2337_s21 + $0xb8] sm:$0xff]  ;;  %v299_v41 = vrot.slane %v215_v14, 7 }
  0x2a   : > { %4647 = vst [vmem:[#allocation26_spill] sm:$0xff] %v2551_v45  ;;  %v2557_v55 = vsel %vm263_vm0, %v293_v26, %v294_v31  ;;  %v2560_v59 = vsel %vm263_vm0, %v294_v31, 0.0  ;;  %v2563_v61 = vsel %vm263_vm0, 0.0, %v293_v26  ;;  %v2570_v18 = vsel %vm429_vm1, %v476_v20, %v478_v42 }
  0x2b   : > { %4648 = vst [vmem:[#allocation27_spill] sm:$0xff] %v2554_v54  ;;  %v481_v0 = vrot.slane %v2557_v55, 1  ;;  %v483_v25 = vrot.slane %v2560_v59, 1  ;;  %v2577_v31 = vsel %vm263_vm0, %v296_v47, %v297_v50  ;;  %v2580_v26 = vsel %vm263_vm0, 0.0, %v296_v47 }
  0x2c   : > { %623 = vrot.lane.b32.xlu0 %v2465_v15, %s2269_s22  ;;  %4649 = vst [vmem:[#allocation28_spill] sm:$0xff] %v2570_v18  ;;  %v480_v39 = vrot.slane %v2563_v61, 1  ;;  %v300_v20 = vrot.slane %v216_v16, 7  ;;  %v514_v42 = vrot.slane %v2326_v3, 2  ;;  %v485_v12 = vrot.slane %v2580_v26, 1 }
  0x2d   : > { %v2592_v47 = vsel %vm263_vm0, %v297_v50, 0.0  ;;  %v512_v14 = vrot.slane %v2315_v1, 2 }
  0x2e   : > { %v2597_v3 = vsel %vm429_vm1, %v480_v39, %v481_v0  ;;  %v2600_v16 = vsel %vm263_vm0, %v299_v41, %v300_v20  ;;  %v488_v39 = vrot.slane %v2592_v47, 1 }
  0x2f   : > { %4651 = vst [vmem:[#allocation30_spill] sm:$0xff] %v2597_v3 }
  0x30   : > { %627 = vrot.lane.b32.xlu2 %v2478_v29, %s2269_s22  ;;  %4652 = vst [vmem:[#allocation31_spill] sm:$0xff] %v2600_v16  ;;  %v222_v29 = vld [vmem:[%s2337_s21 + $0xe8] sm:$0xff] }
  0x31   : > { %625 = vrot.lane.b32.xlu1 %v2481_v30, %s2269_s22 }
  0x34   : > { %629 = vrot.lane.b32.xlu0 %v2500_v46, %s2269_s22 }
  0x38   : > { %633 = vrot.lane.b32.xlu2 %v2514_v60, %s2269_s22  ;;  %v515_v60 = vsel %vm510_vm2, %v512_v14, %v514_v42 }
  0x39   : > { %631 = vrot.lane.b32.xlu1 %v2519_v4, %s2269_s22  ;;  %v218_v4 = vld [vmem:[%s2337_s21 + $0xc8] sm:$0xff] }
  0x3c   : > { %635 = vrot.lane.b32.xlu0 %v2537_v17, %s2269_s22  ;;  %v511_v17 = vrot.slane %v2322_v2, 2  ;;  %v2622_v2 = vsel %vm263_vm0, %v300_v20, 0.0 }
  0x3e   : > { %v513_v50 = vsel %vm510_vm2, %v511_v17, %v512_v14  ;;  %v491_v17 = vrot.slane %v2600_v16, 1  ;;  %v303_v14 = vrot.slane %v218_v4, 7 }
  0x3f   : > { %v2615_v1 = vpack.i.bf16 %v515_v60, %v513_v50 }
  0x40   : > { %639 = vrot.lane.b32.xlu2 %v2551_v45, %s2269_s22  ;;  %v2589_v45 = vsel %vm429_vm1, %v481_v0, %v483_v25  ;;  %v217_v25 = vld [vmem:[%s2337_s21 + $0xc0] sm:$0xff]  ;;  %v2639_v4 = vsel %vm263_vm0, %v303_v14, 0.0 }
  0x41   : > { %637 = vrot.lane.b32.xlu1 %v2554_v54, %s2269_s22  ;;  %v486_v54 = vrot.slane %v2577_v31, 1  ;;  %4650 = vst [vmem:[#allocation29_spill] sm:$0xff] %v2589_v45  ;;  %v302_v42 = vrot.slane %v217_v25, 7 }
  0x42   : > { %4655 = vst [vmem:[#allocation34_spill] sm:$0xff] %v2615_v1 }
  0x43   : > { %v2612_v0 = vsel %vm429_vm1, %v485_v12, %v486_v54  ;;  %v219_v12 = vld [vmem:[%s2337_s21 + $0xd0] sm:$0xff]  ;;  %v2632_v50 = vsel %vm429_vm1, %v486_v54, %v488_v39  ;;  %v2636_v46 = vsel %vm263_vm0, %v302_v42, %v303_v14  ;;  %v2642_v20 = vsel %vm263_vm0, 0.0, %v302_v42 }
  0x44   : > { %641 = vrot.lane.b32.xlu0 %v2570_v18, %s2269_s22  ;;  %v2603_v18 = vsel %vm263_vm0, 0.0, %v299_v41  ;;  %4654 = vst [vmem:[#allocation33_spill] sm:$0xff] %v2612_v0  ;;  %v305_v25 = vrot.slane %v219_v12, 7  ;;  %v496_v39 = vrot.slane %v2636_v46, 1  ;;  %v495_v42 = vrot.slane %v2642_v20, 1 }
  0x45   : > { %4653 = vst [vmem:[#allocation32_spill] sm:$0xff] %v2603_v18  ;;  %v490_v41 = vrot.slane %v2603_v18, 1 }
  0x46   : > { %4657 = vst [vmem:[#allocation36_spill] sm:$0xff] %v2632_v50  ;;  %v2670_v15 = vsel %vm429_vm1, %v495_v42, %v496_v39 }
  0x47   : > { %v2629_v60 = vsel %vm429_vm1, %v490_v41, %v491_v17  ;;  %4658 = vst [vmem:[#allocation37_spill] sm:$0xff] %v2636_v46  ;;  %v498_v41 = vrot.slane %v2639_v4, 1 }
  0x48   : > { %645 = vrot.lane.b32.xlu2 %v2589_v45, %s2269_s22  ;;  %v220_v45 = vld [vmem:[%s2337_s21 + $0xd8] sm:$0xff]  ;;  %4656 = vst [vmem:[#allocation35_spill] sm:$0xff] %v2629_v60 }
  0x49   : > { %643 = vrot.lane.b32.xlu1 %v2597_v3, %s2269_s22  ;;  %v493_v3 = vrot.slane %v2622_v2, 1  ;;  %4659 = vst [vmem:[#allocation38_spill] sm:$0xff] %v2642_v20  ;;  %v306_v30 = vrot.slane %v220_v45, 7  ;;  %v2660_v45 = vsel %vm263_vm0, 0.0, %v305_v25 }
  0x4a   : > { %4663 = vst [vmem:[#allocation42_spill] sm:$0xff] %v2670_v15 }
  0x4b   : > { %v2651_v54 = vsel %vm429_vm1, %v491_v17, %v493_v3  ;;  %v2657_v14 = vsel %vm263_vm0, %v305_v25, %v306_v30  ;;  %v2665_v3 = vsel %vm429_vm1, %v496_v39, %v498_v41  ;;  %v500_v17 = vrot.slane %v2660_v45, 1 }
  0x4c   : > { %647 = vrot.lane.b32.xlu0 %v2612_v0, %s2269_s22  ;;  %v221_v0 = vld [vmem:[%s2337_s21 + $0xe0] sm:$0xff]  ;;  %4660 = vst [vmem:[#allocation39_spill] sm:$0xff] %v2651_v54 }
  0x4d   : > { %4661 = vst [vmem:[#allocation40_spill] sm:$0xff] %v2657_v14  ;;  %v308_v12 = vrot.slane %v221_v0, 7 }
  0x4e   : > { %4662 = vst [vmem:[#allocation41_spill] sm:$0xff] %v2665_v3 }
  0x4f   : > { %v2676_v25 = vsel %vm263_vm0, 0.0, %v308_v12 }
  0x50   : > { %651 = vrot.lane.b32.xlu2 %v2629_v60, %s2269_s22  ;;  %v309_v60 = vrot.slane %v222_v29, 7  ;;  %4665 = vst [vmem:[#allocation44_spill] sm:$0xff] %v2676_v25  ;;  %v2679_v29 = vsel %vm263_vm0, %v306_v30, 0.0  ;;  %v505_v39 = vrot.slane %v2676_v25, 1 }
  0x51   : > { %649 = vrot.lane.b32.xlu1 %v2632_v50, %s2269_s22  ;;  %v501_v50 = vrot.slane %v2657_v14, 1  ;;  %v503_v42 = vrot.slane %v2679_v29, 1 }
  0x52   : > { %v2673_v8 = vsel %vm263_vm0, %v308_v12, %v309_v60  ;;  %v2692_v12 = vsel %vm263_vm0, %v309_v60, 0.0 }
  0x53   : > { %4664 = vst [vmem:[#allocation43_spill] sm:$0xff] %v2673_v8  ;;  %v2686_v0 = vsel %vm429_vm1, %v500_v17, %v501_v50  ;;  %v506_v41 = vrot.slane %v2673_v8, 1  ;;  %v2701_v17 = vsel %vm429_vm1, %v501_v50, %v503_v42  ;;  %v519_v50 = vrot.slane %v2366_v28, 2 }
  0x54   : > { %653 = vrot.lane.b32.xlu0 %v2651_v54, %s2269_s22  ;;  %4666 = vst [vmem:[#allocation45_spill] sm:$0xff] %v2686_v0  ;;  %v524_v42 = vrot.slane %v2355_v23, 2 }
  0x55   : > { %v2697_v30 = vsel %vm429_vm1, %v505_v39, %v506_v41  ;;  %4668 = vst [vmem:[#allocation47_spill] sm:$0xff] %v2701_v17 }
  0x56   : > { %4667 = vst [vmem:[#allocation46_spill] sm:$0xff] %v2697_v30 }
  0x58   : > { %657 = vrot.lane.b32.xlu2 %v2665_v3, %s2269_s22  ;;  %v516_v3 = vrot.slane %v2372_v32, 2 }
  0x59   : > { %655 = vrot.lane.b32.xlu1 %v2670_v15, %s2269_s22  ;;  %v508_v15 = vrot.slane %v2692_v12, 1 }
  0x5b   : > { %v2708_v60 = vsel %vm429_vm1, %v506_v41, %v508_v15  ;;  %v522_v41 = vrot.slane %v2352_v22, 2 }
  0x5c   : > { %659 = vrot.lane.b32.xlu0 %v2686_v0, %s2269_s22  ;;  %4669 = vst [vmem:[#allocation48_spill] sm:$0xff] %v2708_v60  ;;  %v517_v0 = vrot.slane %v2363_v27, 2 }
  0x5d   : > { %v2731_v28 = vsel %vm510_vm2, %v522_v41, %v524_v42 }
  0x5e   : > { %v2715_v39 = vsel %vm510_vm2, %v516_v3, %v517_v0  ;;  %v2723_v15 = vsel %vm510_vm2, %v517_v0, %v519_v50  ;;  %4672 = vst [vmem:[#allocation51_spill] sm:$0xff] %v2731_v28  ;;  %v526_v3 = vrot.slane %v2382_v36, 2  ;;  %v531_v0 = vrot.slane %v2413_v51, 2 }
  0x5f   : > { %4670 = vst [vmem:[#allocation49_spill] sm:$0xff] %v2715_v39  ;;  %v532_v50 = vrot.slane %v2416_v52, 2 }
  0x60   : > { %663 = vrot.lane.b32.xlu2 %v2697_v30, %s2269_s22  ;;  %4671 = vst [vmem:[#allocation50_spill] sm:$0xff] %v2723_v15 }
  0x61   : > { %661 = vrot.lane.b32.xlu1 %v2701_v17, %s2269_s22 }
  0x64   : > { %665 = vrot.lane.b32.xlu0 %v2708_v60, %s2269_s22  ;;  %v521_v60 = vrot.slane %v2358_v24, 2 }
  0x68   : > { %703 = vrot.lane.b32.xlu2 %v2715_v39, %s2270_s23  ;;  %v527_v39 = vrot.slane %v2375_v33, 2 }
  0x69   : > { %2239 = vrot.lane.b32.xlu1 %v2615_v1, %s2270_s23  ;;  %v2736_v1 = vsel %vm510_vm2, %v521_v60, %v522_v41  ;;  %v2753_v60 = vsel %vm510_vm2, %v531_v0, %v532_v50  ;;  %v534_v41 = vrot.slane %v2419_v53, 2  ;;  %v536_v53 = vrot.slane %v2437_v63, 2 }
  0x6a   : > { %v2743_v23 = vsel %vm510_vm2, %v526_v3, %v527_v39  ;;  %4675 = vst [vmem:[#allocation54_spill] sm:$0xff] %v2753_v60 }
  0x6b   : > { %4673 = vst [vmem:[#allocation52_spill] sm:$0xff] %v2743_v23  ;;  %v2764_v3 = vsel %vm510_vm2, %v532_v50, %v534_v41  ;;  %v546_v41 = vrot.slane %v2492_v43, 2 }
  0x6c   : > { %705 = vrot.lane.b32.xlu0 %v2723_v15, %s2270_s23  ;;  %v529_v15 = vrot.slane %v2399_v44, 2  ;;  %4677 = vst [vmem:[#allocation56_spill] sm:$0xff] %v2764_v3  ;;  %v537_v44 = vrot.slane %v2434_v62, 2 }
  0x6e   : > { %v2779_v50 = vsel %vm510_vm2, %v536_v53, %v537_v44  ;;  %v549_v53 = vrot.slane %v2488_v37, 2  ;;  %v551_v37 = vrot.slane %v2509_v57, 2 }
  0x6f   : > { %4680 = vst [vmem:[#allocation59_spill] sm:$0xff] %v2779_v50 }
  0x70   : > { %709 = vrot.lane.b32.xlu2 %v2731_v28, %s2270_s23  ;;  %v2757_v28 = vsel %vm510_vm2, %v527_v39, %v529_v15  ;;  %v541_v15 = vrot.slane %v2453_v10, 2 }
  0x71   : > { %707 = vrot.lane.b32.xlu1 %v2736_v1, %s2270_s23  ;;  %4676 = vst [vmem:[#allocation55_spill] sm:$0xff] %v2757_v28 }
  0x72   : > { %v2747_v42 = vpop.permute.xlu2 %613 }
  0x73   : > { %4674 = vst [vmem:[#allocation53_spill] sm:$0xff] %v2747_v42  ;;  %v539_v42 = vrot.slane %v2456_v11, 2 }
  0x74   : > { %711 = vrot.lane.b32.xlu0 %v2743_v23, %s2270_s23 }
  0x75   : > { %v2774_v39 = vsel %vm510_vm2, %v537_v44, %v539_v42  ;;  %v547_v42 = vrot.slane %v2485_v35, 2 }
  0x76   : > { %4679 = vst [vmem:[#allocation58_spill] sm:$0xff] %v2774_v39 }
  0x77   : > { %v2796_v44 = vsel %vm510_vm2, %v546_v41, %v547_v42  ;;  %v554_v41 = vrot.slane %v2528_v13, 2 }
  0x78   : > { %715 = vrot.lane.b32.xlu2 %v2753_v60, %s2270_s23  ;;  %v542_v60 = vrot.slane %v2450_v9, 2  ;;  %4683 = vst [vmem:[#allocation62_spill] sm:$0xff] %v2796_v44 }
  0x79   : > { %713 = vrot.lane.b32.xlu1 %v2757_v28, %s2270_s23 }
  0x7a   : > { %v2768_v0 = vpop.permute.xlu2 %615  ;;  %v2786_v11 = vsel %vm510_vm2, %v541_v15, %v542_v60 }
  0x7b   : > { %4678 = vst [vmem:[#allocation57_spill] sm:$0xff] %v2768_v0 }
  0x7c   : > { %717 = vrot.lane.b32.xlu0 %v2764_v3, %s2270_s23  ;;  %4681 = vst [vmem:[#allocation60_spill] sm:$0xff] %v2786_v11  ;;  %v544_v3 = vrot.slane %v2471_v19, 2  ;;  %v2809_v19 = vsel %vm510_vm2, %v547_v42, %v549_v53  ;;  %v557_v42 = vrot.slane %v2522_v6, 2 }
  0x7d   : > { %4686 = vst [vmem:[#allocation65_spill] sm:$0xff] %v2809_v19 }
  0x7e   : > { %v2802_v15 = vsel %vm510_vm2, %v542_v60, %v544_v3  ;;  %v556_v3 = vrot.slane %v2525_v7, 2 }
  0x7f   : > { %4685 = vst [vmem:[#allocation64_spill] sm:$0xff] %v2802_v15 }
  0x80   : > { %721 = vrot.lane.b32.xlu2 %v2774_v39, %s2270_s23 }
  0x81   : > { %719 = vrot.lane.b32.xlu1 %v2779_v50, %s2270_s23 }
  0x82   : > { %v2790_v0 = vpop.permute.xlu2 %621 }
  0x83   : > { %4682 = vst [vmem:[#allocation61_spill] sm:$0xff] %v2790_v0  ;;  %v552_v0 = vrot.slane %v2506_v56, 2 }
  0x84   : > { %723 = vrot.lane.b32.xlu0 %v2786_v11, %s2270_s23 }
  0x85   : > { %v2821_v60 = vsel %vm510_vm2, %v552_v0, %v554_v41  ;;  %v2828_v13 = vsel %vm510_vm2, %v551_v37, %v552_v0  ;;  %v561_v41 = vrot.slane %v2563_v61, 2  ;;  %v564_v37 = vrot.slane %v2560_v59, 2 }
  0x86   : > { %v2799_v39 = vpop.permute.xlu0 %2234  ;;  %4689 = vst [vmem:[#allocation68_spill] sm:$0xff] %v2821_v60  ;;  %v566_v59 = vrot.slane %v2580_v26, 2 }
  0x87   : > { %4684 = vst [vmem:[#allocation63_spill] sm:$0xff] %v2799_v39 }
  0x88   : > { %727 = vrot.lane.b32.xlu2 %v2796_v44, %s2270_s23  ;;  %4691 = vst [vmem:[#allocation70_spill] sm:$0xff] %v2828_v13 }
  0x89   : > { %725 = vrot.lane.b32.xlu1 %v2802_v15, %s2270_s23 }
  0x8a   : > { %v2813_v11 = vpop.permute.xlu2 %627 }
  0x8b   : > { %4687 = vst [vmem:[#allocation66_spill] sm:$0xff] %v2813_v11  ;;  %v2816_v39 = vpop.permute.xlu1 %609  ;;  %v562_v11 = vrot.slane %v2557_v55, 2 }
  0x8c   : > { %4688 = vst [vmem:[#allocation67_spill] sm:$0xff] %v2816_v39  ;;  %729 = vrot.lane.b32.xlu0 %v2809_v19, %s2270_s23  ;;  %v2835_v39 = vsel %vm510_vm2, %v556_v3, %v557_v42 }
  0x8d   : > { %4692 = vst [vmem:[#allocation71_spill] sm:$0xff] %v2835_v39  ;;  %v2847_v0 = vsel %vm510_vm2, %v561_v41, %v562_v11  ;;  %v569_v41 = vrot.slane %v2592_v47, 2 }
  0x8e   : > { %v2825_v53 = vpop.permute.xlu0 %607  ;;  %4695 = vst [vmem:[#allocation74_spill] sm:$0xff] %v2847_v0 }
  0x8f   : > { %4690 = vst [vmem:[#allocation69_spill] sm:$0xff] %v2825_v53  ;;  %v559_v53 = vrot.slane %v2542_v21, 2  ;;  %v2860_v21 = vsel %vm510_vm2, %v562_v11, %v564_v37  ;;  %v572_v11 = vrot.slane %v2600_v16, 2 }
  0x90   : > { %733 = vrot.lane.b32.xlu2 %v2821_v60, %s2270_s23  ;;  %4698 = vst [vmem:[#allocation77_spill] sm:$0xff] %v2860_v21 }
  0x91   : > { %731 = vrot.lane.b32.xlu1 %v2828_v13, %s2270_s23  ;;  %v2853_v60 = vsel %vm510_vm2, %v557_v42, %v559_v53  ;;  %v571_v53 = vrot.slane %v2603_v18, 2 }
  0x92   : > { %v2839_v19 = vpop.permute.xlu2 %633  ;;  %4697 = vst [vmem:[#allocation76_spill] sm:$0xff] %v2853_v60 }
  0x93   : > { %4693 = vst [vmem:[#allocation72_spill] sm:$0xff] %v2839_v19  ;;  %v2842_v44 = vpop.permute.xlu1 %611 }
  0x94   : > { %4694 = vst [vmem:[#allocation73_spill] sm:$0xff] %v2842_v44  ;;  %735 = vrot.lane.b32.xlu0 %v2835_v39, %s2270_s23  ;;  %v567_v44 = vrot.slane %v2577_v31, 2 }
  0x96   : > { %v2850_v3 = vpop.permute.xlu0 %617  ;;  %v2872_v42 = vsel %vm510_vm2, %v567_v44, %v569_v41  ;;  %v2879_v47 = vsel %vm510_vm2, %v566_v59, %v567_v44  ;;  %v576_v41 = vrot.slane %v2642_v20, 2  ;;  %v579_v59 = vrot.slane %v2639_v4, 2 }
  0x97   : > { %4696 = vst [vmem:[#allocation75_spill] sm:$0xff] %v2850_v3  ;;  %v581_v4 = vrot.slane %v2660_v45, 2 }
  0x98   : > { %739 = vrot.lane.b32.xlu2 %v2847_v0, %s2270_s23  ;;  %4701 = vst [vmem:[#allocation80_spill] sm:$0xff] %v2872_v42 }
  0x99   : > { %737 = vrot.lane.b32.xlu1 %v2853_v60, %s2270_s23  ;;  %4703 = vst [vmem:[#allocation82_spill] sm:$0xff] %v2879_v47 }
  0x9a   : > { %v2864_v19 = vpop.permute.xlu2 %639 }
  0x9b   : > { %4699 = vst [vmem:[#allocation78_spill] sm:$0xff] %v2864_v19  ;;  %v2867_v3 = vpop.permute.xlu1 %619  ;;  %v577_v19 = vrot.slane %v2636_v46, 2 }
  0x9c   : > { %4700 = vst [vmem:[#allocation79_spill] sm:$0xff] %v2867_v3  ;;  %741 = vrot.lane.b32.xlu0 %v2860_v21, %s2270_s23  ;;  %v2886_v3 = vsel %vm510_vm2, %v571_v53, %v572_v11 }
  0x9d   : > { %4704 = vst [vmem:[#allocation83_spill] sm:$0xff] %v2886_v3  ;;  %v2898_v44 = vsel %vm510_vm2, %v576_v41, %v577_v19  ;;  %v584_v41 = vrot.slane %v2679_v29, 2 }
  0x9e   : > { %v2876_v37 = vpop.permute.xlu0 %623  ;;  %4707 = vst [vmem:[#allocation86_spill] sm:$0xff] %v2898_v44 }
  0x9f   : > { %4702 = vst [vmem:[#allocation81_spill] sm:$0xff] %v2876_v37  ;;  %v574_v37 = vrot.slane %v2622_v2, 2  ;;  %v2911_v2 = vsel %vm510_vm2, %v577_v19, %v579_v59  ;;  %v587_v19 = vrot.slane %v2673_v8, 2 }
  0xa0   : > { %745 = vrot.lane.b32.xlu2 %v2872_v42, %s2270_s23  ;;  %4710 = vst [vmem:[#allocation89_spill] sm:$0xff] %v2911_v2 }
  0xa1   : > { %743 = vrot.lane.b32.xlu1 %v2879_v47, %s2270_s23  ;;  %v2904_v42 = vsel %vm510_vm2, %v572_v11, %v574_v37  ;;  %v586_v37 = vrot.slane %v2676_v25, 2 }
  0xa2   : > { %v2890_v21 = vpop.permute.xlu2 %645  ;;  %4709 = vst [vmem:[#allocation88_spill] sm:$0xff] %v2904_v42 }
  0xa3   : > { %4705 = vst [vmem:[#allocation84_spill] sm:$0xff] %v2890_v21  ;;  %v2893_v0 = vpop.permute.xlu1 %625  ;;  %v582_v21 = vrot.slane %v2657_v14, 2 }
  0xa4   : > { %4706 = vst [vmem:[#allocation85_spill] sm:$0xff] %v2893_v0  ;;  %747 = vrot.lane.b32.xlu0 %v2886_v3, %s2270_s23 }
  0xa5   : > { %v2923_v11 = vsel %vm510_vm2, %v582_v21, %v584_v41  ;;  %v2930_v29 = vsel %vm510_vm2, %v581_v4, %v582_v21 }
  0xa6   : > { %v2901_v53 = vpop.permute.xlu0 %629 }
  0xa7   : > { %4708 = vst [vmem:[#allocation87_spill] sm:$0xff] %v2901_v53 }
  0xa8   : > { %751 = vrot.lane.b32.xlu2 %v2898_v44, %s2270_s23 }
  0xa9   : > { %749 = vrot.lane.b32.xlu1 %v2904_v42, %s2270_s23 }
  0xaa   : > { %v2915_v0 = vpop.permute.xlu2 %651 }
  0xab   : > { %4711 = vst [vmem:[#allocation90_spill] sm:$0xff] %v2915_v0  ;;  %v2918_v53 = vpop.permute.xlu1 %631  ;;  %v2937_v0 = vsel %vm510_vm2, %v586_v37, %v587_v19 }
  0xac   : > { %4712 = vst [vmem:[#allocation91_spill] sm:$0xff] %v2918_v53  ;;  %753 = vrot.lane.b32.xlu0 %v2911_v2, %s2270_s23  ;;  %v589_v53 = vrot.slane %v2692_v12, 2 }
  0xad   : > { %4714 = vst [vmem:[#allocation93_spill] sm:$0xff] %v2937_v0 }
  0xae   : > { %v2927_v59 = vpop.permute.xlu0 %635  ;;  %v2949_v4 = vsel %vm510_vm2, %v587_v19, %v589_v53 }
  0xaf   : > { %4713 = vst [vmem:[#allocation92_spill] sm:$0xff] %v2927_v59 }
  0xb0   : > { %757 = vrot.lane.b32.xlu2 %v2923_v11, %s2270_s23  ;;  %4717 = vst [vmem:[#allocation96_spill] sm:$0xff] %v2949_v4 }
  0xb1   : > { %755 = vrot.lane.b32.xlu1 %v2930_v29, %s2270_s23 }
  0xb2   : > { %v2939_v41 = vpop.permute.xlu2 %657 }
  0xb3   : > { %4715 = vst [vmem:[#allocation94_spill] sm:$0xff] %v2939_v41  ;;  %v2942_v2 = vpop.permute.xlu1 %637 }
  0xb4   : > { %759 = vrot.lane.b32.xlu0 %v2937_v0, %s2270_s23 }
  0xb6   : > { %v2946_v21 = vpop.permute.xlu0 %641 }
  0xb7   : > { %4716 = vst [vmem:[#allocation95_spill] sm:$0xff] %v2946_v21 }
  0xb8   : > { %795 = vrot.lane.b32.xlu2 %v2372_v32, %s2271_s24 }
  0xb9   : > { %761 = vrot.lane.b32.xlu1 %v2949_v4, %s2270_s23 }
  0xba   : > { %v2955_v37 = vpop.permute.xlu2 %663 }
  0xbb   : > { %4718 = vst [vmem:[#allocation97_spill] sm:$0xff] %v2955_v37  ;;  %v2957_v12 = vpop.permute.xlu1 %643 }
  0xbc   : > { %797 = vrot.lane.b32.xlu0 %v2363_v27, %s2271_s24 }
  0xbe   : > { %v2961_v41 = vpop.permute.xlu0 %647 }
  0xbf   : > { %4719 = vst [vmem:[#allocation98_spill] sm:$0xff] %v2961_v41 }
  0xc0   : > { %801 = vrot.lane.b32.xlu2 %v2352_v22, %s2271_s24 }
  0xc1   : > { %799 = vrot.lane.b32.xlu1 %v2358_v24, %s2271_s24 }
  0xc2   : > { %v2967_v53 = vpop.permute.xlu2 %703 }
  0xc3   : > { %4720 = vst [vmem:[#allocation99_spill] sm:$0xff] %v2967_v53  ;;  %v2969_v19 = vpop.permute.xlu1 %649 }
  0xc4   : > { %4721 = vst [vmem:[#allocation100_spill] sm:$0xff] %v2969_v19  ;;  %803 = vrot.lane.b32.xlu0 %v2382_v36, %s2271_s24 }
  0xc6   : > { %v2973_v32 = vpop.permute.xlu0 %653 }
  0xc7   : > { %4722 = vst [vmem:[#allocation101_spill] sm:$0xff] %v2973_v32 }
  0xc8   : > { %807 = vrot.lane.b32.xlu2 %v2413_v51, %s2271_s24 }
  0xc9   : > { %805 = vrot.lane.b32.xlu1 %v2375_v33, %s2271_s24 }
  0xca   : > { %v2979_v37 = vpop.permute.xlu2 %709 }
  0xcb   : > { %4723 = vst [vmem:[#allocation102_spill] sm:$0xff] %v2979_v37  ;;  %v2981_v27 = vpop.permute.xlu1 %655 }
  0xcc   : > { %4724 = vst [vmem:[#allocation103_spill] sm:$0xff] %v2981_v27  ;;  %809 = vrot.lane.b32.xlu0 %v2416_v52, %s2271_s24 }
  0xce   : > { %v2985_v53 = vpop.permute.xlu0 %659 }
  0xcf   : > { %4725 = vst [vmem:[#allocation104_spill] sm:$0xff] %v2985_v53 }
  0xd0   : > { %813 = vrot.lane.b32.xlu2 %v2434_v62, %s2271_s24 }
  0xd1   : > { %811 = vrot.lane.b32.xlu1 %v2437_v63, %s2271_s24 }
  0xd2   : > { %v2991_v32 = vpop.permute.xlu2 %715 }
  0xd3   : > { %4726 = vst [vmem:[#allocation105_spill] sm:$0xff] %v2991_v32  ;;  %v2993_v41 = vpop.permute.xlu1 %661 }
  0xd4   : > { %4727 = vst [vmem:[#allocation106_spill] sm:$0xff] %v2993_v41  ;;  %815 = vrot.lane.b32.xlu0 %v2453_v10, %s2271_s24 }
  0xd6   : > { %v2997_v37 = vpop.permute.xlu0 %665 }
  0xd7   : > { %4728 = vst [vmem:[#allocation107_spill] sm:$0xff] %v2997_v37 }
  0xd8   : > { %819 = vrot.lane.b32.xlu2 %v2492_v43, %s2271_s24 }
  0xd9   : > { %817 = vrot.lane.b32.xlu1 %v2450_v9, %s2271_s24 }
  0xda   : > { %v3003_v53 = vpop.permute.xlu2 %721 }
  0xdb   : > { %v3005_v21 = vpop.permute.xlu1 %2239 }
  0xdc   : > { %4729 = vst [vmem:[#allocation108_spill] sm:$0xff] %v3005_v21  ;;  %821 = vrot.lane.b32.xlu0 %v2485_v35, %s2271_s24 }
  0xde   : > { %v3009_v32 = vpop.permute.xlu0 %705 }
  0xdf   : > { %4730 = vst [vmem:[#allocation109_spill] sm:$0xff] %v3009_v32 }
  0xe0   : > { %825 = vrot.lane.b32.xlu2 %v2506_v56, %s2271_s24 }
  0xe1   : > { %823 = vrot.lane.b32.xlu1 %v2509_v57, %s2271_s24 }
  0xe2   : > { %v3015_v37 = vpop.permute.xlu2 %727 }
  0xe3   : > { %v3017_v41 = vpop.permute.xlu1 %707 }
  0xe4   : > { %4731 = vst [vmem:[#allocation110_spill] sm:$0xff] %v3017_v41  ;;  %827 = vrot.lane.b32.xlu0 %v2525_v7, %s2271_s24 }
  0xe6   : > { %v3021_v59 = vpop.permute.xlu0 %711 }
  0xe7   : > { %4732 = vst [vmem:[#allocation111_spill] sm:$0xff] %v3021_v59 }
  0xe8   : > { %831 = vrot.lane.b32.xlu2 %v2563_v61, %s2271_s24 }
  0xe9   : > { %829 = vrot.lane.b32.xlu1 %v2522_v6, %s2271_s24 }
  0xea   : > { %v3027_v32 = vpop.permute.xlu2 %733 }
  0xeb   : > { %v3029_v21 = vpop.permute.xlu1 %713 }
  0xec   : > { %4733 = vst [vmem:[#allocation112_spill] sm:$0xff] %v3029_v21  ;;  %833 = vrot.lane.b32.xlu0 %v2557_v55, %s2271_s24 }
  0xee   : > { %v3033_v41 = vpop.permute.xlu0 %717 }
  0xef   : > { %4734 = vst [vmem:[#allocation113_spill] sm:$0xff] %v3033_v41 }
  0xf0   : > { %837 = vrot.lane.b32.xlu2 %v2577_v31, %s2271_s24 }
  0xf1   : > { %835 = vrot.lane.b32.xlu1 %v2580_v26, %s2271_s24 }
  0xf2   : > { %v3039_v59 = vpop.permute.xlu2 %739 }
  0xf3   : > { %4735 = vst [vmem:[#allocation114_spill] sm:$0xff] %v3039_v59  ;;  %v3041_v27 = vpop.permute.xlu1 %719 }
  0xf4   : > { %4736 = vst [vmem:[#allocation115_spill] sm:$0xff] %v3041_v27  ;;  %839 = vrot.lane.b32.xlu0 %v2603_v18, %s2271_s24  ;;  %v223_v27 = vld [vmem:[%s2337_s21 + $0xf0] sm:$0xff] }
  0xf5   : > { %v311_v18 = vrot.slane %v223_v27, 7 }
  0xf6   : > { %v3045_v21 = vpop.permute.xlu0 %723 }
  0xf8   : > { %843 = vrot.lane.b32.xlu2 %v2642_v20, %s2271_s24 }
  0xf9   : > { %841 = vrot.lane.b32.xlu1 %v2600_v16, %s2271_s24  ;;  %v3067_v16 = vld [vmem:[%s2337_s21 + $0xf8] sm:$0xff] }
  0xfa   : > { %v3051_v41 = vpop.permute.xlu2 %745 }
  0xfb   : > { %4737 = vst [vmem:[#allocation116_spill] sm:$0xff] %v3051_v41  ;;  %v3053_v19 = vpop.permute.xlu1 %725 }
  0xfc   : > { %4738 = vst [vmem:[#allocation117_spill] sm:$0xff] %v3053_v19  ;;  %845 = vrot.lane.b32.xlu0 %v2636_v46, %s2271_s24  ;;  %v3074_v46 = vsel %vm263_vm0, 0.0, %v311_v18 }
  0xfd   : > { %4742 = vst [vmem:[#allocation121_spill] sm:$0xff] %v3074_v46 }
  0xfe   : > { %v3057_v59 = vpop.permute.xlu0 %729 }
  0xff   : > { %4739 = vst [vmem:[#allocation118_spill] sm:$0xff] %v3057_v59  ;;  %v4593_v59 = vrot.slane %v3067_v16, 7 }
 0x100   : > { %849 = vrot.lane.b32.xlu2 %v2657_v14, %s2271_s24 }
 0x101   : > { %847 = vrot.lane.b32.xlu1 %v2660_v45, %s2271_s24  ;;  %v3086_v27 = vsel %vm263_vm0, %v311_v18, %v4593_v59 }
 0x102   : > { %v3064_v20 = vpop.permute.xlu2 %751  ;;  %4744 = vst [vmem:[#allocation123_spill] sm:$0xff] %v3086_v27 }
 0x103   : > { %4740 = vst [vmem:[#allocation119_spill] sm:$0xff] %v3064_v20  ;;  %v3069_v41 = vpop.permute.xlu1 %731  ;;  %v593_v20 = vrot.slane %v3074_v46, 1 }
 0x104   : > { %4741 = vst [vmem:[#allocation120_spill] sm:$0xff] %v3069_v41  ;;  %851 = vrot.lane.b32.xlu0 %v2676_v25, %s2271_s24 }
 0x106   : > { %v3077_v19 = vpop.permute.xlu0 %735 }
 0x107   : > { %4743 = vst [vmem:[#allocation122_spill] sm:$0xff] %v3077_v19 }
 0x108   : > { %855 = vrot.lane.b32.xlu2 %v3074_v46, %s2271_s24 }
 0x109   : > { %853 = vrot.lane.b32.xlu1 %v2673_v8, %s2271_s24 }
 0x10a   : > { %v3088_v41 = vpop.permute.xlu2 %757 }
 0x10b   : > { %4745 = vst [vmem:[#allocation124_spill] sm:$0xff] %v3088_v41  ;;  %v3090_v25 = vpop.permute.xlu1 %737 }
 0x10c   : > { %4746 = vst [vmem:[#allocation125_spill] sm:$0xff] %v3090_v25  ;;  %857 = vrot.lane.b32.xlu0 %v3086_v27, %s2271_s24 }
 0x10e   : > { %v3094_v14 = vpop.permute.xlu0 %741 }
 0x10f   : > { %4747 = vst [vmem:[#allocation126_spill] sm:$0xff] %v3094_v14 }
 0x110   : > { %893 = vrot.lane.b32.xlu2 %v2388_v38, %s2272_s25 }
 0x111   : > { %891 = vrot.lane.b32.xlu1 %v2393_v40, %s2272_s25 }
 0x112   : > { %v3100_v8 = vpop.permute.xlu2 %795 }
 0x113   : > { %4748 = vst [vmem:[#allocation127_spill] sm:$0xff] %v3100_v8  ;;  %v3102_v18 = vpop.permute.xlu1 %743 }
 0x114   : > { %4749 = vst [vmem:[#allocation128_spill] sm:$0xff] %v3102_v18  ;;  %895 = vrot.lane.b32.xlu0 %v2409_v49, %s2272_s25 }
 0x116   : > { %v3106_v59 = vpop.permute.xlu0 %747 }
 0x117   : > { %4750 = vst [vmem:[#allocation129_spill] sm:$0xff] %v3106_v59  ;;  %v4754_v59 = vld [vmem:[#allocation18_spill] sm:$0xff] }
 0x118   : > { %899 = vrot.lane.b32.xlu2 %v2406_v48, %s2272_s25 }
 0x119   : > { %897 = vrot.lane.b32.xlu1 %v2378_v34, %s2272_s25  ;;  %v4757_v34 = vld [vmem:[#allocation19_spill] sm:$0xff] }
 0x11a   : > { %v3112_v14 = vpop.permute.xlu2 %801 }
 0x11b   : > { %4751 = vst [vmem:[#allocation130_spill] sm:$0xff] %v3112_v14  ;;  %v3114_v38 = vpop.permute.xlu1 %749 }
 0x11c   : > { %4752 = vst [vmem:[#allocation131_spill] sm:$0xff] %v3114_v38  ;;  %901 = vrot.lane.b32.xlu0 %v2428_v58, %s2272_s25  ;;  %v4759_v38 = vld [vmem:[#allocation20_spill] sm:$0xff]  ;;  %v4760_v58 = vld [vmem:[#allocation21_spill] sm:$0xff] }
 0x11e   : > { %v3118_v40 = vpop.permute.xlu0 %753 }
 0x11f   : > { %4753 = vst [vmem:[#allocation132_spill] sm:$0xff] %v3118_v40 }
 0x120   : > { %905 = vrot.lane.b32.xlu2 %v2442_v5, %s2272_s25 }
 0x121   : > { %903 = vrot.lane.b32.xlu1 %v4754_v59, %s2272_s25  ;;  %v4763_v59 = vld [vmem:[#allocation22_spill] sm:$0xff] }
 0x122   : > { %v3124_v18 = vpop.permute.xlu2 %807 }
 0x123   : > { %4755 = vst [vmem:[#allocation133_spill] sm:$0xff] %v3124_v18  ;;  %v3126_v48 = vpop.permute.xlu1 %755 }
 0x124   : > { %4756 = vst [vmem:[#allocation134_spill] sm:$0xff] %v3126_v48  ;;  %907 = vrot.lane.b32.xlu0 %v4757_v34, %s2272_s25  ;;  %v4765_v48 = vld [vmem:[#allocation23_spill] sm:$0xff]  ;;  %v4766_v34 = vld [vmem:[#allocation24_spill] sm:$0xff] }
 0x126   : > { %v3130_v14 = vpop.permute.xlu0 %759 }
 0x127   : > { %4758 = vst [vmem:[#allocation135_spill] sm:$0xff] %v3130_v14 }
 0x128   : > { %911 = vrot.lane.b32.xlu2 %v4759_v38, %s2272_s25  ;;  %v4789_v38 = vrot.slane %v3067_v16, 7  ;;  %v4791_v16 = vld [vmem:[#allocation48_spill] sm:$0xff] }
 0x129   : > { %909 = vrot.lane.b32.xlu1 %v4760_v58, %s2272_s25  ;;  %v4768_v58 = vld [vmem:[#allocation25_spill] sm:$0xff] }
 0x12a   : > { %v3136_v40 = vpop.permute.xlu2 %813 }
 0x12b   : > { %4761 = vst [vmem:[#allocation136_spill] sm:$0xff] %v3136_v40  ;;  %v3138_v5 = vpop.permute.xlu1 %761 }
 0x12c   : > { %4762 = vst [vmem:[#allocation137_spill] sm:$0xff] %v3138_v5  ;;  %913 = vrot.lane.b32.xlu0 %v4763_v59, %s2272_s25  ;;  %v4770_v5 = vld [vmem:[#allocation26_spill] sm:$0xff] }
 0x12e   : > { %v3142_v18 = vpop.permute.xlu0 %797 }
 0x12f   : > { %4764 = vst [vmem:[#allocation138_spill] sm:$0xff] %v3142_v18  ;;  %v4771_v18 = vld [vmem:[#allocation27_spill] sm:$0xff] }
 0x130   : > { %917 = vrot.lane.b32.xlu2 %v4765_v48, %s2272_s25 }
 0x131   : > { %915 = vrot.lane.b32.xlu1 %v4766_v34, %s2272_s25  ;;  %v4774_v34 = vld [vmem:[#allocation28_spill] sm:$0xff] }
 0x132   : > { %v3148_v14 = vpop.permute.xlu2 %819 }
 0x133   : > { %v3150_v8 = vpop.permute.xlu1 %799 }
 0x134   : > { %4767 = vst [vmem:[#allocation139_spill] sm:$0xff] %v3150_v8  ;;  %919 = vrot.lane.b32.xlu0 %v4768_v58, %s2272_s25  ;;  %v4776_v8 = vld [vmem:[#allocation29_spill] sm:$0xff]  ;;  %v4777_v58 = vld [vmem:[#allocation30_spill] sm:$0xff] }
 0x136   : > { %v3154_v40 = vpop.permute.xlu0 %803 }
 0x137   : > { %4769 = vst [vmem:[#allocation140_spill] sm:$0xff] %v3154_v40 }
 0x138   : > { %923 = vrot.lane.b32.xlu2 %v4770_v5, %s2272_s25 }
 0x139   : > { %921 = vrot.lane.b32.xlu1 %v4771_v18, %s2272_s25  ;;  %v4780_v18 = vld [vmem:[#allocation33_spill] sm:$0xff] }
 0x13a   : > { %v3160_v59 = vpop.permute.xlu2 %825 }
 0x13b   : > { %4772 = vst [vmem:[#allocation141_spill] sm:$0xff] %v3160_v59  ;;  %v3162_v48 = vpop.permute.xlu1 %805 }
 0x13c   : > { %4773 = vst [vmem:[#allocation142_spill] sm:$0xff] %v3162_v48  ;;  %925 = vrot.lane.b32.xlu0 %v4774_v34, %s2272_s25  ;;  %v4781_v48 = vld [vmem:[#allocation35_spill] sm:$0xff]  ;;  %v4782_v34 = vld [vmem:[#allocation36_spill] sm:$0xff] }
 0x13e   : > { %v3166_v25 = vpop.permute.xlu0 %809 }
 0x13f   : > { %4775 = vst [vmem:[#allocation143_spill] sm:$0xff] %v3166_v25 }
 0x140   : > { %929 = vrot.lane.b32.xlu2 %v4776_v8, %s2272_s25 }
 0x141   : > { %927 = vrot.lane.b32.xlu1 %v4777_v58, %s2272_s25 }
 0x142   : > { %v3172_v40 = vpop.permute.xlu2 %831 }
 0x143   : > { %4778 = vst [vmem:[#allocation30_spill] sm:$0xff] %v3172_v40  ;;  %v3174_v5 = vpop.permute.xlu1 %811 }
 0x144   : > { %4779 = vst [vmem:[#allocation144_spill] sm:$0xff] %v3174_v5  ;;  %931 = vrot.lane.b32.xlu0 %v4780_v18, %s2272_s25  ;;  %v4784_v5 = vld [vmem:[#allocation41_spill] sm:$0xff]  ;;  %v4785_v18 = vld [vmem:[#allocation42_spill] sm:$0xff] }
 0x146   : > { %v3178_v41 = vpop.permute.xlu0 %815 }
 0x148   : > { %935 = vrot.lane.b32.xlu2 %v4781_v48, %s2272_s25 }
 0x149   : > { %933 = vrot.lane.b32.xlu1 %v4782_v34, %s2272_s25  ;;  %v4787_v34 = vld [vmem:[#allocation45_spill] sm:$0xff] }
 0x14a   : > { %v3184_v25 = vpop.permute.xlu2 %837 }
 0x14b   : > { %4783 = vst [vmem:[#allocation145_spill] sm:$0xff] %v3184_v25  ;;  %v3186_v8 = vpop.permute.xlu1 %817 }
 0x14c   : > { %937 = vrot.lane.b32.xlu0 %v2651_v54, %s2272_s25  ;;  %v3207_v54 = vsel %vm263_vm0, %v4789_v38, 0.0 }
 0x14e   : > { %v3190_v40 = vpop.permute.xlu0 %821 }
 0x150   : > { %941 = vrot.lane.b32.xlu2 %v4784_v5, %s2272_s25  ;;  %v594_v5 = vrot.slane %v3086_v27, 1 }
 0x151   : > { %939 = vrot.lane.b32.xlu1 %v4785_v18, %s2272_s25  ;;  %v596_v18 = vrot.slane %v3207_v54, 1 }
 0x152   : > { %v3196_v19 = vpop.permute.xlu2 %843 }
 0x153   : > { %4786 = vst [vmem:[#allocation146_spill] sm:$0xff] %v3196_v19  ;;  %v3198_v48 = vpop.permute.xlu1 %823  ;;  %v3223_v38 = vsel %vm429_vm1, %v594_v5, %v596_v18 }
 0x154   : > { %943 = vrot.lane.b32.xlu0 %v4787_v34, %s2272_s25  ;;  %4792 = vst [vmem:[#allocation148_spill] sm:$0xff] %v3223_v38 }
 0x156   : > { %v3202_v25 = vpop.permute.xlu0 %827 }
 0x157   : > { %4788 = vst [vmem:[#allocation45_spill] sm:$0xff] %v3202_v25 }
 0x158   : > { %947 = vrot.lane.b32.xlu2 %v2697_v30, %s2272_s25 }
 0x159   : > { %945 = vrot.lane.b32.xlu1 %v2701_v17, %s2272_s25  ;;  %v3228_v17 = vsel %vm429_vm1, %v593_v20, %v594_v5  ;;  %v4798_v5 = vld [vmem:[#allocation50_spill] sm:$0xff] }
 0x15a   : > { %v3215_v19 = vpop.permute.xlu2 %849  ;;  %4794 = vst [vmem:[#allocation150_spill] sm:$0xff] %v3228_v17 }
 0x15b   : > { %4790 = vst [vmem:[#allocation147_spill] sm:$0xff] %v3215_v19  ;;  %v3218_v25 = vpop.permute.xlu1 %829 }
 0x15c   : > { %949 = vrot.lane.b32.xlu0 %v4791_v16, %s2272_s25  ;;  %v4796_v16 = vld [vmem:[#allocation49_spill] sm:$0xff] }
 0x15e   : > { %v3225_v30 = vpop.permute.xlu0 %833 }
 0x15f   : > { %4793 = vst [vmem:[#allocation149_spill] sm:$0xff] %v3225_v30  ;;  %v4815_v30 = vld [vmem:[#allocation68_spill] sm:$0xff] }
 0x160   : > { %953 = vrot.lane.b32.xlu2 %v3223_v38, %s2272_s25 }
 0x161   : > { %951 = vrot.lane.b32.xlu1 %v3228_v17, %s2272_s25  ;;  %v4800_v17 = vld [vmem:[#allocation51_spill] sm:$0xff] }
 0x162   : > { %v3234_v19 = vpop.permute.xlu2 %855 }
 0x163   : > { %4795 = vst [vmem:[#allocation151_spill] sm:$0xff] %v3234_v19  ;;  %v3236_v59 = vpop.permute.xlu1 %835 }
 0x164   : > { %987 = vrot.lane.b32.xlu0 %v4796_v16, %s2273_s26 }
 0x166   : > { %v3240_v18 = vpop.permute.xlu0 %839 }
 0x167   : > { %4797 = vst [vmem:[#allocation49_spill] sm:$0xff] %v3240_v18 }
 0x168   : > { %991 = vrot.lane.b32.xlu2 %v2736_v1, %s2273_s26 }
 0x169   : > { %989 = vrot.lane.b32.xlu1 %v4798_v5, %s2273_s26  ;;  %v4803_v5 = vld [vmem:[#allocation54_spill] sm:$0xff] }
 0x16a   : > { %v3246_v20 = vpop.permute.xlu2 %893 }
 0x16b   : > { %4799 = vst [vmem:[#allocation50_spill] sm:$0xff] %v3246_v20  ;;  %v3248_v38 = vpop.permute.xlu1 %841 }
 0x16c   : > { %993 = vrot.lane.b32.xlu0 %v4800_v17, %s2273_s26  ;;  %v4805_v17 = vld [vmem:[#allocation56_spill] sm:$0xff] }
 0x16e   : > { %v3252_v19 = vpop.permute.xlu0 %845 }
 0x16f   : > { %4801 = vst [vmem:[#allocation152_spill] sm:$0xff] %v3252_v19 }
 0x170   : > { %997 = vrot.lane.b32.xlu2 %v2757_v28, %s2273_s26 }
 0x171   : > { %995 = vrot.lane.b32.xlu1 %v2743_v23, %s2273_s26  ;;  %v4807_v23 = vld [vmem:[#allocation58_spill] sm:$0xff] }
 0x172   : > { %v3258_v16 = vpop.permute.xlu2 %899 }
 0x173   : > { %4802 = vst [vmem:[#allocation153_spill] sm:$0xff] %v3258_v16  ;;  %v3260_v18 = vpop.permute.xlu1 %847 }
 0x174   : > { %999 = vrot.lane.b32.xlu0 %v4803_v5, %s2273_s26  ;;  %v4809_v5 = vld [vmem:[#allocation60_spill] sm:$0xff] }
 0x176   : > { %v3264_v20 = vpop.permute.xlu0 %851 }
 0x177   : > { %4804 = vst [vmem:[#allocation154_spill] sm:$0xff] %v3264_v20 }
 0x178   : > { %1003 = vrot.lane.b32.xlu2 %v2779_v50, %s2273_s26 }
 0x179   : > { %1001 = vrot.lane.b32.xlu1 %v4805_v17, %s2273_s26  ;;  %v4811_v17 = vld [vmem:[#allocation62_spill] sm:$0xff] }
 0x17a   : > { %v3270_v19 = vpop.permute.xlu2 %905 }
 0x17b   : > { %4806 = vst [vmem:[#allocation155_spill] sm:$0xff] %v3270_v19  ;;  %v3272_v28 = vpop.permute.xlu1 %853 }
 0x17c   : > { %1005 = vrot.lane.b32.xlu0 %v4807_v23, %s2273_s26  ;;  %v4813_v23 = vld [vmem:[#allocation65_spill] sm:$0xff] }
 0x17e   : > { %v3276_v16 = vpop.permute.xlu0 %857 }
 0x17f   : > { %4808 = vst [vmem:[#allocation156_spill] sm:$0xff] %v3276_v16 }
 0x180   : > { %1009 = vrot.lane.b32.xlu2 %v2802_v15, %s2273_s26 }
 0x181   : > { %1007 = vrot.lane.b32.xlu1 %v4809_v5, %s2273_s26 }
 0x182   : > { %v3282_v20 = vpop.permute.xlu2 %911 }
 0x183   : > { %v3284_v50 = vpop.permute.xlu1 %891 }
 0x184   : > { %4810 = vst [vmem:[#allocation157_spill] sm:$0xff] %v3284_v50  ;;  %1011 = vrot.lane.b32.xlu0 %v4811_v17, %s2273_s26 }
 0x186   : > { %v3288_v19 = vpop.permute.xlu0 %895 }
 0x187   : > { %4812 = vst [vmem:[#allocation158_spill] sm:$0xff] %v3288_v19 }
 0x188   : > { %1015 = vrot.lane.b32.xlu2 %v2828_v13, %s2273_s26 }
 0x189   : > { %1013 = vrot.lane.b32.xlu1 %v4813_v23, %s2273_s26  ;;  %v4818_v23 = vld [vmem:[#allocation74_spill] sm:$0xff] }
 0x18a   : > { %v3294_v16 = vpop.permute.xlu2 %917 }
 0x18b   : > { %v3296_v15 = vpop.permute.xlu1 %897 }
 0x18c   : > { %4814 = vst [vmem:[#allocation159_spill] sm:$0xff] %v3296_v15  ;;  %1017 = vrot.lane.b32.xlu0 %v4815_v30, %s2273_s26  ;;  %v4820_v30 = vld [vmem:[#allocation77_spill] sm:$0xff] }
 0x18e   : > { %v3300_v5 = vpop.permute.xlu0 %901 }
 0x18f   : > { %4816 = vst [vmem:[#allocation160_spill] sm:$0xff] %v3300_v5 }
 0x190   : > { %1021 = vrot.lane.b32.xlu2 %v2853_v60, %s2273_s26 }
 0x191   : > { %1019 = vrot.lane.b32.xlu1 %v2835_v39, %s2273_s26  ;;  %v4822_v39 = vld [vmem:[#allocation80_spill] sm:$0xff] }
 0x192   : > { %v3306_v17 = vpop.permute.xlu2 %923 }
 0x193   : > { %v3308_v13 = vpop.permute.xlu1 %903 }
 0x194   : > { %4817 = vst [vmem:[#allocation161_spill] sm:$0xff] %v3308_v13  ;;  %1023 = vrot.lane.b32.xlu0 %v4818_v23, %s2273_s26 }
 0x196   : > { %v3312_v19 = vpop.permute.xlu0 %907 }
 0x197   : > { %4819 = vst [vmem:[#allocation74_spill] sm:$0xff] %v3312_v19 }
 0x198   : > { %1027 = vrot.lane.b32.xlu2 %v2879_v47, %s2273_s26 }
 0x199   : > { %1025 = vrot.lane.b32.xlu1 %v4820_v30, %s2273_s26  ;;  %v601_v30 = vrot.slane %v3207_v54, 2 }
 0x19a   : > { %v3318_v5 = vpop.permute.xlu2 %929 }
 0x19b   : > { %v3320_v60 = vpop.permute.xlu1 %909 }
 0x19c   : > { %4821 = vst [vmem:[#allocation162_spill] sm:$0xff] %v3320_v60  ;;  %1029 = vrot.lane.b32.xlu0 %v4822_v39, %s2273_s26  ;;  %v4824_v39 = vld [vmem:[#allocation89_spill] sm:$0xff] }
 0x19e   : > { %v914_v15 = vpop.permute.xlu0 %913 }
 0x1a0   : > { %1033 = vrot.lane.b32.xlu2 %v2904_v42, %s2273_s26 }
 0x1a1   : > { %1031 = vrot.lane.b32.xlu1 %v2886_v3, %s2273_s26  ;;  %v598_v3 = vrot.slane %v3074_v46, 2 }
 0x1a2   : > { %v3328_v19 = vpop.permute.xlu2 %935 }
 0x1a3   : > { %4823 = vst [vmem:[#allocation163_spill] sm:$0xff] %v3328_v19  ;;  %v3330_v47 = vpop.permute.xlu1 %915  ;;  %v599_v19 = vrot.slane %v3086_v27, 2 }
 0x1a4   : > { %1035 = vrot.lane.b32.xlu0 %v2898_v44, %s2273_s26 }
 0x1a5   : > { %v3367_v46 = vsel %vm510_vm2, %v599_v19, %v601_v30 }
 0x1a6   : > { %v3334_v13 = vpop.permute.xlu0 %919  ;;  %4827 = vst [vmem:[#allocation166_spill] sm:$0xff] %v3367_v46 }
 0x1a8   : > { %1039 = vrot.lane.b32.xlu2 %v2930_v29, %s2273_s26 }
 0x1a9   : > { %1037 = vrot.lane.b32.xlu1 %v4824_v39, %s2273_s26  ;;  %v3355_v39 = vsel %vm510_vm2, %v598_v3, %v599_v19 }
 0x1aa   : > { %v3340_v60 = vpop.permute.xlu2 %941  ;;  %4826 = vst [vmem:[#allocation165_spill] sm:$0xff] %v3355_v39 }
 0x1ab   : > { %4825 = vst [vmem:[#allocation164_spill] sm:$0xff] %v3340_v60  ;;  %v3342_v42 = vpop.permute.xlu1 %921 }
 0x1ac   : > { %1041 = vrot.lane.b32.xlu0 %v2923_v11, %s2273_s26 }
 0x1ae   : > { %v3348_v44 = vpop.permute.xlu0 %925 }
 0x1b0   : > { %1045 = vrot.lane.b32.xlu2 %v2949_v4, %s2273_s26 }
 0x1b1   : > { %1043 = vrot.lane.b32.xlu1 %v2937_v0, %s2273_s26 }
 0x1b2   : > { %v3357_v60 = vpop.permute.xlu2 %947 }
 0x1b3   : > { %v3360_v50 = vpop.permute.xlu1 %927 }
 0x1b4   : > { %1047 = vrot.lane.b32.xlu0 %v3355_v39, %s2273_s26 }
 0x1b6   : > { %v3364_v27 = vpop.permute.xlu0 %931 }
 0x1b8   : > { %1083 = vrot.lane.b32.xlu2 %v2358_v24, %s2274_s27  ;;  %v4833_v24 = vld [vmem:[#allocation85_spill] sm:$0xff] }
 0x1b9   : > { %1049 = vrot.lane.b32.xlu1 %v3367_v46, %s2273_s26 }
 0x1ba   : > { %v3373_v3 = vpop.permute.xlu2 %953 }
 0x1bb   : > { %4828 = vst [vmem:[#allocation167_spill] sm:$0xff] %v3373_v3  ;;  %v3375_v54 = vpop.permute.xlu1 %933  ;;  %v1383_v3 = vsel %vm1371_vm3, %v2434_v62, %v4833_v24 }
 0x1bc   : > { %1085 = vrot.lane.b32.xlu0 %v2352_v22, %s2274_s27  ;;  %v1416_v0 = vsel %vm1404_vm4, %v1383_v3, %v3003_v53  ;;  %v4834_v3 = vld [vmem:[#allocation91_spill] sm:$0xff] }
 0x1be   : > { %v3379_v39 = vpop.permute.xlu0 %937 }
 0x1c0   : > { %1089 = vrot.lane.b32.xlu2 %v2375_v33, %s2274_s27 }
 0x1c1   : > { %1087 = vrot.lane.b32.xlu1 %v2382_v36, %s2274_s27 }
 0x1c2   : > { %v3385_v30 = vpop.permute.xlu2 %991 }
 0x1c3   : > { %4829 = vst [vmem:[#allocation168_spill] sm:$0xff] %v3385_v30  ;;  %v3387_v19 = vpop.permute.xlu1 %939 }
 0x1c4   : > { %1091 = vrot.lane.b32.xlu0 %v2413_v51, %s2274_s27 }
 0x1c6   : > { %v3391_v46 = vpop.permute.xlu0 %943 }
 0x1c8   : > { %1095 = vrot.lane.b32.xlu2 %v2437_v63, %s2274_s27 }
 0x1c9   : > { %1093 = vrot.lane.b32.xlu1 %v2416_v52, %s2274_s27 }
 0x1ca   : > { %v3397_v4 = vpop.permute.xlu2 %997 }
 0x1cb   : > { %4830 = vst [vmem:[#allocation169_spill] sm:$0xff] %v3397_v4  ;;  %v3399_v33 = vpop.permute.xlu1 %945 }
 0x1cc   : > { %1097 = vrot.lane.b32.xlu0 %v2434_v62, %s2274_s27 }
 0x1ce   : > { %v3403_v22 = vpop.permute.xlu0 %949 }
 0x1d0   : > { %1101 = vrot.lane.b32.xlu2 %v2450_v9, %s2274_s27 }
 0x1d1   : > { %1099 = vrot.lane.b32.xlu1 %v2453_v10, %s2274_s27 }
 0x1d2   : > { %v3409_v51 = vpop.permute.xlu2 %1003 }
 0x1d3   : > { %4831 = vst [vmem:[#allocation170_spill] sm:$0xff] %v3409_v51  ;;  %v3411_v30 = vpop.permute.xlu1 %951  ;;  %v1449_v51 = vsel %vm1437_vm5, %v1416_v0, %v3186_v8  ;;  %v1386_v8 = vsel %vm1371_vm3, %v2492_v43, %v4834_v3 }
 0x1d4   : > { %4832 = vst [vmem:[#allocation171_spill] sm:$0xff] %v3411_v30  ;;  %1103 = vrot.lane.b32.xlu0 %v2492_v43, %s2274_s27  ;;  %v1482_v30 = vsel %vm1470_vm6, %v1449_v51, %v914_v15  ;;  %v1419_v0 = vsel %vm1404_vm4, %v1386_v8, %v3015_v37 }
 0x1d5   : > { %v1452_v51 = vsel %vm1437_vm5, %v1419_v0, %v3198_v48  ;;  %v1389_v48 = vsel %vm1371_vm3, %v2506_v56, %v2942_v2  ;;  %v4835_v2 = vld [vmem:[#allocation81_spill] sm:$0xff] }
 0x1d6   : > { %v3415_v4 = vpop.permute.xlu0 %987  ;;  %v1422_v3 = vsel %vm1404_vm4, %v1389_v48, %v3027_v32  ;;  %v4837_v48 = vld [vmem:[#allocation115_spill] sm:$0xff] }
 0x1d8   : > { %1107 = vrot.lane.b32.xlu2 %v2509_v57, %s2274_s27 }
 0x1d9   : > { %1105 = vrot.lane.b32.xlu1 %v2485_v35, %s2274_s27 }
 0x1da   : > { %v1010_v52 = vpop.permute.xlu2 %1009 }
 0x1db   : > { %v3430_v24 = vsel %vm1503_vm7, %v1482_v30, %v1010_v52  ;;  %v3432_v62 = vpop.permute.xlu1 %989  ;;  %v1485_v52 = vsel %vm1470_vm6, %v1452_v51, %v3334_v13  ;;  %v1455_v13 = vsel %vm1437_vm5, %v1422_v3, %v3218_v25  ;;  %v1392_v25 = vsel %vm1371_vm3, %v2563_v61, %v2957_v12 }
 0x1dc   : > { %1109 = vrot.lane.b32.xlu0 %v2506_v56, %s2274_s27  ;;  %v1488_v8 = vsel %vm1470_vm6, %v1455_v13, %v3348_v44  ;;  %v4836_v44 = vld [vmem:[#allocation114_spill] sm:$0xff] }
 0x1de   : > { %v3436_v53 = vpop.permute.xlu0 %993 }
 0x1e0   : > { %1113 = vrot.lane.b32.xlu2 %v2522_v6, %s2274_s27 }
 0x1e1   : > { %1111 = vrot.lane.b32.xlu1 %v2525_v7, %s2274_s27 }
 0x1e2   : > { %v1016_v15 = vpop.permute.xlu2 %1015 }
 0x1e3   : > { %v3452_v30 = vsel %vm1503_vm7, %v1485_v52, %v1016_v15  ;;  %v3454_v43 = vpop.permute.xlu1 %995  ;;  %v1382_v52 = vsel %vm1371_vm3, %v2437_v63, %v4835_v2  ;;  %v1425_v15 = vsel %vm1404_vm4, %v1392_v25, %v4836_v44 }
 0x1e4   : > { %1115 = vrot.lane.b32.xlu0 %v2563_v61, %s2274_s27  ;;  %v1415_v3 = vsel %vm1404_vm4, %v1382_v52, %v4837_v48  ;;  %v1458_v13 = vsel %vm1437_vm5, %v1425_v15, %v3236_v59  ;;  %v4839_v52 = vld [vmem:[#allocation100_spill] sm:$0xff] }
 0x1e5   : > { %v1448_v61 = vsel %vm1437_vm5, %v1415_v3, %v3178_v41  ;;  %v1491_v63 = vsel %vm1470_vm6, %v1458_v13, %v3364_v27  ;;  %v1395_v44 = vsel %vm1371_vm3, %v2577_v31, %v4839_v52  ;;  %v4841_v3 = vld [vmem:[#allocation116_spill] sm:$0xff] }
 0x1e6   : > { %v3458_v37 = vpop.permute.xlu0 %999 }
 0x1e8   : > { %1119 = vrot.lane.b32.xlu2 %v2580_v26, %s2274_s27 }
 0x1e9   : > { %1117 = vrot.lane.b32.xlu1 %v2557_v55, %s2274_s27 }
 0x1ea   : > { %v1022_v0 = vpop.permute.xlu2 %1021 }
 0x1eb   : > { %v3474_v51 = vsel %vm1503_vm7, %v1488_v8, %v1022_v0  ;;  %v3476_v56 = vpop.permute.xlu1 %1001  ;;  %v4838_v8 = vld [vmem:[#allocation66_spill] sm:$0xff]  ;;  %v1481_v0 = vsel %vm1470_vm6, %v1448_v61, %v3282_v20 }
 0x1ec   : > { %1121 = vrot.lane.b32.xlu0 %v2577_v31, %s2274_s27 }
 0x1ee   : > { %v3480_v32 = vpop.permute.xlu0 %1005 }
 0x1f0   : > { %1211 = vrot.lane.b32.xlu2 %v4777_v58, %s2275_s28  ;;  %v1384_v58 = vsel %vm1371_vm3, %v2453_v10, %v4838_v8 }
 0x1f1   : > { %1131 = vrot.lane.b32.xlu1 %v2660_v45, %s2274_s27  ;;  %v1417_v2 = vsel %vm1404_vm4, %v1384_v58, %v3045_v21  ;;  %v4840_v21 = vld [vmem:[#allocation87_spill] sm:$0xff]  ;;  %v4844_v58 = vld [vmem:[#allocation118_spill] sm:$0xff] }
 0x1f2   : > { %v1028_v12 = vpop.permute.xlu2 %1027  ;;  %v1450_v27 = vsel %vm1437_vm5, %v1417_v2, %v3148_v14  ;;  %v1385_v48 = vsel %vm1371_vm3, %v2450_v9, %v4840_v21  ;;  %v4842_v14 = vld [vmem:[#allocation117_spill] sm:$0xff]  ;;  %v4847_v2 = vld [vmem:[#allocation38_spill] sm:$0xff]  ;;  %v4850_v21 = vld [vmem:[#allocation40_spill] sm:$0xff] }
 0x1f3   : > { %v3508_v25 = vsel %vm1503_vm7, %v1491_v63, %v1028_v12  ;;  %v1008_v59 = vpop.permute.xlu1 %1007  ;;  %v1483_v10 = vsel %vm1470_vm6, %v1450_v27, %v3330_v47  ;;  %v1418_v47 = vsel %vm1404_vm4, %v1385_v48, %v4842_v14  ;;  %v4843_v63 = vld [vmem:[#allocation72_spill] sm:$0xff]  ;;  %v4853_v14 = vld [vmem:[#allocation45_spill] sm:$0xff] }
 0x1f4   : > { %v3513_v41 = vsel %vm1503_vm7, %v1481_v0, %v1008_v59  ;;  %1227 = vrot.lane.b32.xlu0 %v4787_v34, %s2275_s28  ;;  %v1428_v34 = vsel %vm1404_vm4, %v1395_v44, %v4841_v3  ;;  %v1451_v13 = vsel %vm1437_vm5, %v1418_v47, %v3190_v40  ;;  %v4846_v59 = vld [vmem:[#allocation103_spill] sm:$0xff]  ;;  %v4851_v48 = vld [vmem:[#allocation120_spill] sm:$0xff] }
 0x1f5   : > { %v1461_v31 = vsel %vm1437_vm5, %v1428_v34, %v3248_v38  ;;  %v1484_v12 = vsel %vm1470_vm6, %v1451_v13, %v3294_v16  ;;  %v1398_v27 = vsel %vm1371_vm3, %v4847_v2, %v4846_v59  ;;  %v4849_v44 = vld [vmem:[#allocation119_spill] sm:$0xff]  ;;  %v4852_v34 = vld [vmem:[#allocation20_spill] sm:$0xff]  ;;  %v4854_v13 = vld [vmem:[#allocation78_spill] sm:$0xff] }
 0x1f6   : > { %v1012_v20 = vpop.permute.xlu0 %1011  ;;  %v1494_v9 = vsel %vm1470_vm6, %v1461_v31, %v3379_v39  ;;  %v4845_v39 = vld [vmem:[#allocation141_spill] sm:$0xff]  ;;  %v4859_v59 = vld [vmem:[#allocation124_spill] sm:$0xff] }
 0x1f7   : > { %v3525_v15 = vsel %vm1503_vm7, %v1483_v10, %v1012_v20  ;;  %v4848_v20 = vld [vmem:[#allocation92_spill] sm:$0xff] }
 0x1f8   : > { %1323 = vrot.lane.b32.xlu2 %v2930_v29, %s2276_s29  ;;  %v1387_v29 = vsel %vm1371_vm3, %v2485_v35, %v4843_v63  ;;  %v1388_v52 = vsel %vm1371_vm3, %v2509_v57, %v4848_v20  ;;  %v4861_v20 = vld [vmem:[#allocation125_spill] sm:$0xff] }
 0x1f9   : > { %1307 = vrot.lane.b32.xlu1 %v4818_v23, %s2276_s29  ;;  %v1420_v23 = vsel %vm1404_vm4, %v1387_v29, %v4844_v58  ;;  %v4855_v29 = vld [vmem:[#allocation122_spill] sm:$0xff] }
 0x1fa   : > { %v1034_v61 = vpop.permute.xlu2 %1033  ;;  %v1453_v0 = vsel %vm1437_vm5, %v1420_v23, %v4845_v39  ;;  %v4857_v23 = vld [vmem:[#allocation106_spill] sm:$0xff] }
 0x1fb   : > { %v3550_v8 = vsel %vm1503_vm7, %v1494_v9, %v1034_v61  ;;  %v1014_v38 = vpop.permute.xlu1 %1013  ;;  %v1486_v35 = vsel %vm1470_vm6, %v1453_v0, %v3342_v42  ;;  %v1421_v42 = vsel %vm1404_vm4, %v1388_v52, %v4851_v48  ;;  %v1390_v9 = vsel %vm1371_vm3, %v2525_v7, %v4854_v13  ;;  %v4864_v48 = vld [vmem:[#allocation149_spill] sm:$0xff] }
 0x1fc   : > { %v3555_v40 = vsel %vm1503_vm7, %v1484_v12, %v1014_v38  ;;  %1179 = vrot.lane.b32.xlu0 %v2409_v49, %s2275_s28  ;;  %v1431_v49 = vsel %vm1404_vm4, %v1398_v27, %v4849_v44  ;;  %v1454_v47 = vsel %vm1437_vm5, %v1421_v42, %v4853_v14  ;;  %v1423_v12 = vsel %vm1404_vm4, %v1390_v9, %v4855_v29  ;;  %v4860_v27 = vld [vmem:[#allocation29_spill] sm:$0xff]  ;;  %v4862_v44 = vld [vmem:[#allocation60_spill] sm:$0xff]  ;;  %v4867_v9 = vld [vmem:[#allocation126_spill] sm:$0xff] }
 0x1fd   : > { %v1464_v3 = vsel %vm1437_vm5, %v1431_v49, %v3260_v18  ;;  %v1487_v61 = vsel %vm1470_vm6, %v1454_v47, %v3306_v17  ;;  %v1401_v39 = vsel %vm1371_vm3, %v4850_v21, %v4857_v23  ;;  %v4863_v49 = vld [vmem:[#allocation63_spill] sm:$0xff]  ;;  %v4866_v47 = vld [vmem:[#allocation108_spill] sm:$0xff]  ;;  %v4869_v29 = vld [vmem:[#allocation145_spill] sm:$0xff] }
 0x1fe   : > { %v1018_v16 = vpop.permute.xlu0 %1017  ;;  %v1497_v57 = vsel %vm1470_vm6, %v1464_v3, %v3391_v46  ;;  %v4856_v46 = vld [vmem:[#allocation30_spill] sm:$0xff] }
 0x1ff   : > { %v3567_v10 = vsel %vm1503_vm7, %v1486_v35, %v1018_v16  ;;  %v1456_v58 = vsel %vm1437_vm5, %v1423_v12, %v4856_v46  ;;  %v4858_v35 = vld [vmem:[#allocation95_spill] sm:$0xff]  ;;  %v4870_v12 = vld [vmem:[#allocation5_spill] sm:$0xff]  ;;  %v4871_v23 = vld [vmem:[#allocation98_spill] sm:$0xff] }
 0x200   : > { %1133 = vrot.lane.b32.xlu2 %v4850_v21, %s2274_s27  ;;  %v1489_v7 = vsel %vm1470_vm6, %v1456_v58, %v3360_v50  ;;  %v1391_v16 = vsel %vm1371_vm3, %v2522_v6, %v4858_v35  ;;  %v2236_v21 = vunpack.i.l.bf16 %v4863_v49  ;;  %v4872_v35 = vld [vmem:[#allocation127_spill] sm:$0xff] }
 0x201   : > { %1195 = vrot.lane.b32.xlu1 %v4852_v34, %s2275_s28  ;;  %v1424_v50 = vsel %vm1404_vm4, %v1391_v16, %v4861_v20  ;;  %v4865_v34 = vld [vmem:[#allocation84_spill] sm:$0xff]  ;;  %v4875_v20 = vld [vmem:[#allocation77_spill] sm:$0xff] }
 0x202   : > { %v1040_v31 = vpop.permute.xlu2 %1039  ;;  %v1457_v6 = vsel %vm1437_vm5, %v1424_v50, %v4864_v48  ;;  %v1393_v14 = vsel %vm1371_vm3, %v2557_v55, %v4865_v34  ;;  %v1372_v46 = vsel %vm1371_vm3, %v4870_v12, %v2236_v21  ;;  %v4876_v50 = vld [vmem:[#allocation49_spill] sm:$0xff]  ;;  %v4877_v21 = vld [vmem:[#allocation90_spill] sm:$0xff]  ;;  %v4878_v48 = vld [vmem:[#allocation32_spill] sm:$0xff] }
 0x203   : > { %v3592_v63 = vsel %vm1503_vm7, %v1497_v57, %v1040_v31  ;;  %v1020_v18 = vpop.permute.xlu1 %1019  ;;  %v2241_v57 = vunpack.i.l.bf16 %v4866_v47 }
 0x204   : > { %v3597_v38 = vsel %vm1503_vm7, %v1487_v61, %v1020_v18  ;;  %1275 = vrot.lane.b32.xlu0 %v2736_v1, %s2276_s29  ;;  %v1434_v1 = vsel %vm1404_vm4, %v1401_v39, %v4859_v59  ;;  %v1426_v61 = vsel %vm1404_vm4, %v1393_v14, %v4867_v9  ;;  %v1394_v39 = vsel %vm1371_vm3, %v2580_v26, %v4871_v23  ;;  %v4873_v59 = vld [vmem:[#allocation128_spill] sm:$0xff]  ;;  %v4880_v14 = vld [vmem:[#allocation129_spill] sm:$0xff] }
 0x205   : > { %v1467_v52 = vsel %vm1437_vm5, %v1434_v1, %v3272_v28  ;;  %v1490_v28 = vsel %vm1470_vm6, %v1457_v6, %v3318_v5  ;;  %v1459_v55 = vsel %vm1437_vm5, %v1426_v61, %v4869_v29  ;;  %v4874_v1 = vld [vmem:[#allocation157_spill] sm:$0xff]  ;;  %v4879_v6 = vld [vmem:[#allocation163_spill] sm:$0xff] }
 0x206   : > { %v1024_v17 = vpop.permute.xlu0 %1023  ;;  %v1500_v42 = vsel %vm1470_vm6, %v1467_v52, %v3403_v22  ;;  %v4868_v22 = vld [vmem:[#allocation47_spill] sm:$0xff]  ;;  %v1492_v5 = vsel %vm1470_vm6, %v1459_v55, %v3375_v54  ;;  %v1427_v54 = vsel %vm1404_vm4, %v1394_v39, %v4873_v59  ;;  %v4886_v23 = vld [vmem:[#allocation101_spill] sm:$0xff] }
 0x207   : > { %v3609_v0 = vsel %vm1503_vm7, %v1489_v7, %v1024_v17  ;;  %v1405_v7 = vsel %vm1404_vm4, %v1372_v46, %v2241_v57  ;;  %v1460_v52 = vsel %vm1437_vm5, %v1427_v54, %v4876_v50  ;;  %v4883_v61 = vld [vmem:[#allocation67_spill] sm:$0xff]  ;;  %v4889_v54 = vld [vmem:[#allocation44_spill] sm:$0xff]  ;;  %v4892_v50 = vld [vmem:[#allocation22_spill] sm:$0xff] }
 0x208   : > { %1213 = vrot.lane.b32.xlu2 %v4860_v27, %s2275_s28  ;;  %v1438_v16 = vsel %vm1437_vm5, %v1405_v7, %v4872_v35  ;;  %v4887_v39 = vld [vmem:[#allocation31_spill] sm:$0xff] }
 0x209   : > { %1291 = vrot.lane.b32.xlu1 %v4862_v44, %s2276_s29  ;;  %v1471_v27 = vsel %vm1470_vm6, %v1438_v16, %v4874_v1  ;;  %v1397_v35 = vsel %vm1371_vm3, %v4887_v39, %v4886_v23  ;;  %v4888_v16 = vld [vmem:[#allocation130_spill] sm:$0xff]  ;;  %v4890_v1 = vld [vmem:[#allocation131_spill] sm:$0xff] }
 0x20a   : > { %v1046_v3 = vpop.permute.xlu2 %1045  ;;  %v1504_v26 = vsel %vm1503_vm7, %v1471_v27, %v3415_v4  ;;  %v4881_v4 = vld [vmem:[#allocation12_spill] sm:$0xff]  ;;  %v4891_v27 = vld [vmem:[#allocation159_spill] sm:$0xff] }
 0x20b   : > { %v3636_v31 = vsel %vm1503_vm7, %v1500_v42, %v1046_v3  ;;  %v1026_v13 = vpop.permute.xlu1 %1025  ;;  %v1493_v42 = vsel %vm1470_vm6, %v1460_v52, %v4879_v6  ;;  %v4893_v52 = vld [vmem:[#allocation152_spill] sm:$0xff]  ;;  %v4895_v6 = vld [vmem:[#allocation37_spill] sm:$0xff]  ;;  %v4901_v23 = vld [vmem:[#allocation111_spill] sm:$0xff] }
 0x20c   : > { %v3641_v18 = vsel %vm1503_vm7, %v1490_v28, %v1026_v13  ;;  %1229 = vrot.lane.b32.xlu0 %v4868_v22, %s2275_s28  ;;  %v4882_v13 = vld [vmem:[#allocation146_spill] sm:$0xff]  ;;  %v4884_v22 = vld [vmem:[#allocation9_spill] sm:$0xff] }
 0x20d   : > { %v1375_v29 = vsel %vm1371_vm3, %v4884_v22, %v4883_v61  ;;  %v4899_v22 = vld [vmem:[#allocation147_spill] sm:$0xff] }
 0x20e   : > { %v1030_v58 = vpop.permute.xlu0 %1029 }
 0x20f   : > { %v3653_v17 = vsel %vm1503_vm7, %v1492_v5, %v1030_v58  ;;  %v4885_v5 = vld [vmem:[#allocation109_spill] sm:$0xff] }
 0x210   : > { %1325 = vrot.lane.b32.xlu2 %v2923_v11, %s2276_s29  ;;  %v1396_v11 = vsel %vm1371_vm3, %v4878_v48, %v4877_v21  ;;  %v1408_v58 = vsel %vm1404_vm4, %v1375_v29, %v4885_v5 }
 0x211   : > { %1309 = vrot.lane.b32.xlu1 %v4875_v20, %s2276_s29  ;;  %v1429_v57 = vsel %vm1404_vm4, %v1396_v11, %v4880_v14  ;;  %v1441_v59 = vsel %vm1437_vm5, %v1408_v58, %v4888_v16  ;;  %v4894_v11 = vld [vmem:[#allocation94_spill] sm:$0xff] }
 0x212   : > { %v1084_v44 = vpop.permute.xlu2 %1083  ;;  %v1462_v9 = vsel %vm1437_vm5, %v1429_v57, %v4882_v13  ;;  %v1474_v20 = vsel %vm1470_vm6, %v1441_v59, %v4891_v27  ;;  %v4897_v13 = vld [vmem:[#allocation132_spill] sm:$0xff] }
 0x213   : > { %v3678_v3 = vsel %vm1536_vm8, %v1504_v26, %v1084_v44  ;;  %v1032_v34 = vpop.permute.xlu1 %1031  ;;  %v1495_v55 = vsel %vm1470_vm6, %v1462_v9, %v3387_v19  ;;  %v1430_v19 = vsel %vm1404_vm4, %v1397_v35, %v4890_v1  ;;  %v1507_v44 = vsel %vm1503_vm7, %v1474_v20, %v3436_v53  ;;  %v4898_v53 = vld [vmem:[#allocation51_spill] sm:$0xff]  ;;  %v4902_v59 = vld [vmem:[#allocation104_spill] sm:$0xff]  ;;  %v4904_v20 = vld [vmem:[#allocation33_spill] sm:$0xff] }
 0x214   : > { %v3683_v28 = vsel %vm1503_vm7, %v1493_v42, %v1032_v34  ;;  %1181 = vrot.lane.b32.xlu0 %v4881_v4, %s2275_s28  ;;  %v1463_v26 = vsel %vm1437_vm5, %v1430_v19, %v4893_v52  ;;  %v1399_v42 = vsel %vm1371_vm3, %v4895_v6, %v4894_v11  ;;  %v4896_v34 = vld [vmem:[#allocation164_spill] sm:$0xff]  ;;  %v1400_v1 = vsel %vm1371_vm3, %v2660_v45, %v4902_v59  ;;  %v4903_v19 = vld [vmem:[#allocation133_spill] sm:$0xff] }
 0x215   : > { %v1496_v14 = vsel %vm1470_vm6, %v1463_v26, %v4896_v34  ;;  %v1432_v9 = vsel %vm1404_vm4, %v1399_v42, %v4897_v13  ;;  %v4907_v26 = vld [vmem:[#allocation64_spill] sm:$0xff]  ;;  %v4909_v42 = vld [vmem:[#allocation97_spill] sm:$0xff]  ;;  %v2242_v59 = vunpack.i.h.bf16 %v4866_v47  ;;  %v4922_v47 = vld [vmem:[#allocation162_spill] sm:$0xff] }
 0x216   : > { %v1036_v46 = vpop.permute.xlu0 %1035  ;;  %v1465_v29 = vsel %vm1437_vm5, %v1432_v9, %v4899_v22  ;;  %v1402_v34 = vsel %vm1371_vm3, %v4889_v54, %v4909_v42  ;;  %v4910_v9 = vld [vmem:[#allocation135_spill] sm:$0xff] }
 0x217   : > { %v3697_v7 = vsel %vm1503_vm7, %v1495_v55, %v1036_v46  ;;  %v4900_v55 = vld [vmem:[#allocation57_spill] sm:$0xff]  ;;  %v1498_v5 = vsel %vm1470_vm6, %v1465_v29, %v3399_v33  ;;  %v4912_v29 = vld [vmem:[#allocation151_spill] sm:$0xff] }
 0x218   : > { %1135 = vrot.lane.b32.xlu2 %v4889_v54, %s2274_s27  ;;  %v1378_v46 = vsel %vm1371_vm3, %v2382_v36, %v4900_v55  ;;  %v4905_v36 = vld [vmem:[#allocation134_spill] sm:$0xff]  ;;  %v4913_v54 = vld [vmem:[#allocation61_spill] sm:$0xff] }
 0x219   : > { %1197 = vrot.lane.b32.xlu1 %v4892_v50, %s2275_s28  ;;  %v1411_v35 = vsel %vm1404_vm4, %v1378_v46, %v4901_v23  ;;  %v1433_v33 = vsel %vm1404_vm4, %v1400_v1, %v4905_v36  ;;  %v4906_v50 = vld [vmem:[#allocation161_spill] sm:$0xff]  ;;  %v4914_v46 = vld [vmem:[#allocation15_spill] sm:$0xff] }
 0x21a   : > { %v1090_v21 = vpop.permute.xlu2 %1089  ;;  %v1444_v27 = vsel %vm1437_vm5, %v1411_v35, %v4903_v19  ;;  %v4916_v1 = vld [vmem:[#allocation113_spill] sm:$0xff]  ;;  %v4918_v36 = vld [vmem:[#allocation43_spill] sm:$0xff] }
 0x21b   : > { %v3722_v57 = vsel %vm1536_vm8, %v1507_v44, %v1090_v21  ;;  %v1038_v4 = vpop.permute.xlu1 %1037  ;;  %v1477_v52 = vsel %vm1470_vm6, %v1444_v27, %v4906_v50  ;;  %v4908_v44 = vld [vmem:[#allocation154_spill] sm:$0xff]  ;;  %v4919_v50 = vld [vmem:[#allocation136_spill] sm:$0xff] }
 0x21c   : > { %v3727_v61 = vsel %vm1503_vm7, %v1496_v14, %v1038_v4  ;;  %1277 = vrot.lane.b32.xlu0 %v4898_v53, %s2276_s29  ;;  %v1466_v21 = vsel %vm1437_vm5, %v1433_v33, %v4908_v44  ;;  %v1510_v45 = vsel %vm1503_vm7, %v1477_v52, %v3458_v37  ;;  %v1435_v53 = vsel %vm1404_vm4, %v1402_v34, %v4910_v9  ;;  %v4911_v37 = vld [vmem:[#allocation46_spill] sm:$0xff]  ;;  %v4925_v34 = vld [vmem:[#allocation156_spill] sm:$0xff] }
 0x21d   : > { %v1499_v14 = vsel %vm1470_vm6, %v1466_v21, %v3357_v60  ;;  %v1468_v55 = vsel %vm1437_vm5, %v1435_v53, %v4912_v29  ;;  %v1381_v60 = vsel %vm1371_vm3, %v4914_v46, %v4913_v54  ;;  %v4927_v46 = vld [vmem:[#allocation138_spill] sm:$0xff] }
 0x21e   : > { %v1042_v58 = vpop.permute.xlu0 %1041  ;;  %v1414_v19 = vsel %vm1404_vm4, %v1381_v60, %v4916_v1  ;;  %v4930_v1 = vld [vmem:[#allocation69_spill] sm:$0xff] }
 0x21f   : > { %v3741_v16 = vsel %vm1503_vm7, %v1498_v5, %v1042_v58  ;;  %v2237_v5 = vunpack.i.h.bf16 %v4863_v49  ;;  %v4915_v58 = vld [vmem:[#allocation171_spill] sm:$0xff]  ;;  %v1447_v52 = vsel %vm1437_vm5, %v1414_v19, %v4919_v50  ;;  %v4920_v49 = vld [vmem:[#allocation93_spill] sm:$0xff]  ;;  %v4931_v19 = vld [vmem:[#allocation10_spill] sm:$0xff] }
 0x220   : > { %1215 = vrot.lane.b32.xlu2 %v4904_v20, %s2275_s28  ;;  %v1501_v23 = vsel %vm1470_vm6, %v1468_v55, %v4915_v58  ;;  %v4917_v20 = vld [vmem:[#allocation107_spill] sm:$0xff]  ;;  %v1480_v21 = vsel %vm1470_vm6, %v1447_v52, %v4922_v47  ;;  %v4928_v58 = vld [vmem:[#allocation13_spill] sm:$0xff]  ;;  %v4936_v47 = vld [vmem:[#allocation8_spill] sm:$0xff] }
 0x221   : > { %1293 = vrot.lane.b32.xlu1 %v4907_v26, %s2276_s29  ;;  %v1403_v33 = vsel %vm1371_vm3, %v4918_v36, %v4917_v20  ;;  %v4921_v26 = vld [vmem:[#allocation137_spill] sm:$0xff]  ;;  %v1374_v20 = vsel %vm1371_vm3, %v4931_v19, %v4930_v1  ;;  %v4932_v50 = vld [vmem:[#allocation99_spill] sm:$0xff] }
 0x222   : > { %v1096_v11 = vpop.permute.xlu2 %1095  ;;  %v1436_v44 = vsel %vm1404_vm4, %v1403_v33, %v4921_v26  ;;  %v1407_v52 = vsel %vm1404_vm4, %v1374_v20, %v4932_v50  ;;  %v4945_v20 = vld [vmem:[#allocation102_spill] sm:$0xff] }
 0x223   : > { %v3766_v4 = vsel %vm1536_vm8, %v1510_v45, %v1096_v11  ;;  %v1044_v13 = vpop.permute.xlu1 %1043  ;;  %v4923_v45 = vld [vmem:[#allocation82_spill] sm:$0xff]  ;;  %v4924_v11 = vld [vmem:[#allocation4_spill] sm:$0xff] }
 0x224   : > { %v3771_v22 = vsel %vm1503_vm7, %v1499_v14, %v1044_v13  ;;  %1231 = vrot.lane.b32.xlu0 %v4911_v37, %s2275_s28  ;;  %v1373_v42 = vsel %vm1371_vm3, %v4924_v11, %v2237_v5  ;;  %v1469_v14 = vsel %vm1437_vm5, %v1436_v44, %v4925_v34  ;;  %v1513_v13 = vsel %vm1503_vm7, %v1480_v21, %v3480_v32  ;;  %v4926_v37 = vld [vmem:[#allocation167_spill] sm:$0xff]  ;;  %v4929_v32 = vld [vmem:[#allocation50_spill] sm:$0xff]  ;;  %v4934_v44 = vld [vmem:[#allocation24_spill] sm:$0xff] }
 0x225   : > { %v1406_v53 = vsel %vm1404_vm4, %v1373_v42, %v2242_v59  ;;  %v1502_v29 = vsel %vm1470_vm6, %v1469_v14, %v4926_v37  ;;  %v4938_v14 = vld [vmem:[#allocation110_spill] sm:$0xff] }
 0x226   : > { %v1048_v35 = vpop.permute.xlu0 %1047  ;;  %v1439_v60 = vsel %vm1437_vm5, %v1406_v53, %v4927_v46 }
 0x227   : > { %v3787_v27 = vsel %vm1503_vm7, %v1501_v23, %v1048_v35  ;;  %v1472_v23 = vsel %vm1470_vm6, %v1439_v60, %v4929_v32  ;;  %v4941_v60 = vld [vmem:[#allocation52_spill] sm:$0xff] }
 0x228   : > { %1327 = vrot.lane.b32.xlu2 %v4920_v49, %s2276_s29  ;;  %v1505_v35 = vsel %vm1503_vm7, %v1472_v23, %v3432_v62  ;;  %v4933_v49 = vld [vmem:[#allocation139_spill] sm:$0xff]  ;;  %v4935_v62 = vld [vmem:[#allocation73_spill] sm:$0xff] }
 0x229   : > { %1311 = vrot.lane.b32.xlu1 %v4923_v45, %s2276_s29  ;;  %v1440_v26 = vsel %vm1437_vm5, %v1407_v52, %v4933_v49  ;;  %v1376_v21 = vsel %vm1371_vm3, %v4936_v47, %v4935_v62  ;;  %v4937_v45 = vld [vmem:[#allocation158_spill] sm:$0xff]  ;;  %v4946_v52 = vld [vmem:[#allocation36_spill] sm:$0xff]  ;;  %v4950_v62 = vld [vmem:[#allocation11_spill] sm:$0xff] }
 0x22a   : > { %v1102_v9 = vpop.permute.xlu2 %1101  ;;  %v1473_v42 = vsel %vm1470_vm6, %v1440_v26, %v4937_v45  ;;  %v4947_v49 = vld [vmem:[#allocation142_spill] sm:$0xff] }
 0x22b   : > { %v3812_v55 = vsel %vm1536_vm8, %v1513_v13, %v1102_v9  ;;  %v1050_v54 = vpop.permute.xlu1 %1049  ;;  %v1409_v13 = vsel %vm1404_vm4, %v1376_v21, %v4938_v14  ;;  %v4939_v9 = vld [vmem:[#allocation168_spill] sm:$0xff] }
 0x22c   : > { %v3817_v5 = vsel %vm1503_vm7, %v1502_v29, %v1050_v54  ;;  %1183 = vrot.lane.b32.xlu0 %v4928_v58, %s2275_s28  ;;  %v4940_v29 = vld [vmem:[#allocation140_spill] sm:$0xff]  ;;  %v4942_v58 = vld [vmem:[#allocation153_spill] sm:$0xff] }
 0x22d   : > { %v1442_v54 = vsel %vm1437_vm5, %v1409_v13, %v4940_v29  ;;  %v4951_v21 = vld [vmem:[#allocation160_spill] sm:$0xff]  ;;  %v4953_v13 = vld [vmem:[#allocation169_spill] sm:$0xff]  ;;  %v4954_v29 = vld [vmem:[#allocation143_spill] sm:$0xff] }
 0x22e   : > { %v1086_v59 = vpop.permute.xlu0 %1085  ;;  %v1475_v32 = vsel %vm1470_vm6, %v1442_v54, %v4942_v58  ;;  %v4955_v58 = vld [vmem:[#allocation48_spill] sm:$0xff] }
 0x22f   : > { %v3829_v33 = vsel %vm1536_vm8, %v1505_v35, %v1086_v59  ;;  %v1508_v23 = vsel %vm1503_vm7, %v1475_v32, %v3454_v43  ;;  %v4943_v59 = vld [vmem:[#allocation53_spill] sm:$0xff]  ;;  %v4949_v43 = vld [vmem:[#allocation75_spill] sm:$0xff] }
 0x230   : > { %1137 = vrot.lane.b32.xlu2 %v4918_v36, %s2274_s27  ;;  %v1506_v36 = vsel %vm1503_vm7, %v1473_v42, %v4939_v9  ;;  %v1379_v47 = vsel %vm1371_vm3, %v4950_v62, %v4949_v43  ;;  %v4956_v32 = vld [vmem:[#allocation155_spill] sm:$0xff]  ;;  %v226_v43 = vld [vmem:[%s4499_s1 + $0x8] sm:$0xff] }
 0x231   : > { %1199 = vrot.lane.b32.xlu1 %v4934_v44, %s2275_s28  ;;  %v4948_v44 = vld [vmem:[#allocation62_spill] sm:$0xff] }
 0x232   : > { %v1108_v34 = vpop.permute.xlu2 %1107 }
 0x233   : > { %v3850_v53 = vsel %vm1536_vm8, %v3525_v15, %v1108_v34  ;;  %v1088_v37 = vpop.permute.xlu1 %1087  ;;  %v4944_v15 = vld [vmem:[#allocation7_spill] sm:$0xff]  ;;  %v4952_v34 = vld [vmem:[#allocation112_spill] sm:$0xff] }
 0x234   : > { %v3855_v46 = vsel %vm1536_vm8, %v1506_v36, %v1088_v37  ;;  %1279 = vrot.lane.b32.xlu0 %v4941_v60, %s2276_s29  ;;  %v1377_v1 = vsel %vm1371_vm3, %v4944_v15, %v4943_v59  ;;  %v1412_v14 = vsel %vm1404_vm4, %v1379_v47, %v4952_v34  ;;  %v229_v15 = vld [vmem:[%s4499_s1 + $0x20] sm:$0xf]  ;;  %v4961_v34 = vld [vmem:[#allocation121_spill] sm:$0xff] }
 0x235   : > { %v1410_v50 = vsel %vm1404_vm4, %v1377_v1, %v4945_v20  ;;  %v1445_v54 = vsel %vm1437_vm5, %v1412_v14, %v4954_v29  ;;  %v4957_v1 = vld [vmem:[#allocation96_spill] sm:$0xff]  ;;  %2201 = vmatpush.msk.msra.mxu3 %vm1732_vm9, %v229_v15  ;;  %2200 = vmatpush.msk.msra.mxu2 %vm1732_vm9, %v229_v15 }
 0x236   : > { %v1092_v35 = vpop.permute.xlu0 %1091  ;;  %v1443_v26 = vsel %vm1437_vm5, %v1410_v50, %v4947_v49  ;;  %v4958_v20 = vld [vmem:[#allocation80_spill] sm:$0xff]  ;;  %2160 = vmatpush.msk.msra.mxu0 %vm1732_vm9, %v229_v15  ;;  %2199 = vmatpush.msk.msra.mxu1 %vm1732_vm9, %v229_v15 }
 0x237   : > { %v3867_v19 = vsel %vm1536_vm8, %v1508_v23, %v1092_v35  ;;  %v1476_v45 = vsel %vm1470_vm6, %v1443_v26, %v4951_v21  ;;  %v1478_v23 = vsel %vm1470_vm6, %v1445_v54, %v4956_v32  ;;  %v4959_v26 = vld [vmem:[#allocation16_spill] sm:$0xff]  ;;  %v4960_v21 = vld [vmem:[#allocation23_spill] sm:$0xff] }
 0x238   : > { %1217 = vrot.lane.b32.xlu2 %v4946_v52, %s2275_s28  ;;  %v1509_v9 = vsel %vm1503_vm7, %v1476_v45, %v4953_v13  ;;  %v1511_v35 = vsel %vm1503_vm7, %v1478_v23, %v3476_v56  ;;  %v228_v56 = vld [vmem:[%s4499_s1 + $0x18] sm:$0xff]  ;;  %v225_v47 = vld [vmem:[%s4499_s1] sm:$0xff]  ;;  %v4962_v13 = vld [vmem:[#allocation65_spill] sm:$0xff] }
 0x239   : > { %1295 = vrot.lane.b32.xlu1 %v4948_v44, %s2276_s29  ;;  %2204 = vmatpush.msra.mxu3 %v228_v56  ;;  %v227_v44 = vld [vmem:[%s4499_s1 + $0x10] sm:$0xff]  ;;  %v4964_v54 = vld [vmem:[#allocation35_spill] sm:$0xff] }
 0x23a   : > { %v1114_v42 = vpop.permute.xlu2 %1113  ;;  %2203 = vmatpush.msra.mxu2 %v228_v56  ;;  %1748 = vmatpush.msra.mxu0 %v228_v56  ;;  %v4965_v32 = vld [vmem:[#allocation83_spill] sm:$0xff] }
 0x23b   : > { %v3888_v36 = vsel %vm1536_vm8, %v3567_v10, %v1114_v42  ;;  %v1094_v37 = vpop.permute.xlu1 %1093  ;;  %2207 = vmatpush.msra.mxu3 %v227_v44  ;;  %2202 = vmatpush.msra.mxu1 %v228_v56 }
 0x23c   : > { %v3893_v60 = vsel %vm1536_vm8, %v1509_v9, %v1094_v37  ;;  %1233 = vrot.lane.b32.xlu0 %v4955_v58, %s2275_s28  ;;  %2206 = vmatpush.msra.mxu2 %v227_v44  ;;  %v4963_v9 = vld [vmem:[#allocation55_spill] sm:$0xff] }
 0x23d   : > { %1749 = vmatpush.msra.mxu0 %v227_v44  ;;  %2210 = vmatpush.msra.mxu3 %v226_v43 }
 0x23e   : > { %v1098_v59 = vpop.permute.xlu0 %1097  ;;  %2209 = vmatpush.msra.mxu2 %v226_v43  ;;  %2205 = vmatpush.msra.mxu1 %v227_v44 }
 0x23f   : > { %v3902_v10 = vsel %vm1536_vm8, %v1511_v35, %v1098_v59  ;;  %1750 = vmatpush.msra.mxu0 %v226_v43  ;;  %2213 = vmatpush.msra.mxu3 %v225_v47  ;;  %v4967_v59 = vld [vmem:[#allocation165_spill] sm:$0xff] }
 0x240   : > { %1329 = vrot.lane.b32.xlu2 %v4957_v1, %s2276_s29  ;;  %2212 = vmatpush.msra.mxu2 %v225_v47  ;;  %v4968_v1 = vld [vmem:[#allocation25_spill] sm:$0xff] }
 0x241   : > { %1313 = vrot.lane.b32.xlu1 %v4958_v20, %s2276_s29  ;;  %1751 = vmatpush.msra.mxu0 %v225_v47  ;;  %v4969_v20 = vld [vmem:[#allocation18_spill] sm:$0xff] }
 0x242   : > { %v1120_v50 = vpop.permute.xlu2 %1119  ;;  %2208 = vmatpush.msra.mxu1 %v226_v43 }
 0x243   : > { %v3916_v52 = vsel %vm1536_vm8, %v3609_v0, %v1120_v50  ;;  %v3918_v49 = vpop.permute.xlu1 %1099 }
 0x244   : > { %1185 = vrot.lane.b32.xlu0 %v4959_v26, %s2275_s28  ;;  %2211 = vmatpush.msra.mxu1 %v225_v47 }
 0x246   : > { %v1104_v0 = vpop.permute.xlu0 %1103 }
 0x247   : > { %v3930_v62 = vsel %vm1536_vm8, %v3513_v41, %v1104_v0  ;;  %v4970_v0 = vld [vmem:[#allocation54_spill] sm:$0xff] }
 0x248   : > { %1123 = vrot.lane.b32.xlu2 %v4878_v48, %s2274_s27 }
 0x249   : > { %1201 = vrot.lane.b32.xlu1 %v4960_v21, %s2275_s28  ;;  %v4971_v21 = vld [vmem:[#allocation123_spill] sm:$0xff] }
 0x24a   : > { %v1212_v45 = vpop.permute.xlu2 %1211 }
 0x24b   : > { %v1106_v42 = vpop.permute.xlu1 %1105 }
 0x24c   : > { %v3941_v41 = vsel %vm1536_vm8, %v3430_v24, %v1106_v42  ;;  %1139 = vrot.lane.b32.xlu0 %v4961_v34, %s2274_s27  ;;  %v4972_v34 = vld [vmem:[#allocation70_spill] sm:$0xff] }
 0x24e   : > { %v1110_v14 = vpop.permute.xlu0 %1109 }
 0x24f   : > { %v3947_v48 = vsel %vm1536_vm8, %v3555_v40, %v1110_v14  ;;  %v4966_v40 = vld [vmem:[#allocation150_spill] sm:$0xff] }
 0x250   : > { %1297 = vrot.lane.b32.xlu2 %v4962_v13, %s2276_s29  ;;  %v4973_v13 = vld [vmem:[#allocation148_spill] sm:$0xff] }
 0x251   : > { %1281 = vrot.lane.b32.xlu1 %v4963_v9, %s2276_s29  ;;  %v4974_v9 = vld [vmem:[#allocation39_spill] sm:$0xff] }
 0x252   : > { %v1324_v37 = vpop.permute.xlu2 %1323 }
 0x253   : > { %v1112_v29 = vpop.permute.xlu1 %1111 }
 0x254   : > { %v3955_v24 = vsel %vm1536_vm8, %v3452_v30, %v1112_v29  ;;  %1219 = vrot.lane.b32.xlu0 %v4964_v54, %s2275_s28  ;;  %v4975_v54 = vld [vmem:[#allocation88_spill] sm:$0xff] }
 0x256   : > { %v1116_v58 = vpop.permute.xlu0 %1115 }
 0x257   : > { %v1553_v43 = vsel %vm1536_vm8, %v3597_v38, %v1116_v58  ;;  %v4977_v58 = vld [vmem:[#allocation14_spill] sm:$0xff] }
 0x258   : > { %1315 = vrot.lane.b32.xlu2 %v4965_v32, %s2276_s29 }
 0x259   : > { %1235 = vrot.lane.b32.xlu1 %v4966_v40, %s2275_s28  ;;  %v4978_v40 = vld [vmem:[#allocation105_spill] sm:$0xff] }
 0x25a   : > { %v1134_v23 = vpop.permute.xlu2 %1133 }
 0x25b   : > { %v1118_v35 = vpop.permute.xlu1 %1117 }
 0x25c   : > { %1331 = vrot.lane.b32.xlu0 %v4967_v59, %s2276_s29 }
 0x25e   : > { %v1122_v15 = vpop.permute.xlu0 %1121 }
 0x25f   : > { %v3967_v30 = vsel %vm1536_vm8, %v3641_v18, %v1122_v15 }
 0x260   : > { %1203 = vrot.lane.b32.xlu2 %v4968_v1, %s2275_s28 }
 0x261   : > { %1187 = vrot.lane.b32.xlu1 %v4969_v20, %s2275_s28  ;;  %v4979_v20 = vld [vmem:[#allocation144_spill] sm:$0xff] }
 0x262   : > { %v1214_v56 = vpop.permute.xlu2 %1213 }
 0x263   : > { %v1132_v50 = vpop.permute.xlu1 %1131 }
 0x264   : > { %1125 = vrot.lane.b32.xlu0 %v4887_v39, %s2274_s27  ;;  %v1561_v26 = vsel %vm1536_vm8, %v3697_v7, %v1132_v50  ;;  %v1586_v7 = vsel %vm1569_vm11, %v1553_v43, %v1212_v45  ;;  %v4976_v45 = vld [vmem:[#allocation79_spill] sm:$0xff]  ;;  %v4981_v43 = vld [vmem:[#allocation17_spill] sm:$0xff] }
 0x265   : > { %v1380_v32 = vsel %vm1371_vm3, %v4977_v58, %v4976_v45 }
 0x266   : > { %v1228_v44 = vpop.permute.xlu0 %1227  ;;  %v1413_v59 = vsel %vm1404_vm4, %v1380_v32, %v4978_v40  ;;  %v4986_v32 = vld [vmem:[#allocation42_spill] sm:$0xff] }
 0x267   : > { %v1594_v18 = vsel %vm1569_vm11, %v1561_v26, %v1228_v44  ;;  %v1446_v50 = vsel %vm1437_vm5, %v1413_v59, %v4979_v20  ;;  %v4980_v44 = vld [vmem:[#allocation74_spill] sm:$0xff] }
 0x268   : > { %1283 = vrot.lane.b32.xlu2 %v4970_v0, %s2276_s29  ;;  %v1627_v47 = vsel %vm1602_vm10, %v1594_v18, %v1324_v37  ;;  %v1479_v18 = vsel %vm1470_vm6, %v1446_v50, %v4980_v44  ;;  %v4982_v0 = vld [vmem:[#allocation170_spill] sm:$0xff] }
 0x269   : > { %1141 = vrot.lane.b32.xlu1 %v4971_v21, %s2274_s27  ;;  %2185 = vmatmul.msk.f32.vlgmr.msra.gmra.mxu3 %vm1635_vm12, %v1627_v47  ;;  %v1512_v47 = vsel %vm1503_vm7, %v1479_v18, %v4982_v0  ;;  %v4983_v21 = vld [vmem:[#allocation166_spill] sm:$0xff]  ;;  %v4991_v18 = vld [vmem:[#allocation19_spill] sm:$0xff] }
 0x26a   : > { %v1326_v39 = vpop.permute.xlu2 %1325  ;;  %v4990_v20 = vld [vmem:[#allocation86_spill] sm:$0xff] }
 0x26b   : > { %v1308_v42 = vpop.permute.xlu1 %1307 }
 0x26c   : > { %1299 = vrot.lane.b32.xlu0 %v4972_v34, %s2276_s29  ;;  %v1619_v14 = vsel %vm1602_vm10, %v1586_v7, %v1308_v42 }
 0x26d   : > { %2177 = vmatmul.msk.f32.vlgmr.msra.gmra.mxu2 %vm1635_vm12, %v1619_v14  ;;  %v4984_v14 = vld [vmem:[#allocation27_spill] sm:$0xff] }
 0x26e   : > { %v1180_v38 = vpop.permute.xlu0 %1179 }
 0x26f   : > { %v1570_v15 = vsel %vm1569_vm11, %v3678_v3, %v1180_v38  ;;  %v1545_v3 = vsel %vm1536_vm8, %v1512_v47, %v3918_v49 }
 0x270   : > { %1237 = vrot.lane.b32.xlu2 %v4973_v13, %s2275_s28  ;;  %v2243_v13 = vpack.i.bf16 %v4924_v11, %v4870_v12  ;;  %v1554_v12 = vsel %vm1536_vm8, %v3474_v51, %v1118_v35  ;;  %v4988_v35 = vld [vmem:[#allocation6_spill] sm:$0xff] }
 0x271   : > { %1221 = vrot.lane.b32.xlu1 %v4974_v9, %s2275_s28  ;;  %v1562_v9 = vsel %vm1536_vm8, %v3727_v61, %v1134_v23  ;;  %v1587_v45 = vsel %vm1569_vm11, %v1554_v12, %v1214_v56  ;;  %v4985_v61 = vld [vmem:[#allocation56_spill] sm:$0xff]  ;;  %v4998_v12 = vld [vmem:[#allocation21_spill] sm:$0xff] }
 0x272   : > { %v1136_v37 = vpop.permute.xlu2 %1135 }
 0x273   : > { %v1196_v29 = vpop.permute.xlu1 %1195 }
 0x274   : > { %1317 = vrot.lane.b32.xlu0 %v4975_v54, %s2276_s29  ;;  %v1578_v7 = vsel %vm1569_vm11, %v1545_v3, %v1196_v29 }
 0x276   : > { %v1276_v1 = vpop.permute.xlu0 %1275 }
 0x277   : > { %v1603_v26 = vsel %vm1602_vm10, %v1570_v15, %v1276_v1  ;;  %v4989_v1 = vld [vmem:[#allocation34_spill] sm:$0xff] }
 0x278   : > { %1189 = vrot.lane.b32.xlu2 %v4981_v43, %s2275_s28  ;;  %2161 = vmatmul.msk.f32.vlgmr.msra.gmra.mxu0 %vm1635_vm12, %v1603_v26  ;;  %v1563_v43 = vsel %vm1536_vm8, %v3592_v63, %v1136_v37  ;;  %v4993_v63 = vld [vmem:[#allocation59_spill] sm:$0xff] }
 0x279   : > { %1333 = vrot.lane.b32.xlu1 %v4983_v21, %s2276_s29 }
 0x27a   : > { %v1216_v42 = vpop.permute.xlu2 %1215 }
 0x27b   : > { %v1292_v34 = vpop.permute.xlu1 %1291 }
 0x27c   : > { %1205 = vrot.lane.b32.xlu0 %v4984_v14, %s2275_s28  ;;  %v1611_v38 = vsel %vm1602_vm10, %v1578_v7, %v1292_v34  ;;  %v1588_v7 = vsel %vm1569_vm11, %v3916_v52, %v1216_v42  ;;  %v4994_v14 = vld [vmem:[#allocation41_spill] sm:$0xff] }
 0x27d   : > { %2169 = vmatmul.msk.f32.vlgmr.msra.gmra.mxu1 %vm1635_vm12, %v1611_v38  ;;  %v4995_v38 = vld [vmem:[#allocation71_spill] sm:$0xff] }
 0x27e   : > { %v1230_v54 = vpop.permute.xlu0 %1229 }
 0x27f   : > { %v1595_v49 = vsel %vm1569_vm11, %v1562_v9, %v1230_v54  ;;  %v4996_v54 = vld [vmem:[#allocation89_spill] sm:$0xff] }
 0x280   : > { %2244 = vrot.lane.b32.xlu2 %v2243_v13, %s2274_s27  ;;  %v1628_v29 = vsel %vm1602_vm10, %v1595_v49, %v1326_v39 }
 0x281   : > { %1127 = vrot.lane.b32.xlu1 %v4847_v2, %s2274_s27  ;;  %2186 = vmatmul.msk.f32.gmra.mxu3 %vm1635_vm12, %v1628_v29  ;;  %v4987_v2 = vld [vmem:[#allocation68_spill] sm:$0xff] }
 0x282   : > { %v1328_v11 = vpop.permute.xlu2 %1327  ;;  %v4997_v29 = vld [vmem:[#allocation28_spill] sm:$0xff] }
 0x283   : > { %v1310_v58 = vpop.permute.xlu1 %1309 }
 0x284   : > { %1285 = vrot.lane.b32.xlu0 %v4985_v61, %s2276_s29  ;;  %v1620_v23 = vsel %vm1602_vm10, %v1587_v45, %v1310_v58  ;;  %v4999_v58 = vld [vmem:[#allocation58_spill] sm:$0xff] }
 0x285   : > { %2178 = vmatmul.msk.f32.gmra.mxu2 %vm1635_vm12, %v1620_v23 }
 0x286   : > { %v1182_v39 = vpop.permute.xlu0 %1181 }
 0x287   : > { %v1571_v56 = vsel %vm1569_vm11, %v3829_v33, %v1182_v39 }
 0x288   : > { %1223 = vrot.lane.b32.xlu2 %v4986_v32, %s2275_s28 }
 0x289   : > { %1301 = vrot.lane.b32.xlu1 %v4987_v2, %s2276_s29 }
 0x28a   : > { %v1138_v40 = vpop.permute.xlu2 %1137 }
 0x28b   : > { %v1198_v51 = vpop.permute.xlu1 %1197  ;;  %v1564_v23 = vsel %vm1536_vm8, %v3741_v16, %v1138_v40 }
 0x28c   : > { %2249 = vrot.lane.b32.xlu0 %v4988_v35, %s2275_s28  ;;  %v1579_v26 = vsel %vm1569_vm11, %v3812_v55, %v1198_v51  ;;  %v4992_v55 = vld [vmem:[#allocation26_spill] sm:$0xff]  ;;  %v5000_v51 = vld [vmem:[#allocation76_spill] sm:$0xff] }
 0x28e   : > { %v1278_v59 = vpop.permute.xlu0 %1277 }
 0x28f   : > { %v1604_v15 = vsel %vm1602_vm10, %v1571_v56, %v1278_v59 }
 0x290   : > { %2254 = vrot.lane.b32.xlu2 %v4989_v1, %s2276_s29  ;;  %2162 = vmatmul.msk.f32.gmra.mxu0 %vm1635_vm12, %v1604_v15 }
 0x291   : > { %1319 = vrot.lane.b32.xlu1 %v4990_v20, %s2276_s29 }
 0x292   : > { %v1218_v50 = vpop.permute.xlu2 %1217 }
 0x293   : > { %v1294_v44 = vpop.permute.xlu1 %1293 }
 0x294   : > { %1191 = vrot.lane.b32.xlu0 %v4991_v18, %s2275_s28  ;;  %v1612_v33 = vsel %vm1602_vm10, %v1579_v26, %v1294_v44 }
 0x295   : > { %2170 = vmatmul.msk.f32.gmra.mxu1 %vm1635_vm12, %v1612_v33 }
 0x296   : > { %v1232_v0 = vpop.permute.xlu0 %1231 }
 0x297   : > { %v1596_v47 = vsel %vm1569_vm11, %v1563_v43, %v1232_v0 }
 0x298   : > { %1129 = vrot.lane.b32.xlu2 %v4895_v6, %s2274_s27  ;;  %v1629_v21 = vsel %vm1602_vm10, %v1596_v47, %v1328_v11 }
 0x299   : > { %1207 = vrot.lane.b32.xlu1 %v4992_v55, %s2275_s28  ;;  %2187 = vmatmul.msk.f32.gmra.mxu3 %vm1635_vm12, %v1629_v21 }
 0x29a   : > { %v1330_v3 = vpop.permute.xlu2 %1329 }
 0x29b   : > { %v1312_v34 = vpop.permute.xlu1 %1311 }
 0x29c   : > { %1287 = vrot.lane.b32.xlu0 %v4993_v63, %s2276_s29  ;;  %v1621_v37 = vsel %vm1602_vm10, %v1588_v7, %v1312_v34 }
 0x29d   : > { %2179 = vmatmul.msk.f32.gmra.mxu2 %vm1635_vm12, %v1621_v37 }
 0x29e   : > { %v1184_v6 = vpop.permute.xlu0 %1183 }
 0x29f   : > { %v1572_v52 = vsel %vm1569_vm11, %v3855_v46, %v1184_v6 }
 0x2a0   : > { %1225 = vrot.lane.b32.xlu2 %v4994_v14, %s2275_s28 }
 0x2a1   : > { %1303 = vrot.lane.b32.xlu1 %v4995_v38, %s2276_s29 }
 0x2a2   : > { %v1124_v13 = vpop.permute.xlu2 %1123 }
 0x2a3   : > { %v1200_v9 = vpop.permute.xlu1 %1199  ;;  %v1557_v18 = vsel %vm1536_vm8, %v3508_v25, %v1124_v13 }
 0x2a4   : > { %1321 = vrot.lane.b32.xlu0 %v4996_v54, %s2276_s29  ;;  %v1580_v11 = vsel %vm1569_vm11, %v3930_v62, %v1200_v9  ;;  %v1589_v62 = vsel %vm1569_vm11, %v3967_v30, %v1218_v50 }
 0x2a6   : > { %v1280_v42 = vpop.permute.xlu0 %1279 }
 0x2a7   : > { %v1605_v49 = vsel %vm1602_vm10, %v1572_v52, %v1280_v42 }
 0x2a8   : > { %1209 = vrot.lane.b32.xlu2 %v4997_v29, %s2275_s28  ;;  %2163 = vmatmul.msk.f32.gmra.mxu0 %vm1635_vm12, %v1605_v49 }
 0x2a9   : > { %1193 = vrot.lane.b32.xlu1 %v4998_v12, %s2275_s28 }
 0x2aa   : > { %v1298_v61 = vpop.permute.xlu2 %1297 }
 0x2ab   : > { %v1296_v45 = vpop.permute.xlu1 %1295 }
 0x2ac   : > { %1289 = vrot.lane.b32.xlu0 %v4999_v58, %s2276_s29  ;;  %v1613_v46 = vsel %vm1602_vm10, %v1580_v11, %v1296_v45 }
 0x2ad   : > { %2171 = vmatmul.msk.f32.gmra.mxu1 %vm1635_vm12, %v1613_v46 }
 0x2ae   : > { %v1234_v39 = vpop.permute.xlu0 %1233 }
 0x2af   : > { %v1597_v32 = vsel %vm1569_vm11, %v1564_v23, %v1234_v39 }
 0x2b0   : > { %v1630_v2 = vsel %vm1602_vm10, %v1597_v32, %v1330_v3 }
 0x2b1   : > { %1305 = vrot.lane.b32.xlu1 %v5000_v51, %s2276_s29  ;;  %2188 = vmatmul.msk.f32.gmra.mxu3 %vm1635_vm12, %v1630_v2 }
 0x2b2   : > { %v1316_v16 = vpop.permute.xlu2 %1315 }
 0x2b3   : > { %v1314_v35 = vpop.permute.xlu1 %1313 }
 0x2b4   : > { %v1622_v56 = vsel %vm1602_vm10, %v1589_v62, %v1314_v35 }
 0x2b5   : > { %2180 = vmatmul.msk.f32.gmra.mxu2 %vm1635_vm12, %v1622_v56 }
 0x2b6   : > { %v1186_v59 = vpop.permute.xlu0 %1185 }
 0x2b7   : > { %v1573_v30 = vsel %vm1569_vm11, %v3722_v57, %v1186_v59 }
 0x2ba   : > { %v1204_v26 = vpop.permute.xlu2 %1203 }
 0x2bb   : > { %v1202_v40 = vpop.permute.xlu1 %1201 }
 0x2bc   : > { %v1581_v15 = vsel %vm1569_vm11, %v3941_v41, %v1202_v40 }
 0x2bd   : > { %v1614_v1 = vsel %vm1602_vm10, %v1581_v15, %v1298_v61 }
 0x2be   : > { %2172 = vmatmul.msk.f32.gmra.mxu1 %vm1635_vm12, %v1614_v1  ;;  %v1140_v20 = vpop.permute.xlu0 %1139 }
 0x2bf   : > { %v1565_v57 = vsel %vm1536_vm8, %v3771_v22, %v1140_v20  ;;  %v1582_v22 = vsel %vm1569_vm11, %v3850_v53, %v1204_v26 }
 0x2c2   : > { %v1284_v0 = vpop.permute.xlu2 %1283 }
 0x2c3   : > { %v1282_v50 = vpop.permute.xlu1 %1281 }
 0x2c4   : > { %v1606_v44 = vsel %vm1602_vm10, %v1573_v30, %v1282_v50 }
 0x2c5   : > { %2164 = vmatmul.msk.f32.gmra.mxu0 %vm1635_vm12, %v1606_v44 }
 0x2c6   : > { %v1220_v33 = vpop.permute.xlu0 %1219 }
 0x2c7   : > { %v1590_v41 = vsel %vm1569_vm11, %v1557_v18, %v1220_v33 }
 0x2c8   : > { %v1623_v43 = vsel %vm1602_vm10, %v1590_v41, %v1316_v16 }
 0x2c9   : > { %2181 = vmatmul.msk.f32.gmra.mxu2 %vm1635_vm12, %v1623_v43 }
 0x2ca   : > { %v1238_v34 = vpop.permute.xlu2 %1237 }
 0x2cb   : > { %v1236_v47 = vpop.permute.xlu1 %1235 }
 0x2cc   : > { %v1598_v21 = vsel %vm1569_vm11, %v1565_v57, %v1236_v47 }
 0x2ce   : > { %v1332_v55 = vpop.permute.xlu0 %1331 }
 0x2cf   : > { %v1631_v3 = vsel %vm1602_vm10, %v1598_v21, %v1332_v55 }
 0x2d0   : > { %2189 = vmatmul.msk.f32.gmra.mxu3 %vm1635_vm12, %v1631_v3 }
 0x2d2   : > { %v1190_v38 = vpop.permute.xlu2 %1189 }
 0x2d3   : > { %v1188_v25 = vpop.permute.xlu1 %1187  ;;  %v1575_v23 = vsel %vm1569_vm11, %v3893_v60, %v1190_v38 }
 0x2d4   : > { %v1574_v7 = vsel %vm1569_vm11, %v3867_v19, %v1188_v25 }
 0x2d5   : > { %v1607_v63 = vsel %vm1602_vm10, %v1574_v7, %v1284_v0 }
 0x2d6   : > { %2165 = vmatmul.msk.f32.gmra.mxu0 %vm1635_vm12, %v1607_v63  ;;  %v1126_v37 = vpop.permute.xlu0 %1125 }
 0x2d7   : > { %v1558_v19 = vsel %vm1536_vm8, %v3653_v17, %v1126_v37 }
 0x2da   : > { %v2245_v53 = vpop.permute.xlu2 %2244 }
 0x2db   : > { %v1142_v6 = vpop.permute.xlu1 %1141  ;;  %v2246_v35 = vunpack.i.l.bf16 %v2245_v53  ;;  %v2247_v20 = vunpack.i.h.bf16 %v2245_v53 }
 0x2dc   : > { %v1566_v49 = vsel %vm1536_vm8, %v3636_v31, %v1142_v6 }
 0x2dd   : > { %v1599_v29 = vsel %vm1569_vm11, %v1566_v49, %v1238_v34  ;;  %v1568_v41 = vsel %vm1536_vm8, %v3817_v5, %v2247_v20 }
 0x2de   : > { %v1300_v14 = vpop.permute.xlu0 %1299 }
 0x2df   : > { %v1615_v13 = vsel %vm1602_vm10, %v1582_v22, %v1300_v14 }
 0x2e0   : > { %2173 = vmatmul.msk.f32.gmra.mxu1 %vm1635_vm12, %v1615_v13 }
 0x2e2   : > { %v1224_v58 = vpop.permute.xlu2 %1223 }
 0x2e3   : > { %v1222_v9 = vpop.permute.xlu1 %1221 }
 0x2e4   : > { %v1591_v54 = vsel %vm1569_vm11, %v1558_v19, %v1222_v9 }
 0x2e6   : > { %v1318_v52 = vpop.permute.xlu0 %1317 }
 0x2e7   : > { %v1624_v42 = vsel %vm1602_vm10, %v1591_v54, %v1318_v52 }
 0x2e8   : > { %2182 = vmatmul.msk.f32.gmra.mxu2 %vm1635_vm12, %v1624_v42 }
 0x2ea   : > { %v2255_v56 = vpop.permute.xlu2 %2254 }
 0x2eb   : > { %v1334_v17 = vpop.permute.xlu1 %1333  ;;  %v2256_v59 = vunpack.i.l.bf16 %v2255_v56 }
 0x2ec   : > { %v4147_v12 = vpop.f32.mrf.mxu3  ;;  %v1632_v11 = vsel %vm1602_vm10, %v1599_v29, %v1334_v17 }
 0x2ed   : > { %1873 = vst.msk [vmem:[%s4144_s20 + $0xc0] sm:$0xff] %vm1404_vm4, %v4147_v12  ;;  %2190 = vmatmul.msk.f32.gmra.mxu3 %vm1635_vm12, %v1632_v11 }
 0x2ee   : > { %v1206_v31 = vpop.permute.xlu0 %1205 }
 0x2ef   : > { %v1583_v51 = vsel %vm1569_vm11, %v3947_v48, %v1206_v31  ;;  %v1567_v48 = vsel %vm1536_vm8, %v3787_v27, %v2246_v35 }
 0x2f0   : > { %v4154_v45 = vpop.f32.mrf.mxu2 }
 0x2f1   : > { %1865 = vst.msk [vmem:[%s4144_s20 + $0x80] sm:$0xff] %vm1404_vm4, %v4154_v45 }
 0x2f2   : > { %v1130_v47 = vpop.permute.xlu2 %1129 }
 0x2f3   : > { %v1128_v46 = vpop.permute.xlu1 %1127  ;;  %v1560_v6 = vsel %vm1536_vm8, %v3550_v8, %v1130_v47 }
 0x2f4   : > { %v1559_v15 = vsel %vm1536_vm8, %v3683_v28, %v1128_v46  ;;  %v2257_v28 = vunpack.i.h.bf16 %v2255_v56 }
 0x2f5   : > { %v4159_v61 = vpop.f32.mrf.mxu0  ;;  %v1592_v44 = vsel %vm1569_vm11, %v1559_v15, %v1224_v58 }
 0x2f6   : > { %1849 = vst.msk [vmem:[%s4144_s20] sm:$0xff] %vm1404_vm4, %v4159_v61  ;;  %v1286_v39 = vpop.permute.xlu0 %1285 }
 0x2f7   : > { %v1608_v32 = vsel %vm1602_vm10, %v1575_v23, %v1286_v39 }
 0x2f8   : > { %2166 = vmatmul.msk.f32.gmra.mxu0 %vm1635_vm12, %v1608_v32 }
 0x2fa   : > { %v4168_v2 = vpop.f32.mrf.mxu1  ;;  %v1226_v34 = vpop.permute.xlu2 %1225 }
 0x2fb   : > { %1857 = vst.msk [vmem:[%s4144_s20 + $0x40] sm:$0xff] %vm1404_vm4, %v4168_v2  ;;  %v1302_v62 = vpop.permute.xlu1 %1301  ;;  %v1593_v22 = vsel %vm1569_vm11, %v1560_v6, %v1226_v34 }
 0x2fc   : > { %v1616_v60 = vsel %vm1602_vm10, %v1583_v51, %v1302_v62 }
 0x2fd   : > { %2174 = vmatmul.msk.f32.gmra.mxu1 %vm1635_vm12, %v1616_v60 }
 0x2fe   : > { %v2250_v16 = vpop.permute.xlu0 %2249 }
 0x2ff   : > { %v2251_v40 = vunpack.i.l.bf16 %v2250_v16  ;;  %v2252_v30 = vunpack.i.h.bf16 %v2250_v16 }
 0x301   : > { %v1600_v1 = vsel %vm1569_vm11, %v1567_v48, %v2251_v40  ;;  %v1601_v43 = vsel %vm1569_vm11, %v1568_v41, %v2252_v30 }
 0x302   : > { %v1633_v26 = vsel %vm1602_vm10, %v1600_v1, %v2256_v59  ;;  %v1634_v57 = vsel %vm1602_vm10, %v1601_v43, %v2257_v28  ;;  %v1210_v54 = vpop.permute.xlu2 %1209 }
 0x303   : > { %v1320_v50 = vpop.permute.xlu1 %1319  ;;  %2191 = vmatmul.msk.f32.gmra.mxu3 %vm1635_vm12, %v1633_v26  ;;  %v1585_v42 = vsel %vm1569_vm11, %v3888_v36, %v1210_v54 }
 0x304   : > { %v1625_v18 = vsel %vm1602_vm10, %v1592_v44, %v1320_v50  ;;  %v4186_v33 = vpop.f32.mrf.mxu3 }
 0x305   : > { %2183 = vmatmul.msk.f32.gmra.mxu2 %vm1635_vm12, %v1625_v18  ;;  %1874 = vst.msk [vmem:[%s4144_s20 + $0xc8] sm:$0xff] %vm1404_vm4, %v4186_v33 }
 0x306   : > { %v1192_v27 = vpop.permute.xlu0 %1191 }
 0x307   : > { %v1576_v3 = vsel %vm1569_vm11, %v3766_v4, %v1192_v27 }
 0x308   : > { %v4195_v0 = vpop.f32.mrf.mxu2 }
 0x309   : > { %1866 = vst.msk [vmem:[%s4144_s20 + $0x88] sm:$0xff] %vm1404_vm4, %v4195_v0 }
 0x30b   : > { %v1208_v21 = vpop.permute.xlu1 %1207  ;;  %2192 = vmatmul.msk.f32.gmra.mxu3 %vm1635_vm12, %v1634_v57 }
 0x30c   : > { %v1584_v63 = vsel %vm1569_vm11, %v3955_v24, %v1208_v21 }
 0x30d   : > { %v4202_v55 = vpop.f32.mrf.mxu0 }
 0x30e   : > { %1850 = vst.msk [vmem:[%s4144_s20 + $0x8] sm:$0xff] %vm1404_vm4, %v4202_v55  ;;  %v1288_v5 = vpop.permute.xlu0 %1287 }
 0x30f   : > { %v1609_v25 = vsel %vm1602_vm10, %v1576_v3, %v1288_v5 }
 0x310   : > { %2167 = vmatmul.msk.f32.gmra.mxu0 %vm1635_vm12, %v1609_v25 }
 0x312   : > { %v4211_v7 = vpop.f32.mrf.mxu1 }
 0x313   : > { %1858 = vst.msk [vmem:[%s4144_s20 + $0x48] sm:$0xff] %vm1404_vm4, %v4211_v7  ;;  %v1304_v37 = vpop.permute.xlu1 %1303 }
 0x314   : > { %v1617_v4 = vsel %vm1602_vm10, %v1584_v63, %v1304_v37 }
 0x315   : > { %2175 = vmatmul.msk.f32.gmra.mxu1 %vm1635_vm12, %v1617_v4 }
 0x316   : > { %v1322_v14 = vpop.permute.xlu0 %1321 }
 0x317   : > { %v1626_v38 = vsel %vm1602_vm10, %v1593_v22, %v1322_v14 }
 0x318   : > { %2184 = vmatmul.msk.f32.gmra.mxu2 %vm1635_vm12, %v1626_v38 }
 0x31b   : > { %v1194_v24 = vpop.permute.xlu1 %1193 }
 0x31c   : > { %v4225_v13 = vpop.f32.mrf.mxu3  ;;  %v1577_v8 = vsel %vm1569_vm11, %v3902_v10, %v1194_v24 }
 0x31d   : > { %1875 = vst.msk [vmem:[%s4144_s20 + $0xd0] sm:$0xff] %vm1404_vm4, %v4225_v13 }
 0x31e   : > { %v1290_v9 = vpop.permute.xlu0 %1289 }
 0x31f   : > { %v1610_v19 = vsel %vm1602_vm10, %v1577_v8, %v1290_v9 }
 0x320   : > { %v4233_v52 = vpop.f32.mrf.mxu2  ;;  %2168 = vmatmul.msk.f32.gmra.mxu0 %vm1635_vm12, %v1610_v19 }
 0x321   : > { %1867 = vst.msk [vmem:[%s4144_s20 + $0x90] sm:$0xff] %vm1404_vm4, %v4233_v52 }
 0x323   : > { %v1306_v49 = vpop.permute.xlu1 %1305 }
 0x324   : > { %v1618_v10 = vsel %vm1602_vm10, %v1585_v42, %v1306_v49 }
 0x325   : > { %2176 = vmatmul.msk.f32.gmra.mxu1 %vm1635_vm12, %v1618_v10  ;;  %v4243_v53 = vpop.f32.mrf.mxu0 }
 0x326   : > { %1851 = vst.msk [vmem:[%s4144_s20 + $0x10] sm:$0xff] %vm1404_vm4, %v4243_v53 }
 0x32a   : > { %v4248_v17 = vpop.f32.mrf.mxu1 }
 0x32b   : > { %1859 = vst.msk [vmem:[%s4144_s20 + $0x50] sm:$0xff] %vm1404_vm4, %v4248_v17 }
 0x334   : > { %v4253_v36 = vpop.f32.mrf.mxu3 }
 0x335   : > { %1876 = vst.msk [vmem:[%s4144_s20 + $0xd8] sm:$0xff] %vm1404_vm4, %v4253_v36 }
 0x338   : > { %v4258_v29 = vpop.f32.mrf.mxu2 }
 0x339   : > { %1868 = vst.msk [vmem:[%s4144_s20 + $0x98] sm:$0xff] %vm1404_vm4, %v4258_v29 }
 0x33b   : > { %v4263_v11 = vpop.f32.mrf.mxu1 }
 0x33c   : > { %1860 = vst.msk [vmem:[%s4144_s20 + $0x58] sm:$0xff] %vm1404_vm4, %v4263_v11 }
 0x342   : > { %v1762_v31 = vpop.f32.mrf.mxu0 }
 0x343   : > { %1852 = vst.msk [vmem:[%s4144_s20 + $0x18] sm:$0xff] %vm1404_vm4, %v1762_v31 }
 0x34c   : > { %v4270_v58 = vpop.f32.mrf.mxu2 }
 0x34d   : > { %1869 = vst.msk [vmem:[%s4144_s20 + $0xa0] sm:$0xff] %vm1404_vm4, %v4270_v58 }
 0x353   : > { %v1765_v46 = vpop.f32.mrf.mxu0  ;;  %v4275_v23 = vpop.f32.mrf.mxu3 }
 0x354   : > { %1853 = vst.msk [vmem:[%s4144_s20 + $0x20] sm:$0xff] %vm1404_vm4, %v1765_v46 }
 0x355   : > { %1877 = vst.msk [vmem:[%s4144_s20 + $0xe0] sm:$0xff] %vm1404_vm4, %v4275_v23 }
 0x35d   : > { %v4282_v39 = vpop.f32.mrf.mxu1 }
 0x35e   : > { %1861 = vst.msk [vmem:[%s4144_s20 + $0x60] sm:$0xff] %vm1404_vm4, %v4282_v39 }
 0x36b   : > { %v4287_v32 = vpop.f32.mrf.mxu2 }
 0x36c   : > { %1870 = vst.msk [vmem:[%s4144_s20 + $0xa8] sm:$0xff] %vm1404_vm4, %v4287_v32 }
 0x370   : > { %v4292_v51 = vpop.f32.mrf.mxu3 }
 0x371   : > { %1878 = vst.msk [vmem:[%s4144_s20 + $0xe8] sm:$0xff] %vm1404_vm4, %v4292_v51 }
 0x375   : > { %v1768_v62 = vpop.f32.mrf.mxu0 }
 0x376   : > { %1854 = vst.msk [vmem:[%s4144_s20 + $0x28] sm:$0xff] %vm1404_vm4, %v1768_v62 }
 0x37a   : > { %v4299_v35 = vpop.f32.mrf.mxu1 }
 0x37b   : > { %1862 = vst.msk [vmem:[%s4144_s20 + $0x68] sm:$0xff] %vm1404_vm4, %v4299_v35 }
 0x386   : > { %v4304_v60 = vpop.f32.mrf.mxu3 }
 0x387   : > { %1879 = vst.msk [vmem:[%s4144_s20 + $0xf0] sm:$0xff] %vm1404_vm4, %v4304_v60 }
 0x388   : > { %v4309_v56 = vpop.f32.mrf.mxu2 }
 0x389   : > { %1871 = vst.msk [vmem:[%s4144_s20 + $0xb0] sm:$0xff] %vm1404_vm4, %v4309_v56 }
 0x38d   : > { %v1771_v59 = vpop.f32.mrf.mxu0 }
 0x38e   : > { %1855 = vst.msk [vmem:[%s4144_s20 + $0x30] sm:$0xff] %vm1404_vm4, %v1771_v59  ;;  %v4316_v16 = vpop.f32.mrf.mxu3 }
 0x38f   : > { %1880 = vst.msk [vmem:[%s4144_s20 + $0xf8] sm:$0xff] %vm1404_vm4, %v4316_v16 }
 0x392   : > { %v4321_v40 = vpop.f32.mrf.mxu1 }
 0x393   : > { %1863 = vst.msk [vmem:[%s4144_s20 + $0x70] sm:$0xff] %vm1404_vm4, %v4321_v40 }
 0x39b   : > { %v4326_v15 = vpop.f32.mrf.mxu2 }
 0x39c   : > { %1872 = vst.msk [vmem:[%s4144_s20 + $0xb8] sm:$0xff] %vm1404_vm4, %v4326_v15 }
 0x39d   : > { %v1774_v48 = vpop.f32.mrf.mxu0 }
 0x39e   : > { %1856 = vst.msk [vmem:[%s4144_s20 + $0x38] sm:$0xff] %vm1404_vm4, %v1774_v48 }
 0x39f   : > { %1884 = sbr.rel (%p2193_p4) target bundleno = 935 (0x3a7), region = 32 }
 0x3a2   : > { %v4333_v1 = vpop.f32.mrf.mxu1 }
 0x3a3   : > { %1864 = vst.msk [vmem:[%s4144_s20 + $0x78] sm:$0xff] %vm1404_vm4, %v4333_v1 }
 0x3a4   : > { %vm1885_vm13 = vcmask 57344   ;;  %v2277_v20 = vmov 0.0  }
 0x3a5   : > { %1886 = vst.msk [vmem:[#allocation2] sm:$0x1] %vm1885_vm13, %v2277_v20 }
 0x3a6   : > { %1887 = vst.msk [vmem:[#allocation3] sm:$0x1] %vm1885_vm13, %v2277_v20 }
 0x3a7 PF: > { %v1889_v26 = vsel %vm1404_vm4, %v4159_v61, 0.0  ;;  %v1890_v30 = vsel %vm1404_vm4, %v4202_v55, 0.0  ;;  %v1892_v50 = vsel %vm1404_vm4, %v4243_v53, 0.0  ;;  %v1894_v18 = vsel %vm1404_vm4, %v1762_v31, 0.0  ;;  %p2194_p5 = scmp.ne.s32.totalorder %s2310_s16, 1 }
 0x3a8   : > { %v1891_v44 = vadd.f32 %v1890_v30, %v1889_v26  ;;  %v1896_v27 = vsel %vm1404_vm4, %v1765_v46, 0.0  ;;  %v1898_v43 = vsel %vm1404_vm4, %v1768_v62, 0.0  ;;  %v1900_v57 = vsel %vm1404_vm4, %v1771_v59, 0.0 }
 0x3a9   : > { %v1962_v21 = vmul.f32 %v4159_v61, %v4159_v61  ;;  %v1963_v5 = vmul.f32 %v4202_v55, %v4202_v55  ;;  %v1964_v25 = vmul.f32 %v4243_v53, %v4243_v53  ;;  %v1902_v34 = vsel %vm1404_vm4, %v1774_v48, 0.0 }
 0x3aa   : > { %v1893_v28 = vadd.f32 %v1892_v50, %v1891_v44  ;;  %v1965_v37 = vmul.f32 %v1762_v31, %v1762_v31  ;;  %v1904_v4 = vsel %vm1404_vm4, %v4168_v2, 0.0  ;;  %v1966_v14 = vmul.f32 %v1765_v46, %v1765_v46 }
 0x3ab   : > { %v1994_v6 = vsel %vm1404_vm4, %v1962_v21, 0.0  ;;  %v1995_v61 = vsel %vm1404_vm4, %v1963_v5, 0.0  ;;  %v1997_v38 = vsel %vm1404_vm4, %v1964_v25, 0.0  ;;  %v1906_v55 = vsel %vm1404_vm4, %v4211_v7, 0.0 }
 0x3ac   : > { %v1895_v41 = vadd.f32 %v1894_v18, %v1893_v28  ;;  %v1996_v24 = vadd.f32 %v1995_v61, %v1994_v6  ;;  %v1967_v9 = vmul.f32 %v1768_v62, %v1768_v62  ;;  %v1999_v19 = vsel %vm1404_vm4, %v1965_v37, 0.0 }
 0x3ad   : > { %v1908_v54 = vsel %vm1404_vm4, %v4248_v17, 0.0  ;;  %v1968_v10 = vmul.f32 %v1771_v59, %v1771_v59  ;;  %v2001_v53 = vsel %vm1404_vm4, %v1966_v14, 0.0  ;;  %v1910_v31 = vsel %vm1404_vm4, %v4263_v11, 0.0 }
 0x3ae   : > { %v1897_v47 = vadd.f32 %v1896_v27, %v1895_v41  ;;  %v1998_v42 = vadd.f32 %v1997_v38, %v1996_v24  ;;  %v1969_v26 = vmul.f32 %v1774_v48, %v1774_v48  ;;  %v2003_v30 = vsel %vm1404_vm4, %v1967_v9, 0.0 }
 0x3af   : > { %v1912_v62 = vsel %vm1404_vm4, %v4282_v39, 0.0  ;;  %v1970_v18 = vmul.f32 %v4168_v2, %v4168_v2  ;;  %v2005_v59 = vsel %vm1404_vm4, %v1968_v10, 0.0  ;;  %v1914_v28 = vsel %vm1404_vm4, %v4299_v35, 0.0 }
 0x3b0   : > { %v1899_v3 = vadd.f32 %v1898_v43, %v1897_v47  ;;  %v2000_v46 = vadd.f32 %v1999_v19, %v1998_v42  ;;  %v1971_v48 = vmul.f32 %v4211_v7, %v4211_v7  ;;  %v2007_v43 = vsel %vm1404_vm4, %v1969_v26, 0.0 }
 0x3b1   : > { %v1916_v47 = vsel %vm1404_vm4, %v4321_v40, 0.0  ;;  %v1972_v2 = vmul.f32 %v4248_v17, %v4248_v17  ;;  %v1918_v5 = vsel %vm1404_vm4, %v4333_v1, 0.0  ;;  %v1973_v7 = vmul.f32 %v4263_v11, %v4263_v11 }
 0x3b2   : > { %v1901_v63 = vadd.f32 %v1900_v57, %v1899_v3  ;;  %v2002_v50 = vadd.f32 %v2001_v53, %v2000_v46  ;;  %v2009_v3 = vsel %vm1404_vm4, %v1970_v18, 0.0  ;;  %v1920_v37 = vsel %vm1404_vm4, %v4154_v45, 0.0 }
 0x3b3   : > { %v1974_v17 = vmul.f32 %v4282_v39, %v4282_v39  ;;  %v1922_v14 = vsel %vm1404_vm4, %v4195_v0, 0.0  ;;  %v1975_v11 = vmul.f32 %v4299_v35, %v4299_v35  ;;  %v1924_v24 = vsel %vm1404_vm4, %v4233_v52, 0.0 }
 0x3b4   : > { %v1903_v22 = vadd.f32 %v1902_v34, %v1901_v63  ;;  %v2004_v27 = vadd.f32 %v2003_v30, %v2002_v50  ;;  %v2011_v63 = vsel %vm1404_vm4, %v1971_v48, 0.0  ;;  %v1976_v39 = vmul.f32 %v4321_v40, %v4321_v40 }
 0x3b5   : > { %v2017_v19 = vsel %vm1404_vm4, %v1974_v17, 0.0  ;;  %v1977_v35 = vmul.f32 %v4333_v1, %v4333_v1  ;;  %v2019_v10 = vsel %vm1404_vm4, %v1975_v11, 0.0  ;;  %v1928_v53 = vsel %vm1404_vm4, %v4270_v58, 0.0 }
 0x3b6   : > { %v1905_v8 = vadd.f32 %v1904_v4, %v1903_v22  ;;  %v2006_v57 = vadd.f32 %v2005_v59, %v2004_v27  ;;  %v2013_v22 = vsel %vm1404_vm4, %v1972_v2, 0.0  ;;  %v1978_v40 = vmul.f32 %v4154_v45, %v4154_v45 }
 0x3b7   : > { %v1930_v26 = vsel %vm1404_vm4, %v4287_v32, 0.0  ;;  %v1979_v1 = vmul.f32 %v4195_v0, %v4195_v0  ;;  %v2023_v50 = vsel %vm1404_vm4, %v1977_v35, 0.0  ;;  %v1980_v45 = vmul.f32 %v4233_v52, %v4233_v52 }
 0x3b8   : > { %v1907_v49 = vadd.f32 %v1906_v55, %v1905_v8  ;;  %v2008_v25 = vadd.f32 %v2007_v43, %v2006_v57  ;;  %v2015_v55 = vsel %vm1404_vm4, %v1973_v7, 0.0  ;;  %v1934_v27 = vsel %vm1404_vm4, %v4326_v15, 0.0 }
 0x3b9   : > { %v1981_v0 = vmul.f32 %v4258_v29, %v4258_v29  ;;  %v2027_v43 = vsel %vm1404_vm4, %v1979_v1, 0.0  ;;  %v1982_v52 = vmul.f32 %v4270_v58, %v4270_v58  ;;  %v2029_v2 = vsel %vm1404_vm4, %v1980_v45, 0.0 }
 0x3ba   : > { %v1909_v20 = vadd.f32 %v1908_v54, %v1907_v49  ;;  %v2010_v4 = vadd.f32 %v2009_v3, %v2008_v25  ;;  %v1926_v54 = vsel %vm1404_vm4, %v4258_v29, 0.0  ;;  %v1938_v3 = vsel %vm1404_vm4, %v4186_v33, 0.0 }
 0x3bb   : > { %v1983_v29 = vmul.f32 %v4287_v32, %v4287_v32  ;;  %v1940_v7 = vsel %vm1404_vm4, %v4225_v13, 0.0  ;;  %v1984_v58 = vmul.f32 %v4309_v56, %v4309_v56  ;;  %v1985_v32 = vmul.f32 %v4326_v15, %v4326_v15 }
 0x3bc   : > { %v1911_v44 = vadd.f32 %v1910_v31, %v1909_v20  ;;  %v2012_v61 = vadd.f32 %v2011_v63, %v2010_v4  ;;  %v2021_v20 = vsel %vm1404_vm4, %v1976_v39, 0.0  ;;  %v2033_v4 = vsel %vm1404_vm4, %v1982_v52, 0.0 }
 0x3bd   : > { %v1987_v15 = vmul.f32 %v4186_v33, %v4186_v33  ;;  %v2039_v39 = vsel %vm1404_vm4, %v1985_v32, 0.0  ;;  %v1950_v35 = vsel %vm1404_vm4, %v4316_v16, 0.0  ;;  %v1989_v33 = vmul.f32 %v4253_v36, %v4253_v36 }
 0x3be   : > { %v1913_v41 = vadd.f32 %v1912_v62, %v1911_v44  ;;  %v2014_v8 = vadd.f32 %v2013_v22, %v2012_v61  ;;  %v1932_v44 = vsel %vm1404_vm4, %v4309_v56, 0.0  ;;  %v1944_v61 = vsel %vm1404_vm4, %v4275_v23, 0.0 }
 0x3bf   : > { %v1986_v56 = vmul.f32 %v4147_v12, %v4147_v12  ;;  %v2047_v1 = vsel %vm1404_vm4, %v1989_v33, 0.0  ;;  %vm1959_vm14 = vcmask 57344  }
 0x3c0   : > { %v1915_v21 = vadd.f32 %v1914_v28, %v1913_v41  ;;  %v2016_v42 = vadd.f32 %v2015_v55, %v2014_v8  ;;  %v2025_v28 = vsel %vm1404_vm4, %v1978_v40, 0.0  ;;  %v2037_v55 = vsel %vm1404_vm4, %v1984_v58, 0.0 }
 0x3c2   : > { %v1917_v34 = vadd.f32 %v1916_v47, %v1915_v21  ;;  %v2018_v31 = vadd.f32 %v2017_v19, %v2016_v42  ;;  %v1936_v47 = vsel %vm1404_vm4, %v4147_v12, 0.0  ;;  %v1948_v19 = vsel %vm1404_vm4, %v4304_v60, 0.0 }
 0x3c3   : > { %v1988_v12 = vmul.f32 %v4225_v13, %v4225_v13 }
 0x3c4   : > { %v1919_v6 = vadd.f32 %v1918_v5, %v1917_v34  ;;  %v2020_v30 = vadd.f32 %v2019_v10, %v2018_v31  ;;  %v2031_v34 = vsel %vm1404_vm4, %v1981_v0, 0.0  ;;  %v2043_v31 = vsel %vm1404_vm4, %v1987_v15, 0.0 }
 0x3c6   : > { %v1921_v38 = vadd.f32 %v1920_v37, %v1919_v6  ;;  %v2022_v18 = vadd.f32 %v2021_v20, %v2020_v30  ;;  %v1942_v6 = vsel %vm1404_vm4, %v4253_v36, 0.0  ;;  %v1990_v20 = vmul.f32 %v4275_v23, %v4275_v23 }
 0x3c7   : > { %v1992_v36 = vmul.f32 %v4304_v60, %v4304_v60  ;;  %v1993_v23 = vmul.f32 %v4316_v16, %v4316_v16 }
 0x3c8   : > { %v1923_v9 = vadd.f32 %v1922_v14, %v1921_v38  ;;  %v2024_v41 = vadd.f32 %v2023_v50, %v2022_v18  ;;  %v2035_v14 = vsel %vm1404_vm4, %v1983_v29, 0.0  ;;  %v2049_v18 = vsel %vm1404_vm4, %v1990_v20, 0.0  ;;  %v1961_v29 = vld [vmem:[#allocation3] sm:$0x1] }
 0x3ca   : > { %v1925_v49 = vadd.f32 %v1924_v24, %v1923_v9  ;;  %v2026_v57 = vadd.f32 %v2025_v28, %v2024_v41  ;;  %v1946_v24 = vsel %vm1404_vm4, %v4292_v51, 0.0 }
 0x3cc   : > { %v1927_v46 = vadd.f32 %v1926_v54, %v1925_v49  ;;  %v2028_v5 = vadd.f32 %v2027_v43, %v2026_v57  ;;  %v2041_v49 = vsel %vm1404_vm4, %v1986_v56, 0.0  ;;  %v2055_v43 = vsel %vm1404_vm4, %v1993_v23, 0.0 }
 0x3ce   : > { %v1929_v62 = vadd.f32 %v1928_v53, %v1927_v46  ;;  %v2030_v63 = vadd.f32 %v2029_v2, %v2028_v5 }
 0x3d0   : > { %v1931_v59 = vadd.f32 %v1930_v26, %v1929_v62  ;;  %v2032_v17 = vadd.f32 %v2031_v34, %v2030_v63  ;;  %v2045_v26 = vsel %vm1404_vm4, %v1988_v12, 0.0  ;;  %v1991_v62 = vmul.f32 %v4292_v51, %v4292_v51 }
 0x3d1   : > { %v2053_v51 = vsel %vm1404_vm4, %v1992_v36, 0.0 }
 0x3d2   : > { %v1933_v48 = vadd.f32 %v1932_v44, %v1931_v59  ;;  %v2034_v38 = vadd.f32 %v2033_v4, %v2032_v17  ;;  %v2051_v28 = vsel %vm1404_vm4, %v1991_v62, 0.0 }
 0x3d4   : > { %v1935_v21 = vadd.f32 %v1934_v27, %v1933_v48  ;;  %v2036_v8 = vadd.f32 %v2035_v14, %v2034_v38 }
 0x3d6   : > { %v1937_v25 = vadd.f32 %v1936_v47, %v1935_v21  ;;  %v2038_v54 = vadd.f32 %v2037_v55, %v2036_v8  ;;  %v1888_v47 = vld [vmem:[#allocation2] sm:$0x1] }
 0x3d8   : > { %v1939_v37 = vadd.f32 %v1938_v3, %v1937_v25  ;;  %v2040_v10 = vadd.f32 %v2039_v39, %v2038_v54 }
 0x3da   : > { %v1941_v22 = vadd.f32 %v1940_v7, %v1939_v37  ;;  %v2042_v46 = vadd.f32 %v2041_v49, %v2040_v10 }
 0x3dc   : > { %v1943_v11 = vadd.f32 %v1942_v6, %v1941_v22  ;;  %v2044_v13 = vadd.f32 %v2043_v31, %v2042_v46 }
 0x3de   : > { %v1945_v9 = vadd.f32 %v1944_v61, %v1943_v11  ;;  %v2046_v50 = vadd.f32 %v2045_v26, %v2044_v13 }
 0x3e0   : > { %v1947_v42 = vadd.f32 %v1946_v24, %v1945_v9  ;;  %v2048_v59 = vadd.f32 %v2047_v1, %v2046_v50 }
 0x3e2   : > { %v1949_v53 = vadd.f32 %v1948_v19, %v1947_v42  ;;  %v2050_v27 = vadd.f32 %v2049_v18, %v2048_v59 }
 0x3e4   : > { %v1951_v40 = vadd.f32 %v1950_v35, %v1949_v53  ;;  %v2052_v48 = vadd.f32 %v2051_v28, %v2050_v27 }
 0x3e6   : > { %v1952_v30 = vrot.slane %v1951_v40, 4  ;;  %v2054_v57 = vadd.f32 %v2053_v51, %v2052_v48 }
 0x3e8   : > { %v1953_v44 = vadd.f32 %v1952_v30, %v1951_v40  ;;  %v2056_v21 = vadd.f32 %v2055_v43, %v2054_v57 }
 0x3ea   : > { %v1954_v45 = vrot.slane %v1953_v44, 2  ;;  %v2057_v2 = vrot.slane %v2056_v21, 4 }
 0x3ec   : > { %v1955_v41 = vadd.f32 %v1954_v45, %v1953_v44  ;;  %v2058_v16 = vadd.f32 %v2057_v2, %v2056_v21 }
 0x3ee   : > { %v1956_v0 = vrot.slane %v1955_v41, 1  ;;  %v2059_v3 = vrot.slane %v2058_v16, 2 }
 0x3f0   : > { %v1957_v60 = vadd.f32 %v1956_v0, %v1955_v41  ;;  %v2060_v5 = vadd.f32 %v2059_v3, %v2058_v16 }
 0x3f2   : > { %v1958_v52 = vadd.f32 %v1957_v60, %v1888_v47  ;;  %v2061_v25 = vrot.slane %v2060_v5, 1 }
 0x3f4   : > { %1960 = vst.msk [vmem:[#allocation2] sm:$0x1] %vm1959_vm14, %v1958_v52  ;;  %v2062_v34 = vadd.f32 %v2061_v25, %v2060_v5  ;;  %2068 = sbr.rel (%p2194_p5) target bundleno = 1041 (0x411), region = 36 }
 0x3f6   : > { %v2063_v7 = vadd.f32 %v2062_v34, %v1961_v29 }
 0x3f8   : > { %2064 = vst.msk [vmem:[#allocation3] sm:$0x1] %vm1959_vm14, %v2063_v7 }
 0x3f9   : > { %v2278_v63 = vmov 512.0  }
 0x3fa   : > { %2258 = vrcp.f32 %v2278_v63 }
 0x3fb   : > { %v2069_v17 = vld [vmem:[#allocation2] sm:$0x1] }
 0x3ff   : > { %v2079_v32 = vld [vmem:[#allocation3] sm:$0x1] }
 0x400   : > { %v2259_v37 = vpop.eup %2258 }
 0x401   : > { %v2071_v58 = vmul.f32 512.0, %v2259_v37  ;;  %vm2075_vm15 = vweird.f32 %v2259_v37 }
 0x403   : > { %v2072_v4 = vsub.f32 1.0, %v2071_v58 }
 0x405   : > { %v2073_v6 = vmul.f32 %v2259_v37, %v2072_v4 }
 0x407   : > { %v2074_v22 = vadd.f32 %v2259_v37, %v2073_v6 }
 0x409   : > { %v2076_v14 = vsel %vm2075_vm15, %v2259_v37, %v2074_v22 }
 0x40a   : > { %v2077_v61 = vmul.f32 %v2076_v14, %v2069_v17  ;;  %v2080_v38 = vmul.f32 %v2079_v32, %v2076_v14 }
 0x40c   : > { %2078 = vst.msk [vmem:[%s4501_s3] sm:$0x1] %vm1959_vm14, %v2077_v61  ;;  %v2081_v11 = vmul.f32 %v2077_v61, %v2077_v61 }
 0x40e   : > { %v2082_v56 = vsub.f32 %v2080_v38, %v2081_v11 }
 0x410   : > { %2083 = vst.msk [vmem:[%s4502_s4] sm:$0x1] %vm1959_vm14, %v2082_v56 }
 0x411 PF: > { %s15_s15 = sadd.s32 1, %s2266_s15  }
 0x412   : > { %p12_p6 = scmp.ge.s32.totalorder %s15_s15, 4  }
 0x414   :  { %14 = sbr.rel (!%p12_p6) target bundleno = 1 (0x1), region = 82 }

// kernel: conv_block_forward.4
= control target key start
LH: loop header
LB: loop body
LE: loop exit
PB: predicated region body
PF: predicated region fallthrough
CT: control target
= control target key end

     0   :  { %s2601_s27 = smov 0   ;;  %s4943_s0 = inlined_call_operand.vmem [shape: f32[2,16,16,8], index: 0, kind: input, shape index: {}]   ;;  %s4944_s1 = inlined_call_operand.vmem [shape: f32[1,8], index: 1, kind: input, shape index: {}]   ;;  %s4945_s2 = inlined_call_operand.vmem [shape: f32[1,8], index: 2, kind: input, shape index: {}]   ;;  %s4946_s3 = inlined_call_operand.vmem [shape: f32[1,8], index: 3, kind: input, shape index: {}]   ;;  %s4947_s4 = inlined_call_operand.vmem [shape: f32[1,8], index: 4, kind: input, shape index: {}]   ;;  %s4948_s5 = inlined_call_operand.vmem [shape: f32[72,8], index: 5, kind: input, shape index: {}]   ;;  %s4949_s6 = inlined_call_operand.vmem [shape: f32[2,16,16,8], index: 6, kind: output, shape index: {0}]   ;;  %s4950_s7 = inlined_call_operand.vmem [shape: f32[1,8], index: 7, kind: output, shape index: {1}]   ;;  %s4951_s8 = inlined_call_operand.vmem [shape: f32[1,8], index: 8, kind: output, shape index: {2}]  }
   0x1 LB: > { %s2607_s28 = sadd.s32 4294967295, %s2543_s27   ;;  %p2416_p0 = scmp.ge.s32.totalorder %s2543_s27, 1  ;;  %s2543_s27 = sphi %s2601_s27, %s19_s27  }
   0x2   : > { %p257_p1 = scmp.lt.s32.totalorder %s2543_s27, 3 }
   0x4   : > { %p258_p2 = pnand %p2416_p0, %p257_p1 }
   0x6   : > { %261 = sbr.rel (%p258_p2) target bundleno = 1064 (0x428), region = 44 }
   0xb   : > { %vm528_vm0 = vcmask 1040384   ;;  %v2545_v0 = vmov 0.0   ;;  %v333_v2 = vld [vmem:[%s4945_s2] sm:$0x1]  ;;  %vm694_vm1 = vcmask 1046528   ;;  %p291_p3 = scmp.lt.s32.totalorder %s2607_s28, 1 }
   0xc   : > { %v2611_v1 = vrot.slane %v2545_v0, 7  ;;  %v334_v3 = vadd.f32 1e-05, %v333_v2  ;;  %s2546_s10 = smov 8   ;;  %v2648_v17 = vld [vmem:[%s4944_s1] ss:$0 sm:$0xff] }
   0xd   : > { %s2633_s9 = scalar_select %p291_p3, %s2607_s28, 1  ;;  %v381_v18 = vld [vmem:[%s4946_s3] sm:$0x1]  ;;  %vm775_vm5 = vcmask 1045504   ;;  %vm1636_vm6 = vcmask 64512   ;;  %vm1669_vm7 = vcmask 130048  }
   0xe   : > { %5080 = vst [vmem:[#allocation4_spill] sm:$0xff] %v2611_v1  ;;  %v2618_v4 = vsel %vm528_vm0, 0.0, %v2611_v1  ;;  %v2622_v5 = vsel %vm528_vm0, %v2611_v1, 0.0  ;;  %v696_v6 = vrot.slane %v2611_v1, 1  ;;  %2532 = vrsqrt.f32 %v334_v3  ;;  %v2686_v43 = vld [vmem:[%s4947_s4] ss:$0 sm:$0xff] }
   0xf   : > { %5081 = vst [vmem:[#allocation5_spill] sm:$0xff] %v2618_v4  ;;  %v695_v7 = vrot.slane %v2618_v4, 1  ;;  %v698_v8 = vrot.slane %v2622_v5, 1  ;;  %s2457_s11 = sshll.u32 %s2633_s9, 8  ;;  %vm341_vm2 = vweird.f32 %v334_v3  ;;  %s2547_s21 = smov 16   ;;  %vm1702_vm8 = vcmask 195584  }
  0x10   : > { %s2643_s14 = scalar_lea.vmem %s4943_s0, %s2457_s11  ;;  %s2548_s22 = smov 24   ;;  %vm1735_vm9 = vcmask 261120   ;;  %vm1768_vm10 = vcmask 326656   ;;  %vm1801_vm11 = vcmask 392192   ;;  %vm1867_vm12 = vcmask 523264  }
  0x11   : > { %v697_v9 = vsel %vm694_vm1, %v695_v7, %v696_v6  ;;  %v699_v10 = vsel %vm694_vm1, %v696_v6, %v698_v8  ;;  %v303_v19 = vld [vmem:[%s2643_s14 + $0x10] sm:$0xff]  ;;  %v304_v20 = vld [vmem:[%s2643_s14 + $0x18] sm:$0xff]  ;;  %v301_v22 = vld [vmem:[%s2643_s14] sm:$0xff]  ;;  %s2549_s25 = smov 32   ;;  %s2550_s26 = smov 40   ;;  %vm1834_vm13 = vcmask 457728  }
  0x12   : > { %v2630_v11 = vpack.i.bf16 %v699_v10, %v697_v9  ;;  %v302_v23 = vld [vmem:[%s2643_s14 + $0x8] sm:$0xff]  ;;  %v305_v24 = vld [vmem:[%s2643_s14 + $0x20] sm:$0xff]  ;;  %v307_v26 = vld [vmem:[%s2643_s14 + $0x30] sm:$0xff]  ;;  %v351_v29 = vsub.f32 %v303_v19, %v2648_v17  ;;  %v352_v31 = vsub.f32 %v304_v20, %v2648_v17  ;;  %v349_v33 = vsub.f32 %v301_v22, %v2648_v17  ;;  %s2551_s29 = smov 48   ;;  %s2552_s30 = smov 56  }
  0x13   : > { %v306_v25 = vld [vmem:[%s2643_s14 + $0x28] sm:$0xff]  ;;  %v308_v27 = vld [vmem:[%s2643_s14 + $0x38] sm:$0xff]  ;;  %v2663_v30 = vld [vmem:[%s2643_s14 + $0x40] sm:$0xff]  ;;  %v350_v34 = vsub.f32 %v302_v23, %v2648_v17  ;;  %v353_v38 = vsub.f32 %v305_v24, %v2648_v17  ;;  %v355_v40 = vsub.f32 %v307_v26, %v2648_v17  ;;  %vm1900_vm14 = vcmask 588800   ;;  %p2453_p4 = scmp.ne.s32.totalorder %s2607_s28, 0 }
  0x14   : > { %5082 = vst [vmem:[#allocation6_spill] sm:$0xff] %v2630_v11  ;;  %2506 = vrot.lane.b32.xlu0 %v2630_v11, %s2546_s10  ;;  %v2533_v12 = vpop.eup %2532  ;;  %v2669_v35 = vld [vmem:[%s2643_s14 + $0x48] sm:$0xff]  ;;  %v2672_v36 = vld [vmem:[%s2643_s14 + $0x50] sm:$0xff]  ;;  %v2675_v37 = vld [vmem:[%s2643_s14 + $0x58] sm:$0xff]  ;;  %v354_v39 = vsub.f32 %v306_v25, %v2648_v17  ;;  %v356_v41 = vsub.f32 %v308_v27, %v2648_v17  ;;  %v357_v44 = vsub.f32 %v2663_v30, %v2648_v17 }
  0x15   : > { %v336_v13 = vmul.f32 %v2533_v12, %v334_v3  ;;  %vm342_vm3 = vweird.f32 %v2533_v12  ;;  %v358_v45 = vsub.f32 %v2669_v35, %v2648_v17  ;;  %v359_v46 = vsub.f32 %v2672_v36, %v2648_v17 }
  0x16   : > { %vm343_vm4 = vmor %vm341_vm2, %vm342_vm3  ;;  %v360_v47 = vsub.f32 %v2675_v37, %v2648_v17 }
  0x17   : > { %v337_v14 = vmul.f32 %v2533_v12, %v336_v13 }
  0x19   : > { %v338_v15 = vmul.f32 0.5, %v337_v14 }
  0x1b   : > { %v339_v16 = vsub.f32 1.5, %v338_v15 }
  0x1d   : > { %v340_v21 = vmul.f32 %v2533_v12, %v339_v16 }
  0x1f   : > { %v344_v28 = vsel %vm343_vm4, %v2533_v12, %v340_v21 }
  0x20   : > { %v382_v32 = vmul.f32 %v381_v18, %v344_v28 }
  0x22   : > { %v2681_v42 = vperm.slane %v382_v32, 0 }
  0x24   : > { %v388_v48 = vmul.f32 %v2681_v42, %v351_v29  ;;  %v389_v49 = vmul.f32 %v2681_v42, %v352_v31  ;;  %v386_v50 = vmul.f32 %v2681_v42, %v349_v33  ;;  %v387_v51 = vmul.f32 %v2681_v42, %v350_v34 }
  0x25   : > { %v390_v52 = vmul.f32 %v2681_v42, %v353_v38  ;;  %v391_v53 = vmul.f32 %v2681_v42, %v354_v39  ;;  %v392_v54 = vmul.f32 %v2681_v42, %v355_v40  ;;  %v393_v55 = vmul.f32 %v2681_v42, %v356_v41 }
  0x26   : > { %v424_v56 = vadd.f32 %v2686_v43, %v388_v48  ;;  %v425_v57 = vadd.f32 %v2686_v43, %v389_v49  ;;  %v422_v58 = vadd.f32 %v2686_v43, %v386_v50  ;;  %v423_v59 = vadd.f32 %v2686_v43, %v387_v51 }
  0x27   : > { %v426_v60 = vadd.f32 %v2686_v43, %v390_v52  ;;  %v427_v61 = vadd.f32 %v2686_v43, %v391_v53  ;;  %v428_v62 = vadd.f32 %v2686_v43, %v392_v54  ;;  %v429_v63 = vadd.f32 %v2686_v43, %v393_v55  ;;  %v313_v54 = vld [vmem:[%s2643_s14 + $0x60] sm:$0xff] }
  0x28   : > { %v456_v0 = vmax.f32 %v424_v56, 0.0  ;;  %v457_v2 = vmax.f32 %v425_v57, 0.0  ;;  %v454_v3 = vmax.f32 %v422_v58, 0.0  ;;  %v455_v6 = vmax.f32 %v423_v59, 0.0  ;;  %v314_v57 = vld [vmem:[%s2643_s14 + $0x68] sm:$0xff] }
  0x29   : > { %v458_v7 = vmax.f32 %v426_v60, 0.0  ;;  %v459_v8 = vmax.f32 %v427_v61, 0.0  ;;  %v460_v9 = vmax.f32 %v428_v62, 0.0  ;;  %v461_v10 = vmax.f32 %v429_v63, 0.0  ;;  %v315_v62 = vld [vmem:[%s2643_s14 + $0x70] sm:$0xff] }
  0x2a   : > { %v534_v12 = vrot.slane %v456_v0, 7  ;;  %v535_v13 = vrot.slane %v457_v2, 7  ;;  %v531_v14 = vrot.slane %v454_v3, 7  ;;  %v532_v15 = vrot.slane %v455_v6, 7  ;;  %v316_v2 = vld [vmem:[%s2643_s14 + $0x78] sm:$0xff] }
  0x2b   : > { %v537_v16 = vrot.slane %v458_v7, 7  ;;  %v538_v18 = vrot.slane %v459_v8, 7  ;;  %v540_v19 = vrot.slane %v460_v9, 7  ;;  %v541_v20 = vrot.slane %v461_v10, 7 }
  0x2c   : > { %v2713_v21 = vsel %vm528_vm0, %v534_v12, %v535_v13  ;;  %v2716_v22 = vsel %vm528_vm0, %v535_v13, 0.0  ;;  %v2719_v23 = vsel %vm528_vm0, %v531_v14, %v532_v15  ;;  %v2722_v24 = vsel %vm528_vm0, %v532_v15, 0.0 }
  0x2d   : > { %5083 = vst [vmem:[#allocation7_spill] sm:$0xff] %v2713_v21  ;;  %v706_v25 = vrot.slane %v2713_v21, 1  ;;  %v708_v26 = vrot.slane %v2716_v22, 1  ;;  %v701_v27 = vrot.slane %v2719_v23, 1  ;;  %v703_v28 = vrot.slane %v2722_v24, 1 }
  0x2e   : > { %5084 = vst [vmem:[#allocation8_spill] sm:$0xff] %v2719_v23  ;;  %v2729_v29 = vsel %vm528_vm0, 0.0, %v531_v14  ;;  %v2732_v31 = vsel %vm528_vm0, %v537_v16, %v538_v18  ;;  %v2735_v32 = vsel %vm528_vm0, 0.0, %v537_v16  ;;  %v2738_v33 = vsel %vm528_vm0, 0.0, %v534_v12 }
  0x2f   : > { %5085 = vst [vmem:[#allocation9_spill] sm:$0xff] %v2729_v29  ;;  %v2741_v34 = vsel %vm694_vm1, %v706_v25, %v708_v26  ;;  %v2744_v38 = vsel %vm694_vm1, %v701_v27, %v703_v28  ;;  %v700_v39 = vrot.slane %v2729_v29, 1  ;;  %v710_v40 = vrot.slane %v2735_v32, 1 }
  0x30   : > { %5086 = vst [vmem:[#allocation10_spill] sm:$0xff] %v2732_v31  ;;  %878 = vrot.lane.b32.xlu2 %v2741_v34, %s2546_s10  ;;  %874 = vrot.lane.b32.xlu1 %v2744_v38, %s2546_s10  ;;  %v711_v41 = vrot.slane %v2732_v31, 1  ;;  %v705_v48 = vrot.slane %v2738_v33, 1  ;;  %v2755_v49 = vsel %vm528_vm0, %v538_v18, 0.0  ;;  %v2758_v50 = vsel %vm528_vm0, %v540_v19, %v541_v20 }
  0x31   : > { %5087 = vst [vmem:[#allocation11_spill] sm:$0xff] %v2738_v33  ;;  %v2761_v51 = vsel %vm694_vm1, %v700_v39, %v701_v27  ;;  %v713_v52 = vrot.slane %v2755_v49, 1  ;;  %v2765_v53 = vsel %vm528_vm0, %v541_v20, 0.0  ;;  %v716_v56 = vrot.slane %v2758_v50, 1 }
  0x32   : > { %5088 = vst [vmem:[#allocation12_spill] sm:$0xff] %v2741_v34  ;;  %872 = vrot.lane.b32.xlu0 %v2761_v51, %s2546_s10  ;;  %v2771_v55 = vsel %vm694_vm1, %v710_v40, %v711_v41  ;;  %v2776_v58 = vsel %vm694_vm1, %v705_v48, %v706_v25  ;;  %v718_v59 = vrot.slane %v2765_v53, 1  ;;  %v394_v60 = vmul.f32 %v2681_v42, %v357_v44 }
  0x33   : > { %5089 = vst [vmem:[#allocation13_spill] sm:$0xff] %v2758_v50  ;;  %v395_v61 = vmul.f32 %v2681_v42, %v358_v45  ;;  %v2789_v63 = vsel %vm528_vm0, 0.0, %v540_v19  ;;  %v396_v0 = vmul.f32 %v2681_v42, %v359_v46  ;;  %v397_v30 = vmul.f32 %v2681_v42, %v360_v47 }
  0x34   : > { %5090 = vst [vmem:[#allocation14_spill] sm:$0xff] %v2771_v55  ;;  %v361_v44 = vsub.f32 %v313_v54, %v2648_v17  ;;  %v2802_v35 = vsel %vm694_vm1, %v711_v41, %v713_v52  ;;  %v430_v45 = vadd.f32 %v2686_v43, %v394_v60  ;;  %v362_v6 = vsub.f32 %v314_v57, %v2648_v17 }
  0x35   : > { %5091 = vst [vmem:[#allocation15_spill] sm:$0xff] %v2776_v58  ;;  %v431_v3 = vadd.f32 %v2686_v43, %v395_v61  ;;  %v432_v36 = vadd.f32 %v2686_v43, %v396_v0  ;;  %v433_v46 = vadd.f32 %v2686_v43, %v397_v30  ;;  %v363_v47 = vsub.f32 %v315_v62, %v2648_v17 }
  0x36   : > { %5092 = vst [vmem:[#allocation16_spill] sm:$0xff] %v2789_v63  ;;  %v398_v37 = vmul.f32 %v2681_v42, %v361_v44  ;;  %v462_v7 = vmax.f32 %v430_v45, 0.0  ;;  %v399_v9 = vmul.f32 %v2681_v42, %v362_v6  ;;  %v364_v10 = vsub.f32 %v316_v2, %v2648_v17 }
  0x37   : > { %5093 = vst [vmem:[#allocation17_spill] sm:$0xff] %v2802_v35  ;;  %v463_v8 = vmax.f32 %v431_v3, 0.0  ;;  %v715_v12 = vrot.slane %v2789_v63, 1  ;;  %v464_v13 = vmax.f32 %v432_v36, 0.0  ;;  %v465_v14 = vmax.f32 %v433_v46, 0.0  ;;  %v317_v36 = vld [vmem:[%s2643_s14 + $0x80] sm:$0xff] }
  0x38   : > { %880 = vrot.lane.b32.xlu2 %v2771_v55, %s2546_s10  ;;  %876 = vrot.lane.b32.xlu1 %v2776_v58, %s2546_s10  ;;  %v400_v15 = vmul.f32 %v2681_v42, %v363_v47  ;;  %v543_v16 = vrot.slane %v462_v7, 7  ;;  %v434_v19 = vadd.f32 %v2686_v43, %v398_v37  ;;  %v435_v20 = vadd.f32 %v2686_v43, %v399_v9  ;;  %v319_v46 = vld [vmem:[%s2643_s14 + $0x90] sm:$0xff]  ;;  %v320_v37 = vld [vmem:[%s2643_s14 + $0x98] sm:$0xff] }
  0x39   : > { %v544_v18 = vrot.slane %v463_v8, 7  ;;  %v546_v25 = vrot.slane %v464_v13, 7  ;;  %v547_v26 = vrot.slane %v465_v14, 7  ;;  %v401_v27 = vmul.f32 %v2681_v42, %v364_v10 }
  0x3a   : > { %882 = vrot.lane.b32.xlu0 %v2802_v35, %s2546_s10  ;;  %v2828_v39 = vsel %vm528_vm0, 0.0, %v543_v16  ;;  %v436_v41 = vadd.f32 %v2686_v43, %v400_v15  ;;  %v2843_v60 = vsel %vm694_vm1, %v716_v56, %v718_v59  ;;  %v2846_v61 = vsel %vm694_vm1, %v715_v12, %v716_v56  ;;  %v318_v56 = vld [vmem:[%s2643_s14 + $0x88] sm:$0xff] }
  0x3b   : > { %v2825_v28 = vsel %vm528_vm0, %v543_v16, %v544_v18  ;;  %v2831_v40 = vsel %vm528_vm0, %v544_v18, 0.0  ;;  %v720_v48 = vrot.slane %v2828_v39, 1  ;;  %v2837_v54 = vsel %vm528_vm0, %v546_v25, %v547_v26  ;;  %5094 = vst [vmem:[#allocation18_spill] sm:$0xff] %v2843_v60 }
  0x3c   : > { %v721_v52 = vrot.slane %v2825_v28, 1  ;;  %v2840_v57 = vsel %vm528_vm0, 0.0, %v546_v25  ;;  %5095 = vst [vmem:[#allocation19_spill] sm:$0xff] %v2846_v61  ;;  %v466_v62 = vmax.f32 %v434_v19, 0.0  ;;  %v467_v0 = vmax.f32 %v435_v20, 0.0 }
  0x3d   : > { %v725_v30 = vrot.slane %v2840_v57, 1  ;;  %v726_v44 = vrot.slane %v2837_v54, 1  ;;  %v2851_v2 = vsel %vm528_vm0, %v547_v26, 0.0  ;;  %v723_v3 = vrot.slane %v2831_v40, 1 }
  0x3e   : > { %v2854_v45 = vsel %vm694_vm1, %v720_v48, %v721_v52  ;;  %v437_v59 = vadd.f32 %v2686_v43, %v401_v27  ;;  %v468_v6 = vmax.f32 %v436_v41, 0.0  ;;  %v728_v47 = vrot.slane %v2851_v2, 1  ;;  %v321_v27 = vld [vmem:[%s2643_s14 + $0xa0] sm:$0xff]  ;;  %v322_v41 = vld [vmem:[%s2643_s14 + $0xa8] sm:$0xff] }
  0x3f   : > { %5096 = vst [vmem:[#allocation20_spill] sm:$0xff] %v2854_v45  ;;  %v549_v7 = vrot.slane %v466_v62, 7  ;;  %v550_v8 = vrot.slane %v467_v0, 7  ;;  %v365_v12 = vsub.f32 %v317_v36, %v2648_v17  ;;  %v366_v13 = vsub.f32 %v318_v56, %v2648_v17 }
  0x40   : > { %886 = vrot.lane.b32.xlu2 %v2843_v60, %s2546_s10  ;;  %884 = vrot.lane.b32.xlu1 %v2846_v61, %s2546_s10  ;;  %v469_v9 = vmax.f32 %v437_v59, 0.0  ;;  %v552_v10 = vrot.slane %v468_v6, 7  ;;  %v367_v14 = vsub.f32 %v319_v46, %v2648_v17  ;;  %v2873_v15 = vsel %vm694_vm1, %v725_v30, %v726_v44 }
  0x41   : > { %5097 = vst [vmem:[#allocation21_spill] sm:$0xff] %v2873_v15  ;;  %v2876_v16 = vsel %vm694_vm1, %v721_v52, %v723_v3  ;;  %v368_v18 = vsub.f32 %v320_v37, %v2648_v17  ;;  %v402_v20 = vmul.f32 %v2681_v42, %v365_v12  ;;  %v403_v25 = vmul.f32 %v2681_v42, %v366_v13  ;;  %v323_v37 = vld [vmem:[%s2643_s14 + $0xb0] sm:$0xff] }
  0x42   : > { %888 = vrot.lane.b32.xlu0 %v2854_v45, %s2546_s10  ;;  %5098 = vst [vmem:[#allocation22_spill] sm:$0xff] %v2876_v16  ;;  %v553_v19 = vrot.slane %v469_v9, 7  ;;  %v404_v26 = vmul.f32 %v2681_v42, %v367_v14  ;;  %v2885_v48 = vsel %vm694_vm1, %v726_v44, %v728_v47  ;;  %v2888_v62 = vsel %vm528_vm0, %v549_v7, %v550_v8 }
  0x43   : > { %5099 = vst [vmem:[#allocation23_spill] sm:$0xff] %v2885_v48  ;;  %v2891_v52 = vsel %vm528_vm0, %v550_v8, 0.0  ;;  %v405_v0 = vmul.f32 %v2681_v42, %v368_v18  ;;  %v2895_v30 = vsel %vm528_vm0, 0.0, %v549_v7  ;;  %v2898_v3 = vsel %vm528_vm0, 0.0, %v552_v10 }
  0x44   : > { %v438_v59 = vadd.f32 %v2686_v43, %v402_v20  ;;  %v439_v6 = vadd.f32 %v2686_v43, %v403_v25  ;;  %v440_v44 = vadd.f32 %v2686_v43, %v404_v26  ;;  %v369_v56 = vsub.f32 %v321_v27, %v2648_v17  ;;  %v324_v20 = vld [vmem:[%s2643_s14 + $0xb8] sm:$0xff] }
  0x45   : > { %v441_v36 = vadd.f32 %v2686_v43, %v405_v0  ;;  %v370_v46 = vsub.f32 %v322_v41, %v2648_v17  ;;  %v731_v47 = vrot.slane %v2888_v62, 1  ;;  %v2913_v7 = vsel %vm528_vm0, %v552_v10, %v553_v19 }
  0x46   : > { %v470_v8 = vmax.f32 %v438_v59, 0.0  ;;  %v471_v9 = vmax.f32 %v439_v6, 0.0  ;;  %v733_v12 = vrot.slane %v2891_v52, 1  ;;  %v730_v13 = vrot.slane %v2895_v30, 1 }
  0x47   : > { %v406_v14 = vmul.f32 %v2681_v42, %v369_v56  ;;  %v407_v18 = vmul.f32 %v2681_v42, %v370_v46  ;;  %v735_v25 = vrot.slane %v2898_v3, 1  ;;  %v371_v27 = vsub.f32 %v323_v37, %v2648_v17 }
  0x48   : > { %892 = vrot.lane.b32.xlu2 %v2873_v15, %s2546_s10  ;;  %890 = vrot.lane.b32.xlu1 %v2876_v16, %s2546_s10  ;;  %v555_v26 = vrot.slane %v470_v8, 7  ;;  %v556_v10 = vrot.slane %v471_v9, 7  ;;  %v736_v41 = vrot.slane %v2913_v7, 1  ;;  %v2926_v0 = vsel %vm528_vm0, %v553_v19, 0.0  ;;  %v327_v15 = vld [vmem:[%s2643_s14 + $0xd0] sm:$0xff] }
  0x49   : > { %v472_v59 = vmax.f32 %v440_v44, 0.0  ;;  %v473_v6 = vmax.f32 %v441_v36, 0.0  ;;  %v442_v56 = vadd.f32 %v2686_v43, %v406_v14  ;;  %v443_v46 = vadd.f32 %v2686_v43, %v407_v18  ;;  %v325_v14 = vld [vmem:[%s2643_s14 + $0xc0] sm:$0xff]  ;;  %v326_v18 = vld [vmem:[%s2643_s14 + $0xc8] sm:$0xff] }
  0x4a   : > { %894 = vrot.lane.b32.xlu0 %v2885_v48, %s2546_s10  ;;  %v372_v11 = vsub.f32 %v324_v20, %v2648_v17  ;;  %v2932_v8 = vsel %vm694_vm1, %v731_v47, %v733_v12  ;;  %v2935_v9 = vsel %vm694_vm1, %v730_v13, %v731_v47  ;;  %v2938_v37 = vsel %vm528_vm0, 0.0, %v555_v26 }
  0x4b   : > { %5100 = vst [vmem:[#allocation24_spill] sm:$0xff] %v2932_v8  ;;  %v408_v19 = vmul.f32 %v2681_v42, %v371_v27  ;;  %v2942_v44 = vsel %vm528_vm0, %v555_v26, %v556_v10  ;;  %v738_v36 = vrot.slane %v2926_v0, 1  ;;  %v2948_v20 = vsel %vm694_vm1, %v735_v25, %v736_v41 }
  0x4c   : > { %5101 = vst [vmem:[#allocation25_spill] sm:$0xff] %v2935_v9  ;;  %v2951_v12 = vsel %vm528_vm0, %v556_v10, 0.0  ;;  %v558_v47 = vrot.slane %v472_v59, 7  ;;  %v559_v13 = vrot.slane %v473_v6, 7  ;;  %v740_v26 = vrot.slane %v2938_v37, 1 }
  0x4d   : > { %5102 = vst [vmem:[#allocation26_spill] sm:$0xff] %v2948_v20  ;;  %v474_v27 = vmax.f32 %v442_v56, 0.0  ;;  %v475_v48 = vmax.f32 %v443_v46, 0.0  ;;  %v409_v16 = vmul.f32 %v2681_v42, %v372_v11  ;;  %v741_v25 = vrot.slane %v2942_v44, 1  ;;  %v328_v46 = vld [vmem:[%s2643_s14 + $0xd8] sm:$0xff] }
  0x4e   : > { %v444_v10 = vadd.f32 %v2686_v43, %v408_v19  ;;  %v373_v59 = vsub.f32 %v325_v14, %v2648_v17  ;;  %v374_v6 = vsub.f32 %v326_v18, %v2648_v17  ;;  %v743_v56 = vrot.slane %v2951_v12, 1 }
  0x4f   : > { %v2972_v11 = vsel %vm528_vm0, %v558_v47, %v559_v13  ;;  %v2976_v19 = vsel %vm528_vm0, %v559_v13, 0.0  ;;  %v561_v14 = vrot.slane %v474_v27, 7  ;;  %v562_v18 = vrot.slane %v475_v48, 7  ;;  %v330_v27 = vld [vmem:[%s2643_s14 + $0xe8] sm:$0xff] }
  0x50   : > { %898 = vrot.lane.b32.xlu2 %v2932_v8, %s2546_s10  ;;  %896 = vrot.lane.b32.xlu1 %v2935_v9, %s2546_s10  ;;  %v445_v9 = vadd.f32 %v2686_v43, %v409_v16  ;;  %v2968_v8 = vsel %vm694_vm1, %v736_v41, %v738_v36  ;;  %5104 = vst [vmem:[#allocation28_spill] sm:$0xff] %v2972_v11  ;;  %v476_v41 = vmax.f32 %v444_v10, 0.0  ;;  %v2985_v61 = vsel %vm528_vm0, 0.0, %v558_v47 }
  0x51   : > { %5103 = vst [vmem:[#allocation27_spill] sm:$0xff] %v2968_v8  ;;  %v2980_v16 = vsel %vm694_vm1, %v740_v26, %v741_v25  ;;  %v410_v36 = vmul.f32 %v2681_v42, %v373_v59  ;;  %v411_v45 = vmul.f32 %v2681_v42, %v374_v6  ;;  %v376_v35 = vsub.f32 %v328_v46, %v2648_v17  ;;  %v329_v26 = vld [vmem:[%s2643_s14 + $0xe0] sm:$0xff] }
  0x52   : > { %900 = vrot.lane.b32.xlu0 %v2948_v20, %s2546_s10  ;;  %v375_v20 = vsub.f32 %v327_v15, %v2648_v17  ;;  %5105 = vst [vmem:[#allocation29_spill] sm:$0xff] %v2980_v16  ;;  %v477_v60 = vmax.f32 %v445_v9, 0.0  ;;  %v2989_v13 = vsel %vm694_vm1, %v741_v25, %v743_v56  ;;  %v746_v48 = vrot.slane %v2972_v11, 1 }
  0x53   : > { %5106 = vst [vmem:[#allocation30_spill] sm:$0xff] %v2989_v13  ;;  %v748_v15 = vrot.slane %v2976_v19, 1  ;;  %v3000_v47 = vsel %vm528_vm0, %v561_v14, %v562_v18  ;;  %v3003_v9 = vsel %vm528_vm0, 0.0, %v561_v14  ;;  %v413_v10 = vmul.f32 %v2681_v42, %v376_v35 }
  0x54   : > { %5107 = vst [vmem:[#allocation31_spill] sm:$0xff] %v3000_v47  ;;  %v412_v25 = vmul.f32 %v2681_v42, %v375_v20  ;;  %v745_v59 = vrot.slane %v2985_v61, 1  ;;  %v564_v6 = vrot.slane %v476_v41, 7  ;;  %v446_v56 = vadd.f32 %v2686_v43, %v410_v36 }
  0x55   : > { %5108 = vst [vmem:[#allocation32_spill] sm:$0xff] %v3003_v9  ;;  %v447_v46 = vadd.f32 %v2686_v43, %v411_v45  ;;  %v378_v14 = vsub.f32 %v330_v27, %v2648_v17  ;;  %v750_v34 = vrot.slane %v3003_v9, 1  ;;  %v751_v20 = vrot.slane %v3000_v47, 1 }
  0x56   : > { %v3017_v35 = vsel %vm694_vm1, %v746_v48, %v748_v15  ;;  %v3020_v41 = vsel %vm528_vm0, %v562_v18, 0.0  ;;  %v448_v45 = vadd.f32 %v2686_v43, %v412_v25  ;;  %v449_v36 = vadd.f32 %v2686_v43, %v413_v10 }
  0x57   : > { %5109 = vst [vmem:[#allocation33_spill] sm:$0xff] %v3017_v35  ;;  %v479_v27 = vmax.f32 %v447_v46, 0.0  ;;  %v415_v18 = vmul.f32 %v2681_v42, %v378_v14  ;;  %v779_v55 = vrot.slane %v2622_v5, 2  ;;  %v3037_v25 = vsel %vm694_vm1, %v750_v34, %v751_v20 }
  0x58   : > { %904 = vrot.lane.b32.xlu2 %v2980_v16, %s2546_s10  ;;  %902 = vrot.lane.b32.xlu1 %v2968_v8, %s2546_s10  ;;  %v565_v8 = vrot.slane %v477_v60, 7  ;;  %v377_v16 = vsub.f32 %v329_v26, %v2648_v17  ;;  %v3025_v60 = vsel %vm694_vm1, %v745_v59, %v746_v48  ;;  %v3028_v26 = vsel %vm528_vm0, 0.0, %v564_v6  ;;  %5113 = vst [vmem:[#allocation37_spill] sm:$0xff] %v3037_v25 }
  0x59   : > { %5110 = vst [vmem:[#allocation34_spill] sm:$0xff] %v3025_v60  ;;  %v478_v17 = vmax.f32 %v446_v56, 0.0  ;;  %v753_v48 = vrot.slane %v3020_v41, 1  ;;  %v755_v10 = vrot.slane %v3028_v26, 1  ;;  %v568_v34 = vrot.slane %v479_v27, 7 }
  0x5a   : > { %906 = vrot.lane.b32.xlu0 %v2989_v13, %s2546_s10  ;;  %5111 = vst [vmem:[#allocation35_spill] sm:$0xff] %v3028_v26  ;;  %v3031_v13 = vsel %vm528_vm0, %v564_v6, %v565_v8  ;;  %v414_v15 = vmul.f32 %v2681_v42, %v377_v16  ;;  %v3046_v59 = vsel %vm528_vm0, %v565_v8, 0.0  ;;  %v480_v16 = vmax.f32 %v448_v45, 0.0 }
  0x5b   : > { %5112 = vst [vmem:[#allocation36_spill] sm:$0xff] %v3031_v13  ;;  %v481_v6 = vmax.f32 %v449_v36, 0.0  ;;  %v756_v5 = vrot.slane %v3031_v13, 1  ;;  %v567_v56 = vrot.slane %v478_v17, 7  ;;  %v451_v14 = vadd.f32 %v2686_v43, %v415_v18 }
  0x5c   : > { %v450_v46 = vadd.f32 %v2686_v43, %v414_v15  ;;  %v758_v8 = vrot.slane %v3046_v59, 1  ;;  %v570_v45 = vrot.slane %v480_v16, 7  ;;  %v3073_v16 = vsel %vm528_vm0, %v568_v34, 0.0 }
  0x5d   : > { %v571_v36 = vrot.slane %v481_v6, 7  ;;  %v3059_v27 = vsel %vm694_vm1, %v755_v10, %v756_v5  ;;  %v3065_v15 = vsel %vm528_vm0, 0.0, %v567_v56  ;;  %v483_v6 = vmax.f32 %v451_v14, 0.0 }
  0x5e   : > { %5114 = vst [vmem:[#allocation38_spill] sm:$0xff] %v3059_v27  ;;  %v760_v10 = vrot.slane %v3065_v15, 1 }
  0x5f   : > { %5116 = vst [vmem:[#allocation40_spill] sm:$0xff] %v3065_v15 }
  0x60   : > { %910 = vrot.lane.b32.xlu2 %v3017_v35, %s2546_s10  ;;  %908 = vrot.lane.b32.xlu1 %v3025_v60, %s2546_s10  ;;  %v776_v60 = vrot.slane %v2618_v4, 2  ;;  %v777_v35 = vrot.slane %v2611_v1, 2  ;;  %v3070_v1 = vsel %vm528_vm0, %v567_v56, %v568_v34  ;;  %v574_v56 = vrot.slane %v483_v6, 7 }
  0x61   : > { %5118 = vst [vmem:[#allocation42_spill] sm:$0xff] %v3070_v1  ;;  %v3108_v4 = vsel %vm528_vm0, %v571_v36, 0.0 }
  0x62   : > { %912 = vrot.lane.b32.xlu0 %v3037_v25, %s2546_s10  ;;  %v778_v58 = vsel %vm775_vm5, %v776_v60, %v777_v35  ;;  %v780_v17 = vsel %vm775_vm5, %v777_v35, %v779_v55  ;;  %v3062_v25 = vsel %vm694_vm1, %v751_v20, %v753_v48  ;;  %v482_v60 = vmax.f32 %v450_v46, 0.0 }
  0x63   : > { %5115 = vst [vmem:[#allocation39_spill] sm:$0xff] %v3062_v25  ;;  %v3067_v18 = vpack.i.bf16 %v780_v17, %v778_v58  ;;  %v3076_v55 = vsel %vm694_vm1, %v756_v5, %v758_v8  ;;  %v3083_v58 = vsel %vm528_vm0, %v570_v45, %v571_v36  ;;  %v3086_v20 = vsel %vm528_vm0, 0.0, %v570_v45 }
  0x64   : > { %5119 = vst [vmem:[#allocation43_spill] sm:$0xff] %v3076_v55  ;;  %v761_v35 = vrot.slane %v3070_v1, 1  ;;  %v763_v48 = vrot.slane %v3073_v16, 1  ;;  %v573_v5 = vrot.slane %v482_v60, 7  ;;  %v765_v34 = vrot.slane %v3086_v20, 1 }
  0x65   : > { %5117 = vst [vmem:[#allocation41_spill] sm:$0xff] %v3067_v18  ;;  %v766_v46 = vrot.slane %v3083_v58, 1  ;;  %v3118_v6 = vsel %vm528_vm0, %v574_v56, 0.0 }
  0x66   : > { %5120 = vst [vmem:[#allocation44_spill] sm:$0xff] %v3083_v58  ;;  %v3096_v14 = vsel %vm694_vm1, %v761_v35, %v763_v48  ;;  %v3099_v8 = vsel %vm694_vm1, %v760_v10, %v761_v35  ;;  %v3102_v45 = vsel %vm528_vm0, %v573_v5, %v574_v56  ;;  %v3105_v17 = vsel %vm528_vm0, 0.0, %v573_v5 }
  0x67   : > { %5121 = vst [vmem:[#allocation45_spill] sm:$0xff] %v3096_v14  ;;  %v3111_v60 = vsel %vm694_vm1, %v765_v34, %v766_v46  ;;  %v770_v35 = vrot.slane %v3105_v17, 1  ;;  %v771_v48 = vrot.slane %v3102_v45, 1  ;;  %v768_v10 = vrot.slane %v3108_v4, 1 }
  0x68   : > { %916 = vrot.lane.b32.xlu2 %v3059_v27, %s2546_s10  ;;  %914 = vrot.lane.b32.xlu1 %v3062_v25, %s2546_s10  ;;  %5122 = vst [vmem:[#allocation46_spill] sm:$0xff] %v3099_v8  ;;  %v773_v36 = vrot.slane %v3118_v6, 1 }
  0x69   : > { %5123 = vst [vmem:[#allocation47_spill] sm:$0xff] %v3102_v45  ;;  %v3127_v5 = vsel %vm694_vm1, %v770_v35, %v771_v48  ;;  %v3130_v34 = vsel %vm694_vm1, %v766_v46, %v768_v10  ;;  %v784_v35 = vrot.slane %v2722_v24, 2  ;;  %v787_v10 = vrot.slane %v2713_v21, 2 }
  0x6a   : > { %918 = vrot.lane.b32.xlu0 %v3076_v55, %s2546_s10  ;;  %5124 = vst [vmem:[#allocation48_spill] sm:$0xff] %v3105_v17  ;;  %v3133_v56 = vsel %vm694_vm1, %v771_v48, %v773_v36  ;;  %v789_v36 = vrot.slane %v2716_v22, 2  ;;  %v791_v24 = vrot.slane %v2735_v32, 2  ;;  %v796_v22 = vrot.slane %v2789_v63, 2 }
  0x6b   : > { %5125 = vst [vmem:[#allocation49_spill] sm:$0xff] %v3111_v60 }
  0x6c   : > { %5126 = vst [vmem:[#allocation50_spill] sm:$0xff] %v3127_v5 }
  0x6d   : > { %5127 = vst [vmem:[#allocation51_spill] sm:$0xff] %v3130_v34 }
  0x6e   : > { %5128 = vst [vmem:[#allocation52_spill] sm:$0xff] %v3133_v56 }
  0x70   : > { %922 = vrot.lane.b32.xlu2 %v3096_v14, %s2546_s10  ;;  %920 = vrot.lane.b32.xlu1 %v3099_v8, %s2546_s10  ;;  %v781_v8 = vrot.slane %v2729_v29, 2 }
  0x72   : > { %924 = vrot.lane.b32.xlu0 %v3111_v60, %s2546_s10  ;;  %v782_v60 = vrot.slane %v2719_v23, 2 }
  0x74   : > { %v3145_v46 = vsel %vm775_vm5, %v781_v8, %v782_v60  ;;  %v3148_v48 = vsel %vm775_vm5, %v782_v60, %v784_v35  ;;  %v792_v8 = vrot.slane %v2732_v31, 2  ;;  %v3162_v60 = vsel %vm775_vm5, %v787_v10, %v789_v36 }
  0x75   : > { %5129 = vst [vmem:[#allocation53_spill] sm:$0xff] %v3145_v46 }
  0x76   : > { %5130 = vst [vmem:[#allocation54_spill] sm:$0xff] %v3148_v48 }
  0x77   : > { %5131 = vst [vmem:[#allocation55_spill] sm:$0xff] %v3162_v60 }
  0x78   : > { %928 = vrot.lane.b32.xlu2 %v3127_v5, %s2546_s10  ;;  %926 = vrot.lane.b32.xlu1 %v3130_v34, %s2546_s10 }
  0x7a   : > { %930 = vrot.lane.b32.xlu0 %v3133_v56, %s2546_s10  ;;  %v786_v56 = vrot.slane %v2738_v33, 2  ;;  %s2553_s10 = smov 64  }
  0x7c   : > { %v3165_v35 = vsel %vm775_vm5, %v786_v56, %v787_v10  ;;  %v799_v10 = vrot.slane %v2765_v53, 2  ;;  %v801_v53 = vrot.slane %v2828_v39, 2 }
  0x80   : > { %968 = vrot.lane.b32.xlu2 %v3145_v46, %s2547_s21  ;;  %2511 = vrot.lane.b32.xlu1 %v3067_v18, %s2547_s21  ;;  %v3168_v18 = vsel %vm775_vm5, %v791_v24, %v792_v8  ;;  %v794_v46 = vrot.slane %v2755_v49, 2  ;;  %v802_v49 = vrot.slane %v2825_v28, 2 }
  0x81   : > { %5132 = vst [vmem:[#allocation56_spill] sm:$0xff] %v3168_v18 }
  0x82   : > { %970 = vrot.lane.b32.xlu0 %v3148_v48, %s2547_s21  ;;  %v797_v48 = vrot.slane %v2758_v50, 2  ;;  %v3186_v24 = vsel %vm775_vm5, %v792_v8, %v794_v46  ;;  %v807_v8 = vrot.slane %v2837_v54, 2 }
  0x83   : > { %5135 = vst [vmem:[#allocation59_spill] sm:$0xff] %v3186_v24 }
  0x84   : > { %v3183_v36 = vsel %vm775_vm5, %v796_v22, %v797_v48 }
  0x85   : > { %5134 = vst [vmem:[#allocation58_spill] sm:$0xff] %v3183_v36 }
  0x88   : > { %974 = vrot.lane.b32.xlu2 %v3162_v60, %s2547_s21  ;;  %972 = vrot.lane.b32.xlu1 %v3165_v35, %s2547_s21  ;;  %v3189_v60 = vsel %vm775_vm5, %v797_v48, %v799_v10  ;;  %v806_v48 = vrot.slane %v2840_v57, 2  ;;  %v3208_v10 = vsel %vm775_vm5, %v801_v53, %v802_v49  ;;  %v814_v53 = vrot.slane %v2891_v52, 2 }
  0x89   : > { %5136 = vst [vmem:[#allocation60_spill] sm:$0xff] %v3189_v60  ;;  %v816_v52 = vrot.slane %v2898_v3, 2 }
  0x8a   : > { %976 = vrot.lane.b32.xlu0 %v3168_v18, %s2547_s21  ;;  %v3179_v56 = vpop.permute.xlu2 %878  ;;  %5139 = vst [vmem:[#allocation63_spill] sm:$0xff] %v3208_v10 }
  0x8b   : > { %5133 = vst [vmem:[#allocation57_spill] sm:$0xff] %v3179_v56  ;;  %v804_v56 = vrot.slane %v2831_v40, 2  ;;  %v811_v40 = vrot.slane %v2895_v30, 2 }
  0x8d   : > { %v3205_v22 = vsel %vm775_vm5, %v802_v49, %v804_v56  ;;  %v3222_v56 = vpop.permute.xlu0 %2506 }
  0x8e   : > { %5138 = vst [vmem:[#allocation62_spill] sm:$0xff] %v3205_v22 }
  0x8f   : > { %5140 = vst [vmem:[#allocation64_spill] sm:$0xff] %v3222_v56 }
  0x90   : > { %980 = vrot.lane.b32.xlu2 %v3183_v36, %s2547_s21  ;;  %978 = vrot.lane.b32.xlu1 %v3186_v24, %s2547_s21  ;;  %v3211_v36 = vsel %vm775_vm5, %v806_v48, %v807_v8 }
  0x92   : > { %982 = vrot.lane.b32.xlu0 %v3189_v60, %s2547_s21  ;;  %v3200_v46 = vpop.permute.xlu2 %880  ;;  %v809_v60 = vrot.slane %v2851_v2, 2  ;;  %v817_v2 = vrot.slane %v2913_v7, 2 }
  0x93   : > { %5137 = vst [vmem:[#allocation61_spill] sm:$0xff] %v3200_v46  ;;  %v812_v46 = vrot.slane %v2888_v62, 2 }
  0x95   : > { %v3228_v48 = vsel %vm775_vm5, %v811_v40, %v812_v46  ;;  %v822_v40 = vrot.slane %v2942_v44, 2 }
  0x96   : > { %5142 = vst [vmem:[#allocation66_spill] sm:$0xff] %v3228_v48 }
  0x98   : > { %986 = vrot.lane.b32.xlu2 %v3205_v22, %s2547_s21  ;;  %984 = vrot.lane.b32.xlu1 %v3208_v10, %s2547_s21  ;;  %v3231_v22 = vsel %vm775_vm5, %v807_v8, %v809_v60  ;;  %v3234_v10 = vsel %vm775_vm5, %v812_v46, %v814_v53  ;;  %v821_v46 = vrot.slane %v2938_v37, 2 }
  0x99   : > { %5143 = vst [vmem:[#allocation67_spill] sm:$0xff] %v3231_v22 }
  0x9a   : > { %988 = vrot.lane.b32.xlu0 %v3211_v36, %s2547_s21  ;;  %v3224_v49 = vpop.permute.xlu2 %886  ;;  %5144 = vst [vmem:[#allocation68_spill] sm:$0xff] %v3234_v10 }
  0x9b   : > { %5141 = vst [vmem:[#allocation65_spill] sm:$0xff] %v3224_v49  ;;  %v819_v49 = vrot.slane %v2926_v0, 2  ;;  %v3257_v0 = vsel %vm775_vm5, %v816_v52, %v817_v2  ;;  %v829_v52 = vrot.slane %v2976_v19, 2  ;;  %v834_v19 = vrot.slane %v3020_v41, 2 }
  0x9c   : > { %5149 = vst [vmem:[#allocation73_spill] sm:$0xff] %v3257_v0 }
  0x9d   : > { %v3254_v56 = vsel %vm775_vm5, %v817_v2, %v819_v49 }
  0x9e   : > { %5148 = vst [vmem:[#allocation72_spill] sm:$0xff] %v3254_v56 }
  0xa0   : > { %992 = vrot.lane.b32.xlu2 %v3228_v48, %s2547_s21  ;;  %990 = vrot.lane.b32.xlu1 %v3231_v22, %s2547_s21  ;;  %v3260_v48 = vsel %vm775_vm5, %v821_v46, %v822_v40 }
  0xa1   : > { %5150 = vst [vmem:[#allocation74_spill] sm:$0xff] %v3260_v48 }
  0xa2   : > { %994 = vrot.lane.b32.xlu0 %v3234_v10, %s2547_s21  ;;  %v3245_v60 = vpop.permute.xlu2 %892  ;;  %v3247_v8 = vpop.permute.xlu1 %874 }
  0xa3   : > { %5145 = vst [vmem:[#allocation69_spill] sm:$0xff] %v3245_v60  ;;  %v827_v60 = vrot.slane %v2972_v11, 2 }
  0xa4   : > { %5146 = vst [vmem:[#allocation70_spill] sm:$0xff] %v3247_v8  ;;  %v3251_v53 = vpop.permute.xlu0 %872  ;;  %v826_v8 = vrot.slane %v2985_v61, 2 }
  0xa5   : > { %5147 = vst [vmem:[#allocation71_spill] sm:$0xff] %v3251_v53  ;;  %v824_v53 = vrot.slane %v2951_v12, 2  ;;  %v832_v12 = vrot.slane %v3000_v47, 2 }
  0xa7   : > { %v3282_v10 = vsel %vm775_vm5, %v822_v40, %v824_v53  ;;  %v837_v53 = vrot.slane %v3031_v13, 2 }
  0xa8   : > { %998 = vrot.lane.b32.xlu2 %v3254_v56, %s2547_s21  ;;  %996 = vrot.lane.b32.xlu1 %v3257_v0, %s2547_s21  ;;  %v3279_v56 = vsel %vm775_vm5, %v826_v8, %v827_v60  ;;  %5154 = vst [vmem:[#allocation78_spill] sm:$0xff] %v3282_v10  ;;  %v3285_v0 = vsel %vm775_vm5, %v827_v60, %v829_v52  ;;  %v836_v60 = vrot.slane %v3028_v26, 2 }
  0xa9   : > { %5155 = vst [vmem:[#allocation79_spill] sm:$0xff] %v3285_v0 }
  0xaa   : > { %1000 = vrot.lane.b32.xlu0 %v3260_v48, %s2547_s21  ;;  %v3271_v49 = vpop.permute.xlu2 %898  ;;  %v3273_v2 = vpop.permute.xlu1 %876 }
  0xab   : > { %5151 = vst [vmem:[#allocation75_spill] sm:$0xff] %v3271_v49  ;;  %v3311_v49 = vsel %vm775_vm5, %v836_v60, %v837_v53 }
  0xac   : > { %5152 = vst [vmem:[#allocation76_spill] sm:$0xff] %v3273_v2  ;;  %v3276_v46 = vpop.permute.xlu0 %882  ;;  %v3305_v2 = vsel %vm775_vm5, %v832_v12, %v834_v19  ;;  %v844_v19 = vrot.slane %v3073_v16, 2  ;;  %v849_v16 = vrot.slane %v3108_v4, 2 }
  0xad   : > { %5153 = vst [vmem:[#allocation77_spill] sm:$0xff] %v3276_v46  ;;  %v831_v46 = vrot.slane %v3003_v9, 2 }
  0xae   : > { %5159 = vst [vmem:[#allocation83_spill] sm:$0xff] %v3305_v2 }
  0xaf   : > { %v3308_v41 = vsel %vm775_vm5, %v831_v46, %v832_v12  ;;  %5161 = vst [vmem:[#allocation85_spill] sm:$0xff] %v3311_v49 }
  0xb0   : > { %1004 = vrot.lane.b32.xlu2 %v3279_v56, %s2547_s21  ;;  %1002 = vrot.lane.b32.xlu1 %v3282_v10, %s2547_s21  ;;  %5160 = vst [vmem:[#allocation84_spill] sm:$0xff] %v3308_v41 }
  0xb2   : > { %1006 = vrot.lane.b32.xlu0 %v3285_v0, %s2547_s21  ;;  %v3296_v8 = vpop.permute.xlu2 %904  ;;  %v3298_v40 = vpop.permute.xlu1 %884 }
  0xb3   : > { %5156 = vst [vmem:[#allocation80_spill] sm:$0xff] %v3296_v8  ;;  %v842_v8 = vrot.slane %v3070_v1, 2 }
  0xb4   : > { %5157 = vst [vmem:[#allocation81_spill] sm:$0xff] %v3298_v40  ;;  %v3302_v52 = vpop.permute.xlu0 %888  ;;  %v841_v40 = vrot.slane %v3065_v15, 2 }
  0xb5   : > { %5158 = vst [vmem:[#allocation82_spill] sm:$0xff] %v3302_v52  ;;  %v839_v52 = vrot.slane %v3046_v59, 2  ;;  %v847_v59 = vrot.slane %v3083_v58, 2 }
  0xb7   : > { %v3333_v0 = vsel %vm775_vm5, %v837_v53, %v839_v52  ;;  %v852_v52 = vrot.slane %v3102_v45, 2 }
  0xb8   : > { %1010 = vrot.lane.b32.xlu2 %v3305_v2, %s2547_s21  ;;  %1008 = vrot.lane.b32.xlu1 %v3308_v41, %s2547_s21  ;;  %v3330_v2 = vsel %vm775_vm5, %v841_v40, %v842_v8  ;;  %5166 = vst [vmem:[#allocation90_spill] sm:$0xff] %v3333_v0  ;;  %v3336_v41 = vsel %vm775_vm5, %v842_v8, %v844_v19  ;;  %v851_v8 = vrot.slane %v3105_v17, 2 }
  0xb9   : > { %5165 = vst [vmem:[#allocation89_spill] sm:$0xff] %v3330_v2 }
  0xba   : > { %1012 = vrot.lane.b32.xlu0 %v3311_v49, %s2547_s21  ;;  %v3322_v46 = vpop.permute.xlu2 %910  ;;  %v3324_v12 = vpop.permute.xlu1 %890  ;;  %5167 = vst [vmem:[#allocation91_spill] sm:$0xff] %v3336_v41 }
  0xbb   : > { %5162 = vst [vmem:[#allocation86_spill] sm:$0xff] %v3322_v46  ;;  %v846_v46 = vrot.slane %v3086_v20, 2 }
  0xbc   : > { %5163 = vst [vmem:[#allocation87_spill] sm:$0xff] %v3324_v12  ;;  %v3327_v60 = vpop.permute.xlu0 %894  ;;  %v3362_v12 = vsel %vm775_vm5, %v851_v8, %v852_v52 }
  0xbd   : > { %5164 = vst [vmem:[#allocation88_spill] sm:$0xff] %v3327_v60  ;;  %v3356_v60 = vsel %vm775_vm5, %v847_v59, %v849_v16  ;;  %v3359_v4 = vsel %vm775_vm5, %v846_v46, %v847_v59 }
  0xbe   : > { %5170 = vst [vmem:[#allocation94_spill] sm:$0xff] %v3362_v12 }
  0xc0   : > { %1016 = vrot.lane.b32.xlu2 %v3330_v2, %s2547_s21  ;;  %1014 = vrot.lane.b32.xlu1 %v3333_v0, %s2547_s21 }
  0xc2   : > { %1018 = vrot.lane.b32.xlu0 %v3336_v41, %s2547_s21  ;;  %v3347_v40 = vpop.permute.xlu2 %916  ;;  %v3349_v53 = vpop.permute.xlu1 %896 }
  0xc3   : > { %5168 = vst [vmem:[#allocation92_spill] sm:$0xff] %v3347_v40  ;;  %v854_v40 = vrot.slane %v3118_v6, 2 }
  0xc4   : > { %v3353_v19 = vpop.permute.xlu0 %900 }
  0xc5   : > { %5169 = vst [vmem:[#allocation93_spill] sm:$0xff] %v3353_v19  ;;  %v3378_v59 = vsel %vm775_vm5, %v852_v52, %v854_v40 }
  0xc6   : > { %5174 = vst [vmem:[#allocation98_spill] sm:$0xff] %v3378_v59 }
  0xc8   : > { %1022 = vrot.lane.b32.xlu2 %v3356_v60, %s2547_s21  ;;  %1020 = vrot.lane.b32.xlu1 %v3359_v4, %s2547_s21 }
  0xca   : > { %1024 = vrot.lane.b32.xlu0 %v3362_v12, %s2547_s21  ;;  %v3371_v19 = vpop.permute.xlu2 %922  ;;  %v3373_v16 = vpop.permute.xlu1 %902 }
  0xcb   : > { %5171 = vst [vmem:[#allocation95_spill] sm:$0xff] %v3371_v19 }
  0xcc   : > { %5172 = vst [vmem:[#allocation96_spill] sm:$0xff] %v3373_v16  ;;  %v3375_v46 = vpop.permute.xlu0 %906 }
  0xcd   : > { %5173 = vst [vmem:[#allocation97_spill] sm:$0xff] %v3375_v46 }
  0xd0   : > { %1060 = vrot.lane.b32.xlu2 %v2729_v29, %s2548_s22  ;;  %1026 = vrot.lane.b32.xlu1 %v3378_v59, %s2547_s21 }
  0xd2   : > { %1062 = vrot.lane.b32.xlu0 %v2719_v23, %s2548_s22  ;;  %v3386_v6 = vpop.permute.xlu2 %928  ;;  %v3388_v8 = vpop.permute.xlu1 %908 }
  0xd3   : > { %5175 = vst [vmem:[#allocation99_spill] sm:$0xff] %v3386_v6 }
  0xd4   : > { %5176 = vst [vmem:[#allocation100_spill] sm:$0xff] %v3388_v8  ;;  %v3390_v19 = vpop.permute.xlu0 %912  ;;  %v331_v8 = vld [vmem:[%s2643_s14 + $0xf0] sm:$0xff] }
  0xd5   : > { %5177 = vst [vmem:[#allocation101_spill] sm:$0xff] %v3390_v19 }
  0xd8   : > { %1066 = vrot.lane.b32.xlu2 %v2713_v21, %s2548_s22  ;;  %1064 = vrot.lane.b32.xlu1 %v2738_v33, %s2548_s22 }
  0xda   : > { %1068 = vrot.lane.b32.xlu0 %v2735_v32, %s2548_s22  ;;  %v3398_v40 = vpop.permute.xlu2 %968  ;;  %v3400_v52 = vpop.permute.xlu1 %914 }
  0xdb   : > { %5178 = vst [vmem:[#allocation102_spill] sm:$0xff] %v3398_v40 }
  0xdc   : > { %5179 = vst [vmem:[#allocation103_spill] sm:$0xff] %v3400_v52  ;;  %v3402_v29 = vpop.permute.xlu0 %918 }
  0xdd   : > { %5180 = vst [vmem:[#allocation104_spill] sm:$0xff] %v3402_v29 }
  0xe0   : > { %1072 = vrot.lane.b32.xlu2 %v2789_v63, %s2548_s22  ;;  %1070 = vrot.lane.b32.xlu1 %v2732_v31, %s2548_s22 }
  0xe2   : > { %1074 = vrot.lane.b32.xlu0 %v2758_v50, %s2548_s22  ;;  %v3410_v6 = vpop.permute.xlu2 %974  ;;  %v3412_v23 = vpop.permute.xlu1 %920 }
  0xe3   : > { %5181 = vst [vmem:[#allocation105_spill] sm:$0xff] %v3410_v6 }
  0xe4   : > { %5182 = vst [vmem:[#allocation106_spill] sm:$0xff] %v3412_v23  ;;  %v3414_v19 = vpop.permute.xlu0 %924 }
  0xe5   : > { %5183 = vst [vmem:[#allocation107_spill] sm:$0xff] %v3414_v19 }
  0xe8   : > { %1078 = vrot.lane.b32.xlu2 %v2825_v28, %s2548_s22  ;;  %1076 = vrot.lane.b32.xlu1 %v2828_v39, %s2548_s22 }
  0xea   : > { %1080 = vrot.lane.b32.xlu0 %v2840_v57, %s2548_s22  ;;  %v3422_v40 = vpop.permute.xlu2 %980  ;;  %v3424_v29 = vpop.permute.xlu1 %926 }
  0xeb   : > { %5184 = vst [vmem:[#allocation108_spill] sm:$0xff] %v3422_v40 }
  0xec   : > { %5185 = vst [vmem:[#allocation109_spill] sm:$0xff] %v3424_v29  ;;  %v3426_v46 = vpop.permute.xlu0 %930 }
  0xed   : > { %5186 = vst [vmem:[#allocation110_spill] sm:$0xff] %v3426_v46 }
  0xf0   : > { %1084 = vrot.lane.b32.xlu2 %v2895_v30, %s2548_s22  ;;  %1082 = vrot.lane.b32.xlu1 %v2837_v54, %s2548_s22 }
  0xf2   : > { %1086 = vrot.lane.b32.xlu0 %v2888_v62, %s2548_s22  ;;  %v3434_v6 = vpop.permute.xlu2 %986  ;;  %v3436_v19 = vpop.permute.xlu1 %2511 }
  0xf3   : > { %5187 = vst [vmem:[#allocation111_spill] sm:$0xff] %v3436_v19 }
  0xf4   : > { %v3438_v23 = vpop.permute.xlu0 %970 }
  0xf5   : > { %5188 = vst [vmem:[#allocation112_spill] sm:$0xff] %v3438_v23 }
  0xf8   : > { %1090 = vrot.lane.b32.xlu2 %v2913_v7, %s2548_s22  ;;  %1088 = vrot.lane.b32.xlu1 %v2898_v3, %s2548_s22 }
  0xfa   : > { %1092 = vrot.lane.b32.xlu0 %v2938_v37, %s2548_s22  ;;  %v3446_v40 = vpop.permute.xlu2 %992  ;;  %v3448_v46 = vpop.permute.xlu1 %972 }
  0xfb   : > { %5189 = vst [vmem:[#allocation113_spill] sm:$0xff] %v3448_v46  ;;  %v332_v46 = vld [vmem:[%s2643_s14 + $0xf8] sm:$0xff] }
  0xfc   : > { %v3450_v29 = vpop.permute.xlu0 %976 }
  0xfd   : > { %5190 = vst [vmem:[#allocation114_spill] sm:$0xff] %v3450_v29  ;;  %v2534_v29 = vld [vmem:[%s4944_s1] ss:$0 sm:$0xff] }
  0xfe   : > { %v379_v16 = vsub.f32 %v331_v8, %v2534_v29 }
 0x100   : > { %1096 = vrot.lane.b32.xlu2 %v2985_v61, %s2548_s22  ;;  %1094 = vrot.lane.b32.xlu1 %v2942_v44, %s2548_s22 }
 0x102   : > { %1098 = vrot.lane.b32.xlu0 %v2972_v11, %s2548_s22  ;;  %v3458_v23 = vpop.permute.xlu2 %998  ;;  %v3460_v19 = vpop.permute.xlu1 %978 }
 0x103   : > { %5191 = vst [vmem:[#allocation115_spill] sm:$0xff] %v3458_v23 }
 0x104   : > { %5192 = vst [vmem:[#allocation116_spill] sm:$0xff] %v3460_v19  ;;  %v3462_v52 = vpop.permute.xlu0 %982 }
 0x105   : > { %5193 = vst [vmem:[#allocation117_spill] sm:$0xff] %v3462_v52  ;;  %v380_v52 = vsub.f32 %v332_v46, %v2534_v29 }
 0x108   : > { %1102 = vrot.lane.b32.xlu2 %v3000_v47, %s2548_s22  ;;  %1100 = vrot.lane.b32.xlu1 %v3003_v9, %s2548_s22  ;;  %v416_v47 = vmul.f32 %v2681_v42, %v379_v16  ;;  %v417_v9 = vmul.f32 %v2681_v42, %v380_v52 }
 0x10a   : > { %1104 = vrot.lane.b32.xlu0 %v3028_v26, %s2548_s22  ;;  %v3475_v11 = vpop.permute.xlu2 %1004  ;;  %v3477_v19 = vpop.permute.xlu1 %984  ;;  %v452_v8 = vadd.f32 %v2686_v43, %v416_v47  ;;  %v453_v46 = vadd.f32 %v2686_v43, %v417_v9 }
 0x10c   : > { %v3479_v23 = vpop.permute.xlu0 %988  ;;  %v484_v42 = vmax.f32 %v452_v8, 0.0  ;;  %v485_v52 = vmax.f32 %v453_v46, 0.0 }
 0x10e   : > { %v576_v47 = vrot.slane %v484_v42, 7 }
 0x110   : > { %1108 = vrot.lane.b32.xlu2 %v3065_v15, %s2548_s22  ;;  %1106 = vrot.lane.b32.xlu1 %v3031_v13, %s2548_s22  ;;  %v3507_v15 = vrot.slane %v485_v52, 7  ;;  %v3512_v9 = vsel %vm528_vm0, 0.0, %v576_v47 }
 0x111   : > { %5197 = vst [vmem:[#allocation121_spill] sm:$0xff] %v3512_v9 }
 0x112   : > { %1110 = vrot.lane.b32.xlu0 %v3070_v1, %s2548_s22  ;;  %v3490_v26 = vpop.permute.xlu2 %1010  ;;  %v3492_v29 = vpop.permute.xlu1 %990  ;;  %v3516_v8 = vsel %vm528_vm0, %v576_v47, %v3507_v15  ;;  %v5202_v47 = vld [vmem:[#allocation15_spill] sm:$0xff] }
 0x113   : > { %5198 = vst [vmem:[#allocation122_spill] sm:$0xff] %v3516_v8 }
 0x114   : > { %v3495_v16 = vpop.permute.xlu0 %994 }
 0x118   : > { %1114 = vrot.lane.b32.xlu2 %v3083_v58, %s2548_s22  ;;  %1112 = vrot.lane.b32.xlu1 %v3086_v20, %s2548_s22 }
 0x11a   : > { %1116 = vrot.lane.b32.xlu0 %v3105_v17, %s2548_s22  ;;  %v3503_v1 = vpop.permute.xlu2 %1016  ;;  %v3505_v13 = vpop.permute.xlu1 %996 }
 0x11b   : > { %5194 = vst [vmem:[#allocation118_spill] sm:$0xff] %v3503_v1 }
 0x11c   : > { %5195 = vst [vmem:[#allocation119_spill] sm:$0xff] %v3505_v13  ;;  %v3509_v43 = vpop.permute.xlu0 %1000  ;;  %v5235_v13 = vld [vmem:[#allocation33_spill] sm:$0xff] }
 0x11d   : > { %5196 = vst [vmem:[#allocation120_spill] sm:$0xff] %v3509_v43 }
 0x120   : > { %1120 = vrot.lane.b32.xlu2 %v3512_v9, %s2548_s22  ;;  %1118 = vrot.lane.b32.xlu1 %v3102_v45, %s2548_s22 }
 0x122   : > { %1122 = vrot.lane.b32.xlu0 %v3516_v8, %s2548_s22  ;;  %v3524_v46 = vpop.permute.xlu2 %1022  ;;  %v3526_v42 = vpop.permute.xlu1 %1002 }
 0x123   : > { %5199 = vst [vmem:[#allocation123_spill] sm:$0xff] %v3524_v46 }
 0x124   : > { %5200 = vst [vmem:[#allocation124_spill] sm:$0xff] %v3526_v42  ;;  %v3528_v52 = vpop.permute.xlu0 %1006  ;;  %v5206_v42 = vld [vmem:[#allocation14_spill] sm:$0xff] }
 0x125   : > { %5201 = vst [vmem:[#allocation125_spill] sm:$0xff] %v3528_v52  ;;  %v5207_v52 = vld [vmem:[#allocation12_spill] sm:$0xff] }
 0x128   : > { %1158 = vrot.lane.b32.xlu2 %v2744_v38, %s2549_s25  ;;  %1156 = vrot.lane.b32.xlu1 %v2761_v51, %s2549_s25  ;;  %v5208_v38 = vld [vmem:[#allocation17_spill] sm:$0xff] }
 0x12a   : > { %1160 = vrot.lane.b32.xlu0 %v5202_v47, %s2549_s25  ;;  %v3536_v45 = vpop.permute.xlu2 %1060  ;;  %v3538_v17 = vpop.permute.xlu1 %1008 }
 0x12b   : > { %5203 = vst [vmem:[#allocation15_spill] sm:$0xff] %v3536_v45  ;;  %v5212_v45 = vld [vmem:[#allocation18_spill] sm:$0xff] }
 0x12c   : > { %5204 = vst [vmem:[#allocation126_spill] sm:$0xff] %v3538_v17  ;;  %v3540_v43 = vpop.permute.xlu0 %1012 }
 0x12d   : > { %5205 = vst [vmem:[#allocation127_spill] sm:$0xff] %v3540_v43  ;;  %v5213_v43 = vld [vmem:[#allocation19_spill] sm:$0xff] }
 0x130   : > { %1164 = vrot.lane.b32.xlu2 %v5206_v42, %s2549_s25  ;;  %1162 = vrot.lane.b32.xlu1 %v5207_v52, %s2549_s25  ;;  %v5214_v42 = vld [vmem:[#allocation20_spill] sm:$0xff] }
 0x132   : > { %1166 = vrot.lane.b32.xlu0 %v5208_v38, %s2549_s25  ;;  %v3548_v46 = vpop.permute.xlu2 %1066  ;;  %v3550_v51 = vpop.permute.xlu1 %1014 }
 0x133   : > { %5209 = vst [vmem:[#allocation128_spill] sm:$0xff] %v3548_v46  ;;  %v5218_v46 = vld [vmem:[#allocation21_spill] sm:$0xff] }
 0x134   : > { %5210 = vst [vmem:[#allocation129_spill] sm:$0xff] %v3550_v51  ;;  %v3552_v58 = vpop.permute.xlu0 %1018 }
 0x135   : > { %5211 = vst [vmem:[#allocation130_spill] sm:$0xff] %v3552_v58  ;;  %v5219_v58 = vld [vmem:[#allocation22_spill] sm:$0xff] }
 0x138   : > { %1170 = vrot.lane.b32.xlu2 %v5212_v45, %s2549_s25  ;;  %1168 = vrot.lane.b32.xlu1 %v5213_v43, %s2549_s25  ;;  %v5220_v45 = vld [vmem:[#allocation23_spill] sm:$0xff] }
 0x13a   : > { %1172 = vrot.lane.b32.xlu0 %v5214_v42, %s2549_s25  ;;  %v3560_v17 = vpop.permute.xlu2 %1072  ;;  %v3562_v52 = vpop.permute.xlu1 %1020 }
 0x13b   : > { %5215 = vst [vmem:[#allocation131_spill] sm:$0xff] %v3560_v17  ;;  %v5224_v17 = vld [vmem:[#allocation24_spill] sm:$0xff] }
 0x13c   : > { %5216 = vst [vmem:[#allocation132_spill] sm:$0xff] %v3562_v52  ;;  %v3564_v38 = vpop.permute.xlu0 %1024  ;;  %v5226_v52 = vld [vmem:[#allocation26_spill] sm:$0xff] }
 0x13d   : > { %5217 = vst [vmem:[#allocation133_spill] sm:$0xff] %v3564_v38  ;;  %v5225_v38 = vld [vmem:[#allocation25_spill] sm:$0xff] }
 0x140   : > { %1176 = vrot.lane.b32.xlu2 %v5218_v46, %s2549_s25  ;;  %1174 = vrot.lane.b32.xlu1 %v5219_v58, %s2549_s25 }
 0x142   : > { %1178 = vrot.lane.b32.xlu0 %v5220_v45, %s2549_s25  ;;  %v3572_v51 = vpop.permute.xlu2 %1078  ;;  %v3574_v43 = vpop.permute.xlu1 %1026 }
 0x143   : > { %5221 = vst [vmem:[#allocation134_spill] sm:$0xff] %v3572_v51  ;;  %v5229_v51 = vld [vmem:[#allocation29_spill] sm:$0xff] }
 0x144   : > { %5222 = vst [vmem:[#allocation135_spill] sm:$0xff] %v3574_v43  ;;  %v3576_v42 = vpop.permute.xlu0 %1062 }
 0x145   : > { %5223 = vst [vmem:[#allocation136_spill] sm:$0xff] %v3576_v42  ;;  %v5230_v42 = vld [vmem:[#allocation27_spill] sm:$0xff] }
 0x148   : > { %1182 = vrot.lane.b32.xlu2 %v5224_v17, %s2549_s25  ;;  %1180 = vrot.lane.b32.xlu1 %v5225_v38, %s2549_s25  ;;  %v5231_v17 = vld [vmem:[#allocation30_spill] sm:$0xff] }
 0x14a   : > { %1184 = vrot.lane.b32.xlu0 %v5226_v52, %s2549_s25  ;;  %v3584_v46 = vpop.permute.xlu2 %1084  ;;  %v3586_v58 = vpop.permute.xlu1 %1064 }
 0x14b   : > { %5227 = vst [vmem:[#allocation137_spill] sm:$0xff] %v3586_v58 }
 0x14c   : > { %v3588_v45 = vpop.permute.xlu0 %1068 }
 0x14d   : > { %5228 = vst [vmem:[#allocation138_spill] sm:$0xff] %v3588_v45  ;;  %v5236_v45 = vld [vmem:[#allocation34_spill] sm:$0xff] }
 0x150   : > { %1188 = vrot.lane.b32.xlu2 %v5229_v51, %s2549_s25  ;;  %1186 = vrot.lane.b32.xlu1 %v5230_v42, %s2549_s25  ;;  %v5237_v51 = vld [vmem:[#allocation37_spill] sm:$0xff] }
 0x152   : > { %1190 = vrot.lane.b32.xlu0 %v5231_v17, %s2549_s25  ;;  %v3596_v43 = vpop.permute.xlu2 %1090  ;;  %v3598_v38 = vpop.permute.xlu1 %1070 }
 0x153   : > { %5232 = vst [vmem:[#allocation139_spill] sm:$0xff] %v3596_v43 }
 0x154   : > { %5233 = vst [vmem:[#allocation140_spill] sm:$0xff] %v3598_v38  ;;  %v3600_v52 = vpop.permute.xlu0 %1074 }
 0x155   : > { %5234 = vst [vmem:[#allocation141_spill] sm:$0xff] %v3600_v52 }
 0x158   : > { %1194 = vrot.lane.b32.xlu2 %v5235_v13, %s2549_s25  ;;  %1192 = vrot.lane.b32.xlu1 %v5236_v45, %s2549_s25 }
 0x15a   : > { %1196 = vrot.lane.b32.xlu0 %v5237_v51, %s2549_s25  ;;  %v3608_v58 = vpop.permute.xlu2 %1096  ;;  %v3610_v42 = vpop.permute.xlu1 %1076 }
 0x15b   : > { %5238 = vst [vmem:[#allocation34_spill] sm:$0xff] %v3608_v58  ;;  %v5245_v58 = vld [vmem:[#allocation52_spill] sm:$0xff] }
 0x15c   : > { %5239 = vst [vmem:[#allocation142_spill] sm:$0xff] %v3610_v42  ;;  %v3612_v17 = vpop.permute.xlu0 %1080  ;;  %v5241_v42 = vld [vmem:[#allocation46_spill] sm:$0xff] }
 0x160   : > { %1200 = vrot.lane.b32.xlu2 %v3059_v27, %s2549_s25  ;;  %1198 = vrot.lane.b32.xlu1 %v3062_v25, %s2549_s25  ;;  %v5242_v27 = vld [vmem:[#allocation49_spill] sm:$0xff] }
 0x162   : > { %1202 = vrot.lane.b32.xlu0 %v3076_v55, %s2549_s25  ;;  %v3620_v52 = vpop.permute.xlu2 %1102  ;;  %v3622_v38 = vpop.permute.xlu1 %1082 }
 0x163   : > { %5240 = vst [vmem:[#allocation143_spill] sm:$0xff] %v3620_v52  ;;  %v3640_v52 = vsel %vm528_vm0, %v3507_v15, 0.0 }
 0x164   : > { %v3624_v51 = vpop.permute.xlu0 %1086 }
 0x168   : > { %1206 = vrot.lane.b32.xlu2 %v3096_v14, %s2549_s25  ;;  %1204 = vrot.lane.b32.xlu1 %v5241_v42, %s2549_s25  ;;  %v859_v14 = vrot.slane %v3516_v8, 1  ;;  %v861_v42 = vrot.slane %v3640_v52, 1 }
 0x16a   : > { %1208 = vrot.lane.b32.xlu0 %v5242_v27, %s2549_s25  ;;  %v3632_v13 = vpop.permute.xlu2 %1108  ;;  %v3634_v25 = vpop.permute.xlu1 %1088 }
 0x16b   : > { %5243 = vst [vmem:[#allocation49_spill] sm:$0xff] %v3632_v13  ;;  %v858_v13 = vrot.slane %v3512_v9, 1 }
 0x16c   : > { %v3636_v55 = vpop.permute.xlu0 %1092 }
 0x16d   : > { %5244 = vst [vmem:[#allocation144_spill] sm:$0xff] %v3636_v55 }
 0x170   : > { %1212 = vrot.lane.b32.xlu2 %v3127_v5, %s2549_s25  ;;  %1210 = vrot.lane.b32.xlu1 %v3130_v34, %s2549_s25  ;;  %v3658_v5 = vsel %vm694_vm1, %v859_v14, %v861_v42  ;;  %v3661_v34 = vsel %vm694_vm1, %v858_v13, %v859_v14  ;;  %v5253_v13 = vld [vmem:[#allocation54_spill] sm:$0xff]  ;;  %v5254_v14 = vld [vmem:[#allocation55_spill] sm:$0xff] }
 0x171   : > { %5248 = vst [vmem:[#allocation147_spill] sm:$0xff] %v3658_v5 }
 0x172   : > { %1214 = vrot.lane.b32.xlu0 %v5245_v58, %s2549_s25  ;;  %v3651_v55 = vpop.permute.xlu2 %1114  ;;  %v3653_v1 = vpop.permute.xlu1 %1094  ;;  %5249 = vst [vmem:[#allocation148_spill] sm:$0xff] %v3661_v34  ;;  %v5250_v58 = vld [vmem:[#allocation53_spill] sm:$0xff] }
 0x173   : > { %5246 = vst [vmem:[#allocation145_spill] sm:$0xff] %v3651_v55 }
 0x174   : > { %v3655_v15 = vpop.permute.xlu0 %1098 }
 0x175   : > { %5247 = vst [vmem:[#allocation146_spill] sm:$0xff] %v3655_v15 }
 0x178   : > { %1218 = vrot.lane.b32.xlu2 %v3658_v5, %s2549_s25  ;;  %1216 = vrot.lane.b32.xlu1 %v3661_v34, %s2549_s25  ;;  %v5257_v34 = vld [vmem:[#allocation58_spill] sm:$0xff] }
 0x17a   : > { %1252 = vrot.lane.b32.xlu0 %v5250_v58, %s2550_s26  ;;  %v3669_v55 = vpop.permute.xlu2 %1120  ;;  %v3671_v43 = vpop.permute.xlu1 %1100 }
 0x17b   : > { %5251 = vst [vmem:[#allocation53_spill] sm:$0xff] %v3669_v55 }
 0x17c   : > { %v3673_v15 = vpop.permute.xlu0 %1104 }
 0x17d   : > { %5252 = vst [vmem:[#allocation149_spill] sm:$0xff] %v3673_v15 }
 0x180   : > { %1256 = vrot.lane.b32.xlu2 %v3165_v35, %s2550_s26  ;;  %1254 = vrot.lane.b32.xlu1 %v5253_v13, %s2550_s26 }
 0x182   : > { %1258 = vrot.lane.b32.xlu0 %v5254_v14, %s2550_s26  ;;  %v3681_v42 = vpop.permute.xlu2 %1158  ;;  %v3683_v5 = vpop.permute.xlu1 %1106 }
 0x183   : > { %5255 = vst [vmem:[#allocation54_spill] sm:$0xff] %v3681_v42  ;;  %v5260_v42 = vld [vmem:[#allocation63_spill] sm:$0xff] }
 0x184   : > { %v3685_v58 = vpop.permute.xlu0 %1110 }
 0x185   : > { %5256 = vst [vmem:[#allocation150_spill] sm:$0xff] %v3685_v58  ;;  %v5261_v58 = vld [vmem:[#allocation60_spill] sm:$0xff] }
 0x188   : > { %1262 = vrot.lane.b32.xlu2 %v3186_v24, %s2550_s26  ;;  %1260 = vrot.lane.b32.xlu1 %v3168_v18, %s2550_s26  ;;  %v5262_v24 = vld [vmem:[#allocation62_spill] sm:$0xff] }
 0x18a   : > { %1264 = vrot.lane.b32.xlu0 %v5257_v34, %s2550_s26  ;;  %v3693_v55 = vpop.permute.xlu2 %1164  ;;  %v3695_v13 = vpop.permute.xlu1 %1112 }
 0x18b   : > { %5258 = vst [vmem:[#allocation151_spill] sm:$0xff] %v3693_v55 }
 0x18c   : > { %v3697_v14 = vpop.permute.xlu0 %1116 }
 0x18d   : > { %5259 = vst [vmem:[#allocation152_spill] sm:$0xff] %v3697_v14  ;;  %v5271_v14 = vld [vmem:[#allocation72_spill] sm:$0xff] }
 0x190   : > { %1268 = vrot.lane.b32.xlu2 %v5260_v42, %s2550_s26  ;;  %1266 = vrot.lane.b32.xlu1 %v5261_v58, %s2550_s26  ;;  %v5266_v42 = vld [vmem:[#allocation66_spill] sm:$0xff] }
 0x192   : > { %1270 = vrot.lane.b32.xlu0 %v5262_v24, %s2550_s26  ;;  %v3705_v15 = vpop.permute.xlu2 %1170  ;;  %v3707_v18 = vpop.permute.xlu1 %1118 }
 0x193   : > { %5263 = vst [vmem:[#allocation153_spill] sm:$0xff] %v3705_v15  ;;  %v5269_v15 = vld [vmem:[#allocation73_spill] sm:$0xff] }
 0x194   : > { %5264 = vst [vmem:[#allocation154_spill] sm:$0xff] %v3707_v18  ;;  %v3709_v34 = vpop.permute.xlu0 %1122 }
 0x195   : > { %5265 = vst [vmem:[#allocation155_spill] sm:$0xff] %v3709_v34  ;;  %v5270_v34 = vld [vmem:[#allocation68_spill] sm:$0xff] }
 0x198   : > { %1274 = vrot.lane.b32.xlu2 %v3231_v22, %s2550_s26  ;;  %1272 = vrot.lane.b32.xlu1 %v3211_v36, %s2550_s26 }
 0x19a   : > { %1276 = vrot.lane.b32.xlu0 %v5266_v42, %s2550_s26  ;;  %v3717_v55 = vpop.permute.xlu2 %1176  ;;  %v3719_v58 = vpop.permute.xlu1 %1156 }
 0x19b   : > { %5267 = vst [vmem:[#allocation156_spill] sm:$0xff] %v3719_v58 }
 0x19c   : > { %v3721_v24 = vpop.permute.xlu0 %1160 }
 0x19d   : > { %5268 = vst [vmem:[#allocation157_spill] sm:$0xff] %v3721_v24  ;;  %v5276_v24 = vld [vmem:[#allocation84_spill] sm:$0xff] }
 0x1a0   : > { %1280 = vrot.lane.b32.xlu2 %v5269_v15, %s2550_s26  ;;  %1278 = vrot.lane.b32.xlu1 %v5270_v34, %s2550_s26 }
 0x1a2   : > { %1282 = vrot.lane.b32.xlu0 %v5271_v14, %s2550_s26  ;;  %v3729_v22 = vpop.permute.xlu2 %1182  ;;  %v3731_v18 = vpop.permute.xlu1 %1162 }
 0x1a3   : > { %5272 = vst [vmem:[#allocation158_spill] sm:$0xff] %v3731_v18 }
 0x1a4   : > { %v3733_v42 = vpop.permute.xlu0 %1166 }
 0x1a5   : > { %5273 = vst [vmem:[#allocation159_spill] sm:$0xff] %v3733_v42  ;;  %v5277_v42 = vld [vmem:[#allocation79_spill] sm:$0xff] }
 0x1a8   : > { %1286 = vrot.lane.b32.xlu2 %v3282_v10, %s2550_s26  ;;  %1284 = vrot.lane.b32.xlu1 %v3260_v48, %s2550_s26  ;;  %v5278_v10 = vld [vmem:[#allocation83_spill] sm:$0xff] }
 0x1aa   : > { %1288 = vrot.lane.b32.xlu0 %v3279_v56, %s2550_s26  ;;  %v3741_v15 = vpop.permute.xlu2 %1188  ;;  %v3743_v34 = vpop.permute.xlu1 %1168 }
 0x1ab   : > { %5274 = vst [vmem:[#allocation160_spill] sm:$0xff] %v3743_v34 }
 0x1ac   : > { %v3745_v14 = vpop.permute.xlu0 %1172 }
 0x1ad   : > { %5275 = vst [vmem:[#allocation161_spill] sm:$0xff] %v3745_v14 }
 0x1b0   : > { %1292 = vrot.lane.b32.xlu2 %v5276_v24, %s2550_s26  ;;  %1290 = vrot.lane.b32.xlu1 %v5277_v42, %s2550_s26 }
 0x1b2   : > { %1294 = vrot.lane.b32.xlu0 %v5278_v10, %s2550_s26  ;;  %v3753_v18 = vpop.permute.xlu2 %1194  ;;  %v3755_v48 = vpop.permute.xlu1 %1174  ;;  %v864_v10 = vrot.slane %v3516_v8, 2 }
 0x1b3   : > { %5279 = vst [vmem:[#allocation79_spill] sm:$0xff] %v3755_v48 }
 0x1b4   : > { %v1179_v58 = vpop.permute.xlu0 %1178 }
 0x1b8   : > { %1298 = vrot.lane.b32.xlu2 %v3333_v0, %s2550_s26  ;;  %1296 = vrot.lane.b32.xlu1 %v3311_v49, %s2550_s26 }
 0x1ba   : > { %1300 = vrot.lane.b32.xlu0 %v3330_v2, %s2550_s26  ;;  %v3763_v14 = vpop.permute.xlu2 %1200  ;;  %v3765_v24 = vpop.permute.xlu1 %1180  ;;  %v863_v2 = vrot.slane %v3512_v9, 2 }
 0x1bb   : > { %5280 = vst [vmem:[#allocation162_spill] sm:$0xff] %v3763_v14 }
 0x1bc   : > { %v3767_v34 = vpop.permute.xlu0 %1184  ;;  %v3784_v14 = vsel %vm775_vm5, %v863_v2, %v864_v10 }
 0x1bd   : > { %5282 = vst [vmem:[#allocation164_spill] sm:$0xff] %v3784_v14 }
 0x1c0   : > { %1304 = vrot.lane.b32.xlu2 %v3359_v4, %s2550_s26  ;;  %1302 = vrot.lane.b32.xlu1 %v3336_v41, %s2550_s26  ;;  %v866_v41 = vrot.slane %v3640_v52, 2 }
 0x1c2   : > { %1306 = vrot.lane.b32.xlu0 %v3356_v60, %s2550_s26  ;;  %v3775_v0 = vpop.permute.xlu2 %1206  ;;  %v3777_v49 = vpop.permute.xlu1 %1186  ;;  %v3800_v2 = vsel %vm775_vm5, %v864_v10, %v866_v41 }
 0x1c3   : > { %5281 = vst [vmem:[#allocation163_spill] sm:$0xff] %v3775_v0 }
 0x1c4   : > { %v3781_v48 = vpop.permute.xlu0 %1190  ;;  %5284 = vst [vmem:[#allocation166_spill] sm:$0xff] %v3800_v2 }
 0x1c8   : > { %1310 = vrot.lane.b32.xlu2 %v3378_v59, %s2550_s26  ;;  %1308 = vrot.lane.b32.xlu1 %v3362_v12, %s2550_s26 }
 0x1ca   : > { %1312 = vrot.lane.b32.xlu0 %v3784_v14, %s2550_s26  ;;  %v3793_v0 = vpop.permute.xlu2 %1212  ;;  %v3795_v9 = vpop.permute.xlu1 %1192 }
 0x1cb   : > { %5283 = vst [vmem:[#allocation165_spill] sm:$0xff] %v3793_v0  ;;  %v1651_v0 = vsel %vm1636_vm6, %v2895_v30, %v3349_v53 }
 0x1cc   : > { %v3797_v8 = vpop.permute.xlu0 %1196 }
 0x1d0   : > { %1348 = vrot.lane.b32.xlu2 %v2738_v33, %s2551_s29  ;;  %1314 = vrot.lane.b32.xlu1 %v3800_v2, %s2550_s26 }
 0x1d2   : > { %1350 = vrot.lane.b32.xlu0 %v2713_v21, %s2551_s29  ;;  %v3808_v52 = vpop.permute.xlu2 %1218  ;;  %v3810_v14 = vpop.permute.xlu1 %1198 }
 0x1d3   : > { %5285 = vst [vmem:[#allocation167_spill] sm:$0xff] %v3808_v52 }
 0x1d4   : > { %v3812_v59 = vpop.permute.xlu0 %1202 }
 0x1d8   : > { %1354 = vrot.lane.b32.xlu2 %v2732_v31, %s2551_s29  ;;  %1352 = vrot.lane.b32.xlu1 %v2735_v32, %s2551_s29 }
 0x1da   : > { %1356 = vrot.lane.b32.xlu0 %v2789_v63, %s2551_s29  ;;  %v3820_v10 = vpop.permute.xlu2 %1256  ;;  %v3822_v41 = vpop.permute.xlu1 %1204 }
 0x1db   : > { %5286 = vst [vmem:[#allocation168_spill] sm:$0xff] %v3820_v10 }
 0x1dc   : > { %v3824_v2 = vpop.permute.xlu0 %1208 }
 0x1e0   : > { %1360 = vrot.lane.b32.xlu2 %v2828_v39, %s2551_s29  ;;  %1358 = vrot.lane.b32.xlu1 %v2758_v50, %s2551_s29 }
 0x1e2   : > { %1362 = vrot.lane.b32.xlu0 %v2825_v28, %s2551_s29  ;;  %v3832_v31 = vpop.permute.xlu2 %1262  ;;  %v3834_v21 = vpop.permute.xlu1 %1210 }
 0x1e3   : > { %5287 = vst [vmem:[#allocation169_spill] sm:$0xff] %v3832_v31  ;;  %v5290_v31 = vld [vmem:[#allocation87_spill] sm:$0xff] }
 0x1e4   : > { %v3836_v63 = vpop.permute.xlu0 %1214  ;;  %v1648_v12 = vsel %vm1636_vm6, %v2825_v28, %v5290_v31 }
 0x1e5   : > { %v1681_v50 = vsel %vm1669_vm7, %v1648_v12, %v3434_v6 }
 0x1e8   : > { %1366 = vrot.lane.b32.xlu2 %v2837_v54, %s2551_s29  ;;  %1364 = vrot.lane.b32.xlu1 %v2840_v57, %s2551_s29 }
 0x1ea   : > { %1368 = vrot.lane.b32.xlu0 %v2895_v30, %s2551_s29  ;;  %v3844_v10 = vpop.permute.xlu2 %1268  ;;  %v3846_v33 = vpop.permute.xlu1 %1216 }
 0x1eb   : > { %5288 = vst [vmem:[#allocation170_spill] sm:$0xff] %v3844_v10  ;;  %v1714_v10 = vsel %vm1702_vm8, %v1681_v50, %v3622_v38  ;;  %v1684_v50 = vsel %vm1669_vm7, %v1651_v0, %v3446_v40  ;;  %v5294_v40 = vld [vmem:[#allocation96_spill] sm:$0xff] }
 0x1ec   : > { %5289 = vst [vmem:[#allocation171_spill] sm:$0xff] %v3846_v33  ;;  %v3848_v52 = vpop.permute.xlu0 %1252  ;;  %v1747_v33 = vsel %vm1735_vm9, %v1714_v10, %v1179_v58  ;;  %v1717_v38 = vsel %vm1702_vm8, %v1684_v50, %v3634_v25  ;;  %v1654_v10 = vsel %vm1636_vm6, %v2913_v7, %v5294_v40  ;;  %v5297_v50 = vld [vmem:[#allocation28_spill] sm:$0xff] }
 0x1f0   : > { %1372 = vrot.lane.b32.xlu2 %v2898_v3, %s2551_s29  ;;  %1370 = vrot.lane.b32.xlu1 %v2888_v62, %s2551_s29 }
 0x1f2   : > { %1374 = vrot.lane.b32.xlu0 %v2913_v7, %s2551_s29  ;;  %v1275_v31 = vpop.permute.xlu2 %1274  ;;  %v3864_v28 = vpop.permute.xlu1 %1254 }
 0x1f3   : > { %v3867_v12 = vsel %vm1768_vm10, %v1747_v33, %v1275_v31  ;;  %v1750_v33 = vsel %vm1735_vm9, %v1717_v38, %v3767_v34  ;;  %v5295_v31 = vld [vmem:[#allocation115_spill] sm:$0xff]  ;;  %v5296_v34 = vld [vmem:[#allocation32_spill] sm:$0xff] }
 0x1f4   : > { %5291 = vst [vmem:[#allocation87_spill] sm:$0xff] %v3867_v12  ;;  %v3869_v6 = vpop.permute.xlu0 %1258  ;;  %v1687_v25 = vsel %vm1669_vm7, %v1654_v10, %v5295_v31  ;;  %v5299_v31 = vld [vmem:[#allocation82_spill] sm:$0xff] }
 0x1f5   : > { %v1720_v38 = vsel %vm1702_vm8, %v1687_v25, %v3653_v1  ;;  %v1647_v12 = vsel %vm1636_vm6, %v2828_v39, %v5299_v31  ;;  %v5303_v31 = vld [vmem:[#allocation103_spill] sm:$0xff] }
 0x1f6   : > { %v1680_v25 = vsel %vm1669_vm7, %v1647_v12, %v3477_v19 }
 0x1f8   : > { %1378 = vrot.lane.b32.xlu2 %v2942_v44, %s2551_s29  ;;  %1376 = vrot.lane.b32.xlu1 %v2938_v37, %s2551_s29 }
 0x1fa   : > { %1380 = vrot.lane.b32.xlu0 %v2985_v61, %s2551_s29  ;;  %v1281_v58 = vpop.permute.xlu2 %1280  ;;  %v3886_v30 = vpop.permute.xlu1 %1260 }
 0x1fb   : > { %5292 = vst [vmem:[#allocation172_spill] sm:$0xff] %v3886_v30  ;;  %v3889_v0 = vsel %vm1768_vm10, %v1750_v33, %v1281_v58  ;;  %v1753_v33 = vsel %vm1735_vm9, %v1720_v38, %v3781_v48  ;;  %v5298_v58 = vld [vmem:[#allocation31_spill] sm:$0xff]  ;;  %v5300_v30 = vld [vmem:[#allocation100_spill] sm:$0xff] }
 0x1fc   : > { %5293 = vst [vmem:[#allocation173_spill] sm:$0xff] %v3889_v0  ;;  %v3891_v53 = vpop.permute.xlu0 %1264  ;;  %v1657_v1 = vsel %vm1636_vm6, %v2985_v61, %v5300_v30  ;;  %v1713_v61 = vsel %vm1702_vm8, %v1680_v25, %v3612_v17 }
 0x1fd   : > { %v1690_v48 = vsel %vm1669_vm7, %v1657_v1, %v3475_v11  ;;  %v1746_v12 = vsel %vm1735_vm9, %v1713_v61, %v3717_v55  ;;  %v5306_v61 = vld [vmem:[#allocation93_spill] sm:$0xff] }
 0x1fe   : > { %v1723_v11 = vsel %vm1702_vm8, %v1690_v48, %v3671_v43 }
 0x200   : > { %1384 = vrot.lane.b32.xlu2 %v5296_v34, %s2551_s29  ;;  %1382 = vrot.lane.b32.xlu1 %v5297_v50, %s2551_s29 }
 0x202   : > { %1386 = vrot.lane.b32.xlu0 %v5298_v58, %s2551_s29  ;;  %v1287_v0 = vpop.permute.xlu2 %1286  ;;  %v3908_v7 = vpop.permute.xlu1 %1266 }
 0x203   : > { %v3911_v40 = vsel %vm1768_vm10, %v1753_v33, %v1287_v0  ;;  %v5301_v0 = vld [vmem:[#allocation69_spill] sm:$0xff]  ;;  %v5302_v33 = vld [vmem:[#allocation88_spill] sm:$0xff] }
 0x204   : > { %v3913_v10 = vpop.permute.xlu0 %1270  ;;  %v1649_v39 = vsel %vm1636_vm6, %v2840_v57, %v5301_v0  ;;  %v5305_v0 = vld [vmem:[#allocation139_spill] sm:$0xff] }
 0x205   : > { %v1682_v19 = vsel %vm1669_vm7, %v1649_v39, %v3479_v23 }
 0x206   : > { %v1715_v17 = vsel %vm1702_vm8, %v1682_v19, %v3584_v46  ;;  %v1660_v46 = vsel %vm1636_vm6, %v5298_v58, %v5303_v31  ;;  %v5308_v19 = vld [vmem:[#allocation40_spill] sm:$0xff] }
 0x207   : > { %v1748_v23 = vsel %vm1735_vm9, %v1715_v17, %v3765_v24  ;;  %v1693_v1 = vsel %vm1669_vm7, %v1660_v46, %v3490_v26  ;;  %v5304_v24 = vld [vmem:[#allocation75_spill] sm:$0xff]  ;;  %v5315_v46 = vld [vmem:[#allocation120_spill] sm:$0xff] }
 0x208   : > { %1476 = vrot.lane.b32.xlu2 %v5236_v45, %s2552_s30  ;;  %1396 = vrot.lane.b32.xlu1 %v3086_v20, %s2551_s29  ;;  %v1756_v45 = vsel %vm1735_vm9, %v1723_v11, %v3797_v8  ;;  %v1726_v26 = vsel %vm1702_vm8, %v1693_v1, %v3683_v5  ;;  %v5307_v11 = vld [vmem:[#allocation106_spill] sm:$0xff] }
 0x20a   : > { %1492 = vrot.lane.b32.xlu0 %v5242_v27, %s2552_s30  ;;  %v1293_v30 = vpop.permute.xlu2 %1292  ;;  %v1273_v57 = vpop.permute.xlu1 %1272  ;;  %v1650_v27 = vsel %vm1636_vm6, %v2837_v54, %v5302_v33  ;;  %v1652_v54 = vsel %vm1636_vm6, %v2888_v62, %v5304_v24  ;;  %v5314_v33 = vld [vmem:[#allocation144_spill] sm:$0xff] }
 0x20b   : > { %v3947_v38 = vsel %vm1768_vm10, %v1756_v45, %v1293_v30  ;;  %v3950_v43 = vsel %vm1768_vm10, %v1746_v12, %v1273_v57  ;;  %v1683_v48 = vsel %vm1669_vm7, %v1650_v27, %v3492_v29  ;;  %v1685_v29 = vsel %vm1669_vm7, %v1652_v54, %v3495_v16  ;;  %v5309_v45 = vld [vmem:[#allocation118_spill] sm:$0xff]  ;;  %v5310_v57 = vld [vmem:[#allocation119_spill] sm:$0xff] }
 0x20c   : > { %v1277_v55 = vpop.permute.xlu0 %1276  ;;  %v1716_v58 = vsel %vm1702_vm8, %v1683_v48, %v3624_v51  ;;  %v1718_v51 = vsel %vm1702_vm8, %v1685_v29, %v5305_v0  ;;  %v1663_v12 = vsel %vm1636_vm6, %v5308_v19, %v5307_v11  ;;  %v5319_v0 = vld [vmem:[#allocation123_spill] sm:$0xff] }
 0x20d   : > { %v3955_v8 = vsel %vm1768_vm10, %v1748_v23, %v1277_v55  ;;  %v1749_v25 = vsel %vm1735_vm9, %v1716_v58, %v3729_v22  ;;  %v1751_v22 = vsel %vm1735_vm9, %v1718_v51, %v3777_v49  ;;  %v1696_v30 = vsel %vm1669_vm7, %v1663_v12, %v5309_v45  ;;  %v5311_v49 = vld [vmem:[#allocation44_spill] sm:$0xff]  ;;  %v5312_v23 = vld [vmem:[#allocation21_spill] sm:$0xff]  ;;  %v5316_v58 = vld [vmem:[#allocation34_spill] sm:$0xff] }
 0x20e   : > { %v5313_v55 = vld [vmem:[#allocation80_spill] sm:$0xff]  ;;  %v1729_v31 = vsel %vm1702_vm8, %v1696_v30, %v3695_v13  ;;  %v5324_v12 = vld [vmem:[#allocation154_spill] sm:$0xff] }
 0x20f   : > { %v1762_v24 = vsel %vm1735_vm9, %v1729_v31, %v3824_v2  ;;  %v5325_v30 = vld [vmem:[#allocation64_spill] sm:$0xff]  ;;  %v5329_v31 = vld [vmem:[#allocation143_spill] sm:$0xff] }
 0x210   : > { %1588 = vrot.lane.b32.xlu2 %v3359_v4, %s2553_s10  ;;  %1572 = vrot.lane.b32.xlu1 %v3279_v56, %s2553_s10  ;;  %v1759_v4 = vsel %vm1735_vm9, %v1726_v26, %v3812_v59 }
 0x212   : > { %1444 = vrot.lane.b32.xlu0 %v5202_v47, %s2552_s30  ;;  %v1299_v56 = vpop.permute.xlu2 %1298  ;;  %v1279_v62 = vpop.permute.xlu1 %1278  ;;  %v1653_v47 = vsel %vm1636_vm6, %v2898_v3, %v5306_v61  ;;  %v1655_v3 = vsel %vm1636_vm6, %v2938_v37, %v5313_v55  ;;  %v5322_v61 = vld [vmem:[#allocation86_spill] sm:$0xff]  ;;  %v5327_v55 = vld [vmem:[#allocation51_spill] sm:$0xff] }
 0x213   : > { %v3989_v39 = vsel %vm1768_vm10, %v1759_v4, %v1299_v56  ;;  %v3992_v5 = vsel %vm1768_vm10, %v1749_v25, %v1279_v62  ;;  %v1686_v17 = vsel %vm1669_vm7, %v1653_v47, %v5310_v57  ;;  %v1688_v1 = vsel %vm1669_vm7, %v1655_v3, %v5315_v46  ;;  %v5317_v4 = vld [vmem:[#allocation97_spill] sm:$0xff]  ;;  %v5323_v47 = vld [vmem:[#allocation146_spill] sm:$0xff] }
 0x214   : > { %v1283_v16 = vpop.permute.xlu0 %1282  ;;  %v1719_v27 = vsel %vm1702_vm8, %v1686_v17, %v5314_v33  ;;  %v1721_v26 = vsel %vm1702_vm8, %v1688_v1, %v5316_v58  ;;  %v5318_v56 = vld [vmem:[#allocation109_spill] sm:$0xff]  ;;  %v2508_v57 = vunpack.i.l.bf16 %v5325_v30  ;;  %v5328_v33 = vld [vmem:[#allocation111_spill] sm:$0xff] }
 0x215   : > { %v3997_v59 = vsel %vm1768_vm10, %v1751_v22, %v1283_v16  ;;  %v1752_v48 = vsel %vm1735_vm9, %v1719_v27, %v3741_v15  ;;  %v1754_v15 = vsel %vm1735_vm9, %v1721_v26, %v3795_v9  ;;  %v1666_v62 = vsel %vm1636_vm6, %v5311_v49, %v5318_v56  ;;  %v5320_v22 = vld [vmem:[#allocation124_spill] sm:$0xff]  ;;  %v5321_v9 = vld [vmem:[#allocation33_spill] sm:$0xff] }
 0x216   : > { %v1699_v51 = vsel %vm1669_vm7, %v1666_v62, %v5319_v0  ;;  %v5326_v17 = vld [vmem:[#allocation125_spill] sm:$0xff]  ;;  %v2513_v27 = vunpack.i.l.bf16 %v5328_v33  ;;  %v5335_v62 = vld [vmem:[#allocation35_spill] sm:$0xff] }
 0x217   : > { %v1732_v45 = vsel %vm1702_vm8, %v1699_v51, %v5324_v12  ;;  %v5331_v58 = vld [vmem:[#allocation101_spill] sm:$0xff] }
 0x218   : > { %1398 = vrot.lane.b32.xlu2 %v5311_v49, %s2551_s29  ;;  %1460 = vrot.lane.b32.xlu1 %v5312_v23, %s2552_s30  ;;  %v1659_v26 = vsel %vm1636_vm6, %v5296_v34, %v5331_v58  ;;  %v5336_v34 = vld [vmem:[#allocation149_spill] sm:$0xff] }
 0x21a   : > { %1540 = vrot.lane.b32.xlu0 %v3165_v35, %s2553_s10  ;;  %v1305_v54 = vpop.permute.xlu2 %1304  ;;  %v1285_v37 = vpop.permute.xlu1 %1284  ;;  %v1656_v35 = vsel %vm1636_vm6, %v2942_v44, %v5317_v4  ;;  %v1658_v44 = vsel %vm1636_vm6, %v5297_v50, %v5322_v61 }
 0x21b   : > { %v4031_v29 = vsel %vm1768_vm10, %v1762_v24, %v1305_v54  ;;  %v4034_v13 = vsel %vm1768_vm10, %v1752_v48, %v1285_v37  ;;  %v1689_v16 = vsel %vm1669_vm7, %v1656_v35, %v5320_v22  ;;  %v1691_v49 = vsel %vm1669_vm7, %v1658_v44, %v5326_v17  ;;  %v5330_v54 = vld [vmem:[#allocation5_spill] sm:$0xff]  ;;  %v5333_v35 = vld [vmem:[#allocation126_spill] sm:$0xff]  ;;  %v5337_v22 = vld [vmem:[#allocation156_spill] sm:$0xff] }
 0x21c   : > { %v1289_v25 = vpop.permute.xlu0 %1288  ;;  %v1722_v11 = vsel %vm1702_vm8, %v1689_v16, %v5323_v47  ;;  %v1724_v46 = vsel %vm1702_vm8, %v1691_v49, %v5329_v31  ;;  %v1637_v37 = vsel %vm1636_vm6, %v5330_v54, %v2508_v57  ;;  %v1692_v56 = vsel %vm1669_vm7, %v1659_v26, %v5333_v35  ;;  %v5339_v44 = vld [vmem:[#allocation162_spill] sm:$0xff]  ;;  %v5340_v47 = vld [vmem:[#allocation12_spill] sm:$0xff]  ;;  %v5348_v26 = vld [vmem:[#allocation129_spill] sm:$0xff] }
 0x21d   : > { %v4039_v2 = vsel %vm1768_vm10, %v1754_v15, %v1289_v25  ;;  %v1755_v23 = vsel %vm1735_vm9, %v1722_v11, %v3753_v18  ;;  %v1757_v18 = vsel %vm1735_vm9, %v1724_v46, %v3810_v14  ;;  %v1670_v15 = vsel %vm1669_vm7, %v1637_v37, %v2513_v27  ;;  %v5332_v25 = vld [vmem:[#allocation15_spill] sm:$0xff]  ;;  %v5334_v14 = vld [vmem:[#allocation92_spill] sm:$0xff]  ;;  %v5352_v35 = vld [vmem:[#allocation42_spill] sm:$0xff] }
 0x21e   : > { %v1703_v4 = vsel %vm1702_vm8, %v1670_v15, %v5332_v25  ;;  %v1661_v0 = vsel %vm1636_vm6, %v5335_v62, %v5334_v14  ;;  %v1725_v51 = vsel %vm1702_vm8, %v1692_v56, %v5336_v34  ;;  %v5344_v27 = vld [vmem:[#allocation104_spill] sm:$0xff]  ;;  %v5350_v25 = vld [vmem:[#allocation23_spill] sm:$0xff]  ;;  %v5353_v14 = vld [vmem:[#allocation150_spill] sm:$0xff] }
 0x21f   : > { %v1736_v16 = vsel %vm1735_vm9, %v1703_v4, %v5337_v22  ;;  %v5345_v31 = vld [vmem:[#allocation36_spill] sm:$0xff]  ;;  %v5351_v4 = vld [vmem:[#allocation95_spill] sm:$0xff]  ;;  %v5354_v34 = vld [vmem:[#allocation158_spill] sm:$0xff] }
 0x220   : > { %1478 = vrot.lane.b32.xlu2 %v5321_v9, %s2552_s30  ;;  %1556 = vrot.lane.b32.xlu1 %v3211_v36, %s2553_s10  ;;  %v1765_v36 = vsel %vm1735_vm9, %v1732_v45, %v3836_v63  ;;  %v5338_v9 = vld [vmem:[#allocation127_spill] sm:$0xff]  ;;  %v5341_v45 = vld [vmem:[#allocation49_spill] sm:$0xff]  ;;  %v1662_v46 = vsel %vm1636_vm6, %v5345_v31, %v5344_v27  ;;  %v5347_v37 = vld [vmem:[#allocation128_spill] sm:$0xff]  ;;  %v1664_v56 = vsel %vm1636_vm6, %v5352_v35, %v5351_v4 }
 0x221   : > { %v1694_v61 = vsel %vm1669_vm7, %v1661_v0, %v5338_v9  ;;  %v5349_v15 = vld [vmem:[#allocation48_spill] sm:$0xff]  ;;  %v5355_v22 = vld [vmem:[#allocation130_spill] sm:$0xff]  ;;  %v5356_v9 = vld [vmem:[#allocation163_spill] sm:$0xff] }
 0x222   : > { %1494 = vrot.lane.b32.xlu0 %v5327_v55, %s2552_s30  ;;  %v1311_v50 = vpop.permute.xlu2 %1310  ;;  %v1291_v3 = vpop.permute.xlu1 %1290  ;;  %v1727_v57 = vsel %vm1702_vm8, %v1694_v61, %v5341_v45  ;;  %v5342_v55 = vld [vmem:[#allocation70_spill] sm:$0xff] }
 0x223   : > { %v4075_v1 = vsel %vm1768_vm10, %v1765_v36, %v1311_v50  ;;  %v4078_v48 = vsel %vm1768_vm10, %v1755_v23, %v1291_v3  ;;  %v1760_v23 = vsel %vm1735_vm9, %v1727_v57, %v3822_v41  ;;  %v5343_v50 = vld [vmem:[#allocation8_spill] sm:$0xff]  ;;  %v1695_v41 = vsel %vm1669_vm7, %v1662_v46, %v5348_v26  ;;  %v5361_v46 = vld [vmem:[#allocation114_spill] sm:$0xff]  ;;  %v5364_v26 = vld [vmem:[#allocation37_spill] sm:$0xff] }
 0x224   : > { %v1295_v63 = vpop.permute.xlu0 %1294  ;;  %v1640_v3 = vsel %vm1636_vm6, %v5343_v50, %v5342_v55  ;;  %v1728_v0 = vsel %vm1702_vm8, %v1695_v41, %v5353_v14  ;;  %v5359_v55 = vld [vmem:[#allocation61_spill] sm:$0xff]  ;;  %v5365_v41 = vld [vmem:[#allocation67_spill] sm:$0xff] }
 0x225   : > { %v4083_v24 = vsel %vm1768_vm10, %v1757_v18, %v1295_v63  ;;  %v5346_v18 = vld [vmem:[#allocation112_spill] sm:$0xff]  ;;  %v1761_v61 = vsel %vm1735_vm9, %v1728_v0, %v5356_v9  ;;  %v1643_v50 = vsel %vm1636_vm6, %v2735_v32, %v5359_v55  ;;  %v5366_v32 = vld [vmem:[#allocation99_spill] sm:$0xff]  ;;  %v5369_v0 = vld [vmem:[#allocation133_spill] sm:$0xff] }
 0x226   : > { %v1673_v63 = vsel %vm1669_vm7, %v1640_v3, %v5346_v18  ;;  %v5360_v3 = vld [vmem:[#allocation107_spill] sm:$0xff]  ;;  %v1676_v18 = vsel %vm1669_vm7, %v1643_v50, %v5361_v46  ;;  %v5371_v9 = vld [vmem:[#allocation50_spill] sm:$0xff]  ;;  %v5374_v50 = vld [vmem:[#allocation65_spill] sm:$0xff] }
 0x227   : > { %v1706_v58 = vsel %vm1702_vm8, %v1673_v63, %v5347_v37  ;;  %v1665_v27 = vsel %vm1636_vm6, %v3086_v20, %v5360_v3  ;;  %v5362_v63 = vld [vmem:[#allocation131_spill] sm:$0xff]  ;;  %v5367_v20 = vld [vmem:[#allocation152_spill] sm:$0xff]  ;;  %v5375_v3 = vld [vmem:[#allocation13_spill] sm:$0xff] }
 0x228   : > { %1590 = vrot.lane.b32.xlu2 %v3356_v60, %s2553_s10  ;;  %1574 = vrot.lane.b32.xlu1 %v5277_v42, %s2553_s10  ;;  %v1758_v60 = vsel %vm1735_vm9, %v1725_v51, %v5339_v44  ;;  %v1769_v42 = vsel %vm1768_vm10, %v1736_v16, %v3848_v52  ;;  %v1739_v51 = vsel %vm1735_vm9, %v1706_v58, %v5354_v34  ;;  %v5363_v58 = vld [vmem:[#allocation132_spill] sm:$0xff]  ;;  %v5376_v46 = vld [vmem:[#allocation110_spill] sm:$0xff] }
 0x229   : > { %v1697_v16 = vsel %vm1669_vm7, %v1664_v56, %v5355_v22  ;;  %v1772_v44 = vsel %vm1768_vm10, %v1739_v51, %v3869_v6  ;;  %v1709_v37 = vsel %vm1702_vm8, %v1676_v18, %v5362_v63  ;;  %v5368_v56 = vld [vmem:[#allocation160_spill] sm:$0xff]  ;;  %v5370_v51 = vld [vmem:[#allocation165_spill] sm:$0xff]  ;;  %v5377_v18 = vld [vmem:[#allocation47_spill] sm:$0xff] }
 0x22a   : > { %1446 = vrot.lane.b32.xlu0 %v5340_v47, %s2552_s30  ;;  %v1349_v11 = vpop.permute.xlu2 %1348  ;;  %v1297_v12 = vpop.permute.xlu1 %1296  ;;  %v1742_v14 = vsel %vm1735_vm9, %v1709_v37, %v5368_v56  ;;  %v1668_v63 = vsel %vm1636_vm6, %v5377_v18, %v5376_v46  ;;  %v5378_v37 = vld [vmem:[#allocation117_spill] sm:$0xff]  ;;  %v5384_v56 = vld [vmem:[#allocation155_spill] sm:$0xff] }
 0x22b   : > { %v4117_v17 = vsel %vm1801_vm11, %v1769_v42, %v1349_v11  ;;  %v4120_v49 = vsel %vm1768_vm10, %v1758_v60, %v1297_v12  ;;  %v5357_v60 = vld [vmem:[#allocation55_spill] sm:$0xff]  ;;  %v5358_v11 = vld [vmem:[#allocation145_spill] sm:$0xff] }
 0x22c   : > { %v1301_v36 = vpop.permute.xlu0 %1300  ;;  %v1730_v12 = vsel %vm1702_vm8, %v1697_v16, %v5358_v11  ;;  %v1775_v16 = vsel %vm1768_vm10, %v1742_v14, %v3891_v53  ;;  %v2509_v11 = vunpack.i.h.bf16 %v5325_v30 }
 0x22d   : > { %v4125_v52 = vsel %vm1768_vm10, %v1760_v23, %v1301_v36  ;;  %v1763_v23 = vsel %vm1735_vm9, %v1730_v12, %v3834_v21  ;;  %v1698_v21 = vsel %vm1669_vm7, %v1665_v27, %v5363_v58  ;;  %v5373_v12 = vld [vmem:[#allocation171_spill] sm:$0xff]  ;;  %v1646_v27 = vsel %vm1636_vm6, %v5375_v3, %v5374_v50  ;;  %v5379_v58 = vld [vmem:[#allocation134_spill] sm:$0xff] }
 0x22e   : > { %v1731_v4 = vsel %vm1702_vm8, %v1698_v21, %v5367_v20  ;;  %v1679_v30 = vsel %vm1669_vm7, %v1646_v27, %v5378_v37  ;;  %v5383_v20 = vld [vmem:[#allocation84_spill] sm:$0xff]  ;;  %v5390_v3 = vld [vmem:[#allocation71_spill] sm:$0xff]  ;;  %v5391_v27 = vld [vmem:[#allocation9_spill] sm:$0xff] }
 0x22f   : > { %v1764_v22 = vsel %vm1735_vm9, %v1731_v4, %v5370_v51  ;;  %v1712_v21 = vsel %vm1702_vm8, %v1679_v30, %v5379_v58  ;;  %v5386_v51 = vld [vmem:[#allocation136_spill] sm:$0xff]  ;;  %v1639_v46 = vsel %vm1636_vm6, %v5391_v27, %v5390_v3  ;;  %v5394_v58 = vld [vmem:[#allocation11_spill] sm:$0xff] }
 0x230   : > { %1400 = vrot.lane.b32.xlu2 %v5349_v15, %s2551_s29  ;;  %1462 = vrot.lane.b32.xlu1 %v5350_v25, %s2552_s30  ;;  %v1667_v25 = vsel %vm1636_vm6, %v5349_v15, %v5366_v32  ;;  %v5393_v30 = vld [vmem:[#allocation76_spill] sm:$0xff]  ;;  %v5405_v3 = vld [vmem:[#allocation7_spill] sm:$0xff] }
 0x231   : > { %v1700_v34 = vsel %vm1669_vm7, %v1667_v25, %v5369_v0  ;;  %v5382_v25 = vld [vmem:[#allocation94_spill] sm:$0xff]  ;;  %v5385_v0 = vld [vmem:[#allocation79_spill] sm:$0xff] }
 0x232   : > { %1542 = vrot.lane.b32.xlu0 %v5357_v60, %s2553_s10  ;;  %v1355_v42 = vpop.permute.xlu2 %1354  ;;  %v1303_v47 = vpop.permute.xlu1 %1302 }
 0x233   : > { %v4161_v45 = vsel %vm1801_vm11, %v1772_v44, %v1355_v42  ;;  %v4164_v57 = vsel %vm1768_vm10, %v1761_v61, %v1303_v47  ;;  %v5372_v44 = vld [vmem:[#allocation53_spill] sm:$0xff] }
 0x234   : > { %v1307_v36 = vpop.permute.xlu0 %1306  ;;  %v1733_v60 = vsel %vm1702_vm8, %v1700_v34, %v5372_v44  ;;  %v1745_v34 = vsel %vm1735_vm9, %v1712_v21, %v5385_v0  ;;  %v1641_v21 = vsel %vm1636_vm6, %v5394_v58, %v5393_v30  ;;  %v5400_v0 = vld [vmem:[#allocation168_spill] sm:$0xff]  ;;  %v5408_v30 = vld [vmem:[#allocation10_spill] sm:$0xff] }
 0x235   : > { %v4169_v6 = vsel %vm1768_vm10, %v1763_v23, %v1307_v36  ;;  %v1766_v23 = vsel %vm1735_vm9, %v1733_v60, %v5373_v12  ;;  %v2514_v36 = vunpack.i.h.bf16 %v5328_v33 }
 0x238   : > { %1480 = vrot.lane.b32.xlu2 %v5364_v26, %s2552_s30  ;;  %1558 = vrot.lane.b32.xlu1 %v5365_v41, %s2553_s10  ;;  %v5380_v26 = vld [vmem:[#allocation135_spill] sm:$0xff]  ;;  %v5381_v41 = vld [vmem:[#allocation4_spill] sm:$0xff] }
 0x239   : > { %v1701_v33 = vsel %vm1669_vm7, %v1668_v63, %v5380_v26  ;;  %v1638_v32 = vsel %vm1636_vm6, %v5381_v41, %v2509_v11  ;;  %v5389_v11 = vld [vmem:[#allocation54_spill] sm:$0xff]  ;;  %v5395_v26 = vld [vmem:[#allocation137_spill] sm:$0xff] }
 0x23a   : > { %1496 = vrot.lane.b32.xlu0 %v5371_v9, %s2552_s30  ;;  %v1361_v61 = vpop.permute.xlu2 %1360  ;;  %v1309_v15 = vpop.permute.xlu1 %1308  ;;  %v1671_v4 = vsel %vm1669_vm7, %v1638_v32, %v2514_v36  ;;  %v1734_v14 = vsel %vm1702_vm8, %v1701_v33, %v5384_v56  ;;  %v5392_v63 = vld [vmem:[#allocation102_spill] sm:$0xff]  ;;  %v5397_v32 = vld [vmem:[#allocation113_spill] sm:$0xff] }
 0x23b   : > { %v4205_v42 = vsel %vm1801_vm11, %v1775_v16, %v1361_v61  ;;  %v4208_v47 = vsel %vm1768_vm10, %v1764_v22, %v1309_v15  ;;  %v1704_v22 = vsel %vm1702_vm8, %v1671_v4, %v5386_v51  ;;  %v5387_v16 = vld [vmem:[#allocation167_spill] sm:$0xff]  ;;  %v1778_v61 = vsel %vm1768_vm10, %v1745_v34, %v3913_v10  ;;  %v5388_v15 = vld [vmem:[#allocation14_spill] sm:$0xff]  ;;  %v5401_v51 = vld [vmem:[#allocation56_spill] sm:$0xff] }
 0x23c   : > { %v1313_v53 = vpop.permute.xlu0 %1312  ;;  %v1767_v9 = vsel %vm1735_vm9, %v1734_v14, %v5387_v16  ;;  %v1737_v12 = vsel %vm1735_vm9, %v1704_v22, %v5389_v11  ;;  %v1672_v37 = vsel %vm1669_vm7, %v1639_v46, %v5392_v63  ;;  %v5399_v56 = vld [vmem:[#allocation138_spill] sm:$0xff]  ;;  %v5402_v16 = vld [vmem:[#allocation151_spill] sm:$0xff]  ;;  %v5406_v46 = vld [vmem:[#allocation105_spill] sm:$0xff] }
 0x23d   : > { %v4215_v55 = vsel %vm1768_vm10, %v1766_v23, %v1313_v53  ;;  %v1770_v36 = vsel %vm1768_vm10, %v1737_v12, %v3864_v28  ;;  %v1705_v33 = vsel %vm1702_vm8, %v1672_v37, %v5395_v26  ;;  %v5396_v28 = vld [vmem:[#allocation25_spill] sm:$0xff] }
 0x23e   : > { %v5407_v37 = vld [vmem:[#allocation77_spill] sm:$0xff] }
 0x23f   : > { %v1644_v58 = vsel %vm1636_vm6, %v5408_v30, %v5407_v37 }
 0x240   : > { %1592 = vrot.lane.b32.xlu2 %v5382_v25, %s2553_s10  ;;  %1576 = vrot.lane.b32.xlu1 %v5383_v20, %s2553_s10  ;;  %v1674_v25 = vsel %vm1669_vm7, %v1641_v21, %v5397_v32  ;;  %v5398_v20 = vld [vmem:[#allocation157_spill] sm:$0xff]  ;;  %v5409_v21 = vld [vmem:[#allocation140_spill] sm:$0xff] }
 0x241   : > { %v1738_v4 = vsel %vm1735_vm9, %v1705_v33, %v5398_v20  ;;  %v1707_v14 = vsel %vm1702_vm8, %v1674_v25, %v5399_v56  ;;  %v5410_v33 = vld [vmem:[#allocation39_spill] sm:$0xff]  ;;  %v5412_v32 = vld [vmem:[#allocation116_spill] sm:$0xff]  ;;  %v5414_v56 = vld [vmem:[#allocation141_spill] sm:$0xff] }
 0x242   : > { %1448 = vrot.lane.b32.xlu0 %v5388_v15, %s2552_s30  ;;  %v1367_v44 = vpop.permute.xlu2 %1366  ;;  %v1315_v60 = vpop.permute.xlu1 %1314  ;;  %v1771_v34 = vsel %vm1768_vm10, %v1738_v4, %v5400_v0  ;;  %v1677_v25 = vsel %vm1669_vm7, %v1644_v58, %v5412_v32  ;;  %v5413_v20 = vld [vmem:[#allocation159_spill] sm:$0xff]  ;;  %v5415_v0 = vld [vmem:[#allocation169_spill] sm:$0xff] }
 0x243   : > { %v4251_v23 = vsel %vm1801_vm11, %v1778_v61, %v1367_v44  ;;  %v4254_v53 = vsel %vm1768_vm10, %v1767_v9, %v1315_v60  ;;  %v1740_v9 = vsel %vm1735_vm9, %v1707_v14, %v5402_v16  ;;  %v5403_v44 = vld [vmem:[#allocation172_spill] sm:$0xff]  ;;  %v1710_v14 = vsel %vm1702_vm8, %v1677_v25, %v5414_v56  ;;  %v492_v16 = vld [vmem:[%s4948_s5 + $0x30] sm:$0xff] }
 0x244   : > { %v1351_v50 = vpop.permute.xlu0 %1350  ;;  %v1773_v60 = vsel %vm1768_vm10, %v1740_v9, %v5403_v44  ;;  %v5417_v9 = vld [vmem:[#allocation153_spill] sm:$0xff]  ;;  %v486_v32 = vld [vmem:[%s4948_s5] sm:$0xff] }
 0x245   : > { %v4259_v10 = vsel %vm1801_vm11, %v1770_v36, %v1351_v50  ;;  %v494_v36 = vld [vmem:[%s4948_s5 + $0x40] sm:$0xff]  ;;  %v5404_v50 = vld [vmem:[#allocation57_spill] sm:$0xff]  ;;  %v1743_v44 = vsel %vm1735_vm9, %v1710_v14, %v5417_v9 }
 0x246   : > { %v1642_v27 = vsel %vm1636_vm6, %v5405_v3, %v5404_v50  ;;  %2461 = vmatpush.msra.mxu3 %v494_v36  ;;  %2460 = vmatpush.msra.mxu2 %v494_v36  ;;  %v491_v3 = vld [vmem:[%s4948_s5 + $0x28] sm:$0xff]  ;;  %v488_v58 = vld [vmem:[%s4948_s5 + $0x10] sm:$0xff] }
 0x247   : > { %v1675_v63 = vsel %vm1669_vm7, %v1642_v27, %v5406_v46  ;;  %2004 = vmatpush.msra.mxu0 %v494_v36  ;;  %2459 = vmatpush.msra.mxu1 %v494_v36  ;;  %v1776_v36 = vsel %vm1768_vm10, %v1743_v44, %v3908_v7  ;;  %v489_v7 = vld [vmem:[%s4948_s5 + $0x18] sm:$0xff] }
 0x248   : > { %1402 = vrot.lane.b32.xlu2 %v5377_v18, %s2551_s29  ;;  %1464 = vrot.lane.b32.xlu1 %v5396_v28, %s2552_s30  ;;  %v1708_v26 = vsel %vm1702_vm8, %v1675_v63, %v5409_v21  ;;  %v5411_v28 = vld [vmem:[#allocation66_spill] sm:$0xff]  ;;  %v5420_v63 = vld [vmem:[#allocation17_spill] sm:$0xff] }
 0x249   : > { %v1741_v4 = vsel %vm1735_vm9, %v1708_v26, %v5413_v20  ;;  %v5418_v46 = vld [vmem:[#allocation98_spill] sm:$0xff] }
 0x24a   : > { %1544 = vrot.lane.b32.xlu0 %v5401_v51, %s2553_s10  ;;  %v1373_v22 = vpop.permute.xlu2 %1372  ;;  %v1353_v18 = vpop.permute.xlu1 %1352  ;;  %v5416_v51 = vld [vmem:[#allocation52_spill] sm:$0xff] }
 0x24b   : > { %v4289_v61 = vsel %vm1801_vm11, %v3955_v8, %v1373_v22  ;;  %v4292_v15 = vsel %vm1801_vm11, %v1771_v34, %v1353_v18  ;;  %v493_v8 = vld [vmem:[%s4948_s5 + $0x38] sm:$0xff]  ;;  %v1774_v34 = vsel %vm1768_vm10, %v1741_v4, %v5415_v0  ;;  %v5424_v0 = vld [vmem:[#allocation68_spill] sm:$0xff] }
 0x24c   : > { %v1357_v11 = vpop.permute.xlu0 %1356  ;;  %2464 = vmatpush.msra.mxu3 %v493_v8  ;;  %2463 = vmatpush.msra.mxu2 %v493_v8  ;;  %v5423_v4 = vld [vmem:[#allocation87_spill] sm:$0xff] }
 0x24d   : > { %v4297_v12 = vsel %vm1801_vm11, %v1773_v60, %v1357_v11  ;;  %2005 = vmatpush.msra.mxu0 %v493_v8  ;;  %2462 = vmatpush.msra.mxu1 %v493_v8  ;;  %v5419_v8 = vld [vmem:[#allocation83_spill] sm:$0xff] }
 0x24e   : > { %2467 = vmatpush.msra.mxu3 %v492_v16  ;;  %2466 = vmatpush.msra.mxu2 %v492_v16 }
 0x24f   : > { %2006 = vmatpush.msra.mxu0 %v492_v16  ;;  %2465 = vmatpush.msra.mxu1 %v492_v16  ;;  %v5427_v16 = vld [vmem:[#allocation173_spill] sm:$0xff] }
 0x250   : > { %1482 = vrot.lane.b32.xlu2 %v5410_v33, %s2552_s30  ;;  %1560 = vrot.lane.b32.xlu1 %v5411_v28, %s2553_s10  ;;  %v487_v33 = vld [vmem:[%s4948_s5 + $0x8] sm:$0xff] }
 0x251   : > { %2470 = vmatpush.msra.mxu3 %v491_v3  ;;  %2469 = vmatpush.msra.mxu2 %v491_v3 }
 0x252   : > { %1498 = vrot.lane.b32.xlu0 %v5416_v51, %s2552_s30  ;;  %v1379_v22 = vpop.permute.xlu2 %1378  ;;  %v1359_v18 = vpop.permute.xlu1 %1358  ;;  %2007 = vmatpush.msra.mxu0 %v491_v3  ;;  %v5426_v51 = vld [vmem:[#allocation38_spill] sm:$0xff] }
 0x253   : > { %v4336_v60 = vsel %vm1801_vm11, %v3997_v59, %v1379_v22  ;;  %v4339_v11 = vsel %vm1801_vm11, %v1774_v34, %v1359_v18  ;;  %v490_v59 = vld [vmem:[%s4948_s5 + $0x20] sm:$0xff]  ;;  %2468 = vmatpush.msra.mxu1 %v491_v3 }
 0x254   : > { %v1363_v50 = vpop.permute.xlu0 %1362  ;;  %2473 = vmatpush.msra.mxu3 %v490_v59  ;;  %2472 = vmatpush.msra.mxu2 %v490_v59  ;;  %v5425_v34 = vld [vmem:[#allocation59_spill] sm:$0xff] }
 0x255   : > { %v4347_v27 = vsel %vm1801_vm11, %v1776_v36, %v1363_v50  ;;  %2008 = vmatpush.msra.mxu0 %v490_v59  ;;  %2471 = vmatpush.msra.mxu1 %v490_v59  ;;  %v5429_v36 = vld [vmem:[#allocation148_spill] sm:$0xff] }
 0x256   : > { %2476 = vmatpush.msra.mxu3 %v489_v7  ;;  %2475 = vmatpush.msra.mxu2 %v489_v7  ;;  %v5430_v50 = vld [vmem:[#allocation164_spill] sm:$0xff] }
 0x257   : > { %2009 = vmatpush.msra.mxu0 %v489_v7  ;;  %2474 = vmatpush.msra.mxu1 %v489_v7 }
 0x258   : > { %1594 = vrot.lane.b32.xlu2 %v5418_v46, %s2553_s10  ;;  %1578 = vrot.lane.b32.xlu1 %v5419_v8, %s2553_s10  ;;  %v5431_v8 = vld [vmem:[#allocation26_spill] sm:$0xff] }
 0x259   : > { %2479 = vmatpush.msra.mxu3 %v488_v58  ;;  %2478 = vmatpush.msra.mxu2 %v488_v58 }
 0x25a   : > { %1450 = vrot.lane.b32.xlu0 %v5420_v63, %s2552_s30  ;;  %v1385_v37 = vpop.permute.xlu2 %1384  ;;  %v4361_v30 = vpop.permute.xlu1 %1364  ;;  %2010 = vmatpush.msra.mxu0 %v488_v58  ;;  %v5432_v63 = vld [vmem:[#allocation19_spill] sm:$0xff] }
 0x25b   : > { %v4368_v21 = vsel %vm1801_vm11, %v4039_v2, %v1385_v37  ;;  %2482 = vmatpush.msra.mxu3 %v487_v33  ;;  %2481 = vmatpush.msra.mxu2 %v487_v33  ;;  %v5421_v2 = vld [vmem:[#allocation24_spill] sm:$0xff] }
 0x25c   : > { %v1369_v26 = vpop.permute.xlu0 %1368  ;;  %2011 = vmatpush.msra.mxu0 %v487_v33  ;;  %2477 = vmatpush.msra.mxu1 %v488_v58 }
 0x25d   : > { %v4375_v28 = vsel %vm1801_vm11, %v3950_v43, %v1369_v26  ;;  %2485 = vmatpush.msra.mxu3 %v486_v32  ;;  %2484 = vmatpush.msra.mxu2 %v486_v32  ;;  %v5422_v43 = vld [vmem:[#allocation121_spill] sm:$0xff] }
 0x25e   : > { %2012 = vmatpush.msra.mxu0 %v486_v32  ;;  %2480 = vmatpush.msra.mxu1 %v487_v33 }
 0x260   : > { %1388 = vrot.lane.b32.xlu2 %v5335_v62, %s2551_s29  ;;  %1466 = vrot.lane.b32.xlu1 %v5421_v2, %s2552_s30 }
 0x261   : > { %2483 = vmatpush.msra.mxu1 %v486_v32 }
 0x262   : > { %1404 = vrot.lane.b32.xlu0 %v5422_v43, %s2551_s29  ;;  %v1477_v25 = vpop.permute.xlu2 %1476  ;;  %v1371_v20 = vpop.permute.xlu1 %1370  ;;  %v5434_v43 = vld [vmem:[#allocation122_spill] sm:$0xff] }
 0x263   : > { %v4388_v56 = vsel %vm1801_vm11, %v5423_v4, %v1371_v20 }
 0x264   : > { %v1375_v14 = vpop.permute.xlu0 %1374 }
 0x265   : > { %v4392_v62 = vsel %vm1801_vm11, %v3992_v5, %v1375_v14  ;;  %v5428_v5 = vld [vmem:[#allocation85_spill] sm:$0xff] }
 0x268   : > { %1562 = vrot.lane.b32.xlu2 %v5424_v0, %s2553_s10  ;;  %1546 = vrot.lane.b32.xlu1 %v5425_v34, %s2553_s10 }
 0x26a   : > { %1484 = vrot.lane.b32.xlu0 %v5426_v51, %s2552_s30  ;;  %v1589_v22 = vpop.permute.xlu2 %1588  ;;  %v1377_v18 = vpop.permute.xlu1 %1376  ;;  %v5437_v51 = vld [vmem:[#allocation43_spill] sm:$0xff] }
 0x26b   : > { %v4402_v9 = vsel %vm1801_vm11, %v5427_v16, %v1377_v18 }
 0x26c   : > { %v1381_v44 = vpop.permute.xlu0 %1380 }
 0x26d   : > { %v1818_v2 = vsel %vm1801_vm11, %v4034_v13, %v1381_v44  ;;  %v5436_v13 = vld [vmem:[#allocation147_spill] sm:$0xff]  ;;  %v5439_v44 = vld [vmem:[#allocation81_spill] sm:$0xff] }
 0x26e   : > { %v1851_v14 = vsel %vm1834_vm13, %v1818_v2, %v1477_v25 }
 0x270   : > { %1580 = vrot.lane.b32.xlu2 %v5428_v5, %s2553_s10  ;;  %1500 = vrot.lane.b32.xlu1 %v5429_v36, %s2552_s30  ;;  %v5440_v5 = vld [vmem:[#allocation16_spill] sm:$0xff] }
 0x271   : > { %v1645_v25 = vsel %vm1636_vm6, %v5440_v5, %v5439_v44  ;;  %v5448_v44 = vld [vmem:[#allocation60_spill] sm:$0xff] }
 0x272   : > { %1596 = vrot.lane.b32.xlu0 %v5430_v50, %s2553_s10  ;;  %v1399_v3 = vpop.permute.xlu2 %1398  ;;  %v1383_v59 = vpop.permute.xlu1 %1382 }
 0x274   : > { %v1387_v7 = vpop.permute.xlu0 %1386 }
 0x275   : > { %v4412_v46 = vsel %vm1801_vm11, %v4078_v48, %v1387_v7  ;;  %v5441_v7 = vld [vmem:[#allocation108_spill] sm:$0xff] }
 0x278   : > { %1468 = vrot.lane.b32.xlu2 %v5431_v8, %s2552_s30  ;;  %1452 = vrot.lane.b32.xlu1 %v5432_v63, %s2552_s30  ;;  %v1678_v8 = vsel %vm1669_vm7, %v1645_v25, %v5441_v7  ;;  %v5449_v25 = vld [vmem:[#allocation46_spill] sm:$0xff] }
 0x27a   : > { %1390 = vrot.lane.b32.xlu0 %v5345_v31, %s2551_s29  ;;  %v1479_v37 = vpop.permute.xlu2 %1478  ;;  %v1397_v58 = vpop.permute.xlu1 %1396  ;;  %v5433_v31 = vld [vmem:[#allocation58_spill] sm:$0xff] }
 0x27b   : > { %v1826_v26 = vsel %vm1801_vm11, %v4125_v52, %v1397_v58  ;;  %v5435_v52 = vld [vmem:[#allocation73_spill] sm:$0xff]  ;;  %v5442_v58 = vld [vmem:[#allocation142_spill] sm:$0xff] }
 0x27c   : > { %v1493_v33 = vpop.permute.xlu0 %1492 }
 0x27d   : > { %v1859_v48 = vsel %vm1834_vm13, %v1826_v26, %v1493_v33  ;;  %v1711_v26 = vsel %vm1702_vm8, %v1678_v8, %v5442_v58  ;;  %v5443_v33 = vld [vmem:[#allocation161_spill] sm:$0xff] }
 0x27e   : > { %v1892_v32 = vsel %vm1867_vm12, %v1859_v48, %v1589_v22  ;;  %v5438_v22 = vld [vmem:[#allocation90_spill] sm:$0xff]  ;;  %v1744_v48 = vsel %vm1735_vm9, %v1711_v26, %v5443_v33  ;;  %v5452_v8 = vld [vmem:[#allocation41_spill] sm:$0xff]  ;;  %v5454_v26 = vld [vmem:[#allocation20_spill] sm:$0xff] }
 0x27f   : > { %2445 = vmatmul.msk.f32.vlgmr.msra.gmra.mxu3 %vm1900_vm14, %v1892_v32  ;;  %v5444_v32 = vld [vmem:[#allocation170_spill] sm:$0xff] }
 0x280   : > { %1548 = vrot.lane.b32.xlu2 %v5433_v31, %s2553_s10  ;;  %1406 = vrot.lane.b32.xlu1 %v5434_v43, %s2551_s29  ;;  %v1777_v2 = vsel %vm1768_vm10, %v1744_v48, %v5444_v32  ;;  %v5445_v31 = vld [vmem:[#allocation18_spill] sm:$0xff] }
 0x281   : > { %v1810_v43 = vsel %vm1801_vm11, %v1777_v2, %v4361_v30 }
 0x282   : > { %1564 = vrot.lane.b32.xlu0 %v5435_v52, %s2553_s10  ;;  %v1591_v20 = vpop.permute.xlu2 %1590  ;;  %v1573_v4 = vpop.permute.xlu1 %1572 }
 0x283   : > { %v1884_v0 = vsel %vm1867_vm12, %v1851_v14, %v1573_v4  ;;  %v5447_v4 = vld [vmem:[#allocation27_spill] sm:$0xff] }
 0x284   : > { %v1445_v34 = vpop.permute.xlu0 %1444  ;;  %2437 = vmatmul.msk.f32.vlgmr.msra.gmra.mxu2 %vm1900_vm14, %v1884_v0 }
 0x285   : > { %v1835_v36 = vsel %vm1834_vm13, %v4117_v17, %v1445_v34  ;;  %v5446_v17 = vld [vmem:[#allocation166_spill] sm:$0xff] }
 0x288   : > { %1502 = vrot.lane.b32.xlu2 %v5436_v13, %s2552_s30  ;;  %1486 = vrot.lane.b32.xlu1 %v5437_v51, %s2552_s30  ;;  %v1827_v13 = vsel %vm1801_vm11, %v4164_v57, %v1399_v3  ;;  %v1819_v57 = vsel %vm1801_vm11, %v3911_v40, %v1383_v59  ;;  %v5451_v40 = vld [vmem:[#allocation6_spill] sm:$0xff] }
 0x289   : > { %v1852_v3 = vsel %vm1834_vm13, %v1819_v57, %v1479_v37  ;;  %v5461_v57 = vld [vmem:[#allocation22_spill] sm:$0xff] }
 0x28a   : > { %1582 = vrot.lane.b32.xlu0 %v5438_v22, %s2553_s10  ;;  %v1401_v18 = vpop.permute.xlu2 %1400  ;;  %v1461_v16 = vpop.permute.xlu1 %1460  ;;  %v2515_v22 = vpack.i.bf16 %v5381_v41, %v5330_v54 }
 0x28b   : > { %v1843_v52 = vsel %vm1834_vm13, %v1810_v43, %v1461_v16  ;;  %v1828_v32 = vsel %vm1801_vm11, %v4031_v29, %v1401_v18  ;;  %v5456_v29 = vld [vmem:[#allocation63_spill] sm:$0xff] }
 0x28c   : > { %v1541_v50 = vpop.permute.xlu0 %1540 }
 0x28d   : > { %v1868_v63 = vsel %vm1867_vm12, %v1835_v36, %v1541_v50 }
 0x28e   : > { %2421 = vmatmul.msk.f32.vlgmr.msra.gmra.mxu0 %vm1900_vm14, %v1868_v63  ;;  %v5453_v63 = vld [vmem:[#allocation89_spill] sm:$0xff] }
 0x290   : > { %1454 = vrot.lane.b32.xlu2 %v5445_v31, %s2552_s30  ;;  %1598 = vrot.lane.b32.xlu1 %v5446_v17, %s2553_s10 }
 0x292   : > { %1470 = vrot.lane.b32.xlu0 %v5447_v4, %s2552_s30  ;;  %v1481_v14 = vpop.permute.xlu2 %1480  ;;  %v1557_v0 = vpop.permute.xlu1 %1556 }
 0x293   : > { %v1876_v34 = vsel %vm1867_vm12, %v1843_v52, %v1557_v0  ;;  %v1853_v43 = vsel %vm1834_vm13, %v4368_v21, %v1481_v14 }
 0x294   : > { %v1495_v51 = vpop.permute.xlu0 %1494  ;;  %2429 = vmatmul.msk.f32.vlgmr.msra.gmra.mxu1 %vm1900_vm14, %v1876_v34  ;;  %v5457_v34 = vld [vmem:[#allocation45_spill] sm:$0xff] }
 0x295   : > { %v1860_v30 = vsel %vm1834_vm13, %v1827_v13, %v1495_v51  ;;  %v5459_v13 = vld [vmem:[#allocation91_spill] sm:$0xff] }
 0x296   : > { %v1893_v16 = vsel %vm1867_vm12, %v1860_v30, %v1591_v20 }
 0x297   : > { %2446 = vmatmul.msk.f32.gmra.mxu3 %vm1900_vm14, %v1893_v16  ;;  %v5460_v16 = vld [vmem:[#allocation30_spill] sm:$0xff] }
 0x298   : > { %2516 = vrot.lane.b32.xlu2 %v2515_v22, %s2551_s29  ;;  %1392 = vrot.lane.b32.xlu1 %v5308_v19, %s2551_s29  ;;  %v5450_v19 = vld [vmem:[#allocation72_spill] sm:$0xff] }
 0x29a   : > { %1550 = vrot.lane.b32.xlu0 %v5448_v44, %s2553_s10  ;;  %v1593_v54 = vpop.permute.xlu2 %1592  ;;  %v1575_v41 = vpop.permute.xlu1 %1574  ;;  %v5462_v44 = vld [vmem:[#allocation62_spill] sm:$0xff] }
 0x29b   : > { %v1885_v5 = vsel %vm1867_vm12, %v1852_v3, %v1575_v41 }
 0x29c   : > { %v1447_v20 = vpop.permute.xlu0 %1446  ;;  %2438 = vmatmul.msk.f32.gmra.mxu2 %vm1900_vm14, %v1885_v5 }
 0x29d   : > { %v1836_v36 = vsel %vm1834_vm13, %v4259_v10, %v1447_v20 }
 0x2a0   : > { %1488 = vrot.lane.b32.xlu2 %v5449_v25, %s2552_s30  ;;  %1566 = vrot.lane.b32.xlu1 %v5450_v19, %s2553_s10 }
 0x2a2   : > { %2521 = vrot.lane.b32.xlu0 %v5451_v40, %s2552_s30  ;;  %v1403_v59 = vpop.permute.xlu2 %1402  ;;  %v1463_v37 = vpop.permute.xlu1 %1462 }
 0x2a3   : > { %v1844_v58 = vsel %vm1834_vm13, %v4251_v23, %v1463_v37  ;;  %v5455_v23 = vld [vmem:[#allocation29_spill] sm:$0xff]  ;;  %v1829_v5 = vsel %vm1801_vm11, %v4169_v6, %v1403_v59 }
 0x2a4   : > { %v1543_v50 = vpop.permute.xlu0 %1542 }
 0x2a5   : > { %v1869_v7 = vsel %vm1867_vm12, %v1836_v36, %v1543_v50 }
 0x2a6   : > { %2422 = vmatmul.msk.f32.gmra.mxu0 %vm1900_vm14, %v1869_v7 }
 0x2a8   : > { %2526 = vrot.lane.b32.xlu2 %v5452_v8, %s2553_s10  ;;  %1584 = vrot.lane.b32.xlu1 %v5453_v63, %s2553_s10 }
 0x2aa   : > { %1456 = vrot.lane.b32.xlu0 %v5454_v26, %s2552_s30  ;;  %v1483_v33 = vpop.permute.xlu2 %1482  ;;  %v1559_v48 = vpop.permute.xlu1 %1558 }
 0x2ab   : > { %v1877_v10 = vsel %vm1867_vm12, %v1844_v58, %v1559_v48  ;;  %v1854_v40 = vsel %vm1834_vm13, %v4412_v46, %v1483_v33 }
 0x2ac   : > { %v1497_v2 = vpop.permute.xlu0 %1496  ;;  %2430 = vmatmul.msk.f32.gmra.mxu1 %vm1900_vm14, %v1877_v10 }
 0x2ad   : > { %v1861_v31 = vsel %vm1834_vm13, %v1828_v32, %v1497_v2 }
 0x2ae   : > { %v1894_v17 = vsel %vm1867_vm12, %v1861_v31, %v1593_v54 }
 0x2af   : > { %2447 = vmatmul.msk.f32.gmra.mxu3 %vm1900_vm14, %v1894_v17 }
 0x2b0   : > { %1394 = vrot.lane.b32.xlu2 %v5352_v35, %s2551_s29  ;;  %1472 = vrot.lane.b32.xlu1 %v5455_v23, %s2552_s30  ;;  %v5458_v35 = vld [vmem:[#allocation74_spill] sm:$0xff] }
 0x2b2   : > { %1552 = vrot.lane.b32.xlu0 %v5456_v29, %s2553_s10  ;;  %v1595_v18 = vpop.permute.xlu2 %1594  ;;  %v1577_v52 = vpop.permute.xlu1 %1576 }
 0x2b3   : > { %v1886_v4 = vsel %vm1867_vm12, %v1853_v43, %v1577_v52 }
 0x2b4   : > { %v1449_v0 = vpop.permute.xlu0 %1448  ;;  %2439 = vmatmul.msk.f32.gmra.mxu2 %vm1900_vm14, %v1886_v4 }
 0x2b5   : > { %v1837_v51 = vsel %vm1834_vm13, %v4292_v15, %v1449_v0 }
 0x2b8   : > { %1490 = vrot.lane.b32.xlu2 %v5457_v34, %s2552_s30  ;;  %1568 = vrot.lane.b32.xlu1 %v5458_v35, %s2553_s10 }
 0x2ba   : > { %1586 = vrot.lane.b32.xlu0 %v5459_v13, %s2553_s10  ;;  %v1389_v21 = vpop.permute.xlu2 %1388  ;;  %v1465_v14 = vpop.permute.xlu1 %1464 }
 0x2bb   : > { %v1845_v3 = vsel %vm1834_vm13, %v4375_v28, %v1465_v14  ;;  %v5463_v28 = vld [vmem:[#allocation78_spill] sm:$0xff]  ;;  %v1822_v48 = vsel %vm1801_vm11, %v3947_v38, %v1389_v21 }
 0x2bc   : > { %v1545_v22 = vpop.permute.xlu0 %1544 }
 0x2bd   : > { %v1870_v30 = vsel %vm1867_vm12, %v1837_v51, %v1545_v22 }
 0x2be   : > { %2423 = vmatmul.msk.f32.gmra.mxu0 %vm1900_vm14, %v1870_v30 }
 0x2c0   : > { %1474 = vrot.lane.b32.xlu2 %v5460_v16, %s2552_s30  ;;  %1458 = vrot.lane.b32.xlu1 %v5461_v57, %s2552_s30 }
 0x2c2   : > { %1554 = vrot.lane.b32.xlu0 %v5462_v44, %s2553_s10  ;;  %v1561_v54 = vpop.permute.xlu1 %1560  ;;  %v1563_v41 = vpop.permute.xlu2 %1562 }
 0x2c3   : > { %v1878_v15 = vsel %vm1867_vm12, %v1845_v3, %v1561_v54 }
 0x2c4   : > { %v1499_v20 = vpop.permute.xlu0 %1498  ;;  %2431 = vmatmul.msk.f32.gmra.mxu1 %vm1900_vm14, %v1878_v15 }
 0x2c5   : > { %v1862_v25 = vsel %vm1834_vm13, %v1829_v5, %v1499_v20 }
 0x2c6   : > { %v1895_v19 = vsel %vm1867_vm12, %v1862_v25, %v1595_v18 }
 0x2c7   : > { %2448 = vmatmul.msk.f32.gmra.mxu3 %vm1900_vm14, %v1895_v19 }
 0x2c8   : > { %1570 = vrot.lane.b32.xlu1 %v5463_v28, %s2553_s10  ;;  %s4589_s10 = scalar_lea.vmem %s4949_s6, %s2457_s11 }
 0x2ca   : > { %v1579_v37 = vpop.permute.xlu1 %1578  ;;  %v1581_v6 = vpop.permute.xlu2 %1580 }
 0x2cb   : > { %v1887_v36 = vsel %vm1867_vm12, %v1854_v40, %v1579_v37 }
 0x2cc   : > { %v1451_v50 = vpop.permute.xlu0 %1450  ;;  %2440 = vmatmul.msk.f32.gmra.mxu2 %vm1900_vm14, %v1887_v36 }
 0x2cd   : > { %v1838_v46 = vsel %vm1834_vm13, %v4161_v45, %v1451_v50 }
 0x2d2   : > { %v1467_v59 = vpop.permute.xlu1 %1466  ;;  %v1469_v58 = vpop.permute.xlu2 %1468 }
 0x2d3   : > { %v1846_v7 = vsel %vm1834_vm13, %v4388_v56, %v1467_v59  ;;  %v1847_v0 = vsel %vm1834_vm13, %v4289_v61, %v1469_v58 }
 0x2d4   : > { %v1405_v8 = vpop.permute.xlu0 %1404  ;;  %v1879_v63 = vsel %vm1867_vm12, %v1846_v7, %v1563_v41 }
 0x2d5   : > { %2432 = vmatmul.msk.f32.gmra.mxu1 %vm1900_vm14, %v1879_v63  ;;  %v1830_v31 = vsel %vm1801_vm11, %v4208_v47, %v1405_v8 }
 0x2da   : > { %v1547_v26 = vpop.permute.xlu1 %1546  ;;  %v1549_v2 = vpop.permute.xlu2 %1548 }
 0x2db   : > { %v1871_v33 = vsel %vm1867_vm12, %v1838_v46, %v1547_v26 }
 0x2dc   : > { %v1485_v10 = vpop.permute.xlu0 %1484  ;;  %2424 = vmatmul.msk.f32.gmra.mxu0 %vm1900_vm14, %v1871_v33 }
 0x2dd   : > { %v1855_v56 = vsel %vm1834_vm13, %v1822_v48, %v1485_v10 }
 0x2de   : > { %v1888_v32 = vsel %vm1867_vm12, %v1855_v56, %v1581_v6 }
 0x2df   : > { %2441 = vmatmul.msk.f32.gmra.mxu2 %vm1900_vm14, %v1888_v32 }
 0x2e2   : > { %v1501_v45 = vpop.permute.xlu1 %1500  ;;  %v1503_v29 = vpop.permute.xlu2 %1502 }
 0x2e3   : > { %v1863_v17 = vsel %vm1834_vm13, %v1830_v31, %v1501_v45 }
 0x2e4   : > { %v1597_v23 = vpop.permute.xlu0 %1596 }
 0x2e5   : > { %v1896_v43 = vsel %vm1867_vm12, %v1863_v17, %v1597_v23 }
 0x2e6   : > { %2449 = vmatmul.msk.f32.gmra.mxu3 %vm1900_vm14, %v1896_v43 }
 0x2ea   : > { %v1453_v38 = vpop.permute.xlu1 %1452  ;;  %v1455_v35 = vpop.permute.xlu2 %1454 }
 0x2eb   : > { %v1839_v18 = vsel %vm1834_vm13, %v4297_v12, %v1453_v38  ;;  %v1840_v5 = vsel %vm1834_vm13, %v4339_v11, %v1455_v35 }
 0x2ec   : > { %v1391_v52 = vpop.permute.xlu0 %1390  ;;  %v1872_v4 = vsel %vm1867_vm12, %v1839_v18, %v1549_v2 }
 0x2ed   : > { %2425 = vmatmul.msk.f32.gmra.mxu0 %vm1900_vm14, %v1872_v4  ;;  %v1823_v21 = vsel %vm1801_vm11, %v4083_v24, %v1391_v52 }
 0x2f2   : > { %v1407_v47 = vpop.permute.xlu1 %1406  ;;  %v2517_v30 = vpop.permute.xlu2 %2516 }
 0x2f3   : > { %v1831_v61 = vsel %vm1801_vm11, %v4075_v1, %v1407_v47  ;;  %v2518_v28 = vunpack.i.l.bf16 %v2517_v30  ;;  %v2519_v63 = vunpack.i.h.bf16 %v2517_v30 }
 0x2f4   : > { %v1565_v34 = vpop.permute.xlu0 %1564  ;;  %v1864_v57 = vsel %vm1834_vm13, %v1831_v61, %v1503_v29 }
 0x2f5   : > { %v1880_v13 = vsel %vm1867_vm12, %v1847_v0, %v1565_v34  ;;  %v1832_v7 = vsel %vm1801_vm11, %v4215_v55, %v2518_v28 }
 0x2f6   : > { %2433 = vmatmul.msk.f32.gmra.mxu1 %vm1900_vm14, %v1880_v13 }
 0x2fa   : > { %v1487_v12 = vpop.permute.xlu1 %1486  ;;  %v1489_v54 = vpop.permute.xlu2 %1488 }
 0x2fb   : > { %v1856_v14 = vsel %vm1834_vm13, %v1823_v21, %v1487_v12 }
 0x2fc   : > { %v1583_v51 = vpop.permute.xlu0 %1582 }
 0x2fd   : > { %v1889_v22 = vsel %vm1867_vm12, %v1856_v14, %v1583_v51 }
 0x2fe   : > { %2442 = vmatmul.msk.f32.gmra.mxu2 %vm1900_vm14, %v1889_v22 }
 0x302   : > { %v4591_v24 = vpop.f32.mrf.mxu3  ;;  %v1599_v16 = vpop.permute.xlu1 %1598 }
 0x303   : > { %2134 = vst.msk [vmem:[%s4589_s10 + $0xc0] sm:$0xff] %vm1636_vm6, %v4591_v24  ;;  %v1897_v1 = vsel %vm1867_vm12, %v1864_v57, %v1599_v16  ;;  %v2527_v40 = vpop.permute.xlu2 %2526 }
 0x304   : > { %v1471_v3 = vpop.permute.xlu0 %1470  ;;  %2450 = vmatmul.msk.f32.gmra.mxu3 %vm1900_vm14, %v1897_v1  ;;  %v2528_v36 = vunpack.i.l.bf16 %v2527_v40  ;;  %v2529_v48 = vunpack.i.h.bf16 %v2527_v40 }
 0x305   : > { %v1848_v37 = vsel %vm1834_vm13, %v4392_v62, %v1471_v3 }
 0x307   : > { %v4599_v44 = vpop.f32.mrf.mxu2 }
 0x308   : > { %2126 = vst.msk [vmem:[%s4589_s10 + $0x80] sm:$0xff] %vm1636_vm6, %v4599_v44 }
 0x30a   : > { %v1393_v15 = vpop.permute.xlu1 %1392 }
 0x30b   : > { %v4604_v41 = vpop.f32.mrf.mxu0  ;;  %v1824_v58 = vsel %vm1801_vm11, %v4120_v49, %v1393_v15  ;;  %v1833_v49 = vsel %vm1801_vm11, %v4254_v53, %v2519_v63  ;;  %v1395_v2 = vpop.permute.xlu2 %1394 }
 0x30c   : > { %2110 = vst.msk [vmem:[%s4589_s10] sm:$0xff] %vm1636_vm6, %v4604_v41  ;;  %v1551_v20 = vpop.permute.xlu0 %1550  ;;  %v1857_v55 = vsel %vm1834_vm13, %v1824_v58, %v1489_v54  ;;  %v1825_v52 = vsel %vm1801_vm11, %v3989_v39, %v1395_v2 }
 0x30d   : > { %v1873_v25 = vsel %vm1867_vm12, %v1840_v5, %v1551_v20 }
 0x30e   : > { %2426 = vmatmul.msk.f32.gmra.mxu0 %vm1900_vm14, %v1873_v25 }
 0x311   : > { %v4613_v19 = vpop.f32.mrf.mxu1 }
 0x312   : > { %2118 = vst.msk [vmem:[%s4589_s10 + $0x40] sm:$0xff] %vm1636_vm6, %v4613_v19  ;;  %v1567_v11 = vpop.permute.xlu1 %1566 }
 0x313   : > { %v1881_v6 = vsel %vm1867_vm12, %v1848_v37, %v1567_v11  ;;  %v1491_v29 = vpop.permute.xlu2 %1490 }
 0x314   : > { %v2522_v50 = vpop.permute.xlu0 %2521  ;;  %2434 = vmatmul.msk.f32.gmra.mxu1 %vm1900_vm14, %v1881_v6  ;;  %v1858_v47 = vsel %vm1834_vm13, %v1825_v52, %v1491_v29 }
 0x315   : > { %v2523_v59 = vunpack.i.l.bf16 %v2522_v50  ;;  %v2524_v46 = vunpack.i.h.bf16 %v2522_v50 }
 0x317   : > { %v1865_v8 = vsel %vm1834_vm13, %v1832_v7, %v2523_v59  ;;  %v1866_v32 = vsel %vm1834_vm13, %v1833_v49, %v2524_v46 }
 0x318   : > { %v1898_v62 = vsel %vm1867_vm12, %v1865_v8, %v2528_v36  ;;  %v1899_v45 = vsel %vm1867_vm12, %v1866_v32, %v2529_v48 }
 0x319   : > { %2451 = vmatmul.msk.f32.gmra.mxu3 %vm1900_vm14, %v1898_v62 }
 0x31a   : > { %v4629_v26 = vpop.f32.mrf.mxu3  ;;  %v1585_v33 = vpop.permute.xlu1 %1584 }
 0x31b   : > { %2135 = vst.msk [vmem:[%s4589_s10 + $0xc8] sm:$0xff] %vm1636_vm6, %v4629_v26  ;;  %v1890_v56 = vsel %vm1867_vm12, %v1857_v55, %v1585_v33  ;;  %v1475_v51 = vpop.permute.xlu2 %1474 }
 0x31c   : > { %v1457_v10 = vpop.permute.xlu0 %1456  ;;  %2443 = vmatmul.msk.f32.gmra.mxu2 %vm1900_vm14, %v1890_v56  ;;  %v1850_v22 = vsel %vm1834_vm13, %v4336_v60, %v1475_v51 }
 0x31d   : > { %v1841_v53 = vsel %vm1834_vm13, %v4205_v42, %v1457_v10 }
 0x31f   : > { %v4640_v31 = vpop.f32.mrf.mxu2 }
 0x320   : > { %2127 = vst.msk [vmem:[%s4589_s10 + $0x88] sm:$0xff] %vm1636_vm6, %v4640_v31 }
 0x321   : > { %2452 = vmatmul.msk.f32.gmra.mxu3 %vm1900_vm14, %v1899_v45 }
 0x322   : > { %v1473_v23 = vpop.permute.xlu1 %1472 }
 0x323   : > { %v4647_v17 = vpop.f32.mrf.mxu0  ;;  %v1849_v42 = vsel %vm1834_vm13, %v4402_v9, %v1473_v23 }
 0x324   : > { %2111 = vst.msk [vmem:[%s4589_s10 + $0x8] sm:$0xff] %vm1636_vm6, %v4647_v17  ;;  %v1553_v43 = vpop.permute.xlu0 %1552 }
 0x325   : > { %v1874_v38 = vsel %vm1867_vm12, %v1841_v53, %v1553_v43 }
 0x326   : > { %2427 = vmatmul.msk.f32.gmra.mxu0 %vm1900_vm14, %v1874_v38 }
 0x329   : > { %v4656_v18 = vpop.f32.mrf.mxu1 }
 0x32a   : > { %2119 = vst.msk [vmem:[%s4589_s10 + $0x48] sm:$0xff] %vm1636_vm6, %v4656_v18  ;;  %v1569_v4 = vpop.permute.xlu1 %1568 }
 0x32b   : > { %v1882_v34 = vsel %vm1867_vm12, %v1849_v42, %v1569_v4 }
 0x32c   : > { %v1587_v0 = vpop.permute.xlu0 %1586  ;;  %2435 = vmatmul.msk.f32.gmra.mxu1 %vm1900_vm14, %v1882_v34 }
 0x32d   : > { %v1891_v35 = vsel %vm1867_vm12, %v1858_v47, %v1587_v0 }
 0x32e   : > { %2444 = vmatmul.msk.f32.gmra.mxu2 %vm1900_vm14, %v1891_v35 }
 0x332   : > { %v4670_v13 = vpop.f32.mrf.mxu3  ;;  %v1459_v39 = vpop.permute.xlu1 %1458 }
 0x333   : > { %2136 = vst.msk [vmem:[%s4589_s10 + $0xd0] sm:$0xff] %vm1636_vm6, %v4670_v13  ;;  %v1842_v9 = vsel %vm1834_vm13, %v4347_v27, %v1459_v39 }
 0x334   : > { %v1555_v21 = vpop.permute.xlu0 %1554 }
 0x335   : > { %v1875_v12 = vsel %vm1867_vm12, %v1842_v9, %v1555_v21 }
 0x336   : > { %2428 = vmatmul.msk.f32.gmra.mxu0 %vm1900_vm14, %v1875_v12 }
 0x337   : > { %v4679_v14 = vpop.f32.mrf.mxu2 }
 0x338   : > { %2128 = vst.msk [vmem:[%s4589_s10 + $0x90] sm:$0xff] %vm1636_vm6, %v4679_v14 }
 0x33a   : > { %v1571_v27 = vpop.permute.xlu1 %1570 }
 0x33b   : > { %v4686_v30 = vpop.f32.mrf.mxu0  ;;  %v1883_v61 = vsel %vm1867_vm12, %v1850_v22, %v1571_v27 }
 0x33c   : > { %2112 = vst.msk [vmem:[%s4589_s10 + $0x10] sm:$0xff] %vm1636_vm6, %v4686_v30  ;;  %2436 = vmatmul.msk.f32.gmra.mxu1 %vm1900_vm14, %v1883_v61 }
 0x341   : > { %v4693_v16 = vpop.f32.mrf.mxu1 }
 0x342   : > { %2120 = vst.msk [vmem:[%s4589_s10 + $0x50] sm:$0xff] %vm1636_vm6, %v4693_v16 }
 0x34a   : > { %v4698_v60 = vpop.f32.mrf.mxu3 }
 0x34b   : > { %2137 = vst.msk [vmem:[%s4589_s10 + $0xd8] sm:$0xff] %vm1636_vm6, %v4698_v60 }
 0x34f   : > { %v4703_v57 = vpop.f32.mrf.mxu2 }
 0x350   : > { %2129 = vst.msk [vmem:[%s4589_s10 + $0x98] sm:$0xff] %vm1636_vm6, %v4703_v57 }
 0x352   : > { %v4708_v3 = vpop.f32.mrf.mxu1 }
 0x353   : > { %2121 = vst.msk [vmem:[%s4589_s10 + $0x58] sm:$0xff] %vm1636_vm6, %v4708_v3 }
 0x359   : > { %v2023_v1 = vpop.f32.mrf.mxu0 }
 0x35a   : > { %2113 = vst.msk [vmem:[%s4589_s10 + $0x18] sm:$0xff] %vm1636_vm6, %v2023_v1 }
 0x362   : > { %v4715_v54 = vpop.f32.mrf.mxu2 }
 0x363   : > { %2130 = vst.msk [vmem:[%s4589_s10 + $0xa0] sm:$0xff] %vm1636_vm6, %v4715_v54 }
 0x369   : > { %v4720_v15 = vpop.f32.mrf.mxu3 }
 0x36a   : > { %2138 = vst.msk [vmem:[%s4589_s10 + $0xe0] sm:$0xff] %vm1636_vm6, %v4720_v15  ;;  %v2026_v5 = vpop.f32.mrf.mxu0 }
 0x36b   : > { %2114 = vst.msk [vmem:[%s4589_s10 + $0x20] sm:$0xff] %vm1636_vm6, %v2026_v5 }
 0x373   : > { %v4727_v20 = vpop.f32.mrf.mxu1 }
 0x374   : > { %2122 = vst.msk [vmem:[%s4589_s10 + $0x60] sm:$0xff] %vm1636_vm6, %v4727_v20 }
 0x381   : > { %v4732_v25 = vpop.f32.mrf.mxu2 }
 0x382   : > { %2131 = vst.msk [vmem:[%s4589_s10 + $0xa8] sm:$0xff] %vm1636_vm6, %v4732_v25 }
 0x387   : > { %v4737_v28 = vpop.f32.mrf.mxu3 }
 0x388   : > { %2139 = vst.msk [vmem:[%s4589_s10 + $0xe8] sm:$0xff] %vm1636_vm6, %v4737_v28 }
 0x38b   : > { %v2029_v40 = vpop.f32.mrf.mxu0 }
 0x38c   : > { %2115 = vst.msk [vmem:[%s4589_s10 + $0x28] sm:$0xff] %vm1636_vm6, %v2029_v40 }
 0x391   : > { %v4744_v37 = vpop.f32.mrf.mxu1 }
 0x392   : > { %2123 = vst.msk [vmem:[%s4589_s10 + $0x68] sm:$0xff] %vm1636_vm6, %v4744_v37 }
 0x39c   : > { %v4749_v11 = vpop.f32.mrf.mxu3 }
 0x39d   : > { %2140 = vst.msk [vmem:[%s4589_s10 + $0xf0] sm:$0xff] %vm1636_vm6, %v4749_v11 }
 0x39f   : > { %v4754_v36 = vpop.f32.mrf.mxu2 }
 0x3a0   : > { %2132 = vst.msk [vmem:[%s4589_s10 + $0xb0] sm:$0xff] %vm1636_vm6, %v4754_v36 }
 0x3a3   : > { %v2032_v50 = vpop.f32.mrf.mxu0 }
 0x3a4   : > { %2116 = vst.msk [vmem:[%s4589_s10 + $0x30] sm:$0xff] %vm1636_vm6, %v2032_v50  ;;  %v4761_v6 = vpop.f32.mrf.mxu3 }
 0x3a5   : > { %2141 = vst.msk [vmem:[%s4589_s10 + $0xf8] sm:$0xff] %vm1636_vm6, %v4761_v6 }
 0x3a9   : > { %v4766_v59 = vpop.f32.mrf.mxu1 }
 0x3aa   : > { %2124 = vst.msk [vmem:[%s4589_s10 + $0x70] sm:$0xff] %vm1636_vm6, %v4766_v59 }
 0x3b1   : > { %v4771_v7 = vpop.f32.mrf.mxu2 }
 0x3b2   : > { %2133 = vst.msk [vmem:[%s4589_s10 + $0xb8] sm:$0xff] %vm1636_vm6, %v4771_v7 }
 0x3b3   : > { %v2035_v8 = vpop.f32.mrf.mxu0 }
 0x3b4   : > { %2117 = vst.msk [vmem:[%s4589_s10 + $0x38] sm:$0xff] %vm1636_vm6, %v2035_v8 }
 0x3b6   : > { %2145 = sbr.rel (%p2453_p4) target bundleno = 958 (0x3be), region = 48 }
 0x3b9   : > { %v4778_v63 = vpop.f32.mrf.mxu1 }
 0x3ba   : > { %2125 = vst.msk [vmem:[%s4589_s10 + $0x78] sm:$0xff] %vm1636_vm6, %v4778_v63 }
 0x3bb   : > { %vm2146_vm15 = vcmask 57344   ;;  %v2554_v58 = vmov 0.0  }
 0x3bc   : > { %2147 = vst.msk [vmem:[#allocation2] sm:$0x1] %vm2146_vm15, %v2554_v58 }
 0x3bd   : > { %2148 = vst.msk [vmem:[#allocation3] sm:$0x1] %vm2146_vm15, %v2554_v58 }
 0x3be PF: > { %v2150_v62 = vsel %vm1636_vm6, %v4604_v41, 0.0  ;;  %v2151_v46 = vsel %vm1636_vm6, %v4647_v17, 0.0  ;;  %v2153_v33 = vsel %vm1636_vm6, %v4686_v30, 0.0  ;;  %v2155_v48 = vsel %vm1636_vm6, %v2023_v1, 0.0  ;;  %p2454_p5 = scmp.ne.s32.totalorder %s2607_s28, 1 }
 0x3bf   : > { %v2152_v55 = vadd.f32 %v2151_v46, %v2150_v62  ;;  %v2157_v56 = vsel %vm1636_vm6, %v2026_v5, 0.0  ;;  %v2159_v32 = vsel %vm1636_vm6, %v2029_v40, 0.0  ;;  %v2161_v45 = vsel %vm1636_vm6, %v2032_v50, 0.0 }
 0x3c0   : > { %v2223_v23 = vmul.f32 %v4604_v41, %v4604_v41  ;;  %v2224_v43 = vmul.f32 %v4647_v17, %v4647_v17  ;;  %v2225_v38 = vmul.f32 %v4686_v30, %v4686_v30  ;;  %v2163_v29 = vsel %vm1636_vm6, %v2035_v8, 0.0 }
 0x3c1   : > { %v2154_v10 = vadd.f32 %v2153_v33, %v2152_v55  ;;  %v2226_v42 = vmul.f32 %v2023_v1, %v2023_v1  ;;  %v2165_v4 = vsel %vm1636_vm6, %v4613_v19, 0.0  ;;  %v2227_v34 = vmul.f32 %v2026_v5, %v2026_v5 }
 0x3c2   : > { %v2255_v47 = vsel %vm1636_vm6, %v2223_v23, 0.0  ;;  %v2256_v41 = vsel %vm1636_vm6, %v2224_v43, 0.0  ;;  %v2258_v35 = vsel %vm1636_vm6, %v2225_v38, 0.0  ;;  %v2167_v17 = vsel %vm1636_vm6, %v4656_v18, 0.0 }
 0x3c3   : > { %v2156_v49 = vadd.f32 %v2155_v48, %v2154_v10  ;;  %v2257_v39 = vadd.f32 %v2256_v41, %v2255_v47  ;;  %v2228_v21 = vmul.f32 %v2029_v40, %v2029_v40  ;;  %v2260_v12 = vsel %vm1636_vm6, %v2226_v42, 0.0 }
 0x3c4   : > { %v2169_v51 = vsel %vm1636_vm6, %v4693_v16, 0.0  ;;  %v2229_v27 = vmul.f32 %v2032_v50, %v2032_v50  ;;  %v2262_v61 = vsel %vm1636_vm6, %v2227_v34, 0.0  ;;  %v2171_v1 = vsel %vm1636_vm6, %v4708_v3, 0.0 }
 0x3c5   : > { %v2158_v2 = vadd.f32 %v2157_v56, %v2156_v49  ;;  %v2259_v22 = vadd.f32 %v2258_v35, %v2257_v39  ;;  %v2230_v62 = vmul.f32 %v2035_v8, %v2035_v8  ;;  %v2264_v46 = vsel %vm1636_vm6, %v2228_v21, 0.0 }
 0x3c6   : > { %v2173_v40 = vsel %vm1636_vm6, %v4727_v20, 0.0  ;;  %v2231_v48 = vmul.f32 %v4613_v19, %v4613_v19  ;;  %v2266_v50 = vsel %vm1636_vm6, %v2229_v27, 0.0  ;;  %v2175_v10 = vsel %vm1636_vm6, %v4744_v37, 0.0 }
 0x3c7   : > { %v2160_v53 = vadd.f32 %v2159_v32, %v2158_v2  ;;  %v2261_v5 = vadd.f32 %v2260_v12, %v2259_v22  ;;  %v2232_v8 = vmul.f32 %v4656_v18, %v4656_v18  ;;  %v2268_v32 = vsel %vm1636_vm6, %v2230_v62, 0.0 }
 0x3c8   : > { %v2177_v2 = vsel %vm1636_vm6, %v4766_v59, 0.0  ;;  %v2233_v19 = vmul.f32 %v4693_v16, %v4693_v16  ;;  %v2179_v43 = vsel %vm1636_vm6, %v4778_v63, 0.0  ;;  %v2234_v18 = vmul.f32 %v4708_v3, %v4708_v3 }
 0x3c9   : > { %v2162_v52 = vadd.f32 %v2161_v45, %v2160_v53  ;;  %v2263_v33 = vadd.f32 %v2262_v61, %v2261_v5  ;;  %v2270_v53 = vsel %vm1636_vm6, %v2231_v48, 0.0  ;;  %v2181_v42 = vsel %vm1636_vm6, %v4599_v44, 0.0 }
 0x3ca   : > { %v2235_v16 = vmul.f32 %v4727_v20, %v4727_v20  ;;  %v2183_v34 = vsel %vm1636_vm6, %v4640_v31, 0.0  ;;  %v2236_v3 = vmul.f32 %v4744_v37, %v4744_v37  ;;  %v2185_v39 = vsel %vm1636_vm6, %v4679_v14, 0.0 }
 0x3cb   : > { %v2164_v0 = vadd.f32 %v2163_v29, %v2162_v52  ;;  %v2265_v56 = vadd.f32 %v2264_v46, %v2263_v33  ;;  %v2272_v52 = vsel %vm1636_vm6, %v2232_v8, 0.0  ;;  %v2237_v20 = vmul.f32 %v4766_v59, %v4766_v59 }
 0x3cc   : > { %v2278_v12 = vsel %vm1636_vm6, %v2235_v16, 0.0  ;;  %v2238_v37 = vmul.f32 %v4778_v63, %v4778_v63  ;;  %v2280_v27 = vsel %vm1636_vm6, %v2236_v3, 0.0  ;;  %v2189_v61 = vsel %vm1636_vm6, %v4715_v54, 0.0 }
 0x3cd   : > { %v2166_v9 = vadd.f32 %v2165_v4, %v2164_v0  ;;  %v2267_v45 = vadd.f32 %v2266_v50, %v2265_v56  ;;  %v2274_v0 = vsel %vm1636_vm6, %v2233_v19, 0.0  ;;  %v2239_v59 = vmul.f32 %v4599_v44, %v4599_v44 }
 0x3ce   : > { %v2191_v62 = vsel %vm1636_vm6, %v4732_v25, 0.0  ;;  %v2240_v63 = vmul.f32 %v4640_v31, %v4640_v31  ;;  %v2284_v33 = vsel %vm1636_vm6, %v2238_v37, 0.0  ;;  %v2241_v44 = vmul.f32 %v4679_v14, %v4679_v14 }
 0x3cf   : > { %v2168_v30 = vadd.f32 %v2167_v17, %v2166_v9  ;;  %v2269_v38 = vadd.f32 %v2268_v32, %v2267_v45  ;;  %v2276_v17 = vsel %vm1636_vm6, %v2234_v18, 0.0  ;;  %v2195_v56 = vsel %vm1636_vm6, %v4771_v7, 0.0 }
 0x3d0   : > { %v2242_v31 = vmul.f32 %v4703_v57, %v4703_v57  ;;  %v2288_v32 = vsel %vm1636_vm6, %v2240_v63, 0.0  ;;  %v2243_v14 = vmul.f32 %v4715_v54, %v4715_v54  ;;  %v2290_v19 = vsel %vm1636_vm6, %v2241_v44, 0.0 }
 0x3d1   : > { %v2170_v58 = vadd.f32 %v2169_v51, %v2168_v30  ;;  %v2271_v4 = vadd.f32 %v2270_v53, %v2269_v38  ;;  %v2187_v51 = vsel %vm1636_vm6, %v4703_v57, 0.0  ;;  %v2199_v53 = vsel %vm1636_vm6, %v4629_v26, 0.0 }
 0x3d2   : > { %v2244_v57 = vmul.f32 %v4732_v25, %v4732_v25  ;;  %v2201_v18 = vsel %vm1636_vm6, %v4670_v13, 0.0  ;;  %v2245_v54 = vmul.f32 %v4754_v36, %v4754_v36  ;;  %v2246_v25 = vmul.f32 %v4771_v7, %v4771_v7 }
 0x3d3   : > { %v2172_v55 = vadd.f32 %v2171_v1, %v2170_v58  ;;  %v2273_v41 = vadd.f32 %v2272_v52, %v2271_v4  ;;  %v2282_v58 = vsel %vm1636_vm6, %v2237_v20, 0.0  ;;  %v2294_v4 = vsel %vm1636_vm6, %v2243_v14, 0.0 }
 0x3d4   : > { %v2248_v7 = vmul.f32 %v4629_v26, %v4629_v26  ;;  %v2300_v20 = vsel %vm1636_vm6, %v2246_v25, 0.0  ;;  %v2211_v37 = vsel %vm1636_vm6, %v4761_v6, 0.0  ;;  %v2250_v26 = vmul.f32 %v4698_v60, %v4698_v60 }
 0x3d5   : > { %v2174_v49 = vadd.f32 %v2173_v40, %v2172_v55  ;;  %v2275_v9 = vadd.f32 %v2274_v0, %v2273_v41  ;;  %v2193_v55 = vsel %vm1636_vm6, %v4754_v36, 0.0  ;;  %v2205_v41 = vsel %vm1636_vm6, %v4720_v15, 0.0 }
 0x3d6   : > { %v2247_v36 = vmul.f32 %v4591_v24, %v4591_v24  ;;  %v2308_v63 = vsel %vm1636_vm6, %v2250_v26, 0.0  ;;  %vm2220_vm0 = vcmask 57344  }
 0x3d7   : > { %v2176_v23 = vadd.f32 %v2175_v10, %v2174_v49  ;;  %v2277_v22 = vadd.f32 %v2276_v17, %v2275_v9  ;;  %v2286_v10 = vsel %vm1636_vm6, %v2239_v59, 0.0  ;;  %v2298_v17 = vsel %vm1636_vm6, %v2245_v54, 0.0 }
 0x3d9   : > { %v2178_v29 = vadd.f32 %v2177_v2, %v2176_v23  ;;  %v2279_v1 = vadd.f32 %v2278_v12, %v2277_v22  ;;  %v2197_v2 = vsel %vm1636_vm6, %v4591_v24, 0.0  ;;  %v2209_v12 = vsel %vm1636_vm6, %v4749_v11, 0.0 }
 0x3da   : > { %v2249_v24 = vmul.f32 %v4670_v13, %v4670_v13 }
 0x3db   : > { %v2180_v47 = vadd.f32 %v2179_v43, %v2178_v29  ;;  %v2281_v46 = vadd.f32 %v2280_v27, %v2279_v1  ;;  %v2292_v29 = vsel %vm1636_vm6, %v2242_v31, 0.0  ;;  %v2304_v1 = vsel %vm1636_vm6, %v2248_v7, 0.0 }
 0x3dd   : > { %v2182_v35 = vadd.f32 %v2181_v42, %v2180_v47  ;;  %v2283_v48 = vadd.f32 %v2282_v58, %v2281_v46  ;;  %v2203_v47 = vsel %vm1636_vm6, %v4698_v60, 0.0  ;;  %v2251_v58 = vmul.f32 %v4720_v15, %v4720_v15 }
 0x3de   : > { %v2253_v60 = vmul.f32 %v4749_v11, %v4749_v11  ;;  %v2254_v15 = vmul.f32 %v4761_v6, %v4761_v6 }
 0x3df   : > { %v2184_v21 = vadd.f32 %v2183_v34, %v2182_v35  ;;  %v2285_v49 = vadd.f32 %v2284_v33, %v2283_v48  ;;  %v2296_v34 = vsel %vm1636_vm6, %v2244_v57, 0.0  ;;  %v2310_v48 = vsel %vm1636_vm6, %v2251_v58, 0.0  ;;  %v2222_v57 = vld [vmem:[#allocation3] sm:$0x1] }
 0x3e1   : > { %v2186_v30 = vadd.f32 %v2185_v39, %v2184_v21  ;;  %v2287_v45 = vadd.f32 %v2286_v10, %v2285_v49  ;;  %v2207_v39 = vsel %vm1636_vm6, %v4737_v28, 0.0 }
 0x3e3   : > { %v2188_v5 = vadd.f32 %v2187_v51, %v2186_v30  ;;  %v2289_v43 = vadd.f32 %v2288_v32, %v2287_v45  ;;  %v2302_v30 = vsel %vm1636_vm6, %v2247_v36, 0.0  ;;  %v2316_v32 = vsel %vm1636_vm6, %v2254_v15, 0.0 }
 0x3e5   : > { %v2190_v40 = vadd.f32 %v2189_v61, %v2188_v5  ;;  %v2291_v52 = vadd.f32 %v2290_v19, %v2289_v43 }
 0x3e7   : > { %v2192_v50 = vadd.f32 %v2191_v62, %v2190_v40  ;;  %v2293_v16 = vadd.f32 %v2292_v29, %v2291_v52  ;;  %v2306_v62 = vsel %vm1636_vm6, %v2249_v24, 0.0  ;;  %v2252_v40 = vmul.f32 %v4737_v28, %v4737_v28 }
 0x3e8   : > { %v2314_v28 = vsel %vm1636_vm6, %v2253_v60, 0.0 }
 0x3e9   : > { %v2194_v8 = vadd.f32 %v2193_v55, %v2192_v50  ;;  %v2295_v35 = vadd.f32 %v2294_v4, %v2293_v16  ;;  %v2312_v10 = vsel %vm1636_vm6, %v2252_v40, 0.0 }
 0x3eb   : > { %v2196_v23 = vadd.f32 %v2195_v56, %v2194_v8  ;;  %v2297_v9 = vadd.f32 %v2296_v34, %v2295_v35 }
 0x3ed   : > { %v2198_v38 = vadd.f32 %v2197_v2, %v2196_v23  ;;  %v2299_v51 = vadd.f32 %v2298_v17, %v2297_v9  ;;  %v2149_v2 = vld [vmem:[#allocation2] sm:$0x1] }
 0x3ef   : > { %v2200_v42 = vadd.f32 %v2199_v53, %v2198_v38  ;;  %v2301_v27 = vadd.f32 %v2300_v20, %v2299_v51 }
 0x3f1   : > { %v2202_v0 = vadd.f32 %v2201_v18, %v2200_v42  ;;  %v2303_v5 = vadd.f32 %v2302_v30, %v2301_v27 }
 0x3f3   : > { %v2204_v3 = vadd.f32 %v2203_v47, %v2202_v0  ;;  %v2305_v13 = vadd.f32 %v2304_v1, %v2303_v5 }
 0x3f5   : > { %v2206_v21 = vadd.f32 %v2205_v41, %v2204_v3  ;;  %v2307_v33 = vadd.f32 %v2306_v62, %v2305_v13 }
 0x3f7   : > { %v2208_v22 = vadd.f32 %v2207_v39, %v2206_v21  ;;  %v2309_v50 = vadd.f32 %v2308_v63, %v2307_v33 }
 0x3f9   : > { %v2210_v61 = vadd.f32 %v2209_v12, %v2208_v22  ;;  %v2311_v56 = vadd.f32 %v2310_v48, %v2309_v50 }
 0x3fb   : > { %v2212_v59 = vadd.f32 %v2211_v37, %v2210_v61  ;;  %v2313_v8 = vadd.f32 %v2312_v10, %v2311_v56 }
 0x3fd   : > { %v2213_v46 = vrot.slane %v2212_v59, 4  ;;  %v2315_v45 = vadd.f32 %v2314_v28, %v2313_v8 }
 0x3ff   : > { %v2214_v55 = vadd.f32 %v2213_v46, %v2212_v59  ;;  %v2317_v23 = vadd.f32 %v2316_v32, %v2315_v45 }
 0x401   : > { %v2215_v44 = vrot.slane %v2214_v55, 2  ;;  %v2318_v19 = vrot.slane %v2317_v23, 4 }
 0x403   : > { %v2216_v49 = vadd.f32 %v2215_v44, %v2214_v55  ;;  %v2319_v6 = vadd.f32 %v2318_v19, %v2317_v23 }
 0x405   : > { %v2217_v31 = vrot.slane %v2216_v49, 1  ;;  %v2320_v53 = vrot.slane %v2319_v6, 2 }
 0x407   : > { %v2218_v11 = vadd.f32 %v2217_v31, %v2216_v49  ;;  %v2321_v43 = vadd.f32 %v2320_v53, %v2319_v6 }
 0x409   : > { %v2219_v14 = vadd.f32 %v2218_v11, %v2149_v2  ;;  %v2322_v38 = vrot.slane %v2321_v43, 1 }
 0x40b   : > { %2221 = vst.msk [vmem:[#allocation2] sm:$0x1] %vm2220_vm0, %v2219_v14  ;;  %v2323_v29 = vadd.f32 %v2322_v38, %v2321_v43  ;;  %2329 = sbr.rel (%p2454_p5) target bundleno = 1064 (0x428), region = 52 }
 0x40d   : > { %v2324_v18 = vadd.f32 %v2323_v29, %v2222_v57 }
 0x40f   : > { %2325 = vst.msk [vmem:[#allocation3] sm:$0x1] %vm2220_vm0, %v2324_v18 }
 0x410   : > { %v2555_v52 = vmov 512.0  }
 0x411   : > { %2535 = vrcp.f32 %v2555_v52 }
 0x412   : > { %v2330_v16 = vld [vmem:[#allocation2] sm:$0x1] }
 0x416   : > { %v2340_v25 = vld [vmem:[#allocation3] sm:$0x1] }
 0x417   : > { %v2536_v42 = vpop.eup %2535 }
 0x418   : > { %v2332_v54 = vmul.f32 512.0, %v2536_v42  ;;  %vm2336_vm1 = vweird.f32 %v2536_v42 }
 0x41a   : > { %v2333_v4 = vsub.f32 1.0, %v2332_v54 }
 0x41c   : > { %v2334_v47 = vmul.f32 %v2536_v42, %v2333_v4 }
 0x41e   : > { %v2335_v0 = vadd.f32 %v2536_v42, %v2334_v47 }
 0x420   : > { %v2337_v34 = vsel %vm2336_vm1, %v2536_v42, %v2335_v0 }
 0x421   : > { %v2338_v41 = vmul.f32 %v2337_v34, %v2330_v16  ;;  %v2341_v35 = vmul.f32 %v2340_v25, %v2337_v34 }
 0x423   : > { %2339 = vst.msk [vmem:[%s4950_s7] sm:$0x1] %vm2220_vm0, %v2338_v41  ;;  %v2342_v3 = vmul.f32 %v2338_v41, %v2338_v41 }
 0x425   : > { %v2343_v36 = vsub.f32 %v2341_v35, %v2342_v3 }
 0x427   : > { %2344 = vst.msk [vmem:[%s4951_s8] sm:$0x1] %vm2220_vm0, %v2343_v36 }
 0x428 PF: > { %s19_s27 = sadd.s32 1, %s2543_s27  }
 0x429   : > { %p16_p6 = scmp.ge.s32.totalorder %s19_s27, 4  }
 0x42b   :  { %18 = sbr.rel (!%p16_p6) target bundleno = 1 (0x1), region = 98 }

</bundles_post_ra>
